<compile_context>
chip_gen: v5e
topology: v5e:2x2
jax: 0.10.0
libtpu: 0.0.40
codegen_flags: <defaults>
</compile_context>

<pallas_src>
import functools
import numpy as np
import jax
import jax.numpy as jnp
from jax import lax
from jax.experimental import pallas as pl
from jax.experimental.pallas import tpu as pltpu

# ---------------- small, module-consistent config ----------------
BATCH = 2
EMBED = 32                    # embedding_dim
SEQ = 32                      # sequence_length (must equal EMBED, see NOTE above)
HEADS = 4                     # num_heads  (head_dim = 8)
MLP_RATIO = 2.0
FFN = int(EMBED * MLP_RATIO)  # dim_feedforward
LAYERS = 2                    # num_layers
CLASSES = 10                  # num_classes
REDUCTION = 16                # SElikePool reduction
LN_EPS = 1e-5

LAYER_KEYS = ('ln1_w', 'ln1_b', 'q_w', 'k_w', 'v_w', 'proj_w', 'proj_b',
              'ln2_w', 'ln2_b', 'fc1_w', 'fc1_b', 'fc2_w', 'fc2_b')
HEAD_KEYS = ('norm_w', 'norm_b', 'se1_w', 'se1_b', 'se2_w', 'se2_b', 'fc_w', 'fc_b')


# ---------------- in-kernel math helpers (pure elementwise, always lower) ----
def _erf_poly(x):
    # Abramowitz & Stegun 7.1.26, |err| < 1.5e-7  (matches torch's exact-erf GELU
    # to float32 precision without relying on an erf lowering).
    a1, a2, a3, a4, a5 = 0.254829592, -0.284496736, 1.421413741, -1.453152027, 1.061405429
    p = 0.3275911
    ax = jnp.where(x >= 0, x, -x)
    t = 1.0 / (1.0 + p * ax)
    poly = ((((a5 * t + a4) * t + a3) * t + a2) * t + a1) * t
    y = 1.0 - poly * jnp.exp(-ax * ax)
    return jnp.where(x >= 0, y, -y)


def _gelu_exact(x):
    return 0.5 * x * (1.0 + _erf_poly(x * 0.7071067811865476))


def _layernorm(v, w, b):
    mu = jnp.mean(v, axis=-1, keepdims=True)
    var = jnp.mean((v - mu) ** 2, axis=-1, keepdims=True)
    return (v - mu) * lax.rsqrt(var + LN_EPS) * w + b


# ---------------- Pallas kernel: fused full forward ----------------
def fused_forward_kernel(x_ref, *refs, num_layers, num_heads):
    # refs = (pos_emb, <13 per layer> * num_layers, <8 head weights>, o_ref)
    o_ref = refs[-1]
    pos_ref = refs[0]
    w_refs = refs[1:-1]
    npl = len(LAYER_KEYS)
    layer_refs = [w_refs[i * npl:(i + 1) * npl] for i in range(num_layers)]
    norm_w, norm_b, se1_w, se1_b, se2_w, se2_b, fc_w, fc_b = w_refs[num_layers * npl:]

    Bb, N, C = x_ref.shape
    D = C // num_heads
    scale = D ** -0.5

    # batch folded into matmul rows: (Bb*N, C) slab
    x = x_ref[...].reshape(Bb * N, C)
    pos = pos_ref[0]                                              # (N, C)
    pos_full = pos if Bb == 1 else jnp.concatenate([pos] * Bb, axis=0)
    x = x + pos_full                                              # learnable pos-emb
    # Dropout(p=0.1) is identity in eval mode.

    for lr in layer_refs:
        (ln1w, ln1b, qw, kw, vw, projw, projb,
         ln2w, ln2b, fc1w, fc1b, fc2w, fc2b) = lr

        # ---- attention branch (pre-LN) ----
        xn = _layernorm(x, ln1w[...], ln1b[...])
        q = jnp.dot(xn, qw[...], preferred_element_type=jnp.float32)   # (Bb*N, C)
        k = jnp.dot(xn, kw[...], preferred_element_type=jnp.float32)
        v = jnp.dot(xn, vw[...], preferred_element_type=jnp.float32)
        pw = projw[...]                                                 # (C, C)

        batch_outs = []
        for b in range(Bb):                     # static loop (Bb is 1 or BATCH)
            r0, r1 = b * N, (b + 1) * N
            qb, kb, vb = q[r0:r1], k[r0:r1], v[r0:r1]
            acc = None
            for h in range(num_heads):          # accumulate heads through proj_w
                c0, c1 = h * D, (h + 1) * D
                qh, kh, vh = qb[:, c0:c1], kb[:, c0:c1], vb[:, c0:c1]
                s = lax.dot_general(qh, kh, (((1,), (1,)), ((), ())),
                                    preferred_element_type=jnp.float32) * scale
                s = s - jnp.max(s, axis=-1, keepdims=True)
                p = jnp.exp(s)
                p = p * pl.reciprocal(jnp.sum(p, axis=-1, keepdims=True), approx=True)
                oh = jnp.dot(p, vh, preferred_element_type=jnp.float32)          # (N, D)
                contrib = jnp.dot(oh, pw[c0:c1, :],
                                  preferred_element_type=jnp.float32)            # (N, C)
                acc = contrib if acc is None else acc + contrib
            batch_outs.append(acc)
        attn = batch_outs[0] if Bb == 1 else jnp.concatenate(batch_outs, axis=0)
        x = x + attn + projb[...]

        # ---- MLP branch (pre-LN) ----
        xn2 = _layernorm(x, ln2w[...], ln2b[...])
        hdn = _gelu_exact(jnp.dot(xn2, fc1w[...],
                                  preferred_element_type=jnp.float32) + fc1b[...])
        x = x + jnp.dot(hdn, fc2w[...],
                        preferred_element_type=jnp.float32) + fc2b[...]

    # ---- final LayerNorm + SElikePool + fc ----
    xn = _layernorm(x, norm_w[...], norm_b[...])                  # (Bb*N, C)
    xn3 = xn.reshape(Bb, N, C)
    m = jnp.mean(xn3, axis=-1)                                    # (Bb, N)
    h = jnp.maximum(
        jnp.dot(m, se1_w[...], preferred_element_type=jnp.float32) + se1_b[...], 0.0)
    g = jax.nn.sigmoid(
        jnp.dot(h, se2_w[...], preferred_element_type=jnp.float32) + se2_b[...])  # (Bb, N)

    inv_n = 1.0 / N
    pooled_rows = []
    for b in range(Bb):                      # weighted mean over tokens as a matmul
        gb = g[b:b + 1, :] * inv_n                                # (1, N)
        pooled_rows.append(jnp.dot(gb, xn3[b],
                                   preferred_element_type=jnp.float32))  # (1, C)
    pooled = pooled_rows[0] if Bb == 1 else jnp.concatenate(pooled_rows, axis=0)

    o_ref[...] = jnp.dot(pooled, fc_w[...],
                         preferred_element_type=jnp.float32) + fc_b[...]


# ---------------- wrapper ----------------
def _is_multi_tensorcore():
    # v7x-style chips expose 2 TensorCores per device; v5e/v6e are single-TC.
    try:
        kind = jax.devices()[0].device_kind.lower()
        return ('v7' in kind) or ('7x' in kind)
    except Exception:
        return False


def _flatten_weights(params):
    flat = [params['pos_emb']]
    C = EMBED
    for lp in params['layers']:
        qkv = lp['qkv_w']
        lw = dict(lp)
        lw['q_w'] = qkv[:, 0:C]          # split in the wrapper (lane-aligned kernel inputs)
        lw['k_w'] = qkv[:, C:2 * C]
        lw['v_w'] = qkv[:, 2 * C:3 * C]
        flat += [lw[k] for k in LAYER_KEYS]
    flat += [params[k] for k in HEAD_KEYS]
    return flat


def transformer_classifier_forward(x, params, *, batch_grid=None):
    B, N, C = x.shape
    nc = params['fc_b'].shape[-1]
    if batch_grid is None:
        batch_grid = _is_multi_tensorcore()
    flat = _flatten_weights(params)
    kern = functools.partial(fused_forward_kernel,
                             num_layers=len(params['layers']), num_heads=HEADS)

    if batch_grid:
        # v7x path: shard batch elements across the 2 TensorCores.
        w_specs = [pl.BlockSpec(w.shape, lambda b, nd=w.ndim: (0,) * nd) for w in flat]
        return pl.pallas_call(
            kern,
            out_shape=jax.ShapeDtypeStruct((B, nc), jnp.float32),
            grid=(B,),
            in_specs=[pl.BlockSpec((1, N, C), lambda b: (b, 0, 0))] + w_specs,
            out_specs=pl.BlockSpec((1, nc), lambda b: (b, 0)),
            compiler_params=pltpu.CompilerParams(dimension_semantics=("parallel",)),
        )(x, *flat)

    # v5e/v6e path (single TC): whole problem in one block, batch folded into rows.
    return pl.pallas_call(
        kern,
        out_shape=jax.ShapeDtypeStruct((B, nc), jnp.float32),
    )(x, *flat)


# ---------------- deterministic parameter init ----------------
def init_params(key):
    n_keys = 1 + LAYERS * 4 + 3
    ks = iter(jax.random.split(key, n_keys))

    def lin_w(in_dim, out_dim, std=0.02):
        # deterministic stand-in for torch trunc_normal_(std=...), stored as (in, out)
        return (std * jax.random.truncated_normal(next(ks), -2.0, 2.0,
                                                  (in_dim, out_dim))).astype(jnp.float32)

    params = {
        'pos_emb': (0.2 * jax.random.truncated_normal(next(ks), -2.0, 2.0,
                                                      (1, SEQ, EMBED))).astype(jnp.float32)
    }
    layers = []
    for _ in range(LAYERS):
        layers.append(dict(
            ln1_w=jnp.ones((1, EMBED), jnp.float32), ln1_b=jnp.zeros((1, EMBED), jnp.float32),
            qkv_w=lin_w(EMBED, 3 * EMBED),                                   # qkv has no bias
            proj_w=lin_w(EMBED, EMBED), proj_b=jnp.zeros((1, EMBED), jnp.float32),
            ln2_w=jnp.ones((1, EMBED), jnp.float32), ln2_b=jnp.zeros((1, EMBED), jnp.float32),
            fc1_w=lin_w(EMBED, FFN), fc1_b=jnp.zeros((1, FFN), jnp.float32),
            fc2_w=lin_w(FFN, EMBED), fc2_b=jnp.zeros((1, EMBED), jnp.float32),
        ))
    params['layers'] = layers
    params['norm_w'] = jnp.ones((1, EMBED), jnp.float32)
    params['norm_b'] = jnp.zeros((1, EMBED), jnp.float32)
    r = EMBED // REDUCTION
    params['se1_w'] = lin_w(EMBED, r)
    params['se1_b'] = jnp.zeros((1, r), jnp.float32)
    params['se2_w'] = lin_w(r, EMBED)
    params['se2_b'] = jnp.zeros((1, EMBED), jnp.float32)
    params['fc_w'] = lin_w(EMBED, CLASSES)
    params['fc_b'] = jnp.zeros((1, CLASSES), jnp.float32)
    return params


# ---------------- pure-JAX reference (for a sanity check) ----------------
def _ln_ref(v, w, b):
    mu = v.mean(-1, keepdims=True)
    var = ((v - mu) ** 2).mean(-1, keepdims=True)
    return (v - mu) / jnp.sqrt(var + LN_EPS) * w + b


def reference_forward(x, params):
    x = x + params['pos_emb']
    B, N, C = x.shape
    H, D = HEADS, EMBED // HEADS
    for lp in params['layers']:
        xn = _ln_ref(x, lp['ln1_w'], lp['ln1_b'])
        qkv = (xn @ lp['qkv_w']).reshape(B, N, 3, H, D).transpose(2, 0, 3, 1, 4)
        q, k, v = qkv[0], qkv[1], qkv[2]
        attn = jax.nn.softmax(jnp.einsum('bhnd,bhmd->bhnm', q, k) * (D ** -0.5), axis=-1)
        o = jnp.einsum('bhnm,bhmd->bhnd', attn, v).transpose(0, 2, 1, 3).reshape(B, N, C)
        x = x + o @ lp['proj_w'] + lp['proj_b']
        xn2 = _ln_ref(x, lp['ln2_w'], lp['ln2_b'])
        h = jax.nn.gelu(xn2 @ lp['fc1_w'] + lp['fc1_b'], approximate=False)
        x = x + h @ lp['fc2_w'] + lp['fc2_b']
    x = _ln_ref(x, params['norm_w'], params['norm_b'])
    m = x.mean(-1)
    h = jax.nn.relu(m @ params['se1_w'] + params['se1_b'])
    g = jax.nn.sigmoid(h @ params['se2_w'] + params['se2_b'])
    pooled = (g[:, :, None] * x).mean(axis=1)
    return pooled @ params['fc_w'] + params['fc_b']


if __name__ == "__main__":
    key = jax.random.PRNGKey(0)
    pkey, xkey = jax.random.split(key)
    params = init_params(pkey)
    x = jax.random.normal(xkey, (BATCH, SEQ, EMBED), dtype=jnp.float32)

    logits = transformer_classifier_forward(x, params)
    logits = jax.block_until_ready(logits)
    assert logits.shape == (BATCH, CLASSES)

    ref = reference_forward(x, params)
    np.testing.assert_allclose(np.asarray(logits), np.asarray(ref), rtol=2e-3, atol=2e-3)
    print("KERNEL_OK")
</pallas_src>

<mosaic_0001>
module attributes {stable_mosaic.version = 11 : i64} {
  func.func @fused_forward_kernel(%arg0: memref<2x32x32xf32, #tpu.memory_space<vmem>>, %arg1: memref<1x32x32xf32, #tpu.memory_space<vmem>>, %arg2: memref<1x32xf32, #tpu.memory_space<vmem>>, %arg3: memref<1x32xf32, #tpu.memory_space<vmem>>, %arg4: memref<32x32xf32, #tpu.memory_space<vmem>>, %arg5: memref<32x32xf32, #tpu.memory_space<vmem>>, %arg6: memref<32x32xf32, #tpu.memory_space<vmem>>, %arg7: memref<32x32xf32, #tpu.memory_space<vmem>>, %arg8: memref<1x32xf32, #tpu.memory_space<vmem>>, %arg9: memref<1x32xf32, #tpu.memory_space<vmem>>, %arg10: memref<1x32xf32, #tpu.memory_space<vmem>>, %arg11: memref<32x64xf32, #tpu.memory_space<vmem>>, %arg12: memref<1x64xf32, #tpu.memory_space<vmem>>, %arg13: memref<64x32xf32, #tpu.memory_space<vmem>>, %arg14: memref<1x32xf32, #tpu.memory_space<vmem>>, %arg15: memref<1x32xf32, #tpu.memory_space<vmem>>, %arg16: memref<1x32xf32, #tpu.memory_space<vmem>>, %arg17: memref<32x32xf32, #tpu.memory_space<vmem>>, %arg18: memref<32x32xf32, #tpu.memory_space<vmem>>, %arg19: memref<32x32xf32, #tpu.memory_space<vmem>>, %arg20: memref<32x32xf32, #tpu.memory_space<vmem>>, %arg21: memref<1x32xf32, #tpu.memory_space<vmem>>, %arg22: memref<1x32xf32, #tpu.memory_space<vmem>>, %arg23: memref<1x32xf32, #tpu.memory_space<vmem>>, %arg24: memref<32x64xf32, #tpu.memory_space<vmem>>, %arg25: memref<1x64xf32, #tpu.memory_space<vmem>>, %arg26: memref<64x32xf32, #tpu.memory_space<vmem>>, %arg27: memref<1x32xf32, #tpu.memory_space<vmem>>, %arg28: memref<1x32xf32, #tpu.memory_space<vmem>>, %arg29: memref<1x32xf32, #tpu.memory_space<vmem>>, %arg30: memref<32x2xf32, #tpu.memory_space<vmem>>, %arg31: memref<1x2xf32, #tpu.memory_space<vmem>>, %arg32: memref<2x32xf32, #tpu.memory_space<vmem>>, %arg33: memref<1x32xf32, #tpu.memory_space<vmem>>, %arg34: memref<32x10xf32, #tpu.memory_space<vmem>>, %arg35: memref<1x10xf32, #tpu.memory_space<vmem>>, %arg36: memref<2x10xf32, #tpu.memory_space<vmem>>) attributes {dimension_semantics = [], scalar_prefetch = 0 : i64, scratch_operands = 0 : i64, tpu.core_type = #tpu.core_type<tc>} {
    %c0 = arith.constant 0 : index
    %c0_0 = arith.constant 0 : index
    %c0_1 = arith.constant 0 : index
    %0 = vector.load %arg0[%c0, %c0_0, %c0_1] : memref<2x32x32xf32, #tpu.memory_space<vmem>>, vector<2x32x32xf32>
    %1 = vector.shape_cast %0 : vector<2x32x32xf32> to vector<64x32xf32>
    %c0_2 = arith.constant 0 : index
    %c0_3 = arith.constant 0 : index
    %c0_4 = arith.constant 0 : index
    %2 = vector.load %arg1[%c0_2, %c0_3, %c0_4] : memref<1x32x32xf32, #tpu.memory_space<vmem>>, vector<1x32x32xf32>
    %3 = vector.shape_cast %2 : vector<1x32x32xf32> to vector<32x32xf32>
    %4 = tpu.concatenate %3, %3 in 0 : vector<32x32xf32>, vector<32x32xf32> -> vector<64x32xf32>
    %5 = arith.addf %1, %4 : vector<64x32xf32>
    %c0_5 = arith.constant 0 : index
    %c0_6 = arith.constant 0 : index
    %6 = vector.load %arg2[%c0_5, %c0_6] : memref<1x32xf32, #tpu.memory_space<vmem>>, vector<1x32xf32>
    %c0_7 = arith.constant 0 : index
    %c0_8 = arith.constant 0 : index
    %7 = vector.load %arg3[%c0_7, %c0_8] : memref<1x32xf32, #tpu.memory_space<vmem>>, vector<1x32xf32>
    %cst = arith.constant dense<0.000000e+00> : vector<64xf32>
    %8 = vector.multi_reduction <add>, %5, %cst [1] : vector<64x32xf32> to vector<64xf32>
    %9 = vector.shape_cast %8 : vector<64xf32> to vector<64x1xf32>
    %cst_9 = arith.constant 3.200000e+01 : f32
    %10 = vector.broadcast %cst_9 : f32 to vector<64x1xf32>
    %11 = arith.divf %9, %10 : vector<64x1xf32>
    %12 = vector.broadcast %11 : vector<64x1xf32> to vector<64x32xf32>
    %13 = arith.subf %5, %12 : vector<64x32xf32>
    %14 = arith.mulf %13, %13 : vector<64x32xf32>
    %cst_10 = arith.constant dense<0.000000e+00> : vector<64xf32>
    %15 = vector.multi_reduction <add>, %14, %cst_10 [1] : vector<64x32xf32> to vector<64xf32>
    %16 = vector.shape_cast %15 : vector<64xf32> to vector<64x1xf32>
    %cst_11 = arith.constant 3.200000e+01 : f32
    %17 = vector.broadcast %cst_11 : f32 to vector<64x1xf32>
    %18 = arith.divf %16, %17 : vector<64x1xf32>
    %19 = vector.broadcast %11 : vector<64x1xf32> to vector<64x32xf32>
    %20 = arith.subf %5, %19 : vector<64x32xf32>
    %cst_12 = arith.constant 9.99999974E-6 : f32
    %21 = vector.broadcast %cst_12 : f32 to vector<64x1xf32>
    %22 = arith.addf %18, %21 : vector<64x1xf32>
    %23 = math.rsqrt %22 : vector<64x1xf32>
    %24 = vector.broadcast %23 : vector<64x1xf32> to vector<64x32xf32>
    %25 = arith.mulf %20, %24 : vector<64x32xf32>
    %26 = vector.broadcast %6 : vector<1x32xf32> to vector<64x32xf32>
    %27 = arith.mulf %25, %26 : vector<64x32xf32>
    %28 = vector.broadcast %7 : vector<1x32xf32> to vector<64x32xf32>
    %29 = arith.addf %27, %28 : vector<64x32xf32>
    %c0_13 = arith.constant 0 : index
    %c0_14 = arith.constant 0 : index
    %30 = vector.load %arg4[%c0_13, %c0_14] : memref<32x32xf32, #tpu.memory_space<vmem>>, vector<32x32xf32>
    %cst_15 = arith.constant dense<0.000000e+00> : vector<64x32xf32>
    %31 = tpu.matmul %29, %30, %cst_15 {dimension_numbers = #tpu.dot_dimension_numbers<[1], [0], [0], [1], [0, 0, 1, 1], [], []>} : vector<64x32xf32>, vector<32x32xf32>, vector<64x32xf32> -> vector<64x32xf32>
    %c0_16 = arith.constant 0 : index
    %c0_17 = arith.constant 0 : index
    %32 = vector.load %arg5[%c0_16, %c0_17] : memref<32x32xf32, #tpu.memory_space<vmem>>, vector<32x32xf32>
    %cst_18 = arith.constant dense<0.000000e+00> : vector<64x32xf32>
    %33 = tpu.matmul %29, %32, %cst_18 {dimension_numbers = #tpu.dot_dimension_numbers<[1], [0], [0], [1], [0, 0, 1, 1], [], []>} : vector<64x32xf32>, vector<32x32xf32>, vector<64x32xf32> -> vector<64x32xf32>
    %c0_19 = arith.constant 0 : index
    %c0_20 = arith.constant 0 : index
    %34 = vector.load %arg6[%c0_19, %c0_20] : memref<32x32xf32, #tpu.memory_space<vmem>>, vector<32x32xf32>
    %cst_21 = arith.constant dense<0.000000e+00> : vector<64x32xf32>
    %35 = tpu.matmul %29, %34, %cst_21 {dimension_numbers = #tpu.dot_dimension_numbers<[1], [0], [0], [1], [0, 0, 1, 1], [], []>} : vector<64x32xf32>, vector<32x32xf32>, vector<64x32xf32> -> vector<64x32xf32>
    %c0_22 = arith.constant 0 : index
    %c0_23 = arith.constant 0 : index
    %36 = vector.load %arg7[%c0_22, %c0_23] : memref<32x32xf32, #tpu.memory_space<vmem>>, vector<32x32xf32>
    %37 = vector.extract_strided_slice %31 {offsets = [0, 0], sizes = [32, 32], strides = [1, 1]} : vector<64x32xf32> to vector<32x32xf32>
    %38 = vector.extract_strided_slice %33 {offsets = [0, 0], sizes = [32, 32], strides = [1, 1]} : vector<64x32xf32> to vector<32x32xf32>
    %39 = vector.extract_strided_slice %35 {offsets = [0, 0], sizes = [32, 32], strides = [1, 1]} : vector<64x32xf32> to vector<32x32xf32>
    %40 = vector.extract_strided_slice %37 {offsets = [0, 0], sizes = [32, 8], strides = [1, 1]} : vector<32x32xf32> to vector<32x8xf32>
    %41 = vector.extract_strided_slice %38 {offsets = [0, 0], sizes = [32, 8], strides = [1, 1]} : vector<32x32xf32> to vector<32x8xf32>
    %42 = vector.extract_strided_slice %39 {offsets = [0, 0], sizes = [32, 8], strides = [1, 1]} : vector<32x32xf32> to vector<32x8xf32>
    %cst_24 = arith.constant dense<0.000000e+00> : vector<32x32xf32>
    %43 = tpu.matmul %40, %41, %cst_24 {dimension_numbers = #tpu.dot_dimension_numbers<[1], [1], [0], [0], [0, 0, 1, 0], [], []>} : vector<32x8xf32>, vector<32x8xf32>, vector<32x32xf32> -> vector<32x32xf32>
    %cst_25 = arith.constant 0.353553385 : f32
    %44 = vector.broadcast %cst_25 : f32 to vector<32x32xf32>
    %45 = arith.mulf %43, %44 : vector<32x32xf32>
    %cst_26 = arith.constant dense<0xFF800000> : vector<32xf32>
    %46 = vector.multi_reduction <maximumf>, %45, %cst_26 [1] : vector<32x32xf32> to vector<32xf32>
    %47 = vector.shape_cast %46 : vector<32xf32> to vector<32x1xf32>
    %48 = vector.broadcast %47 : vector<32x1xf32> to vector<32x32xf32>
    %49 = arith.subf %45, %48 : vector<32x32xf32>
    %50 = math.exp %49 : vector<32x32xf32>
    %cst_27 = arith.constant dense<0.000000e+00> : vector<32xf32>
    %51 = vector.multi_reduction <add>, %50, %cst_27 [1] : vector<32x32xf32> to vector<32xf32>
    %52 = vector.shape_cast %51 : vector<32xf32> to vector<32x1xf32>
    %53 = tpu.reciprocal %52 {approx = true} : vector<32x1xf32> -> vector<32x1xf32>
    %54 = vector.broadcast %53 : vector<32x1xf32> to vector<32x32xf32>
    %55 = arith.mulf %50, %54 : vector<32x32xf32>
    %cst_28 = arith.constant dense<0.000000e+00> : vector<32x8xf32>
    %56 = tpu.matmul %55, %42, %cst_28 {dimension_numbers = #tpu.dot_dimension_numbers<[1], [0], [0], [1], [0, 0, 1, 1], [], []>} : vector<32x32xf32>, vector<32x8xf32>, vector<32x8xf32> -> vector<32x8xf32>
    %57 = vector.extract_strided_slice %36 {offsets = [0, 0], sizes = [8, 32], strides = [1, 1]} : vector<32x32xf32> to vector<8x32xf32>
    %cst_29 = arith.constant dense<0.000000e+00> : vector<32x32xf32>
    %58 = tpu.matmul %56, %57, %cst_29 {dimension_numbers = #tpu.dot_dimension_numbers<[1], [0], [0], [1], [0, 0, 1, 1], [], []>} : vector<32x8xf32>, vector<8x32xf32>, vector<32x32xf32> -> vector<32x32xf32>
    %59 = vector.extract_strided_slice %37 {offsets = [0, 8], sizes = [32, 8], strides = [1, 1]} : vector<32x32xf32> to vector<32x8xf32>
    %60 = vector.extract_strided_slice %38 {offsets = [0, 8], sizes = [32, 8], strides = [1, 1]} : vector<32x32xf32> to vector<32x8xf32>
    %61 = vector.extract_strided_slice %39 {offsets = [0, 8], sizes = [32, 8], strides = [1, 1]} : vector<32x32xf32> to vector<32x8xf32>
    %cst_30 = arith.constant dense<0.000000e+00> : vector<32x32xf32>
    %62 = tpu.matmul %59, %60, %cst_30 {dimension_numbers = #tpu.dot_dimension_numbers<[1], [1], [0], [0], [0, 0, 1, 0], [], []>} : vector<32x8xf32>, vector<32x8xf32>, vector<32x32xf32> -> vector<32x32xf32>
    %cst_31 = arith.constant 0.353553385 : f32
    %63 = vector.broadcast %cst_31 : f32 to vector<32x32xf32>
    %64 = arith.mulf %62, %63 : vector<32x32xf32>
    %cst_32 = arith.constant dense<0xFF800000> : vector<32xf32>
    %65 = vector.multi_reduction <maximumf>, %64, %cst_32 [1] : vector<32x32xf32> to vector<32xf32>
    %66 = vector.shape_cast %65 : vector<32xf32> to vector<32x1xf32>
    %67 = vector.broadcast %66 : vector<32x1xf32> to vector<32x32xf32>
    %68 = arith.subf %64, %67 : vector<32x32xf32>
    %69 = math.exp %68 : vector<32x32xf32>
    %cst_33 = arith.constant dense<0.000000e+00> : vector<32xf32>
    %70 = vector.multi_reduction <add>, %69, %cst_33 [1] : vector<32x32xf32> to vector<32xf32>
    %71 = vector.shape_cast %70 : vector<32xf32> to vector<32x1xf32>
    %72 = tpu.reciprocal %71 {approx = true} : vector<32x1xf32> -> vector<32x1xf32>
    %73 = vector.broadcast %72 : vector<32x1xf32> to vector<32x32xf32>
    %74 = arith.mulf %69, %73 : vector<32x32xf32>
    %cst_34 = arith.constant dense<0.000000e+00> : vector<32x8xf32>
    %75 = tpu.matmul %74, %61, %cst_34 {dimension_numbers = #tpu.dot_dimension_numbers<[1], [0], [0], [1], [0, 0, 1, 1], [], []>} : vector<32x32xf32>, vector<32x8xf32>, vector<32x8xf32> -> vector<32x8xf32>
    %76 = vector.extract_strided_slice %36 {offsets = [8, 0], sizes = [8, 32], strides = [1, 1]} : vector<32x32xf32> to vector<8x32xf32>
    %cst_35 = arith.constant dense<0.000000e+00> : vector<32x32xf32>
    %77 = tpu.matmul %75, %76, %cst_35 {dimension_numbers = #tpu.dot_dimension_numbers<[1], [0], [0], [1], [0, 0, 1, 1], [], []>} : vector<32x8xf32>, vector<8x32xf32>, vector<32x32xf32> -> vector<32x32xf32>
    %78 = arith.addf %58, %77 : vector<32x32xf32>
    %79 = vector.extract_strided_slice %37 {offsets = [0, 16], sizes = [32, 8], strides = [1, 1]} : vector<32x32xf32> to vector<32x8xf32>
    %80 = vector.extract_strided_slice %38 {offsets = [0, 16], sizes = [32, 8], strides = [1, 1]} : vector<32x32xf32> to vector<32x8xf32>
    %81 = vector.extract_strided_slice %39 {offsets = [0, 16], sizes = [32, 8], strides = [1, 1]} : vector<32x32xf32> to vector<32x8xf32>
    %cst_36 = arith.constant dense<0.000000e+00> : vector<32x32xf32>
    %82 = tpu.matmul %79, %80, %cst_36 {dimension_numbers = #tpu.dot_dimension_numbers<[1], [1], [0], [0], [0, 0, 1, 0], [], []>} : vector<32x8xf32>, vector<32x8xf32>, vector<32x32xf32> -> vector<32x32xf32>
    %cst_37 = arith.constant 0.353553385 : f32
    %83 = vector.broadcast %cst_37 : f32 to vector<32x32xf32>
    %84 = arith.mulf %82, %83 : vector<32x32xf32>
    %cst_38 = arith.constant dense<0xFF800000> : vector<32xf32>
    %85 = vector.multi_reduction <maximumf>, %84, %cst_38 [1] : vector<32x32xf32> to vector<32xf32>
    %86 = vector.shape_cast %85 : vector<32xf32> to vector<32x1xf32>
    %87 = vector.broadcast %86 : vector<32x1xf32> to vector<32x32xf32>
    %88 = arith.subf %84, %87 : vector<32x32xf32>
    %89 = math.exp %88 : vector<32x32xf32>
    %cst_39 = arith.constant dense<0.000000e+00> : vector<32xf32>
    %90 = vector.multi_reduction <add>, %89, %cst_39 [1] : vector<32x32xf32> to vector<32xf32>
    %91 = vector.shape_cast %90 : vector<32xf32> to vector<32x1xf32>
    %92 = tpu.reciprocal %91 {approx = true} : vector<32x1xf32> -> vector<32x1xf32>
    %93 = vector.broadcast %92 : vector<32x1xf32> to vector<32x32xf32>
    %94 = arith.mulf %89, %93 : vector<32x32xf32>
    %cst_40 = arith.constant dense<0.000000e+00> : vector<32x8xf32>
    %95 = tpu.matmul %94, %81, %cst_40 {dimension_numbers = #tpu.dot_dimension_numbers<[1], [0], [0], [1], [0, 0, 1, 1], [], []>} : vector<32x32xf32>, vector<32x8xf32>, vector<32x8xf32> -> vector<32x8xf32>
    %96 = vector.extract_strided_slice %36 {offsets = [16, 0], sizes = [8, 32], strides = [1, 1]} : vector<32x32xf32> to vector<8x32xf32>
    %cst_41 = arith.constant dense<0.000000e+00> : vector<32x32xf32>
    %97 = tpu.matmul %95, %96, %cst_41 {dimension_numbers = #tpu.dot_dimension_numbers<[1], [0], [0], [1], [0, 0, 1, 1], [], []>} : vector<32x8xf32>, vector<8x32xf32>, vector<32x32xf32> -> vector<32x32xf32>
    %98 = arith.addf %78, %97 : vector<32x32xf32>
    %99 = vector.extract_strided_slice %37 {offsets = [0, 24], sizes = [32, 8], strides = [1, 1]} : vector<32x32xf32> to vector<32x8xf32>
    %100 = vector.extract_strided_slice %38 {offsets = [0, 24], sizes = [32, 8], strides = [1, 1]} : vector<32x32xf32> to vector<32x8xf32>
    %101 = vector.extract_strided_slice %39 {offsets = [0, 24], sizes = [32, 8], strides = [1, 1]} : vector<32x32xf32> to vector<32x8xf32>
    %cst_42 = arith.constant dense<0.000000e+00> : vector<32x32xf32>
    %102 = tpu.matmul %99, %100, %cst_42 {dimension_numbers = #tpu.dot_dimension_numbers<[1], [1], [0], [0], [0, 0, 1, 0], [], []>} : vector<32x8xf32>, vector<32x8xf32>, vector<32x32xf32> -> vector<32x32xf32>
    %cst_43 = arith.constant 0.353553385 : f32
    %103 = vector.broadcast %cst_43 : f32 to vector<32x32xf32>
    %104 = arith.mulf %102, %103 : vector<32x32xf32>
    %cst_44 = arith.constant dense<0xFF800000> : vector<32xf32>
    %105 = vector.multi_reduction <maximumf>, %104, %cst_44 [1] : vector<32x32xf32> to vector<32xf32>
    %106 = vector.shape_cast %105 : vector<32xf32> to vector<32x1xf32>
    %107 = vector.broadcast %106 : vector<32x1xf32> to vector<32x32xf32>
    %108 = arith.subf %104, %107 : vector<32x32xf32>
    %109 = math.exp %108 : vector<32x32xf32>
    %cst_45 = arith.constant dense<0.000000e+00> : vector<32xf32>
    %110 = vector.multi_reduction <add>, %109, %cst_45 [1] : vector<32x32xf32> to vector<32xf32>
    %111 = vector.shape_cast %110 : vector<32xf32> to vector<32x1xf32>
    %112 = tpu.reciprocal %111 {approx = true} : vector<32x1xf32> -> vector<32x1xf32>
    %113 = vector.broadcast %112 : vector<32x1xf32> to vector<32x32xf32>
    %114 = arith.mulf %109, %113 : vector<32x32xf32>
    %cst_46 = arith.constant dense<0.000000e+00> : vector<32x8xf32>
    %115 = tpu.matmul %114, %101, %cst_46 {dimension_numbers = #tpu.dot_dimension_numbers<[1], [0], [0], [1], [0, 0, 1, 1], [], []>} : vector<32x32xf32>, vector<32x8xf32>, vector<32x8xf32> -> vector<32x8xf32>
    %116 = vector.extract_strided_slice %36 {offsets = [24, 0], sizes = [8, 32], strides = [1, 1]} : vector<32x32xf32> to vector<8x32xf32>
    %cst_47 = arith.constant dense<0.000000e+00> : vector<32x32xf32>
    %117 = tpu.matmul %115, %116, %cst_47 {dimension_numbers = #tpu.dot_dimension_numbers<[1], [0], [0], [1], [0, 0, 1, 1], [], []>} : vector<32x8xf32>, vector<8x32xf32>, vector<32x32xf32> -> vector<32x32xf32>
    %118 = arith.addf %98, %117 : vector<32x32xf32>
    %119 = vector.extract_strided_slice %31 {offsets = [32, 0], sizes = [32, 32], strides = [1, 1]} : vector<64x32xf32> to vector<32x32xf32>
    %120 = vector.extract_strided_slice %33 {offsets = [32, 0], sizes = [32, 32], strides = [1, 1]} : vector<64x32xf32> to vector<32x32xf32>
    %121 = vector.extract_strided_slice %35 {offsets = [32, 0], sizes = [32, 32], strides = [1, 1]} : vector<64x32xf32> to vector<32x32xf32>
    %122 = vector.extract_strided_slice %119 {offsets = [0, 0], sizes = [32, 8], strides = [1, 1]} : vector<32x32xf32> to vector<32x8xf32>
    %123 = vector.extract_strided_slice %120 {offsets = [0, 0], sizes = [32, 8], strides = [1, 1]} : vector<32x32xf32> to vector<32x8xf32>
    %124 = vector.extract_strided_slice %121 {offsets = [0, 0], sizes = [32, 8], strides = [1, 1]} : vector<32x32xf32> to vector<32x8xf32>
    %cst_48 = arith.constant dense<0.000000e+00> : vector<32x32xf32>
    %125 = tpu.matmul %122, %123, %cst_48 {dimension_numbers = #tpu.dot_dimension_numbers<[1], [1], [0], [0], [0, 0, 1, 0], [], []>} : vector<32x8xf32>, vector<32x8xf32>, vector<32x32xf32> -> vector<32x32xf32>
    %cst_49 = arith.constant 0.353553385 : f32
    %126 = vector.broadcast %cst_49 : f32 to vector<32x32xf32>
    %127 = arith.mulf %125, %126 : vector<32x32xf32>
    %cst_50 = arith.constant dense<0xFF800000> : vector<32xf32>
    %128 = vector.multi_reduction <maximumf>, %127, %cst_50 [1] : vector<32x32xf32> to vector<32xf32>
    %129 = vector.shape_cast %128 : vector<32xf32> to vector<32x1xf32>
    %130 = vector.broadcast %129 : vector<32x1xf32> to vector<32x32xf32>
    %131 = arith.subf %127, %130 : vector<32x32xf32>
    %132 = math.exp %131 : vector<32x32xf32>
    %cst_51 = arith.constant dense<0.000000e+00> : vector<32xf32>
    %133 = vector.multi_reduction <add>, %132, %cst_51 [1] : vector<32x32xf32> to vector<32xf32>
    %134 = vector.shape_cast %133 : vector<32xf32> to vector<32x1xf32>
    %135 = tpu.reciprocal %134 {approx = true} : vector<32x1xf32> -> vector<32x1xf32>
    %136 = vector.broadcast %135 : vector<32x1xf32> to vector<32x32xf32>
    %137 = arith.mulf %132, %136 : vector<32x32xf32>
    %cst_52 = arith.constant dense<0.000000e+00> : vector<32x8xf32>
    %138 = tpu.matmul %137, %124, %cst_52 {dimension_numbers = #tpu.dot_dimension_numbers<[1], [0], [0], [1], [0, 0, 1, 1], [], []>} : vector<32x32xf32>, vector<32x8xf32>, vector<32x8xf32> -> vector<32x8xf32>
    %139 = vector.extract_strided_slice %36 {offsets = [0, 0], sizes = [8, 32], strides = [1, 1]} : vector<32x32xf32> to vector<8x32xf32>
    %cst_53 = arith.constant dense<0.000000e+00> : vector<32x32xf32>
    %140 = tpu.matmul %138, %139, %cst_53 {dimension_numbers = #tpu.dot_dimension_numbers<[1], [0], [0], [1], [0, 0, 1, 1], [], []>} : vector<32x8xf32>, vector<8x32xf32>, vector<32x32xf32> -> vector<32x32xf32>
    %141 = vector.extract_strided_slice %119 {offsets = [0, 8], sizes = [32, 8], strides = [1, 1]} : vector<32x32xf32> to vector<32x8xf32>
    %142 = vector.extract_strided_slice %120 {offsets = [0, 8], sizes = [32, 8], strides = [1, 1]} : vector<32x32xf32> to vector<32x8xf32>
    %143 = vector.extract_strided_slice %121 {offsets = [0, 8], sizes = [32, 8], strides = [1, 1]} : vector<32x32xf32> to vector<32x8xf32>
    %cst_54 = arith.constant dense<0.000000e+00> : vector<32x32xf32>
    %144 = tpu.matmul %141, %142, %cst_54 {dimension_numbers = #tpu.dot_dimension_numbers<[1], [1], [0], [0], [0, 0, 1, 0], [], []>} : vector<32x8xf32>, vector<32x8xf32>, vector<32x32xf32> -> vector<32x32xf32>
    %cst_55 = arith.constant 0.353553385 : f32
    %145 = vector.broadcast %cst_55 : f32 to vector<32x32xf32>
    %146 = arith.mulf %144, %145 : vector<32x32xf32>
    %cst_56 = arith.constant dense<0xFF800000> : vector<32xf32>
    %147 = vector.multi_reduction <maximumf>, %146, %cst_56 [1] : vector<32x32xf32> to vector<32xf32>
    %148 = vector.shape_cast %147 : vector<32xf32> to vector<32x1xf32>
    %149 = vector.broadcast %148 : vector<32x1xf32> to vector<32x32xf32>
    %150 = arith.subf %146, %149 : vector<32x32xf32>
    %151 = math.exp %150 : vector<32x32xf32>
    %cst_57 = arith.constant dense<0.000000e+00> : vector<32xf32>
    %152 = vector.multi_reduction <add>, %151, %cst_57 [1] : vector<32x32xf32> to vector<32xf32>
    %153 = vector.shape_cast %152 : vector<32xf32> to vector<32x1xf32>
    %154 = tpu.reciprocal %153 {approx = true} : vector<32x1xf32> -> vector<32x1xf32>
    %155 = vector.broadcast %154 : vector<32x1xf32> to vector<32x32xf32>
    %156 = arith.mulf %151, %155 : vector<32x32xf32>
    %cst_58 = arith.constant dense<0.000000e+00> : vector<32x8xf32>
    %157 = tpu.matmul %156, %143, %cst_58 {dimension_numbers = #tpu.dot_dimension_numbers<[1], [0], [0], [1], [0, 0, 1, 1], [], []>} : vector<32x32xf32>, vector<32x8xf32>, vector<32x8xf32> -> vector<32x8xf32>
    %158 = vector.extract_strided_slice %36 {offsets = [8, 0], sizes = [8, 32], strides = [1, 1]} : vector<32x32xf32> to vector<8x32xf32>
    %cst_59 = arith.constant dense<0.000000e+00> : vector<32x32xf32>
    %159 = tpu.matmul %157, %158, %cst_59 {dimension_numbers = #tpu.dot_dimension_numbers<[1], [0], [0], [1], [0, 0, 1, 1], [], []>} : vector<32x8xf32>, vector<8x32xf32>, vector<32x32xf32> -> vector<32x32xf32>
    %160 = arith.addf %140, %159 : vector<32x32xf32>
    %161 = vector.extract_strided_slice %119 {offsets = [0, 16], sizes = [32, 8], strides = [1, 1]} : vector<32x32xf32> to vector<32x8xf32>
    %162 = vector.extract_strided_slice %120 {offsets = [0, 16], sizes = [32, 8], strides = [1, 1]} : vector<32x32xf32> to vector<32x8xf32>
    %163 = vector.extract_strided_slice %121 {offsets = [0, 16], sizes = [32, 8], strides = [1, 1]} : vector<32x32xf32> to vector<32x8xf32>
    %cst_60 = arith.constant dense<0.000000e+00> : vector<32x32xf32>
    %164 = tpu.matmul %161, %162, %cst_60 {dimension_numbers = #tpu.dot_dimension_numbers<[1], [1], [0], [0], [0, 0, 1, 0], [], []>} : vector<32x8xf32>, vector<32x8xf32>, vector<32x32xf32> -> vector<32x32xf32>
    %cst_61 = arith.constant 0.353553385 : f32
    %165 = vector.broadcast %cst_61 : f32 to vector<32x32xf32>
    %166 = arith.mulf %164, %165 : vector<32x32xf32>
    %cst_62 = arith.constant dense<0xFF800000> : vector<32xf32>
    %167 = vector.multi_reduction <maximumf>, %166, %cst_62 [1] : vector<32x32xf32> to vector<32xf32>
    %168 = vector.shape_cast %167 : vector<32xf32> to vector<32x1xf32>
    %169 = vector.broadcast %168 : vector<32x1xf32> to vector<32x32xf32>
    %170 = arith.subf %166, %169 : vector<32x32xf32>
    %171 = math.exp %170 : vector<32x32xf32>
    %cst_63 = arith.constant dense<0.000000e+00> : vector<32xf32>
    %172 = vector.multi_reduction <add>, %171, %cst_63 [1] : vector<32x32xf32> to vector<32xf32>
    %173 = vector.shape_cast %172 : vector<32xf32> to vector<32x1xf32>
    %174 = tpu.reciprocal %173 {approx = true} : vector<32x1xf32> -> vector<32x1xf32>
    %175 = vector.broadcast %174 : vector<32x1xf32> to vector<32x32xf32>
    %176 = arith.mulf %171, %175 : vector<32x32xf32>
    %cst_64 = arith.constant dense<0.000000e+00> : vector<32x8xf32>
    %177 = tpu.matmul %176, %163, %cst_64 {dimension_numbers = #tpu.dot_dimension_numbers<[1], [0], [0], [1], [0, 0, 1, 1], [], []>} : vector<32x32xf32>, vector<32x8xf32>, vector<32x8xf32> -> vector<32x8xf32>
    %178 = vector.extract_strided_slice %36 {offsets = [16, 0], sizes = [8, 32], strides = [1, 1]} : vector<32x32xf32> to vector<8x32xf32>
    %cst_65 = arith.constant dense<0.000000e+00> : vector<32x32xf32>
    %179 = tpu.matmul %177, %178, %cst_65 {dimension_numbers = #tpu.dot_dimension_numbers<[1], [0], [0], [1], [0, 0, 1, 1], [], []>} : vector<32x8xf32>, vector<8x32xf32>, vector<32x32xf32> -> vector<32x32xf32>
    %180 = arith.addf %160, %179 : vector<32x32xf32>
    %181 = vector.extract_strided_slice %119 {offsets = [0, 24], sizes = [32, 8], strides = [1, 1]} : vector<32x32xf32> to vector<32x8xf32>
    %182 = vector.extract_strided_slice %120 {offsets = [0, 24], sizes = [32, 8], strides = [1, 1]} : vector<32x32xf32> to vector<32x8xf32>
    %183 = vector.extract_strided_slice %121 {offsets = [0, 24], sizes = [32, 8], strides = [1, 1]} : vector<32x32xf32> to vector<32x8xf32>
    %cst_66 = arith.constant dense<0.000000e+00> : vector<32x32xf32>
    %184 = tpu.matmul %181, %182, %cst_66 {dimension_numbers = #tpu.dot_dimension_numbers<[1], [1], [0], [0], [0, 0, 1, 0], [], []>} : vector<32x8xf32>, vector<32x8xf32>, vector<32x32xf32> -> vector<32x32xf32>
    %cst_67 = arith.constant 0.353553385 : f32
    %185 = vector.broadcast %cst_67 : f32 to vector<32x32xf32>
    %186 = arith.mulf %184, %185 : vector<32x32xf32>
    %cst_68 = arith.constant dense<0xFF800000> : vector<32xf32>
    %187 = vector.multi_reduction <maximumf>, %186, %cst_68 [1] : vector<32x32xf32> to vector<32xf32>
    %188 = vector.shape_cast %187 : vector<32xf32> to vector<32x1xf32>
    %189 = vector.broadcast %188 : vector<32x1xf32> to vector<32x32xf32>
    %190 = arith.subf %186, %189 : vector<32x32xf32>
    %191 = math.exp %190 : vector<32x32xf32>
    %cst_69 = arith.constant dense<0.000000e+00> : vector<32xf32>
    %192 = vector.multi_reduction <add>, %191, %cst_69 [1] : vector<32x32xf32> to vector<32xf32>
    %193 = vector.shape_cast %192 : vector<32xf32> to vector<32x1xf32>
    %194 = tpu.reciprocal %193 {approx = true} : vector<32x1xf32> -> vector<32x1xf32>
    %195 = vector.broadcast %194 : vector<32x1xf32> to vector<32x32xf32>
    %196 = arith.mulf %191, %195 : vector<32x32xf32>
    %cst_70 = arith.constant dense<0.000000e+00> : vector<32x8xf32>
    %197 = tpu.matmul %196, %183, %cst_70 {dimension_numbers = #tpu.dot_dimension_numbers<[1], [0], [0], [1], [0, 0, 1, 1], [], []>} : vector<32x32xf32>, vector<32x8xf32>, vector<32x8xf32> -> vector<32x8xf32>
    %198 = vector.extract_strided_slice %36 {offsets = [24, 0], sizes = [8, 32], strides = [1, 1]} : vector<32x32xf32> to vector<8x32xf32>
    %cst_71 = arith.constant dense<0.000000e+00> : vector<32x32xf32>
    %199 = tpu.matmul %197, %198, %cst_71 {dimension_numbers = #tpu.dot_dimension_numbers<[1], [0], [0], [1], [0, 0, 1, 1], [], []>} : vector<32x8xf32>, vector<8x32xf32>, vector<32x32xf32> -> vector<32x32xf32>
    %200 = arith.addf %180, %199 : vector<32x32xf32>
    %201 = tpu.concatenate %118, %200 in 0 : vector<32x32xf32>, vector<32x32xf32> -> vector<64x32xf32>
    %202 = arith.addf %5, %201 : vector<64x32xf32>
    %c0_72 = arith.constant 0 : index
    %c0_73 = arith.constant 0 : index
    %203 = vector.load %arg8[%c0_72, %c0_73] : memref<1x32xf32, #tpu.memory_space<vmem>>, vector<1x32xf32>
    %204 = vector.broadcast %203 : vector<1x32xf32> to vector<64x32xf32>
    %205 = arith.addf %202, %204 : vector<64x32xf32>
    %c0_74 = arith.constant 0 : index
    %c0_75 = arith.constant 0 : index
    %206 = vector.load %arg9[%c0_74, %c0_75] : memref<1x32xf32, #tpu.memory_space<vmem>>, vector<1x32xf32>
    %c0_76 = arith.constant 0 : index
    %c0_77 = arith.constant 0 : index
    %207 = vector.load %arg10[%c0_76, %c0_77] : memref<1x32xf32, #tpu.memory_space<vmem>>, vector<1x32xf32>
    %cst_78 = arith.constant dense<0.000000e+00> : vector<64xf32>
    %208 = vector.multi_reduction <add>, %205, %cst_78 [1] : vector<64x32xf32> to vector<64xf32>
    %209 = vector.shape_cast %208 : vector<64xf32> to vector<64x1xf32>
    %cst_79 = arith.constant 3.200000e+01 : f32
    %210 = vector.broadcast %cst_79 : f32 to vector<64x1xf32>
    %211 = arith.divf %209, %210 : vector<64x1xf32>
    %212 = vector.broadcast %211 : vector<64x1xf32> to vector<64x32xf32>
    %213 = arith.subf %205, %212 : vector<64x32xf32>
    %214 = arith.mulf %213, %213 : vector<64x32xf32>
    %cst_80 = arith.constant dense<0.000000e+00> : vector<64xf32>
    %215 = vector.multi_reduction <add>, %214, %cst_80 [1] : vector<64x32xf32> to vector<64xf32>
    %216 = vector.shape_cast %215 : vector<64xf32> to vector<64x1xf32>
    %cst_81 = arith.constant 3.200000e+01 : f32
    %217 = vector.broadcast %cst_81 : f32 to vector<64x1xf32>
    %218 = arith.divf %216, %217 : vector<64x1xf32>
    %219 = vector.broadcast %211 : vector<64x1xf32> to vector<64x32xf32>
    %220 = arith.subf %205, %219 : vector<64x32xf32>
    %cst_82 = arith.constant 9.99999974E-6 : f32
    %221 = vector.broadcast %cst_82 : f32 to vector<64x1xf32>
    %222 = arith.addf %218, %221 : vector<64x1xf32>
    %223 = math.rsqrt %222 : vector<64x1xf32>
    %224 = vector.broadcast %223 : vector<64x1xf32> to vector<64x32xf32>
    %225 = arith.mulf %220, %224 : vector<64x32xf32>
    %226 = vector.broadcast %206 : vector<1x32xf32> to vector<64x32xf32>
    %227 = arith.mulf %225, %226 : vector<64x32xf32>
    %228 = vector.broadcast %207 : vector<1x32xf32> to vector<64x32xf32>
    %229 = arith.addf %227, %228 : vector<64x32xf32>
    %c0_83 = arith.constant 0 : index
    %c0_84 = arith.constant 0 : index
    %230 = vector.load %arg11[%c0_83, %c0_84] : memref<32x64xf32, #tpu.memory_space<vmem>>, vector<32x64xf32>
    %cst_85 = arith.constant dense<0.000000e+00> : vector<64x64xf32>
    %231 = tpu.matmul %229, %230, %cst_85 {dimension_numbers = #tpu.dot_dimension_numbers<[1], [0], [0], [1], [0, 0, 1, 1], [], []>} : vector<64x32xf32>, vector<32x64xf32>, vector<64x64xf32> -> vector<64x64xf32>
    %c0_86 = arith.constant 0 : index
    %c0_87 = arith.constant 0 : index
    %232 = vector.load %arg12[%c0_86, %c0_87] : memref<1x64xf32, #tpu.memory_space<vmem>>, vector<1x64xf32>
    %233 = vector.broadcast %232 : vector<1x64xf32> to vector<64x64xf32>
    %234 = arith.addf %231, %233 : vector<64x64xf32>
    %cst_88 = arith.constant 5.000000e-01 : f32
    %235 = vector.broadcast %cst_88 : f32 to vector<64x64xf32>
    %236 = arith.mulf %235, %234 : vector<64x64xf32>
    %cst_89 = arith.constant 0.707106769 : f32
    %237 = vector.broadcast %cst_89 : f32 to vector<64x64xf32>
    %238 = arith.mulf %234, %237 : vector<64x64xf32>
    %cst_90 = arith.constant 0.000000e+00 : f32
    %239 = vector.broadcast %cst_90 : f32 to vector<64x64xf32>
    %240 = arith.cmpf oge, %238, %239 : vector<64x64xf32>
    %cst_91 = arith.constant 0.000000e+00 : f32
    %241 = vector.broadcast %cst_91 : f32 to vector<64x64xf32>
    %242 = arith.subf %241, %238 : vector<64x64xf32>
    %243 = arith.select %240, %238, %242 : vector<64x64xi1>, vector<64x64xf32>
    %cst_92 = arith.constant 0.327591091 : f32
    %244 = vector.broadcast %cst_92 : f32 to vector<64x64xf32>
    %245 = arith.mulf %244, %243 : vector<64x64xf32>
    %cst_93 = arith.constant 1.000000e+00 : f32
    %246 = vector.broadcast %cst_93 : f32 to vector<64x64xf32>
    %247 = arith.addf %246, %245 : vector<64x64xf32>
    %cst_94 = arith.constant 1.000000e+00 : f32
    %248 = vector.broadcast %cst_94 : f32 to vector<64x64xf32>
    %249 = arith.divf %248, %247 : vector<64x64xf32>
    %cst_95 = arith.constant 1.06140542 : f32
    %250 = vector.broadcast %cst_95 : f32 to vector<64x64xf32>
    %251 = arith.mulf %250, %249 : vector<64x64xf32>
    %cst_96 = arith.constant -1.45315206 : f32
    %252 = vector.broadcast %cst_96 : f32 to vector<64x64xf32>
    %253 = arith.addf %251, %252 : vector<64x64xf32>
    %254 = arith.mulf %253, %249 : vector<64x64xf32>
    %cst_97 = arith.constant 1.42141378 : f32
    %255 = vector.broadcast %cst_97 : f32 to vector<64x64xf32>
    %256 = arith.addf %254, %255 : vector<64x64xf32>
    %257 = arith.mulf %256, %249 : vector<64x64xf32>
    %cst_98 = arith.constant -0.284496725 : f32
    %258 = vector.broadcast %cst_98 : f32 to vector<64x64xf32>
    %259 = arith.addf %257, %258 : vector<64x64xf32>
    %260 = arith.mulf %259, %249 : vector<64x64xf32>
    %cst_99 = arith.constant 0.254829586 : f32
    %261 = vector.broadcast %cst_99 : f32 to vector<64x64xf32>
    %262 = arith.addf %260, %261 : vector<64x64xf32>
    %263 = arith.mulf %262, %249 : vector<64x64xf32>
    %cst_100 = arith.constant 0.000000e+00 : f32
    %264 = vector.broadcast %cst_100 : f32 to vector<64x64xf32>
    %265 = arith.subf %264, %243 : vector<64x64xf32>
    %266 = arith.mulf %265, %243 : vector<64x64xf32>
    %267 = math.exp %266 : vector<64x64xf32>
    %268 = arith.mulf %263, %267 : vector<64x64xf32>
    %cst_101 = arith.constant 1.000000e+00 : f32
    %269 = vector.broadcast %cst_101 : f32 to vector<64x64xf32>
    %270 = arith.subf %269, %268 : vector<64x64xf32>
    %cst_102 = arith.constant 0.000000e+00 : f32
    %271 = vector.broadcast %cst_102 : f32 to vector<64x64xf32>
    %272 = arith.cmpf oge, %238, %271 : vector<64x64xf32>
    %cst_103 = arith.constant 0.000000e+00 : f32
    %273 = vector.broadcast %cst_103 : f32 to vector<64x64xf32>
    %274 = arith.subf %273, %270 : vector<64x64xf32>
    %275 = arith.select %272, %270, %274 : vector<64x64xi1>, vector<64x64xf32>
    %cst_104 = arith.constant 1.000000e+00 : f32
    %276 = vector.broadcast %cst_104 : f32 to vector<64x64xf32>
    %277 = arith.addf %276, %275 : vector<64x64xf32>
    %278 = arith.mulf %236, %277 : vector<64x64xf32>
    %c0_105 = arith.constant 0 : index
    %c0_106 = arith.constant 0 : index
    %279 = vector.load %arg13[%c0_105, %c0_106] : memref<64x32xf32, #tpu.memory_space<vmem>>, vector<64x32xf32>
    %cst_107 = arith.constant dense<0.000000e+00> : vector<64x32xf32>
    %280 = tpu.matmul %278, %279, %cst_107 {dimension_numbers = #tpu.dot_dimension_numbers<[1], [0], [0], [1], [0, 0, 1, 1], [], []>} : vector<64x64xf32>, vector<64x32xf32>, vector<64x32xf32> -> vector<64x32xf32>
    %281 = arith.addf %205, %280 : vector<64x32xf32>
    %c0_108 = arith.constant 0 : index
    %c0_109 = arith.constant 0 : index
    %282 = vector.load %arg14[%c0_108, %c0_109] : memref<1x32xf32, #tpu.memory_space<vmem>>, vector<1x32xf32>
    %283 = vector.broadcast %282 : vector<1x32xf32> to vector<64x32xf32>
    %284 = arith.addf %281, %283 : vector<64x32xf32>
    %c0_110 = arith.constant 0 : index
    %c0_111 = arith.constant 0 : index
    %285 = vector.load %arg15[%c0_110, %c0_111] : memref<1x32xf32, #tpu.memory_space<vmem>>, vector<1x32xf32>
    %c0_112 = arith.constant 0 : index
    %c0_113 = arith.constant 0 : index
    %286 = vector.load %arg16[%c0_112, %c0_113] : memref<1x32xf32, #tpu.memory_space<vmem>>, vector<1x32xf32>
    %cst_114 = arith.constant dense<0.000000e+00> : vector<64xf32>
    %287 = vector.multi_reduction <add>, %284, %cst_114 [1] : vector<64x32xf32> to vector<64xf32>
    %288 = vector.shape_cast %287 : vector<64xf32> to vector<64x1xf32>
    %cst_115 = arith.constant 3.200000e+01 : f32
    %289 = vector.broadcast %cst_115 : f32 to vector<64x1xf32>
    %290 = arith.divf %288, %289 : vector<64x1xf32>
    %291 = vector.broadcast %290 : vector<64x1xf32> to vector<64x32xf32>
    %292 = arith.subf %284, %291 : vector<64x32xf32>
    %293 = arith.mulf %292, %292 : vector<64x32xf32>
    %cst_116 = arith.constant dense<0.000000e+00> : vector<64xf32>
    %294 = vector.multi_reduction <add>, %293, %cst_116 [1] : vector<64x32xf32> to vector<64xf32>
    %295 = vector.shape_cast %294 : vector<64xf32> to vector<64x1xf32>
    %cst_117 = arith.constant 3.200000e+01 : f32
    %296 = vector.broadcast %cst_117 : f32 to vector<64x1xf32>
    %297 = arith.divf %295, %296 : vector<64x1xf32>
    %298 = vector.broadcast %290 : vector<64x1xf32> to vector<64x32xf32>
    %299 = arith.subf %284, %298 : vector<64x32xf32>
    %cst_118 = arith.constant 9.99999974E-6 : f32
    %300 = vector.broadcast %cst_118 : f32 to vector<64x1xf32>
    %301 = arith.addf %297, %300 : vector<64x1xf32>
    %302 = math.rsqrt %301 : vector<64x1xf32>
    %303 = vector.broadcast %302 : vector<64x1xf32> to vector<64x32xf32>
    %304 = arith.mulf %299, %303 : vector<64x32xf32>
    %305 = vector.broadcast %285 : vector<1x32xf32> to vector<64x32xf32>
    %306 = arith.mulf %304, %305 : vector<64x32xf32>
    %307 = vector.broadcast %286 : vector<1x32xf32> to vector<64x32xf32>
    %308 = arith.addf %306, %307 : vector<64x32xf32>
    %c0_119 = arith.constant 0 : index
    %c0_120 = arith.constant 0 : index
    %309 = vector.load %arg17[%c0_119, %c0_120] : memref<32x32xf32, #tpu.memory_space<vmem>>, vector<32x32xf32>
    %cst_121 = arith.constant dense<0.000000e+00> : vector<64x32xf32>
    %310 = tpu.matmul %308, %309, %cst_121 {dimension_numbers = #tpu.dot_dimension_numbers<[1], [0], [0], [1], [0, 0, 1, 1], [], []>} : vector<64x32xf32>, vector<32x32xf32>, vector<64x32xf32> -> vector<64x32xf32>
    %c0_122 = arith.constant 0 : index
    %c0_123 = arith.constant 0 : index
    %311 = vector.load %arg18[%c0_122, %c0_123] : memref<32x32xf32, #tpu.memory_space<vmem>>, vector<32x32xf32>
    %cst_124 = arith.constant dense<0.000000e+00> : vector<64x32xf32>
    %312 = tpu.matmul %308, %311, %cst_124 {dimension_numbers = #tpu.dot_dimension_numbers<[1], [0], [0], [1], [0, 0, 1, 1], [], []>} : vector<64x32xf32>, vector<32x32xf32>, vector<64x32xf32> -> vector<64x32xf32>
    %c0_125 = arith.constant 0 : index
    %c0_126 = arith.constant 0 : index
    %313 = vector.load %arg19[%c0_125, %c0_126] : memref<32x32xf32, #tpu.memory_space<vmem>>, vector<32x32xf32>
    %cst_127 = arith.constant dense<0.000000e+00> : vector<64x32xf32>
    %314 = tpu.matmul %308, %313, %cst_127 {dimension_numbers = #tpu.dot_dimension_numbers<[1], [0], [0], [1], [0, 0, 1, 1], [], []>} : vector<64x32xf32>, vector<32x32xf32>, vector<64x32xf32> -> vector<64x32xf32>
    %c0_128 = arith.constant 0 : index
    %c0_129 = arith.constant 0 : index
    %315 = vector.load %arg20[%c0_128, %c0_129] : memref<32x32xf32, #tpu.memory_space<vmem>>, vector<32x32xf32>
    %316 = vector.extract_strided_slice %310 {offsets = [0, 0], sizes = [32, 32], strides = [1, 1]} : vector<64x32xf32> to vector<32x32xf32>
    %317 = vector.extract_strided_slice %312 {offsets = [0, 0], sizes = [32, 32], strides = [1, 1]} : vector<64x32xf32> to vector<32x32xf32>
    %318 = vector.extract_strided_slice %314 {offsets = [0, 0], sizes = [32, 32], strides = [1, 1]} : vector<64x32xf32> to vector<32x32xf32>
    %319 = vector.extract_strided_slice %316 {offsets = [0, 0], sizes = [32, 8], strides = [1, 1]} : vector<32x32xf32> to vector<32x8xf32>
    %320 = vector.extract_strided_slice %317 {offsets = [0, 0], sizes = [32, 8], strides = [1, 1]} : vector<32x32xf32> to vector<32x8xf32>
    %321 = vector.extract_strided_slice %318 {offsets = [0, 0], sizes = [32, 8], strides = [1, 1]} : vector<32x32xf32> to vector<32x8xf32>
    %cst_130 = arith.constant dense<0.000000e+00> : vector<32x32xf32>
    %322 = tpu.matmul %319, %320, %cst_130 {dimension_numbers = #tpu.dot_dimension_numbers<[1], [1], [0], [0], [0, 0, 1, 0], [], []>} : vector<32x8xf32>, vector<32x8xf32>, vector<32x32xf32> -> vector<32x32xf32>
    %cst_131 = arith.constant 0.353553385 : f32
    %323 = vector.broadcast %cst_131 : f32 to vector<32x32xf32>
    %324 = arith.mulf %322, %323 : vector<32x32xf32>
    %cst_132 = arith.constant dense<0xFF800000> : vector<32xf32>
    %325 = vector.multi_reduction <maximumf>, %324, %cst_132 [1] : vector<32x32xf32> to vector<32xf32>
    %326 = vector.shape_cast %325 : vector<32xf32> to vector<32x1xf32>
    %327 = vector.broadcast %326 : vector<32x1xf32> to vector<32x32xf32>
    %328 = arith.subf %324, %327 : vector<32x32xf32>
    %329 = math.exp %328 : vector<32x32xf32>
    %cst_133 = arith.constant dense<0.000000e+00> : vector<32xf32>
    %330 = vector.multi_reduction <add>, %329, %cst_133 [1] : vector<32x32xf32> to vector<32xf32>
    %331 = vector.shape_cast %330 : vector<32xf32> to vector<32x1xf32>
    %332 = tpu.reciprocal %331 {approx = true} : vector<32x1xf32> -> vector<32x1xf32>
    %333 = vector.broadcast %332 : vector<32x1xf32> to vector<32x32xf32>
    %334 = arith.mulf %329, %333 : vector<32x32xf32>
    %cst_134 = arith.constant dense<0.000000e+00> : vector<32x8xf32>
    %335 = tpu.matmul %334, %321, %cst_134 {dimension_numbers = #tpu.dot_dimension_numbers<[1], [0], [0], [1], [0, 0, 1, 1], [], []>} : vector<32x32xf32>, vector<32x8xf32>, vector<32x8xf32> -> vector<32x8xf32>
    %336 = vector.extract_strided_slice %315 {offsets = [0, 0], sizes = [8, 32], strides = [1, 1]} : vector<32x32xf32> to vector<8x32xf32>
    %cst_135 = arith.constant dense<0.000000e+00> : vector<32x32xf32>
    %337 = tpu.matmul %335, %336, %cst_135 {dimension_numbers = #tpu.dot_dimension_numbers<[1], [0], [0], [1], [0, 0, 1, 1], [], []>} : vector<32x8xf32>, vector<8x32xf32>, vector<32x32xf32> -> vector<32x32xf32>
    %338 = vector.extract_strided_slice %316 {offsets = [0, 8], sizes = [32, 8], strides = [1, 1]} : vector<32x32xf32> to vector<32x8xf32>
    %339 = vector.extract_strided_slice %317 {offsets = [0, 8], sizes = [32, 8], strides = [1, 1]} : vector<32x32xf32> to vector<32x8xf32>
    %340 = vector.extract_strided_slice %318 {offsets = [0, 8], sizes = [32, 8], strides = [1, 1]} : vector<32x32xf32> to vector<32x8xf32>
    %cst_136 = arith.constant dense<0.000000e+00> : vector<32x32xf32>
    %341 = tpu.matmul %338, %339, %cst_136 {dimension_numbers = #tpu.dot_dimension_numbers<[1], [1], [0], [0], [0, 0, 1, 0], [], []>} : vector<32x8xf32>, vector<32x8xf32>, vector<32x32xf32> -> vector<32x32xf32>
    %cst_137 = arith.constant 0.353553385 : f32
    %342 = vector.broadcast %cst_137 : f32 to vector<32x32xf32>
    %343 = arith.mulf %341, %342 : vector<32x32xf32>
    %cst_138 = arith.constant dense<0xFF800000> : vector<32xf32>
    %344 = vector.multi_reduction <maximumf>, %343, %cst_138 [1] : vector<32x32xf32> to vector<32xf32>
    %345 = vector.shape_cast %344 : vector<32xf32> to vector<32x1xf32>
    %346 = vector.broadcast %345 : vector<32x1xf32> to vector<32x32xf32>
    %347 = arith.subf %343, %346 : vector<32x32xf32>
    %348 = math.exp %347 : vector<32x32xf32>
    %cst_139 = arith.constant dense<0.000000e+00> : vector<32xf32>
    %349 = vector.multi_reduction <add>, %348, %cst_139 [1] : vector<32x32xf32> to vector<32xf32>
    %350 = vector.shape_cast %349 : vector<32xf32> to vector<32x1xf32>
    %351 = tpu.reciprocal %350 {approx = true} : vector<32x1xf32> -> vector<32x1xf32>
    %352 = vector.broadcast %351 : vector<32x1xf32> to vector<32x32xf32>
    %353 = arith.mulf %348, %352 : vector<32x32xf32>
    %cst_140 = arith.constant dense<0.000000e+00> : vector<32x8xf32>
    %354 = tpu.matmul %353, %340, %cst_140 {dimension_numbers = #tpu.dot_dimension_numbers<[1], [0], [0], [1], [0, 0, 1, 1], [], []>} : vector<32x32xf32>, vector<32x8xf32>, vector<32x8xf32> -> vector<32x8xf32>
    %355 = vector.extract_strided_slice %315 {offsets = [8, 0], sizes = [8, 32], strides = [1, 1]} : vector<32x32xf32> to vector<8x32xf32>
    %cst_141 = arith.constant dense<0.000000e+00> : vector<32x32xf32>
    %356 = tpu.matmul %354, %355, %cst_141 {dimension_numbers = #tpu.dot_dimension_numbers<[1], [0], [0], [1], [0, 0, 1, 1], [], []>} : vector<32x8xf32>, vector<8x32xf32>, vector<32x32xf32> -> vector<32x32xf32>
    %357 = arith.addf %337, %356 : vector<32x32xf32>
    %358 = vector.extract_strided_slice %316 {offsets = [0, 16], sizes = [32, 8], strides = [1, 1]} : vector<32x32xf32> to vector<32x8xf32>
    %359 = vector.extract_strided_slice %317 {offsets = [0, 16], sizes = [32, 8], strides = [1, 1]} : vector<32x32xf32> to vector<32x8xf32>
    %360 = vector.extract_strided_slice %318 {offsets = [0, 16], sizes = [32, 8], strides = [1, 1]} : vector<32x32xf32> to vector<32x8xf32>
    %cst_142 = arith.constant dense<0.000000e+00> : vector<32x32xf32>
    %361 = tpu.matmul %358, %359, %cst_142 {dimension_numbers = #tpu.dot_dimension_numbers<[1], [1], [0], [0], [0, 0, 1, 0], [], []>} : vector<32x8xf32>, vector<32x8xf32>, vector<32x32xf32> -> vector<32x32xf32>
    %cst_143 = arith.constant 0.353553385 : f32
    %362 = vector.broadcast %cst_143 : f32 to vector<32x32xf32>
    %363 = arith.mulf %361, %362 : vector<32x32xf32>
    %cst_144 = arith.constant dense<0xFF800000> : vector<32xf32>
    %364 = vector.multi_reduction <maximumf>, %363, %cst_144 [1] : vector<32x32xf32> to vector<32xf32>
    %365 = vector.shape_cast %364 : vector<32xf32> to vector<32x1xf32>
    %366 = vector.broadcast %365 : vector<32x1xf32> to vector<32x32xf32>
    %367 = arith.subf %363, %366 : vector<32x32xf32>
    %368 = math.exp %367 : vector<32x32xf32>
    %cst_145 = arith.constant dense<0.000000e+00> : vector<32xf32>
    %369 = vector.multi_reduction <add>, %368, %cst_145 [1] : vector<32x32xf32> to vector<32xf32>
    %370 = vector.shape_cast %369 : vector<32xf32> to vector<32x1xf32>
    %371 = tpu.reciprocal %370 {approx = true} : vector<32x1xf32> -> vector<32x1xf32>
    %372 = vector.broadcast %371 : vector<32x1xf32> to vector<32x32xf32>
    %373 = arith.mulf %368, %372 : vector<32x32xf32>
    %cst_146 = arith.constant dense<0.000000e+00> : vector<32x8xf32>
    %374 = tpu.matmul %373, %360, %cst_146 {dimension_numbers = #tpu.dot_dimension_numbers<[1], [0], [0], [1], [0, 0, 1, 1], [], []>} : vector<32x32xf32>, vector<32x8xf32>, vector<32x8xf32> -> vector<32x8xf32>
    %375 = vector.extract_strided_slice %315 {offsets = [16, 0], sizes = [8, 32], strides = [1, 1]} : vector<32x32xf32> to vector<8x32xf32>
    %cst_147 = arith.constant dense<0.000000e+00> : vector<32x32xf32>
    %376 = tpu.matmul %374, %375, %cst_147 {dimension_numbers = #tpu.dot_dimension_numbers<[1], [0], [0], [1], [0, 0, 1, 1], [], []>} : vector<32x8xf32>, vector<8x32xf32>, vector<32x32xf32> -> vector<32x32xf32>
    %377 = arith.addf %357, %376 : vector<32x32xf32>
    %378 = vector.extract_strided_slice %316 {offsets = [0, 24], sizes = [32, 8], strides = [1, 1]} : vector<32x32xf32> to vector<32x8xf32>
    %379 = vector.extract_strided_slice %317 {offsets = [0, 24], sizes = [32, 8], strides = [1, 1]} : vector<32x32xf32> to vector<32x8xf32>
    %380 = vector.extract_strided_slice %318 {offsets = [0, 24], sizes = [32, 8], strides = [1, 1]} : vector<32x32xf32> to vector<32x8xf32>
    %cst_148 = arith.constant dense<0.000000e+00> : vector<32x32xf32>
    %381 = tpu.matmul %378, %379, %cst_148 {dimension_numbers = #tpu.dot_dimension_numbers<[1], [1], [0], [0], [0, 0, 1, 0], [], []>} : vector<32x8xf32>, vector<32x8xf32>, vector<32x32xf32> -> vector<32x32xf32>
    %cst_149 = arith.constant 0.353553385 : f32
    %382 = vector.broadcast %cst_149 : f32 to vector<32x32xf32>
    %383 = arith.mulf %381, %382 : vector<32x32xf32>
    %cst_150 = arith.constant dense<0xFF800000> : vector<32xf32>
    %384 = vector.multi_reduction <maximumf>, %383, %cst_150 [1] : vector<32x32xf32> to vector<32xf32>
    %385 = vector.shape_cast %384 : vector<32xf32> to vector<32x1xf32>
    %386 = vector.broadcast %385 : vector<32x1xf32> to vector<32x32xf32>
    %387 = arith.subf %383, %386 : vector<32x32xf32>
    %388 = math.exp %387 : vector<32x32xf32>
    %cst_151 = arith.constant dense<0.000000e+00> : vector<32xf32>
    %389 = vector.multi_reduction <add>, %388, %cst_151 [1] : vector<32x32xf32> to vector<32xf32>
    %390 = vector.shape_cast %389 : vector<32xf32> to vector<32x1xf32>
    %391 = tpu.reciprocal %390 {approx = true} : vector<32x1xf32> -> vector<32x1xf32>
    %392 = vector.broadcast %391 : vector<32x1xf32> to vector<32x32xf32>
    %393 = arith.mulf %388, %392 : vector<32x32xf32>
    %cst_152 = arith.constant dense<0.000000e+00> : vector<32x8xf32>
    %394 = tpu.matmul %393, %380, %cst_152 {dimension_numbers = #tpu.dot_dimension_numbers<[1], [0], [0], [1], [0, 0, 1, 1], [], []>} : vector<32x32xf32>, vector<32x8xf32>, vector<32x8xf32> -> vector<32x8xf32>
    %395 = vector.extract_strided_slice %315 {offsets = [24, 0], sizes = [8, 32], strides = [1, 1]} : vector<32x32xf32> to vector<8x32xf32>
    %cst_153 = arith.constant dense<0.000000e+00> : vector<32x32xf32>
    %396 = tpu.matmul %394, %395, %cst_153 {dimension_numbers = #tpu.dot_dimension_numbers<[1], [0], [0], [1], [0, 0, 1, 1], [], []>} : vector<32x8xf32>, vector<8x32xf32>, vector<32x32xf32> -> vector<32x32xf32>
    %397 = arith.addf %377, %396 : vector<32x32xf32>
    %398 = vector.extract_strided_slice %310 {offsets = [32, 0], sizes = [32, 32], strides = [1, 1]} : vector<64x32xf32> to vector<32x32xf32>
    %399 = vector.extract_strided_slice %312 {offsets = [32, 0], sizes = [32, 32], strides = [1, 1]} : vector<64x32xf32> to vector<32x32xf32>
    %400 = vector.extract_strided_slice %314 {offsets = [32, 0], sizes = [32, 32], strides = [1, 1]} : vector<64x32xf32> to vector<32x32xf32>
    %401 = vector.extract_strided_slice %398 {offsets = [0, 0], sizes = [32, 8], strides = [1, 1]} : vector<32x32xf32> to vector<32x8xf32>
    %402 = vector.extract_strided_slice %399 {offsets = [0, 0], sizes = [32, 8], strides = [1, 1]} : vector<32x32xf32> to vector<32x8xf32>
    %403 = vector.extract_strided_slice %400 {offsets = [0, 0], sizes = [32, 8], strides = [1, 1]} : vector<32x32xf32> to vector<32x8xf32>
    %cst_154 = arith.constant dense<0.000000e+00> : vector<32x32xf32>
    %404 = tpu.matmul %401, %402, %cst_154 {dimension_numbers = #tpu.dot_dimension_numbers<[1], [1], [0], [0], [0, 0, 1, 0], [], []>} : vector<32x8xf32>, vector<32x8xf32>, vector<32x32xf32> -> vector<32x32xf32>
    %cst_155 = arith.constant 0.353553385 : f32
    %405 = vector.broadcast %cst_155 : f32 to vector<32x32xf32>
    %406 = arith.mulf %404, %405 : vector<32x32xf32>
    %cst_156 = arith.constant dense<0xFF800000> : vector<32xf32>
    %407 = vector.multi_reduction <maximumf>, %406, %cst_156 [1] : vector<32x32xf32> to vector<32xf32>
    %408 = vector.shape_cast %407 : vector<32xf32> to vector<32x1xf32>
    %409 = vector.broadcast %408 : vector<32x1xf32> to vector<32x32xf32>
    %410 = arith.subf %406, %409 : vector<32x32xf32>
    %411 = math.exp %410 : vector<32x32xf32>
    %cst_157 = arith.constant dense<0.000000e+00> : vector<32xf32>
    %412 = vector.multi_reduction <add>, %411, %cst_157 [1] : vector<32x32xf32> to vector<32xf32>
    %413 = vector.shape_cast %412 : vector<32xf32> to vector<32x1xf32>
    %414 = tpu.reciprocal %413 {approx = true} : vector<32x1xf32> -> vector<32x1xf32>
    %415 = vector.broadcast %414 : vector<32x1xf32> to vector<32x32xf32>
    %416 = arith.mulf %411, %415 : vector<32x32xf32>
    %cst_158 = arith.constant dense<0.000000e+00> : vector<32x8xf32>
    %417 = tpu.matmul %416, %403, %cst_158 {dimension_numbers = #tpu.dot_dimension_numbers<[1], [0], [0], [1], [0, 0, 1, 1], [], []>} : vector<32x32xf32>, vector<32x8xf32>, vector<32x8xf32> -> vector<32x8xf32>
    %418 = vector.extract_strided_slice %315 {offsets = [0, 0], sizes = [8, 32], strides = [1, 1]} : vector<32x32xf32> to vector<8x32xf32>
    %cst_159 = arith.constant dense<0.000000e+00> : vector<32x32xf32>
    %419 = tpu.matmul %417, %418, %cst_159 {dimension_numbers = #tpu.dot_dimension_numbers<[1], [0], [0], [1], [0, 0, 1, 1], [], []>} : vector<32x8xf32>, vector<8x32xf32>, vector<32x32xf32> -> vector<32x32xf32>
    %420 = vector.extract_strided_slice %398 {offsets = [0, 8], sizes = [32, 8], strides = [1, 1]} : vector<32x32xf32> to vector<32x8xf32>
    %421 = vector.extract_strided_slice %399 {offsets = [0, 8], sizes = [32, 8], strides = [1, 1]} : vector<32x32xf32> to vector<32x8xf32>
    %422 = vector.extract_strided_slice %400 {offsets = [0, 8], sizes = [32, 8], strides = [1, 1]} : vector<32x32xf32> to vector<32x8xf32>
    %cst_160 = arith.constant dense<0.000000e+00> : vector<32x32xf32>
    %423 = tpu.matmul %420, %421, %cst_160 {dimension_numbers = #tpu.dot_dimension_numbers<[1], [1], [0], [0], [0, 0, 1, 0], [], []>} : vector<32x8xf32>, vector<32x8xf32>, vector<32x32xf32> -> vector<32x32xf32>
    %cst_161 = arith.constant 0.353553385 : f32
    %424 = vector.broadcast %cst_161 : f32 to vector<32x32xf32>
    %425 = arith.mulf %423, %424 : vector<32x32xf32>
    %cst_162 = arith.constant dense<0xFF800000> : vector<32xf32>
    %426 = vector.multi_reduction <maximumf>, %425, %cst_162 [1] : vector<32x32xf32> to vector<32xf32>
    %427 = vector.shape_cast %426 : vector<32xf32> to vector<32x1xf32>
    %428 = vector.broadcast %427 : vector<32x1xf32> to vector<32x32xf32>
    %429 = arith.subf %425, %428 : vector<32x32xf32>
    %430 = math.exp %429 : vector<32x32xf32>
    %cst_163 = arith.constant dense<0.000000e+00> : vector<32xf32>
    %431 = vector.multi_reduction <add>, %430, %cst_163 [1] : vector<32x32xf32> to vector<32xf32>
    %432 = vector.shape_cast %431 : vector<32xf32> to vector<32x1xf32>
    %433 = tpu.reciprocal %432 {approx = true} : vector<32x1xf32> -> vector<32x1xf32>
    %434 = vector.broadcast %433 : vector<32x1xf32> to vector<32x32xf32>
    %435 = arith.mulf %430, %434 : vector<32x32xf32>
    %cst_164 = arith.constant dense<0.000000e+00> : vector<32x8xf32>
    %436 = tpu.matmul %435, %422, %cst_164 {dimension_numbers = #tpu.dot_dimension_numbers<[1], [0], [0], [1], [0, 0, 1, 1], [], []>} : vector<32x32xf32>, vector<32x8xf32>, vector<32x8xf32> -> vector<32x8xf32>
    %437 = vector.extract_strided_slice %315 {offsets = [8, 0], sizes = [8, 32], strides = [1, 1]} : vector<32x32xf32> to vector<8x32xf32>
    %cst_165 = arith.constant dense<0.000000e+00> : vector<32x32xf32>
    %438 = tpu.matmul %436, %437, %cst_165 {dimension_numbers = #tpu.dot_dimension_numbers<[1], [0], [0], [1], [0, 0, 1, 1], [], []>} : vector<32x8xf32>, vector<8x32xf32>, vector<32x32xf32> -> vector<32x32xf32>
    %439 = arith.addf %419, %438 : vector<32x32xf32>
    %440 = vector.extract_strided_slice %398 {offsets = [0, 16], sizes = [32, 8], strides = [1, 1]} : vector<32x32xf32> to vector<32x8xf32>
    %441 = vector.extract_strided_slice %399 {offsets = [0, 16], sizes = [32, 8], strides = [1, 1]} : vector<32x32xf32> to vector<32x8xf32>
    %442 = vector.extract_strided_slice %400 {offsets = [0, 16], sizes = [32, 8], strides = [1, 1]} : vector<32x32xf32> to vector<32x8xf32>
    %cst_166 = arith.constant dense<0.000000e+00> : vector<32x32xf32>
    %443 = tpu.matmul %440, %441, %cst_166 {dimension_numbers = #tpu.dot_dimension_numbers<[1], [1], [0], [0], [0, 0, 1, 0], [], []>} : vector<32x8xf32>, vector<32x8xf32>, vector<32x32xf32> -> vector<32x32xf32>
    %cst_167 = arith.constant 0.353553385 : f32
    %444 = vector.broadcast %cst_167 : f32 to vector<32x32xf32>
    %445 = arith.mulf %443, %444 : vector<32x32xf32>
    %cst_168 = arith.constant dense<0xFF800000> : vector<32xf32>
    %446 = vector.multi_reduction <maximumf>, %445, %cst_168 [1] : vector<32x32xf32> to vector<32xf32>
    %447 = vector.shape_cast %446 : vector<32xf32> to vector<32x1xf32>
    %448 = vector.broadcast %447 : vector<32x1xf32> to vector<32x32xf32>
    %449 = arith.subf %445, %448 : vector<32x32xf32>
    %450 = math.exp %449 : vector<32x32xf32>
    %cst_169 = arith.constant dense<0.000000e+00> : vector<32xf32>
    %451 = vector.multi_reduction <add>, %450, %cst_169 [1] : vector<32x32xf32> to vector<32xf32>
    %452 = vector.shape_cast %451 : vector<32xf32> to vector<32x1xf32>
    %453 = tpu.reciprocal %452 {approx = true} : vector<32x1xf32> -> vector<32x1xf32>
    %454 = vector.broadcast %453 : vector<32x1xf32> to vector<32x32xf32>
    %455 = arith.mulf %450, %454 : vector<32x32xf32>
    %cst_170 = arith.constant dense<0.000000e+00> : vector<32x8xf32>
    %456 = tpu.matmul %455, %442, %cst_170 {dimension_numbers = #tpu.dot_dimension_numbers<[1], [0], [0], [1], [0, 0, 1, 1], [], []>} : vector<32x32xf32>, vector<32x8xf32>, vector<32x8xf32> -> vector<32x8xf32>
    %457 = vector.extract_strided_slice %315 {offsets = [16, 0], sizes = [8, 32], strides = [1, 1]} : vector<32x32xf32> to vector<8x32xf32>
    %cst_171 = arith.constant dense<0.000000e+00> : vector<32x32xf32>
    %458 = tpu.matmul %456, %457, %cst_171 {dimension_numbers = #tpu.dot_dimension_numbers<[1], [0], [0], [1], [0, 0, 1, 1], [], []>} : vector<32x8xf32>, vector<8x32xf32>, vector<32x32xf32> -> vector<32x32xf32>
    %459 = arith.addf %439, %458 : vector<32x32xf32>
    %460 = vector.extract_strided_slice %398 {offsets = [0, 24], sizes = [32, 8], strides = [1, 1]} : vector<32x32xf32> to vector<32x8xf32>
    %461 = vector.extract_strided_slice %399 {offsets = [0, 24], sizes = [32, 8], strides = [1, 1]} : vector<32x32xf32> to vector<32x8xf32>
    %462 = vector.extract_strided_slice %400 {offsets = [0, 24], sizes = [32, 8], strides = [1, 1]} : vector<32x32xf32> to vector<32x8xf32>
    %cst_172 = arith.constant dense<0.000000e+00> : vector<32x32xf32>
    %463 = tpu.matmul %460, %461, %cst_172 {dimension_numbers = #tpu.dot_dimension_numbers<[1], [1], [0], [0], [0, 0, 1, 0], [], []>} : vector<32x8xf32>, vector<32x8xf32>, vector<32x32xf32> -> vector<32x32xf32>
    %cst_173 = arith.constant 0.353553385 : f32
    %464 = vector.broadcast %cst_173 : f32 to vector<32x32xf32>
    %465 = arith.mulf %463, %464 : vector<32x32xf32>
    %cst_174 = arith.constant dense<0xFF800000> : vector<32xf32>
    %466 = vector.multi_reduction <maximumf>, %465, %cst_174 [1] : vector<32x32xf32> to vector<32xf32>
    %467 = vector.shape_cast %466 : vector<32xf32> to vector<32x1xf32>
    %468 = vector.broadcast %467 : vector<32x1xf32> to vector<32x32xf32>
    %469 = arith.subf %465, %468 : vector<32x32xf32>
    %470 = math.exp %469 : vector<32x32xf32>
    %cst_175 = arith.constant dense<0.000000e+00> : vector<32xf32>
    %471 = vector.multi_reduction <add>, %470, %cst_175 [1] : vector<32x32xf32> to vector<32xf32>
    %472 = vector.shape_cast %471 : vector<32xf32> to vector<32x1xf32>
    %473 = tpu.reciprocal %472 {approx = true} : vector<32x1xf32> -> vector<32x1xf32>
    %474 = vector.broadcast %473 : vector<32x1xf32> to vector<32x32xf32>
    %475 = arith.mulf %470, %474 : vector<32x32xf32>
    %cst_176 = arith.constant dense<0.000000e+00> : vector<32x8xf32>
    %476 = tpu.matmul %475, %462, %cst_176 {dimension_numbers = #tpu.dot_dimension_numbers<[1], [0], [0], [1], [0, 0, 1, 1], [], []>} : vector<32x32xf32>, vector<32x8xf32>, vector<32x8xf32> -> vector<32x8xf32>
    %477 = vector.extract_strided_slice %315 {offsets = [24, 0], sizes = [8, 32], strides = [1, 1]} : vector<32x32xf32> to vector<8x32xf32>
    %cst_177 = arith.constant dense<0.000000e+00> : vector<32x32xf32>
    %478 = tpu.matmul %476, %477, %cst_177 {dimension_numbers = #tpu.dot_dimension_numbers<[1], [0], [0], [1], [0, 0, 1, 1], [], []>} : vector<32x8xf32>, vector<8x32xf32>, vector<32x32xf32> -> vector<32x32xf32>
    %479 = arith.addf %459, %478 : vector<32x32xf32>
    %480 = tpu.concatenate %397, %479 in 0 : vector<32x32xf32>, vector<32x32xf32> -> vector<64x32xf32>
    %481 = arith.addf %284, %480 : vector<64x32xf32>
    %c0_178 = arith.constant 0 : index
    %c0_179 = arith.constant 0 : index
    %482 = vector.load %arg21[%c0_178, %c0_179] : memref<1x32xf32, #tpu.memory_space<vmem>>, vector<1x32xf32>
    %483 = vector.broadcast %482 : vector<1x32xf32> to vector<64x32xf32>
    %484 = arith.addf %481, %483 : vector<64x32xf32>
    %c0_180 = arith.constant 0 : index
    %c0_181 = arith.constant 0 : index
    %485 = vector.load %arg22[%c0_180, %c0_181] : memref<1x32xf32, #tpu.memory_space<vmem>>, vector<1x32xf32>
    %c0_182 = arith.constant 0 : index
    %c0_183 = arith.constant 0 : index
    %486 = vector.load %arg23[%c0_182, %c0_183] : memref<1x32xf32, #tpu.memory_space<vmem>>, vector<1x32xf32>
    %cst_184 = arith.constant dense<0.000000e+00> : vector<64xf32>
    %487 = vector.multi_reduction <add>, %484, %cst_184 [1] : vector<64x32xf32> to vector<64xf32>
    %488 = vector.shape_cast %487 : vector<64xf32> to vector<64x1xf32>
    %cst_185 = arith.constant 3.200000e+01 : f32
    %489 = vector.broadcast %cst_185 : f32 to vector<64x1xf32>
    %490 = arith.divf %488, %489 : vector<64x1xf32>
    %491 = vector.broadcast %490 : vector<64x1xf32> to vector<64x32xf32>
    %492 = arith.subf %484, %491 : vector<64x32xf32>
    %493 = arith.mulf %492, %492 : vector<64x32xf32>
    %cst_186 = arith.constant dense<0.000000e+00> : vector<64xf32>
    %494 = vector.multi_reduction <add>, %493, %cst_186 [1] : vector<64x32xf32> to vector<64xf32>
    %495 = vector.shape_cast %494 : vector<64xf32> to vector<64x1xf32>
    %cst_187 = arith.constant 3.200000e+01 : f32
    %496 = vector.broadcast %cst_187 : f32 to vector<64x1xf32>
    %497 = arith.divf %495, %496 : vector<64x1xf32>
    %498 = vector.broadcast %490 : vector<64x1xf32> to vector<64x32xf32>
    %499 = arith.subf %484, %498 : vector<64x32xf32>
    %cst_188 = arith.constant 9.99999974E-6 : f32
    %500 = vector.broadcast %cst_188 : f32 to vector<64x1xf32>
    %501 = arith.addf %497, %500 : vector<64x1xf32>
    %502 = math.rsqrt %501 : vector<64x1xf32>
    %503 = vector.broadcast %502 : vector<64x1xf32> to vector<64x32xf32>
    %504 = arith.mulf %499, %503 : vector<64x32xf32>
    %505 = vector.broadcast %485 : vector<1x32xf32> to vector<64x32xf32>
    %506 = arith.mulf %504, %505 : vector<64x32xf32>
    %507 = vector.broadcast %486 : vector<1x32xf32> to vector<64x32xf32>
    %508 = arith.addf %506, %507 : vector<64x32xf32>
    %c0_189 = arith.constant 0 : index
    %c0_190 = arith.constant 0 : index
    %509 = vector.load %arg24[%c0_189, %c0_190] : memref<32x64xf32, #tpu.memory_space<vmem>>, vector<32x64xf32>
    %cst_191 = arith.constant dense<0.000000e+00> : vector<64x64xf32>
    %510 = tpu.matmul %508, %509, %cst_191 {dimension_numbers = #tpu.dot_dimension_numbers<[1], [0], [0], [1], [0, 0, 1, 1], [], []>} : vector<64x32xf32>, vector<32x64xf32>, vector<64x64xf32> -> vector<64x64xf32>
    %c0_192 = arith.constant 0 : index
    %c0_193 = arith.constant 0 : index
    %511 = vector.load %arg25[%c0_192, %c0_193] : memref<1x64xf32, #tpu.memory_space<vmem>>, vector<1x64xf32>
    %512 = vector.broadcast %511 : vector<1x64xf32> to vector<64x64xf32>
    %513 = arith.addf %510, %512 : vector<64x64xf32>
    %cst_194 = arith.constant 5.000000e-01 : f32
    %514 = vector.broadcast %cst_194 : f32 to vector<64x64xf32>
    %515 = arith.mulf %514, %513 : vector<64x64xf32>
    %cst_195 = arith.constant 0.707106769 : f32
    %516 = vector.broadcast %cst_195 : f32 to vector<64x64xf32>
    %517 = arith.mulf %513, %516 : vector<64x64xf32>
    %cst_196 = arith.constant 0.000000e+00 : f32
    %518 = vector.broadcast %cst_196 : f32 to vector<64x64xf32>
    %519 = arith.cmpf oge, %517, %518 : vector<64x64xf32>
    %cst_197 = arith.constant 0.000000e+00 : f32
    %520 = vector.broadcast %cst_197 : f32 to vector<64x64xf32>
    %521 = arith.subf %520, %517 : vector<64x64xf32>
    %522 = arith.select %519, %517, %521 : vector<64x64xi1>, vector<64x64xf32>
    %cst_198 = arith.constant 0.327591091 : f32
    %523 = vector.broadcast %cst_198 : f32 to vector<64x64xf32>
    %524 = arith.mulf %523, %522 : vector<64x64xf32>
    %cst_199 = arith.constant 1.000000e+00 : f32
    %525 = vector.broadcast %cst_199 : f32 to vector<64x64xf32>
    %526 = arith.addf %525, %524 : vector<64x64xf32>
    %cst_200 = arith.constant 1.000000e+00 : f32
    %527 = vector.broadcast %cst_200 : f32 to vector<64x64xf32>
    %528 = arith.divf %527, %526 : vector<64x64xf32>
    %cst_201 = arith.constant 1.06140542 : f32
    %529 = vector.broadcast %cst_201 : f32 to vector<64x64xf32>
    %530 = arith.mulf %529, %528 : vector<64x64xf32>
    %cst_202 = arith.constant -1.45315206 : f32
    %531 = vector.broadcast %cst_202 : f32 to vector<64x64xf32>
    %532 = arith.addf %530, %531 : vector<64x64xf32>
    %533 = arith.mulf %532, %528 : vector<64x64xf32>
    %cst_203 = arith.constant 1.42141378 : f32
    %534 = vector.broadcast %cst_203 : f32 to vector<64x64xf32>
    %535 = arith.addf %533, %534 : vector<64x64xf32>
    %536 = arith.mulf %535, %528 : vector<64x64xf32>
    %cst_204 = arith.constant -0.284496725 : f32
    %537 = vector.broadcast %cst_204 : f32 to vector<64x64xf32>
    %538 = arith.addf %536, %537 : vector<64x64xf32>
    %539 = arith.mulf %538, %528 : vector<64x64xf32>
    %cst_205 = arith.constant 0.254829586 : f32
    %540 = vector.broadcast %cst_205 : f32 to vector<64x64xf32>
    %541 = arith.addf %539, %540 : vector<64x64xf32>
    %542 = arith.mulf %541, %528 : vector<64x64xf32>
    %cst_206 = arith.constant 0.000000e+00 : f32
    %543 = vector.broadcast %cst_206 : f32 to vector<64x64xf32>
    %544 = arith.subf %543, %522 : vector<64x64xf32>
    %545 = arith.mulf %544, %522 : vector<64x64xf32>
    %546 = math.exp %545 : vector<64x64xf32>
    %547 = arith.mulf %542, %546 : vector<64x64xf32>
    %cst_207 = arith.constant 1.000000e+00 : f32
    %548 = vector.broadcast %cst_207 : f32 to vector<64x64xf32>
    %549 = arith.subf %548, %547 : vector<64x64xf32>
    %cst_208 = arith.constant 0.000000e+00 : f32
    %550 = vector.broadcast %cst_208 : f32 to vector<64x64xf32>
    %551 = arith.cmpf oge, %517, %550 : vector<64x64xf32>
    %cst_209 = arith.constant 0.000000e+00 : f32
    %552 = vector.broadcast %cst_209 : f32 to vector<64x64xf32>
    %553 = arith.subf %552, %549 : vector<64x64xf32>
    %554 = arith.select %551, %549, %553 : vector<64x64xi1>, vector<64x64xf32>
    %cst_210 = arith.constant 1.000000e+00 : f32
    %555 = vector.broadcast %cst_210 : f32 to vector<64x64xf32>
    %556 = arith.addf %555, %554 : vector<64x64xf32>
    %557 = arith.mulf %515, %556 : vector<64x64xf32>
    %c0_211 = arith.constant 0 : index
    %c0_212 = arith.constant 0 : index
    %558 = vector.load %arg26[%c0_211, %c0_212] : memref<64x32xf32, #tpu.memory_space<vmem>>, vector<64x32xf32>
    %cst_213 = arith.constant dense<0.000000e+00> : vector<64x32xf32>
    %559 = tpu.matmul %557, %558, %cst_213 {dimension_numbers = #tpu.dot_dimension_numbers<[1], [0], [0], [1], [0, 0, 1, 1], [], []>} : vector<64x64xf32>, vector<64x32xf32>, vector<64x32xf32> -> vector<64x32xf32>
    %560 = arith.addf %484, %559 : vector<64x32xf32>
    %c0_214 = arith.constant 0 : index
    %c0_215 = arith.constant 0 : index
    %561 = vector.load %arg27[%c0_214, %c0_215] : memref<1x32xf32, #tpu.memory_space<vmem>>, vector<1x32xf32>
    %562 = vector.broadcast %561 : vector<1x32xf32> to vector<64x32xf32>
    %563 = arith.addf %560, %562 : vector<64x32xf32>
    %c0_216 = arith.constant 0 : index
    %c0_217 = arith.constant 0 : index
    %564 = vector.load %arg28[%c0_216, %c0_217] : memref<1x32xf32, #tpu.memory_space<vmem>>, vector<1x32xf32>
    %c0_218 = arith.constant 0 : index
    %c0_219 = arith.constant 0 : index
    %565 = vector.load %arg29[%c0_218, %c0_219] : memref<1x32xf32, #tpu.memory_space<vmem>>, vector<1x32xf32>
    %cst_220 = arith.constant dense<0.000000e+00> : vector<64xf32>
    %566 = vector.multi_reduction <add>, %563, %cst_220 [1] : vector<64x32xf32> to vector<64xf32>
    %567 = vector.shape_cast %566 : vector<64xf32> to vector<64x1xf32>
    %cst_221 = arith.constant 3.200000e+01 : f32
    %568 = vector.broadcast %cst_221 : f32 to vector<64x1xf32>
    %569 = arith.divf %567, %568 : vector<64x1xf32>
    %570 = vector.broadcast %569 : vector<64x1xf32> to vector<64x32xf32>
    %571 = arith.subf %563, %570 : vector<64x32xf32>
    %572 = arith.mulf %571, %571 : vector<64x32xf32>
    %cst_222 = arith.constant dense<0.000000e+00> : vector<64xf32>
    %573 = vector.multi_reduction <add>, %572, %cst_222 [1] : vector<64x32xf32> to vector<64xf32>
    %574 = vector.shape_cast %573 : vector<64xf32> to vector<64x1xf32>
    %cst_223 = arith.constant 3.200000e+01 : f32
    %575 = vector.broadcast %cst_223 : f32 to vector<64x1xf32>
    %576 = arith.divf %574, %575 : vector<64x1xf32>
    %577 = vector.broadcast %569 : vector<64x1xf32> to vector<64x32xf32>
    %578 = arith.subf %563, %577 : vector<64x32xf32>
    %cst_224 = arith.constant 9.99999974E-6 : f32
    %579 = vector.broadcast %cst_224 : f32 to vector<64x1xf32>
    %580 = arith.addf %576, %579 : vector<64x1xf32>
    %581 = math.rsqrt %580 : vector<64x1xf32>
    %582 = vector.broadcast %581 : vector<64x1xf32> to vector<64x32xf32>
    %583 = arith.mulf %578, %582 : vector<64x32xf32>
    %584 = vector.broadcast %564 : vector<1x32xf32> to vector<64x32xf32>
    %585 = arith.mulf %583, %584 : vector<64x32xf32>
    %586 = vector.broadcast %565 : vector<1x32xf32> to vector<64x32xf32>
    %587 = arith.addf %585, %586 : vector<64x32xf32>
    %588 = vector.shape_cast %587 : vector<64x32xf32> to vector<2x32x32xf32>
    %cst_225 = arith.constant dense<0.000000e+00> : vector<2x32xf32>
    %589 = vector.multi_reduction <add>, %588, %cst_225 [2] : vector<2x32x32xf32> to vector<2x32xf32>
    %cst_226 = arith.constant 3.200000e+01 : f32
    %590 = vector.broadcast %cst_226 : f32 to vector<2x32xf32>
    %591 = arith.divf %589, %590 : vector<2x32xf32>
    %c0_227 = arith.constant 0 : index
    %c0_228 = arith.constant 0 : index
    %592 = vector.load %arg30[%c0_227, %c0_228] : memref<32x2xf32, #tpu.memory_space<vmem>>, vector<32x2xf32>
    %cst_229 = arith.constant dense<0.000000e+00> : vector<2x2xf32>
    %593 = tpu.matmul %591, %592, %cst_229 {dimension_numbers = #tpu.dot_dimension_numbers<[1], [0], [0], [1], [0, 0, 1, 1], [], []>} : vector<2x32xf32>, vector<32x2xf32>, vector<2x2xf32> -> vector<2x2xf32>
    %c0_230 = arith.constant 0 : index
    %c0_231 = arith.constant 0 : index
    %594 = vector.load %arg31[%c0_230, %c0_231] : memref<1x2xf32, #tpu.memory_space<vmem>>, vector<1x2xf32>
    %595 = vector.broadcast %594 : vector<1x2xf32> to vector<2x2xf32>
    %596 = arith.addf %593, %595 : vector<2x2xf32>
    %cst_232 = arith.constant 0.000000e+00 : f32
    %597 = vector.broadcast %cst_232 : f32 to vector<2x2xf32>
    %598 = arith.maximumf %596, %597 : vector<2x2xf32>
    %c0_233 = arith.constant 0 : index
    %c0_234 = arith.constant 0 : index
    %599 = vector.load %arg32[%c0_233, %c0_234] : memref<2x32xf32, #tpu.memory_space<vmem>>, vector<2x32xf32>
    %cst_235 = arith.constant dense<0.000000e+00> : vector<2x32xf32>
    %600 = tpu.matmul %598, %599, %cst_235 {dimension_numbers = #tpu.dot_dimension_numbers<[1], [0], [0], [1], [0, 0, 1, 1], [], []>} : vector<2x2xf32>, vector<2x32xf32>, vector<2x32xf32> -> vector<2x32xf32>
    %c0_236 = arith.constant 0 : index
    %c0_237 = arith.constant 0 : index
    %601 = vector.load %arg33[%c0_236, %c0_237] : memref<1x32xf32, #tpu.memory_space<vmem>>, vector<1x32xf32>
    %602 = vector.broadcast %601 : vector<1x32xf32> to vector<2x32xf32>
    %603 = arith.addf %600, %602 : vector<2x32xf32>
    %604 = arith.negf %603 : vector<2x32xf32>
    %605 = math.exp %604 : vector<2x32xf32>
    %cst_238 = arith.constant 1.000000e+00 : f32
    %606 = vector.broadcast %cst_238 : f32 to vector<2x32xf32>
    %607 = arith.addf %606, %605 : vector<2x32xf32>
    %608 = arith.divf %606, %607 : vector<2x32xf32>
    %609 = vector.extract_strided_slice %608 {offsets = [0, 0], sizes = [1, 32], strides = [1, 1]} : vector<2x32xf32> to vector<1x32xf32>
    %cst_239 = arith.constant 3.125000e-02 : f32
    %610 = vector.broadcast %cst_239 : f32 to vector<1x32xf32>
    %611 = arith.mulf %609, %610 : vector<1x32xf32>
    %612 = vector.extract_strided_slice %588 {offsets = [0, 0, 0], sizes = [1, 32, 32], strides = [1, 1, 1]} : vector<2x32x32xf32> to vector<1x32x32xf32>
    %613 = vector.shape_cast %612 : vector<1x32x32xf32> to vector<32x32xf32>
    %cst_240 = arith.constant dense<0.000000e+00> : vector<1x32xf32>
    %614 = tpu.matmul %611, %613, %cst_240 {dimension_numbers = #tpu.dot_dimension_numbers<[1], [0], [0], [1], [0, 0, 1, 1], [], []>} : vector<1x32xf32>, vector<32x32xf32>, vector<1x32xf32> -> vector<1x32xf32>
    %615 = vector.extract_strided_slice %608 {offsets = [1, 0], sizes = [1, 32], strides = [1, 1]} : vector<2x32xf32> to vector<1x32xf32>
    %cst_241 = arith.constant 3.125000e-02 : f32
    %616 = vector.broadcast %cst_241 : f32 to vector<1x32xf32>
    %617 = arith.mulf %615, %616 : vector<1x32xf32>
    %618 = vector.extract_strided_slice %588 {offsets = [1, 0, 0], sizes = [1, 32, 32], strides = [1, 1, 1]} : vector<2x32x32xf32> to vector<1x32x32xf32>
    %619 = vector.shape_cast %618 : vector<1x32x32xf32> to vector<32x32xf32>
    %cst_242 = arith.constant dense<0.000000e+00> : vector<1x32xf32>
    %620 = tpu.matmul %617, %619, %cst_242 {dimension_numbers = #tpu.dot_dimension_numbers<[1], [0], [0], [1], [0, 0, 1, 1], [], []>} : vector<1x32xf32>, vector<32x32xf32>, vector<1x32xf32> -> vector<1x32xf32>
    %621 = tpu.concatenate %614, %620 in 0 : vector<1x32xf32>, vector<1x32xf32> -> vector<2x32xf32>
    %c0_243 = arith.constant 0 : index
    %c0_244 = arith.constant 0 : index
    %622 = vector.load %arg34[%c0_243, %c0_244] : memref<32x10xf32, #tpu.memory_space<vmem>>, vector<32x10xf32>
    %cst_245 = arith.constant dense<0.000000e+00> : vector<2x10xf32>
    %623 = tpu.matmul %621, %622, %cst_245 {dimension_numbers = #tpu.dot_dimension_numbers<[1], [0], [0], [1], [0, 0, 1, 1], [], []>} : vector<2x32xf32>, vector<32x10xf32>, vector<2x10xf32> -> vector<2x10xf32>
    %c0_246 = arith.constant 0 : index
    %c0_247 = arith.constant 0 : index
    %624 = vector.load %arg35[%c0_246, %c0_247] : memref<1x10xf32, #tpu.memory_space<vmem>>, vector<1x10xf32>
    %625 = vector.broadcast %624 : vector<1x10xf32> to vector<2x10xf32>
    %626 = arith.addf %623, %625 : vector<2x10xf32>
    %c0_248 = arith.constant 0 : index
    %c0_249 = arith.constant 0 : index
    %627 = vector.load %arg36[%c0_248, %c0_249] : memref<2x10xf32, #tpu.memory_space<vmem>>, vector<2x10xf32>
    tpu.vector_store %arg36[%c0_248, %c0_249], %626 {strides = array<i32>} : memref<2x10xf32, #tpu.memory_space<vmem>>, vector<2x10xf32>,
    return
  }
}

</mosaic_0001>

<bundles_post_ra>
// kernel: tpu_custom_call.1
= control target key start
LH: loop header
LB: loop body
LE: loop exit
PB: predicated region body
PF: predicated region fallthrough
CT: control target
= control target key end

     0   :  { %s7338_s6 = smov 1   ;;  %s7339_s10 = smov 2   ;;  %s10075_s0 = inlined_call_operand.smem [shape: u32[37], index: -1, kind: input, shape index: {}] }
   0x1   :  { %s7397_s5 = sld [smem:[%s10075_s0]]   ;;  %s7340_s14 = smov 3  }
   0x2   :  { %s7402_s9 = sld [smem:[%s10075_s0 + %s7338_s6]]   ;;  %s7341_s18 = smov 4  }
   0x3   :  { %s7407_s13 = sld [smem:[%s10075_s0 + %s7339_s10]]   ;;  %s7342_s22 = smov 5  }
   0x4   :  { %s7412_s17 = sld [smem:[%s10075_s0 + %s7340_s14]]   ;;  %s7343_s26 = smov 6  }
   0x5   :  { %s7417_s21 = sld [smem:[%s10075_s0 + %s7341_s18]]   ;;  %s7344_s30 = smov 7  }
   0x6   :  { %s7422_s25 = sld [smem:[%s10075_s0 + %s7342_s22]]   ;;  %s7345_s4 = smov 8  }
   0x7   :  { %s7427_s29 = sld [smem:[%s10075_s0 + %s7343_s26]]   ;;  %s7346_s10 = smov 9  }
   0x8   :  { %s7432_s3 = sld [smem:[%s10075_s0 + %s7344_s30]]   ;;  %s7347_s15 = smov 10  }
   0x9   :  { %s7437_s8 = sld [smem:[%s10075_s0 + %s7345_s4]]   ;;  %s7348_s20 = smov 11  }
   0xa   :  { %s7442_s14 = sld [smem:[%s10075_s0 + %s7346_s10]]   ;;  %s7349_s26 = smov 12  }
   0xb   :  { %s7447_s19 = sld [smem:[%s10075_s0 + %s7347_s15]]   ;;  %s7350_s1 = smov 13  }
   0xc   :  { %s7452_s24 = sld [smem:[%s10075_s0 + %s7348_s20]]   ;;  %s7351_s7 = smov 14  }
   0xd   :  { %s7457_s30 = sld [smem:[%s10075_s0 + %s7349_s26]]   ;;  %s7352_s15 = smov 15  }
   0xe   :  { %s7462_s6 = sld [smem:[%s10075_s0 + %s7350_s1]]   ;;  %s7353_s22 = smov 16  }
   0xf   :  { %10079 = sst [smem:[#allocation23_spill]] %s7437_s8  ;;  %s7354_s28 = smov 17  }
  0x10   :  { %10080 = sst [smem:[#allocation24_spill]] %s7442_s14 }
  0x11   :  { %10081 = sst [smem:[#allocation25_spill]] %s7447_s19 }
  0x12   :  { %s7467_s12 = sld [smem:[%s10075_s0 + %s7351_s7]]   ;;  %s7355_s7 = smov 18  }
  0x13   :  { %10082 = sst [smem:[#allocation26_spill]] %s7457_s30 }
  0x14   :  { %10083 = sst [smem:[#allocation27_spill]] %s7462_s6 }
  0x15   :  { %s7472_s20 = sld [smem:[%s10075_s0 + %s7352_s15]]   ;;  %s7356_s15 = smov 19  }
  0x16   :  { %s7477_s27 = sld [smem:[%s10075_s0 + %s7353_s22]]   ;;  %s7357_s22 = smov 20  }
  0x17   :  { %s7482_s4 = sld [smem:[%s10075_s0 + %s7354_s28]]   ;;  %s7358_s28 = smov 21  }
  0x18   :  { %10084 = sst [smem:[#allocation28_spill]] %s7467_s12 }
  0x19   :  { %s7487_s12 = sld [smem:[%s10075_s0 + %s7355_s7]]   ;;  %s7359_s7 = smov 22  }
  0x1a   :  { %s7502_s6 = sld [smem:[%s10075_s0 + %s7358_s28]]   ;;  %s7362_s28 = smov 25  }
  0x1b   :  { %10085 = sst [smem:[#allocation29_spill]] %s7472_s20 }
  0x1c   :  { %10086 = sst [smem:[#allocation30_spill]] %s7477_s27 }
  0x1d   :  { %s7492_s20 = sld [smem:[%s10075_s0 + %s7356_s15]]   ;;  %s7360_s15 = smov 23  }
  0x1e   :  { %s7497_s27 = sld [smem:[%s10075_s0 + %s7357_s22]]   ;;  %s7361_s22 = smov 24  }
  0x1f   :  { %s7507_s30 = sld [smem:[%s10075_s0 + %s7359_s7]]   ;;  %s7363_s7 = smov 26  }
  0x20   :  { %10087 = sst [smem:[#allocation31_spill]] %s7502_s6 }
  0x21   :  { %s7512_s19 = sld [smem:[%s10075_s0 + %s7360_s15]]   ;;  %s7364_s15 = smov 27  }
  0x22   :  { %s7517_s14 = sld [smem:[%s10075_s0 + %s7361_s22]]   ;;  %s7365_s22 = smov 28  }
  0x23   :  { %s7522_s6 = sld [smem:[%s10075_s0 + %s7362_s28]]   ;;  %s7366_s28 = smov 29  }
  0x24   :  { %s7537_s8 = sld [smem:[%s10075_s0 + %s7365_s22]]   ;;  %s7369_s22 = smov 32  }
  0x25   :  { %10088 = sst [smem:[#allocation32_spill]] %s7507_s30 }
  0x26   :  { %s7527_s30 = sld [smem:[%s10075_s0 + %s7363_s7]]   ;;  %s7367_s7 = smov 30  }
  0x27   :  { %10089 = sst [smem:[#allocation33_spill]] %s7512_s19 }
  0x28   :  { %s7532_s19 = sld [smem:[%s10075_s0 + %s7364_s15]]   ;;  %s7368_s15 = smov 31  }
  0x29   :  { %10090 = sst [smem:[#allocation34_spill]] %s7522_s6 }
  0x2a   :  { %10093 = sst [smem:[#allocation37_spill]] %s7537_s8 }
  0x2b   :  { %s7542_s6 = sld [smem:[%s10075_s0 + %s7366_s28]]   ;;  %s7370_s28 = smov 33  }
  0x2c   :  { %10091 = sst [smem:[#allocation35_spill]] %s7527_s30 }
  0x2d   :  { %s7547_s30 = sld [smem:[%s10075_s0 + %s7367_s7]]   ;;  %s7371_s7 = smov 34  }
  0x2e   :  { %10092 = sst [smem:[#allocation36_spill]] %s7532_s19 }
  0x2f   :  { %s7552_s19 = sld [smem:[%s10075_s0 + %s7368_s15]]   ;;  %s7372_s15 = smov 35  }
  0x30   :  { %s7557_s8 = sld [smem:[%s10075_s0 + %s7369_s22]]   ;;  %s7373_s22 = smov 36  }
  0x31   :  { %10094 = sst [smem:[#allocation38_spill]] %s7542_s6 }
  0x32   :  { %s7562_s6 = sld [smem:[%s10075_s0 + %s7370_s28]]  }
  0x33   :  { %10095 = sst [smem:[#allocation39_spill]] %s7547_s30 }
  0x34   :  { %s7567_s30 = sld [smem:[%s10075_s0 + %s7371_s7]]  }
  0x35   :  { %10096 = sst [smem:[#allocation40_spill]] %s7552_s19 }
  0x36   :  { %10097 = sst [smem:[#allocation41_spill]] %s7557_s8 }
  0x37   :  { %s7572_s19 = sld [smem:[%s10075_s0 + %s7372_s15]]  }
  0x38   :  { %s7577_s8 = sld [smem:[%s10075_s0 + %s7373_s22]]  }
  0x39   :  { %78 = vsyncpa [#allocation3], 0 }
  0x3a   :  { %79 = vsyncpa [#allocation6], 0 }
  0x3b   :  { %80 = vsyncpa [#allocation9], 0 }
  0x3c   :  { %81 = vsyncpa [#allocation12], 0 }
  0x3d   :  { %82 = vsyncpa [#allocation15], 0  ;;  %s111_s28 = sshll.u32 %s7432_s3, 4  ;;  %s112_s28 = int_to_ptr.hbm [resolvable:$true] %s111_s28 }
  0x3e   :  { %83 = vsyncpa [#allocation4], 0  ;;  %s7374_s1 = smov [#allocation5]   ;;  %s153_s7 = sshll.u32 %s7482_s4, 4  ;;  %s154_s7 = int_to_ptr.hbm [resolvable:$true] %s153_s7 }
  0x3f   :  { %s113_s2 = sshll.u32 %s7374_s1, 4  ;;  %s7110_s10 = sshra.s32 %s112_s28, 4  ;;  %s114_s2 = int_to_ptr.vmem [resolvable:$true] %s113_s2  ;;  %s7111_s10 = int_to_ptr.hbm [resolvable:$true] %s7110_s10 }
  0x40   :  { %s7112_s0 = scalar_lea.hbm %s7111_s10, 32  ;;  %s7114_s11 = scalar_lea.hbm %s7432_s3, 32 }
  0x41   :  { %p7113_p0 = scmp.ne.s32.totalorder %s7111_s10, %s7112_s0  ;;  %p7115_p1 = scmp.lt.s32.totalorder %s7111_s10, %s7432_s3 }
  0x42   :  { %p7116_p2 = scmp.lt.s32.totalorder %s7114_s11, %s7112_s0 }
  0x44   :  { %p7117_p3 = por %p7116_p2, %p7115_p1 }
  0x46   :  { %p7118_p4 = pnand %p7117_p3, %p7113_p0 }
  0x48   :  { %7121 = shalt.err (!%p7118_p4)
}
  0x49   :  { %s7375_s15 = smov 128   ;;  %s7376_s16 = smov 8  }
  0x4a   :  { %119 = dma.hbm_to_vmem [thread:$0]  %s112_s28, 512, %s114_s2, [#allocation6], %s7375_s15, %s7375_s15, %s7376_s16  }
  0x4b   :  { %s7377_s18 = smov [#allocation8]   ;;  %s179_s23 = sshll.u32 %s7492_s20, 4  ;;  %s7587_s23 = int_to_ptr.hbm [resolvable:$true] %s179_s23 }
  0x4c   :  { %s155_s22 = sshll.u32 %s7377_s18, 4  ;;  %s7134_s3 = sshra.s32 %s154_s7, 4  ;;  %s156_s22 = int_to_ptr.vmem [resolvable:$true] %s155_s22  ;;  %s7135_s3 = int_to_ptr.hbm [resolvable:$true] %s7134_s3 }
  0x4d   :  { %s7136_s26 = scalar_lea.hbm %s7135_s3, 32  ;;  %s7138_s1 = scalar_lea.hbm %s7482_s4, 32 }
  0x4e   :  { %p7137_p5 = scmp.ne.s32.totalorder %s7135_s3, %s7136_s26  ;;  %p7139_p6 = scmp.lt.s32.totalorder %s7135_s3, %s7482_s4 }
  0x4f   :  { %p7140_p7 = scmp.lt.s32.totalorder %s7138_s1, %s7136_s26 }
  0x51   :  { %p7141_p8 = por %p7140_p7, %p7139_p6 }
  0x53   :  { %p7142_p9 = pnand %p7141_p8, %p7137_p5 }
  0x55   :  { %7145 = shalt.err (!%p7142_p9)
}
  0x56   :  { %161 = dma.hbm_to_vmem [thread:$0]  %s154_s7, 512, %s156_s22, [#allocation9], %s7375_s15, %s7375_s15, %s7376_s16  }
  0x57   :  { %s93_s28 = sshll.u32 %s7407_s13, 4  ;;  %s7378_s2 = smov [#allocation11]   ;;  %s94_s28 = int_to_ptr.hbm [resolvable:$true] %s93_s28 }
  0x58   :  { %s181_s10 = sshll.u32 %s7378_s2, 4  ;;  %s7158_s0 = sshra.s32 %s7587_s23, 4  ;;  %s182_s10 = int_to_ptr.vmem [resolvable:$true] %s181_s10  ;;  %s7159_s0 = int_to_ptr.hbm [resolvable:$true] %s7158_s0 }
  0x59   :  { %s7160_s4 = scalar_lea.hbm %s7159_s0, 32  ;;  %s7162_s11 = scalar_lea.hbm %s7492_s20, 32 }
  0x5a   :  { %p7161_p10 = scmp.ne.s32.totalorder %s7159_s0, %s7160_s4  ;;  %p7163_p11 = scmp.lt.s32.totalorder %s7159_s0, %s7492_s20 }
  0x5b   :  { %p7164_p12 = scmp.lt.s32.totalorder %s7162_s11, %s7160_s4 }
  0x5d   :  { %p7165_p13 = por %p7164_p12, %p7163_p11 }
  0x5f   :  { %p7166_p0 = pnand %p7165_p13, %p7161_p10 }
  0x61   :  { %7169 = shalt.err (!%p7166_p0)
}
  0x62   :  { %187 = dma.hbm_to_vmem [thread:$0]  %s7587_s23, 512, %s182_s10, [#allocation12], %s7375_s15, %s7375_s15, %s7376_s16  }
  0x63   :  { %s7379_s7 = smov [#allocation2]   ;;  %s130_s22 = sshll.u32 %s7452_s24, 4  ;;  %s7603_s22 = int_to_ptr.hbm [resolvable:$true] %s130_s22 }
  0x64   :  { %s95_s18 = sshll.u32 %s7379_s7, 4  ;;  %s7182_s3 = sshra.s32 %s94_s28, 4  ;;  %s96_s18 = int_to_ptr.vmem [resolvable:$true] %s95_s18  ;;  %s7183_s3 = int_to_ptr.hbm [resolvable:$true] %s7182_s3 }
  0x65   :  { %s7184_s20 = scalar_lea.hbm %s7183_s3, 1  ;;  %s7186_s26 = scalar_lea.hbm %s7407_s13, 1 }
  0x66   :  { %p7185_p1 = scmp.ne.s32.totalorder %s7183_s3, %s7184_s20  ;;  %p7187_p2 = scmp.lt.s32.totalorder %s7183_s3, %s7407_s13 }
  0x67   :  { %p7188_p3 = scmp.lt.s32.totalorder %s7186_s26, %s7184_s20 }
  0x69   :  { %p7189_p4 = por %p7188_p3, %p7187_p2 }
  0x6b   :  { %p7190_p5 = pnand %p7189_p4, %p7185_p1 }
  0x6d   :  { %7193 = shalt.err (!%p7190_p5)
}
  0x6e   :  { %98 = dma.hbm_to_vmem [thread:$0]  %s94_s28, 16, %s96_s18, [#allocation3]  }
  0x6f   :  { %s166_s23 = sshll.u32 %s7487_s12, 4  ;;  %s7380_s1 = smov [#allocation7]   ;;  %s7608_s23 = int_to_ptr.hbm [resolvable:$true] %s166_s23 }
  0x70   :  { %s132_s2 = sshll.u32 %s7380_s1, 4  ;;  %s7206_s10 = sshra.s32 %s7603_s22, 4  ;;  %s133_s2 = int_to_ptr.vmem [resolvable:$true] %s132_s2  ;;  %s7207_s10 = int_to_ptr.hbm [resolvable:$true] %s7206_s10 }
  0x71   :  { %s7208_s0 = scalar_lea.hbm %s7207_s10, 32  ;;  %s7210_s13 = scalar_lea.hbm %s7452_s24, 32 }
  0x72   :  { %p7209_p6 = scmp.ne.s32.totalorder %s7207_s10, %s7208_s0  ;;  %p7211_p7 = scmp.lt.s32.totalorder %s7207_s10, %s7452_s24 }
  0x73   :  { %p7212_p8 = scmp.lt.s32.totalorder %s7210_s13, %s7208_s0 }
  0x75   :  { %p7213_p9 = por %p7212_p8, %p7211_p7 }
  0x77   :  { %p7214_p10 = pnand %p7213_p9, %p7209_p6 }
  0x79   :  { %7217 = shalt.err (!%p7214_p10)
}
  0x7a   :  { %138 = dma.hbm_to_vmem [thread:$0]  %s7603_s22, 512, %s133_s2, [#allocation6], %s7375_s15, %s7375_s15, %s7376_s16  }
  0x7b   :  { %s7381_s28 = smov [#allocation10]   ;;  %s192_s11 = sshll.u32 %s7497_s27, 4  ;;  %s7618_s11 = int_to_ptr.hbm [resolvable:$true] %s192_s11 }
  0x7c   :  { %s168_s4 = sshll.u32 %s7381_s28, 4  ;;  %s7230_s24 = sshra.s32 %s7608_s23, 4  ;;  %s169_s4 = int_to_ptr.vmem [resolvable:$true] %s168_s4  ;;  %s7231_s24 = int_to_ptr.hbm [resolvable:$true] %s7230_s24 }
  0x7d   :  { %s7232_s7 = scalar_lea.hbm %s7231_s24, 32  ;;  %s7234_s18 = scalar_lea.hbm %s7487_s12, 32 }
  0x7e   :  { %p7233_p11 = scmp.ne.s32.totalorder %s7231_s24, %s7232_s7  ;;  %p7235_p12 = scmp.lt.s32.totalorder %s7231_s24, %s7487_s12 }
  0x7f   :  { %p7236_p13 = scmp.lt.s32.totalorder %s7234_s18, %s7232_s7 }
  0x81   :  { %p7237_p0 = por %p7236_p13, %p7235_p12 }
  0x83   :  { %p7238_p1 = pnand %p7237_p0, %p7233_p11 }
  0x85   :  { %7241 = shalt.err (!%p7238_p1)
}
  0x86   :  { %174 = dma.hbm_to_vmem [thread:$0]  %s7608_s23, 512, %s169_s4, [#allocation9], %s7375_s15, %s7375_s15, %s7376_s16  }
  0x87   :  { %s211_s22 = sshll.u32 %s7517_s14, 4  ;;  %s7382_s3 = smov [#allocation13]   ;;  %s7628_s22 = int_to_ptr.hbm [resolvable:$true] %s211_s22 }
  0x88   :  { %s194_s20 = sshll.u32 %s7382_s3, 4  ;;  %s7254_s12 = sshra.s32 %s7618_s11, 4  ;;  %s195_s20 = int_to_ptr.vmem [resolvable:$true] %s194_s20  ;;  %s7255_s12 = int_to_ptr.hbm [resolvable:$true] %s7254_s12 }
  0x89   :  { %s7256_s26 = scalar_lea.hbm %s7255_s12, 32  ;;  %s7258_s1 = scalar_lea.hbm %s7497_s27, 32 }
  0x8a   :  { %p7257_p2 = scmp.ne.s32.totalorder %s7255_s12, %s7256_s26  ;;  %p7259_p3 = scmp.lt.s32.totalorder %s7255_s12, %s7497_s27 }
  0x8b   :  { %p7260_p4 = scmp.lt.s32.totalorder %s7258_s1, %s7256_s26 }
  0x8d   :  { %p7261_p5 = por %p7260_p4, %p7259_p3 }
  0x8f   :  { %p7262_p6 = pnand %p7261_p5, %p7257_p2 }
  0x91   :  { %7265 = shalt.err (!%p7262_p6)
}
  0x92   :  { %200 = dma.hbm_to_vmem [thread:$0]  %s7618_s11, 512, %s195_s20, [#allocation12], %s7375_s15, %s7375_s15, %s7376_s16  }
  0x93   :  { %s7383_s23 = smov [#allocation14]   ;;  %s7278_s10 = sshra.s32 %s7628_s22, 4  ;;  %s7279_s10 = int_to_ptr.hbm [resolvable:$true] %s7278_s10 }
  0x94   :  { %s213_s2 = sshll.u32 %s7383_s23, 4  ;;  %s7280_s0 = scalar_lea.hbm %s7279_s10, 32  ;;  %s214_s2 = int_to_ptr.vmem [resolvable:$true] %s213_s2 }
  0x95   :  { %p7281_p7 = scmp.ne.s32.totalorder %s7279_s10, %s7280_s0  ;;  %s7282_s27 = scalar_lea.hbm %s7517_s14, 32 }
  0x96   :  { %p7283_p8 = scmp.lt.s32.totalorder %s7279_s10, %s7517_s14  ;;  %p7284_p9 = scmp.lt.s32.totalorder %s7282_s27, %s7280_s0 }
  0x98   :  { %p7285_p10 = por %p7284_p9, %p7283_p8 }
  0x9a   :  { %p7286_p11 = pnand %p7285_p10, %p7281_p7 }
  0x9c   :  { %7289 = shalt.err (!%p7286_p11)
}
  0x9d   :  { %219 = dma.hbm_to_vmem [thread:$0]  %s7628_s22, 512, %s214_s2, [#allocation15], %s7375_s15, %s7375_s15, %s7376_s16  }
  0x9e   :  { %7326 = dma.done.wait [#allocation3], 16  }
  0x9f   :  { %7327 = vsyncadd [#allocation3], 4294967280 }
  0xa0   :  { %7328 = dma.done.wait [#allocation6], 1024  }
  0xa1   :  { %7329 = vsyncadd [#allocation6], 4294966272 }
  0xa2   :  { %7330 = dma.done.wait [#allocation9], 1024  }
  0xa3   :  { %7331 = vsyncadd [#allocation9], 4294966272 }
  0xa4   :  { %7332 = dma.done.wait [#allocation12], 1024  }
  0xa5   :  { %7333 = vsyncadd [#allocation12], 4294966272 }
  0xa6   :  { %7334 = dma.done.wait [#allocation15], 512  }
  0xa7   :  { %7335 = vsyncadd [#allocation15], 4294966784  ;;  %v276_v0 = vld [vmem:[%s7397_s5 + $0x10] sm:$0xff]  ;;  %vm296_vm0 = vcmask 261120   ;;  %v274_v2 = vld [vmem:[%s7397_s5] sm:$0xff]  ;;  %v7384_v16 = vmov 32.0  }
  0xa8   :  { %v284_v1 = vld [vmem:[%s7402_s9 + $0x10] sm:$0xff]  ;;  %v282_v4 = vld [vmem:[%s7402_s9] sm:$0xff]  ;;  %v277_v5 = vld [vmem:[%s7397_s5 + $0x18] sm:$0xff]  ;;  %6704 = vrcp.f32 %v7384_v16  ;;  %s10105_s14 = sld [smem:[#allocation26_spill]]  ;;  %s6113_s2 = sshll.u32 %s7577_s8, 4  ;;  %s6114_s2 = int_to_ptr.hbm [resolvable:$true] %s6113_s2 }
  0xa9   :  { %v7647_v3 = vadd.f32 %v284_v1, %v276_v0  ;;  %v285_v6 = vld [vmem:[%s7402_s9 + $0x18] sm:$0xff]  ;;  %v7652_v7 = vadd.f32 %v282_v4, %v274_v2  ;;  %v275_v9 = vld [vmem:[%s7397_s5 + $0x8] sm:$0xff]  ;;  %v280_v44 = vld [vmem:[%s7397_s5 + $0x30] sm:$0xff]  ;;  %s10106_s15 = sld [smem:[#allocation27_spill]]  ;;  %s7318_s0 = scalar_lea.hbm %s7577_s8, 2 }
  0xaa   :  { %v7654_v8 = vadd.f32 %v285_v6, %v277_v5  ;;  %v283_v11 = vld [vmem:[%s7402_s9 + $0x8] sm:$0xff]  ;;  %v278_v46 = vld [vmem:[%s7397_s5 + $0x20] sm:$0xff]  ;;  %v7705_v48 = vadd.f32 %v284_v1, %v280_v44  ;;  %v281_v52 = vld [vmem:[%s7397_s5 + $0x38] sm:$0xff]  ;;  %s7386_s9 = smov 112   ;;  %s10107_s16 = sld [smem:[#allocation28_spill]] }
  0xab   :  { %v303_v10 = vsel %vm296_vm0, %v7647_v3, 0.0  ;;  %v297_v12 = vsel %vm296_vm0, %v7652_v7, 0.0  ;;  %v7664_v14 = vadd.f32 %v283_v11, %v275_v9  ;;  %v279_v31 = vld [vmem:[%s7397_s5 + $0x28] sm:$0xff]  ;;  %v7707_v49 = vadd.f32 %v282_v4, %v278_v46  ;;  %v505_v55 = vld [vmem:[%s7417_s21 + $0x18] sm:$0xff]  ;;  %v504_v57 = vld [vmem:[%s7417_s21 + $0x10] sm:$0xff]  ;;  %s7385_s5 = smov 120  }
  0xac   :  { %304 = vadd.xlane.f32.xlu1 %v303_v10  ;;  %298 = vadd.xlane.f32.xlu0 %v297_v12  ;;  %v306_v13 = vsel %vm296_vm0, %v7654_v8, 0.0  ;;  %v7686_v37 = vadd.f32 %v283_v11, %v279_v31  ;;  %v315_v50 = vsel %vm296_vm0, %v7705_v48, 0.0  ;;  %v7714_v53 = vadd.f32 %v285_v6, %v281_v52  ;;  %v574_v56 = vld [vmem:[%s7422_s25 + $0x18] sm:$0xff]  ;;  %v573_v58 = vld [vmem:[%s7422_s25 + $0x10] sm:$0xff]  ;;  %v503_v59 = vld [vmem:[%s7417_s21 + $0x8] sm:$0xff]  ;;  %s10108_s13 = sld [smem:[#allocation29_spill]] }
  0xad   :  { %v300_v15 = vsel %vm296_vm0, %v7664_v14, 0.0  ;;  %v309_v51 = vsel %vm296_vm0, %v7707_v49, 0.0  ;;  %542 = vmatpush.msra.mxu0 %v505_v55  ;;  %587 = vmatpush.msra.mxu1 %v574_v56  ;;  %v572_v60 = vld [vmem:[%s7422_s25 + $0x8] sm:$0xff]  ;;  %v502_v61 = vld [vmem:[%s7417_s21] sm:$0xff]  ;;  %s10102_s21 = sld [smem:[#allocation23_spill]] }
  0xae   :  { %v6705_v17 = vpop.eup %6704  ;;  %v312_v42 = vsel %vm296_vm0, %v7686_v37, 0.0  ;;  %v318_v54 = vsel %vm296_vm0, %v7714_v53, 0.0  ;;  %6506 = vmatpush.msra.mxu2 %v505_v55  ;;  %6510 = vmatpush.msra.mxu3 %v574_v56  ;;  %v571_v62 = vld [vmem:[%s7422_s25] sm:$0xff]  ;;  %s10103_s25 = sld [smem:[#allocation24_spill]] }
  0xaf   :  { %v322_v18 = vmul.f32 32.0, %v6705_v17  ;;  %vm326_vm1 = vweird.f32 %v6705_v17  ;;  %543 = vmatpush.msra.mxu0 %v504_v57  ;;  %588 = vmatpush.msra.mxu1 %v573_v58  ;;  %s10109_s28 = sld [smem:[#allocation30_spill]] }
  0xb0   :  { %6507 = vmatpush.msra.mxu2 %v504_v57  ;;  %6511 = vmatpush.msra.mxu3 %v573_v58  ;;  %v7770_v57 = vld [vmem:[%s7412_s17] ss:$0 sm:$0xff]  ;;  %s7387_s17 = smov 104   ;;  %s10110_s4 = sld [smem:[#allocation31_spill]] }
  0xb1   :  { %v323_v19 = vsub.f32 1.0, %v322_v18  ;;  %544 = vmatpush.msra.mxu0 %v503_v59  ;;  %589 = vmatpush.msra.mxu1 %v572_v60  ;;  %s10111_s11 = sld [smem:[#allocation32_spill]] }
  0xb2   :  { %6508 = vmatpush.msra.mxu2 %v503_v59  ;;  %6512 = vmatpush.msra.mxu3 %v572_v60  ;;  %s10112_s24 = sld [smem:[#allocation33_spill]] }
  0xb3   :  { %v324_v20 = vmul.f32 %v6705_v17, %v323_v19  ;;  %545 = vmatpush.msra.mxu0 %v502_v61  ;;  %590 = vmatpush.msra.mxu1 %v571_v62  ;;  %s10113_s7 = sld [smem:[#allocation34_spill]] }
  0xb4   :  { %307 = vadd.xlane.f32.xlu1 %v306_v13  ;;  %301 = vadd.xlane.f32.xlu0 %v300_v15  ;;  %s10114_s18 = sld [smem:[#allocation35_spill]] }
  0xb5   :  { %v325_v21 = vadd.f32 %v6705_v17, %v324_v20  ;;  %6509 = vmatpush.msra.mxu2 %v502_v61  ;;  %6513 = vmatpush.msra.mxu3 %v571_v62  ;;  %s10115_s22 = sld [smem:[#allocation36_spill]] }
  0xb6   :  { %s10116_s3 = sld [smem:[#allocation37_spill]] }
  0xb7   :  { %v7668_v22 = vsel %vm326_vm1, %v6705_v17, %v325_v21  ;;  %s10117_s20 = sld [smem:[#allocation38_spill]] }
  0xb8   :  { %s10118_s12 = sld [smem:[#allocation39_spill]] }
  0xb9   :  { %s10119_s26 = sld [smem:[#allocation41_spill]] }
  0xba   :  { %s10120_s1 = sld [smem:[#allocation40_spill]] }
 0x11f   :  { %v305_v23 = vpop.xlane.xlu1 %304  ;;  %v299_v25 = vpop.xlane.xlu0 %298 }
 0x120   :  { %v330_v24 = vmul.f32 %v7668_v22, %v305_v23  ;;  %v328_v26 = vmul.f32 %v7668_v22, %v299_v25 }
 0x122   :  { %v7673_v27 = vsub.f32 %v7647_v3, %v330_v24  ;;  %v7676_v28 = vsub.f32 %v7652_v7, %v328_v26 }
 0x124   :  { %v346_v29 = vmul.f32 %v7673_v27, %v7673_v27  ;;  %v344_v30 = vmul.f32 %v7676_v28, %v7676_v28 }
 0x126   :  { %v358_v32 = vsel %vm296_vm0, %v346_v29, 0.0  ;;  %v352_v34 = vsel %vm296_vm0, %v344_v30, 0.0 }
 0x127   :  { %v308_v33 = vpop.xlane.xlu1 %307  ;;  %359 = vadd.xlane.f32.xlu0 %v358_v32  ;;  %353 = vadd.xlane.f32.xlu2 %v352_v34  ;;  %v302_v36 = vpop.xlane.xlu0 %301 }
 0x128   :  { %v331_v35 = vmul.f32 %v7668_v22, %v308_v33  ;;  %v329_v38 = vmul.f32 %v7668_v22, %v302_v36 }
 0x12a   :  { %v7690_v39 = vsub.f32 %v7654_v8, %v331_v35  ;;  %v7693_v40 = vsub.f32 %v7664_v14, %v329_v38 }
 0x12c   :  { %v347_v41 = vmul.f32 %v7690_v39, %v7690_v39  ;;  %v345_v43 = vmul.f32 %v7693_v40, %v7693_v40 }
 0x12e   :  { %v361_v45 = vsel %vm296_vm0, %v347_v41, 0.0  ;;  %v355_v47 = vsel %vm296_vm0, %v345_v43, 0.0 }
 0x12f   :  { %362 = vadd.xlane.f32.xlu1 %v361_v45  ;;  %313 = vadd.xlane.f32.xlu0 %v312_v42 }
 0x130   :  { %356 = vadd.xlane.f32.xlu2 %v355_v47 }
 0x137   :  { %316 = vadd.xlane.f32.xlu1 %v315_v50  ;;  %v7764_v50 = vld [vmem:[#allocation2] ss:$0 sm:$0xff] }
 0x138   :  { %310 = vadd.xlane.f32.xlu2 %v309_v51 }
 0x140   :  { %319 = vadd.xlane.f32.xlu2 %v318_v54 }
 0x19a   :  { %v360_v63 = vpop.xlane.xlu0 %359  ;;  %v354_v0 = vpop.xlane.xlu2 %353 }
 0x19b   :  { %v378_v1 = vmul.f32 %v360_v63, %v7668_v22  ;;  %v376_v2 = vmul.f32 %v354_v0, %v7668_v22 }
 0x19d   :  { %v7728_v4 = vadd.f32 1e-05, %v378_v1  ;;  %v384_v5 = vadd.f32 1e-05, %v376_v2 }
 0x19f   :  { %6706 = vrsqrt.f32 %v7728_v4  ;;  %vm398_vm3 = vweird.f32 %v384_v5  ;;  %vm418_vm5 = vweird.f32 %v7728_v4 }
 0x1a0   :  { %6708 = vrsqrt.f32 %v384_v5 }
 0x1a2   :  { %v363_v6 = vpop.xlane.xlu1 %362  ;;  %v314_v9 = vpop.xlane.xlu0 %313 }
 0x1a3   :  { %v379_v10 = vmul.f32 %v363_v6, %v7668_v22  ;;  %v357_v11 = vpop.xlane.xlu2 %356  ;;  %v333_v12 = vmul.f32 %v7668_v22, %v314_v9 }
 0x1a4   :  { %v377_v13 = vmul.f32 %v357_v11, %v7668_v22 }
 0x1a5   :  { %v7734_v15 = vpop.eup %6706  ;;  %v7736_v16 = vadd.f32 1e-05, %v379_v10  ;;  %v7739_v17 = vsub.f32 %v7686_v37, %v333_v12 }
 0x1a6   :  { %v6709_v18 = vpop.eup %6708  ;;  %v413_v19 = vmul.f32 %v7734_v15, %v7728_v4  ;;  %v385_v20 = vadd.f32 1e-05, %v377_v13  ;;  %vm419_vm6 = vweird.f32 %v7734_v15 }
 0x1a7   :  { %v393_v21 = vmul.f32 %v6709_v18, %v384_v5  ;;  %6710 = vrsqrt.f32 %v7736_v16  ;;  %v349_v23 = vmul.f32 %v7739_v17, %v7739_v17  ;;  %vm399_vm2 = vweird.f32 %v6709_v18  ;;  %vm7784_vm8 = vmor %vm418_vm5, %vm419_vm6 }
 0x1a8   :  { %6712 = vrsqrt.f32 %v385_v20  ;;  %v414_v25 = vmul.f32 %v7734_v15, %v413_v19  ;;  %vm400_vm4 = vmor %vm398_vm3, %vm399_vm2  ;;  %vm408_vm9 = vweird.f32 %v385_v20  ;;  %vm428_vm11 = vweird.f32 %v7736_v16 }
 0x1a9   :  { %v394_v24 = vmul.f32 %v6709_v18, %v393_v21  ;;  %v367_v29 = vsel %vm296_vm0, %v349_v23, 0.0 }
 0x1aa   :  { %v317_v26 = vpop.xlane.xlu1 %316  ;;  %368 = vadd.xlane.f32.xlu1 %v367_v29  ;;  %v415_v41 = vmul.f32 0.5, %v414_v25 }
 0x1ab   :  { %v395_v30 = vmul.f32 0.5, %v394_v24  ;;  %v334_v31 = vmul.f32 %v7668_v22, %v317_v26  ;;  %v311_v32 = vpop.xlane.xlu2 %310 }
 0x1ac   :  { %v332_v33 = vmul.f32 %v7668_v22, %v311_v32  ;;  %v416_v58 = vsub.f32 1.5, %v415_v41 }
 0x1ad   :  { %v7750_v34 = vpop.eup %6710  ;;  %v396_v35 = vsub.f32 1.5, %v395_v30  ;;  %v7753_v36 = vsub.f32 %v7705_v48, %v334_v31 }
 0x1ae   :  { %v6713_v38 = vpop.eup %6712  ;;  %v7756_v42 = vsub.f32 %v7707_v49, %v332_v33  ;;  %v423_v44 = vmul.f32 %v7750_v34, %v7736_v16  ;;  %v417_v2 = vmul.f32 %v7734_v15, %v416_v58  ;;  %vm429_vm12 = vweird.f32 %v7750_v34 }
 0x1af   :  { %v397_v43 = vmul.f32 %v6709_v18, %v396_v35  ;;  %v403_v45 = vmul.f32 %v6713_v38, %v385_v20  ;;  %v350_v46 = vmul.f32 %v7753_v36, %v7753_v36  ;;  %vm409_vm7 = vweird.f32 %v6713_v38  ;;  %vm430_vm13 = vmor %vm428_vm11, %vm429_vm12 }
 0x1b0   :  { %v348_v47 = vmul.f32 %v7756_v42, %v7756_v42  ;;  %v424_v59 = vmul.f32 %v7750_v34, %v423_v44  ;;  %vm410_vm10 = vmor %vm408_vm9, %vm409_vm7  ;;  %v618_v44 = vld [vmem:[%s7427_s29 + $0x10] sm:$0xff]  ;;  %vm665_vm11 = vcmask 64512  }
 0x1b1   :  { %v404_v51 = vmul.f32 %v6713_v38, %v403_v45  ;;  %v370_v52 = vsel %vm296_vm0, %v350_v46, 0.0  ;;  %v401_v54 = vsel %vm400_vm4, %v6709_v18, %v397_v43  ;;  %v421_v18 = vsel %vm7784_vm8, %v7734_v15, %v417_v2  ;;  %v619_v43 = vld [vmem:[%s7427_s29 + $0x18] sm:$0xff] }
 0x1b2   :  { %371 = vadd.xlane.f32.xlu2 %v370_v52  ;;  %v364_v55 = vsel %vm296_vm0, %v348_v47, 0.0  ;;  %v472_v56 = vmul.f32 %v401_v54, %v7676_v28  ;;  %v425_v4 = vmul.f32 0.5, %v424_v59  ;;  %v474_v21 = vmul.f32 %v421_v18, %v7673_v27  ;;  %632 = vmatpush.msrb.mxu2 %v619_v43  ;;  %v616_v54 = vld [vmem:[%s7427_s29] sm:$0xff] }
 0x1b3   :  { %v405_v60 = vmul.f32 0.5, %v404_v51  ;;  %365 = vadd.xlane.f32.xlu0 %v364_v55  ;;  %v320_v61 = vpop.xlane.xlu2 %319  ;;  %v617_v51 = vld [vmem:[%s7427_s29 + $0x8] sm:$0xff]  ;;  %s10104_s29 = sld [smem:[#allocation25_spill]] }
 0x1b4   :  { %v335_v62 = vmul.f32 %v7668_v22, %v320_v61  ;;  %v483_v63 = vmul.f32 %v7764_v50, %v472_v56  ;;  %v426_v13 = vsub.f32 1.5, %v425_v4  ;;  %633 = vmatpush.msrb.mxu2 %v618_v44 }
 0x1b5   :  { %v406_v0 = vsub.f32 1.5, %v405_v60 }
 0x1b6   :  { %v7778_v28 = vsub.f32 %v7714_v53, %v335_v62  ;;  %v7781_v1 = vadd.f32 %v7770_v57, %v483_v63  ;;  %v427_v23 = vmul.f32 %v7750_v34, %v426_v13  ;;  %634 = vmatpush.msrb.mxu2 %v617_v51 }
 0x1b7   :  { %v407_v6 = vmul.f32 %v6713_v38, %v406_v0 }
 0x1b8   :  { %6163 = vmatmul.msk.f32.vlgmr.msra.gmra.mxu0 %vm296_vm0, %v7781_v1  ;;  %6171 = vmatmul.msk.f32.vlgmr.msra.gmra.mxu1 %vm296_vm0, %v7781_v1  ;;  %v351_v9 = vmul.f32 %v7778_v28, %v7778_v28  ;;  %v431_v15 = vsel %vm430_vm13, %v7750_v34, %v427_v23 }
 0x1b9   :  { %v411_v10 = vsel %vm410_vm10, %v6713_v38, %v407_v6  ;;  %v475_v24 = vmul.f32 %v431_v15, %v7690_v39  ;;  %635 = vmatpush.msrb.mxu2 %v616_v54 }
 0x1ba   :  { %v373_v11 = vsel %vm296_vm0, %v351_v9, 0.0  ;;  %v473_v12 = vmul.f32 %v411_v10, %v7693_v40  ;;  %v485_v40 = vmul.f32 %v7764_v50, %v474_v21 }
 0x1bb   :  { %374 = vadd.xlane.f32.xlu2 %v373_v11  ;;  %v486_v27 = vmul.f32 %v7764_v50, %v475_v24 }
 0x1bc   :  { %v484_v19 = vmul.f32 %v7764_v50, %v473_v12  ;;  %v7814_v16 = vadd.f32 %v7770_v57, %v485_v40 }
 0x1bd   :  { %v7823_v25 = vadd.f32 %v7770_v57, %v486_v27 }
 0x1be   :  { %v7803_v20 = vadd.f32 %v7770_v57, %v484_v19 }
 0x1c0   :  { %6164 = vmatmul.msk.f32.gmra.mxu0 %vm296_vm0, %v7803_v20  ;;  %6172 = vmatmul.msk.f32.gmra.mxu1 %vm296_vm0, %v7803_v20 }
 0x1c8   :  { %6165 = vmatmul.msk.f32.gmra.mxu0 %vm296_vm0, %v7814_v16  ;;  %6173 = vmatmul.msk.f32.gmra.mxu1 %vm296_vm0, %v7814_v16 }
 0x1d0   :  { %6166 = vmatmul.msk.f32.gmra.mxu0 %vm296_vm0, %v7823_v25  ;;  %6174 = vmatmul.msk.f32.gmra.mxu1 %vm296_vm0, %v7823_v25 }
 0x21d   :  { %v369_v26 = vpop.xlane.xlu1 %368 }
 0x21e   :  { %v381_v39 = vmul.f32 %v369_v26, %v7668_v22 }
 0x220   :  { %v389_v29 = vadd.f32 1e-05, %v381_v39 }
 0x222   :  { %6714 = vrsqrt.f32 %v389_v29  ;;  %vm448_vm3 = vweird.f32 %v389_v29 }
 0x225   :  { %v372_v30 = vpop.xlane.xlu2 %371 }
 0x226   :  { %v382_v31 = vmul.f32 %v372_v30, %v7668_v22  ;;  %v366_v32 = vpop.xlane.xlu0 %365 }
 0x227   :  { %v380_v33 = vmul.f32 %v366_v32, %v7668_v22 }
 0x228   :  { %v390_v34 = vadd.f32 1e-05, %v382_v31  ;;  %v7832_v35 = vpop.eup %6714 }
 0x229   :  { %v388_v38 = vadd.f32 1e-05, %v380_v33  ;;  %v443_v41 = vmul.f32 %v7832_v35, %v389_v29  ;;  %vm449_vm4 = vweird.f32 %v7832_v35 }
 0x22a   :  { %6716 = vrsqrt.f32 %v390_v34  ;;  %vm458_vm14 = vweird.f32 %v390_v34  ;;  %vm7847_vm7 = vmor %vm448_vm3, %vm449_vm4 }
 0x22b   :  { %6718 = vrsqrt.f32 %v388_v38  ;;  %v444_v45 = vmul.f32 %v7832_v35, %v443_v41  ;;  %vm438_vm1 = vweird.f32 %v388_v38 }
 0x22d   :  { %v445_v59 = vmul.f32 0.5, %v444_v45 }
 0x22e   :  { %v375_v46 = vpop.xlane.xlu2 %374 }
 0x22f   :  { %v383_v47 = vmul.f32 %v375_v46, %v7668_v22  ;;  %v446_v5 = vsub.f32 1.5, %v445_v59 }
 0x230   :  { %v6717_v52 = vpop.eup %6716 }
 0x231   :  { %v6719_v55 = vpop.eup %6718  ;;  %v453_v56 = vmul.f32 %v6717_v52, %v390_v34  ;;  %v391_v58 = vadd.f32 1e-05, %v383_v47  ;;  %vm459_vm15 = vweird.f32 %v6717_v52  ;;  %v447_v12 = vmul.f32 %v7832_v35, %v446_v5 }
 0x232   :  { %v433_v60 = vmul.f32 %v6719_v55, %v388_v38  ;;  %vm439_vm2 = vweird.f32 %v6719_v55  ;;  %vm460_vm5 = vmor %vm458_vm14, %vm459_vm15 }
 0x233   :  { %v454_v61 = vmul.f32 %v6717_v52, %v453_v56  ;;  %6720 = vrsqrt.f32 %v391_v58  ;;  %vm440_vm6 = vmor %vm438_vm1, %vm439_vm2  ;;  %vm468_vm8 = vweird.f32 %v391_v58  ;;  %v451_v30 = vsel %vm7847_vm7, %v7832_v35, %v447_v12 }
 0x234   :  { %v434_v62 = vmul.f32 %v6719_v55, %v433_v60  ;;  %v477_v33 = vmul.f32 %v451_v30, %v7739_v17 }
 0x235   :  { %v455_v63 = vmul.f32 0.5, %v454_v61  ;;  %v7841_v0 = vpop.f32.mrf.mxu0  ;;  %v7843_v2 = vpop.f32.mrf.mxu1 }
 0x236   :  { %v435_v4 = vmul.f32 0.5, %v434_v62  ;;  %v488_v43 = vmul.f32 %v7764_v50, %v477_v33 }
 0x237   :  { %v456_v6 = vsub.f32 1.5, %v455_v63 }
 0x238   :  { %v436_v9 = vsub.f32 1.5, %v435_v4  ;;  %v499_v45 = vadd.f32 %v7770_v57, %v488_v43 }
 0x239   :  { %v6721_v10 = vpop.eup %6720  ;;  %v457_v11 = vmul.f32 %v6717_v52, %v456_v6 }
 0x23a   :  { %v437_v13 = vmul.f32 %v6719_v55, %v436_v9  ;;  %v463_v18 = vmul.f32 %v6721_v10, %v391_v58  ;;  %vm469_vm9 = vweird.f32 %v6721_v10 }
 0x23b   :  { %v461_v21 = vsel %vm460_vm5, %v6717_v52, %v457_v11  ;;  %vm470_vm10 = vmor %vm468_vm8, %vm469_vm9 }
 0x23c   :  { %v464_v23 = vmul.f32 %v6721_v10, %v463_v18  ;;  %v441_v40 = vsel %vm440_vm6, %v6719_v55, %v437_v13  ;;  %v478_v15 = vmul.f32 %v461_v21, %v7753_v36 }
 0x23d   :  { %v7852_v24 = vpop.f32.mrf.mxu0  ;;  %v7854_v27 = vpop.f32.mrf.mxu1  ;;  %v476_v26 = vmul.f32 %v441_v40, %v7756_v42 }
 0x23e   :  { %v465_v39 = vmul.f32 0.5, %v464_v23  ;;  %818 = vrot.lane.b32.xlu2 %v7854_v27, %s7385_s5  ;;  %v489_v29 = vmul.f32 %v7764_v50, %v478_v15 }
 0x23f   :  { %v487_v36 = vmul.f32 %v7764_v50, %v476_v26 }
 0x240   :  { %v466_v31 = vsub.f32 1.5, %v465_v39  ;;  %v500_v32 = vadd.f32 %v7770_v57, %v489_v29 }
 0x241   :  { %v498_v42 = vadd.f32 %v7770_v57, %v487_v36 }
 0x242   :  { %v467_v34 = vmul.f32 %v6721_v10, %v466_v31  ;;  %6169 = vmatmul.msk.f32.vlgmr.msra.gmra.mxu2 %vm296_vm0, %v500_v32  ;;  %6177 = vmatmul.msk.f32.vlgmr.msra.gmra.mxu3 %vm296_vm0, %v500_v32 }
 0x243   :  { %6167 = vmatmul.msk.f32.gmra.mxu0 %vm296_vm0, %v498_v42  ;;  %6175 = vmatmul.msk.f32.gmra.mxu1 %vm296_vm0, %v498_v42 }
 0x244   :  { %v471_v35 = vsel %vm470_vm10, %v6721_v10, %v467_v34 }
 0x245   :  { %v7871_v38 = vpop.f32.mrf.mxu0  ;;  %v7873_v41 = vpop.f32.mrf.mxu1  ;;  %v479_v44 = vmul.f32 %v471_v35, %v7778_v28 }
 0x246   :  { %812 = vrot.lane.b32.xlu2 %v7871_v38, %s7385_s5  ;;  %820 = vrot.lane.b32.xlu1 %v7873_v41, %s7385_s5 }
 0x247   :  { %v490_v17 = vmul.f32 %v7764_v50, %v479_v44 }
 0x249   :  { %v501_v46 = vadd.f32 %v7770_v57, %v490_v17 }
 0x24b   :  { %6168 = vmatmul.msk.f32.gmra.mxu0 %vm296_vm0, %v499_v45  ;;  %6170 = vmatmul.msk.f32.gmra.mxu2 %vm296_vm0, %v501_v46 }
 0x24c   :  { %6176 = vmatmul.msk.f32.gmra.mxu1 %vm296_vm0, %v499_v45  ;;  %6178 = vmatmul.msk.f32.gmra.mxu3 %vm296_vm0, %v501_v46 }
 0x24d   :  { %v7888_v28 = vpop.f32.mrf.mxu0  ;;  %v7890_v47 = vpop.f32.mrf.mxu1 }
 0x24e   :  { %822 = vrot.lane.b32.xlu0 %v7890_v47, %s7385_s5  ;;  %6187 = vmatpush.xpose.msk.msrb.mxu3 %vm665_vm11, %v7890_v47 }
 0x24f   :  { %814 = vrot.lane.b32.xlu2 %v7888_v28, %s7385_s5  ;;  %808 = vrot.lane.b32.xlu1 %v7841_v0, %s7385_s5 }
 0x252   :  { %6188 = vmatpush.xpose.msk.msrb.mxu3 %vm665_vm11, %v7873_v41 }
 0x253   :  { %6179 = vmatmul.msk.f32.vlgmr.msrb.gmra.mxu2 %vm296_vm0, %v7781_v1 }
 0x256   :  { %816 = vrot.lane.b32.xlu0 %v7843_v2, %s7385_s5  ;;  %6189 = vmatpush.xpose.msk.msrb.mxu3 %vm665_vm11, %v7854_v27 }
 0x257   :  { %1056 = vrot.lane.b32.xlu2 %v7841_v0, %s7386_s9  ;;  %1070 = vrot.lane.b32.xlu1 %v7890_v47, %s7386_s9 }
 0x25a   :  { %6190 = vmatpush.xpose.msk.msrb.mxu3 %vm665_vm11, %v7843_v2 }
 0x25b   :  { %6180 = vmatmul.msk.f32.gmra.mxu2 %vm296_vm0, %v7803_v20 }
 0x25d   :  { %6191 = vmatmul.msk.f32.vlgmr.msrb.gmra.mxu3 %vm665_vm11, %v7841_v0 }
 0x25e   :  { %810 = vrot.lane.b32.xlu0 %v7852_v24, %s7385_s5 }
 0x25f   :  { %1062 = vrot.lane.b32.xlu2 %v7888_v28, %s7386_s9  ;;  %1066 = vrot.lane.b32.xlu1 %v7854_v27, %s7386_s9 }
 0x263   :  { %6181 = vmatmul.msk.f32.gmra.mxu2 %vm296_vm0, %v7814_v16 }
 0x265   :  { %6192 = vmatmul.msk.f32.gmra.mxu3 %vm665_vm11, %v7852_v24 }
 0x266   :  { %1068 = vrot.lane.b32.xlu0 %v7873_v41, %s7386_s9 }
 0x267   :  { %1058 = vrot.lane.b32.xlu1 %v7852_v24, %s7386_s9 }
 0x26b   :  { %6182 = vmatmul.msk.f32.gmra.mxu2 %vm296_vm0, %v7823_v25 }
 0x26d   :  { %6193 = vmatmul.msk.f32.gmra.mxu3 %vm665_vm11, %v7871_v38 }
 0x26e   :  { %1064 = vrot.lane.b32.xlu0 %v7843_v2, %s7386_s9 }
 0x273   :  { %6183 = vmatmul.msk.f32.gmra.mxu2 %vm296_vm0, %v498_v42 }
 0x275   :  { %6194 = vmatmul.msk.f32.gmra.mxu3 %vm665_vm11, %v7888_v28 }
 0x276   :  { %1060 = vrot.lane.b32.xlu0 %v7871_v38, %s7386_s9 }
 0x27b   :  { %6184 = vmatmul.msk.f32.gmra.mxu2 %vm296_vm0, %v499_v45 }
 0x283   :  { %6185 = vmatmul.msk.f32.gmra.mxu2 %vm296_vm0, %v500_v32 }
 0x28b   :  { %6186 = vmatmul.msk.f32.gmra.mxu2 %vm296_vm0, %v501_v46 }
 0x298   :  { %v819_v16 = vpop.permute.xlu2 %818 }
 0x2a0   :  { %v813_v58 = vpop.permute.xlu2 %812 }
 0x2a9   :  { %v815_v62 = vpop.permute.xlu2 %814 }
 0x2b1   :  { %v1057_v4 = vpop.permute.xlu2 %1056 }
 0x2b8   :  { %v821_v50 = vpop.permute.xlu1 %820 }
 0x2b9   :  { %v1063_v10 = vpop.permute.xlu2 %1062 }
 0x2c0   :  { %v823_v57 = vpop.permute.xlu0 %822  ;;  %v7972_v11 = vpop.f32.mrf.mxu0 }
 0x2c1   :  { %6199 = vmatpush.xpose.msk.msrb.mxu0 %vm665_vm11, %v823_v57  ;;  %v809_v1 = vpop.permute.xlu1 %808 }
 0x2c5   :  { %v7947_v20 = vpop.f32.mrf.mxu2  ;;  %6200 = vmatpush.xpose.msk.msrb.mxu0 %vm665_vm11, %v821_v50 }
 0x2c8   :  { %v817_v25 = vpop.permute.xlu0 %816  ;;  %v7974_v12 = vpop.f32.mrf.mxu0 }
 0x2c9   :  { %6201 = vmatpush.xpose.msk.msrb.mxu0 %vm665_vm11, %v819_v16  ;;  %v1071_v51 = vpop.permute.xlu1 %1070 }
 0x2cd   :  { %6202 = vmatpush.xpose.msk.msrb.mxu0 %vm665_vm11, %v817_v25 }
 0x2ce   :  { %v7952_v52 = vpop.f32.mrf.mxu2 }
 0x2d0   :  { %6203 = vmatmul.msk.f32.vlgmr.msrb.gmra.mxu0 %vm665_vm11, %v809_v1  ;;  %v811_v54 = vpop.permute.xlu0 %810 }
 0x2d1   :  { %6219 = vmatpush.xpose.msk.msra.mxu0 %vm665_vm11, %v1071_v51  ;;  %v1067_v59 = vpop.permute.xlu1 %1066 }
 0x2d6   :  { %v7956_v55 = vpop.f32.mrf.mxu2 }
 0x2d8   :  { %6204 = vmatmul.msk.f32.gmra.mxu0 %vm665_vm11, %v811_v54  ;;  %v1069_v56 = vpop.permute.xlu0 %1068 }
 0x2d9   :  { %6220 = vmatpush.xpose.msk.msra.mxu0 %vm665_vm11, %v1069_v56  ;;  %v1059_v6 = vpop.permute.xlu1 %1058 }
 0x2dd   :  { %6221 = vmatpush.xpose.msk.msra.mxu0 %vm665_vm11, %v1067_v59 }
 0x2de   :  { %v7960_v60 = vpop.f32.mrf.mxu2 }
 0x2e0   :  { %6205 = vmatmul.msk.f32.gmra.mxu0 %vm665_vm11, %v813_v58  ;;  %v1065_v61 = vpop.permute.xlu0 %1064 }
 0x2e1   :  { %6222 = vmatpush.xpose.msk.msra.mxu0 %vm665_vm11, %v1065_v61 }
 0x2e6   :  { %v643_v63 = vpop.f32.mrf.mxu2 }
 0x2e8   :  { %6206 = vmatmul.msk.f32.gmra.mxu0 %vm665_vm11, %v815_v62  ;;  %v1061_v9 = vpop.permute.xlu0 %1060 }
 0x2ee   :  { %v646_v5 = vpop.f32.mrf.mxu2 }
 0x2ef   :  { %791 = vmatpush.msra.mxu3 %v646_v5  ;;  %v7993_v57 = vpack.i.bf16 %v643_v63, %v646_v5 }
 0x2f0   :  { %6223 = vmatmul.msk.f32.vlgmr.msra.gmra.mxu0 %vm665_vm11, %v1057_v4 }
 0x2f1   :  { %792 = vmatpush.msra.mxu3 %v643_v63 }
 0x2f3   :  { %793 = vmatpush.msra.mxu3 %v7960_v60 }
 0x2f5   :  { %794 = vmatpush.msra.mxu3 %v7956_v55 }
 0x2f8   :  { %6224 = vmatmul.msk.f32.gmra.mxu0 %vm665_vm11, %v1059_v6 }
 0x300   :  { %6225 = vmatmul.msk.f32.gmra.mxu0 %vm665_vm11, %v1061_v9 }
 0x308   :  { %6226 = vmatmul.msk.f32.gmra.mxu0 %vm665_vm11, %v1063_v10 }
 0x34d   :  { %v857_v13 = vpop.f32.mrf.mxu0 }
 0x34e   :  { %v869_v18 = vmul.f32 0.35355338, %v857_v13 }
 0x350   :  { %v873_v19 = vsel %vm296_vm0, %v869_v18, -inf }
 0x351   :  { %874 = vmax.xlane.f32.xlu1 %v873_v19  ;;  %v8009_v19 = vpop.f32.mrf.mxu3 }
 0x355   :  { %v860_v21 = vpop.f32.mrf.mxu0 }
 0x356   :  { %v870_v23 = vmul.f32 0.35355338, %v860_v21  ;;  %v8013_v21 = vpack.i.bf16 %v7956_v55, %v7960_v60 }
 0x358   :  { %v876_v40 = vsel %vm296_vm0, %v870_v23, -inf }
 0x359   :  { %877 = vmax.xlane.f32.xlu0 %v876_v40 }
 0x35d   :  { %v863_v15 = vpop.f32.mrf.mxu0 }
 0x35e   :  { %v871_v26 = vmul.f32 0.35355338, %v863_v15 }
 0x360   :  { %v879_v39 = vsel %vm296_vm0, %v871_v26, -inf }
 0x361   :  { %880 = vmax.xlane.f32.xlu2 %v879_v39 }
 0x365   :  { %v866_v29 = vpop.f32.mrf.mxu0 }
 0x366   :  { %v872_v30 = vmul.f32 0.35355338, %v866_v29 }
 0x368   :  { %v882_v36 = vsel %vm296_vm0, %v872_v30, -inf }
 0x369   :  { %883 = vmax.xlane.f32.xlu1 %v882_v36 }
 0x36d   :  { %v1105_v31 = vpop.f32.mrf.mxu0 }
 0x36e   :  { %v7980_v32 = vmul.f32 0.35355338, %v1105_v31 }
 0x370   :  { %v1121_v42 = vsel %vm296_vm0, %v7980_v32, -inf }
 0x371   :  { %1122 = vmax.xlane.f32.xlu0 %v1121_v42 }
 0x375   :  { %v1108_v33 = vpop.f32.mrf.mxu0 }
 0x376   :  { %v7984_v34 = vmul.f32 0.35355338, %v1108_v33 }
 0x378   :  { %v1124_v35 = vsel %vm296_vm0, %v7984_v34, -inf }
 0x379   :  { %1125 = vmax.xlane.f32.xlu2 %v1124_v35 }
 0x37d   :  { %v1111_v43 = vpop.f32.mrf.mxu0 }
 0x37e   :  { %v1119_v44 = vmul.f32 0.35355338, %v1111_v43 }
 0x380   :  { %v1127_v17 = vsel %vm296_vm0, %v1119_v44, -inf }
 0x381   :  { %1128 = vmax.xlane.f32.xlu1 %v1127_v17 }
 0x385   :  { %v1114_v45 = vpop.f32.mrf.mxu0 }
 0x386   :  { %v7989_v46 = vmul.f32 0.35355338, %v1114_v45 }
 0x388   :  { %v1130_v50 = vsel %vm296_vm0, %v7989_v46, -inf }
 0x389   :  { %1131 = vmax.xlane.f32.xlu1 %v1130_v50 }
 0x391   :  { %6566 = vrot.lane.b32.xlu2 %v7993_v57, %s7385_s5 }
 0x3c4   :  { %v875_v1 = vpop.xlane.xlu1 %874 }
 0x3c5   :  { %v885_v16 = vsub.f32 %v869_v18, %v875_v1 }
 0x3c7   :  { %v889_v25 = vmul.f32 1.442695, %v885_v16 }
 0x3c9   :  { %6722 = vpow2.f32 %v889_v25 }
 0x3cc   :  { %v878_v51 = vpop.xlane.xlu0 %877 }
 0x3cd   :  { %v886_v54 = vsub.f32 %v870_v23, %v878_v51 }
 0x3cf   :  { %v7997_v56 = vpop.eup %6722  ;;  %v891_v58 = vmul.f32 1.442695, %v886_v54 }
 0x3d0   :  { %v897_v59 = vsel %vm296_vm0, %v7997_v56, 0.0 }
 0x3d1   :  { %6724 = vpow2.f32 %v891_v58  ;;  %898 = vadd.xlane.f32.xlu0 %v897_v59 }
 0x3d4   :  { %v881_v61 = vpop.xlane.xlu2 %880 }
 0x3d5   :  { %v887_v62 = vsub.f32 %v871_v26, %v881_v61  ;;  %v8021_v26 = vpop.f32.mrf.mxu3 }
 0x3d7   :  { %v8001_v63 = vpop.eup %6724  ;;  %v893_v5 = vmul.f32 1.442695, %v887_v62 }
 0x3d8   :  { %v900_v4 = vsel %vm296_vm0, %v8001_v63, 0.0 }
 0x3d9   :  { %6726 = vpow2.f32 %v893_v5  ;;  %901 = vadd.xlane.f32.xlu1 %v900_v4 }
 0x3dc   :  { %v884_v6 = vpop.xlane.xlu1 %883 }
 0x3dd   :  { %v888_v9 = vsub.f32 %v872_v30, %v884_v6  ;;  %v707_v30 = vpop.f32.mrf.mxu3 }
 0x3de   :  { %v8032_v50 = vmul.f32 0.35355338, %v707_v30 }
 0x3df   :  { %v8005_v10 = vpop.eup %6726  ;;  %v895_v13 = vmul.f32 1.442695, %v888_v9 }
 0x3e0   :  { %v903_v18 = vsel %vm296_vm0, %v8005_v10, 0.0 }
 0x3e1   :  { %6728 = vpow2.f32 %v895_v13  ;;  %904 = vadd.xlane.f32.xlu1 %v903_v18 }
 0x3e4   :  { %v1123_v60 = vpop.xlane.xlu0 %1122 }
 0x3e5   :  { %6571 = vrot.lane.b32.xlu0 %v8013_v21, %s7385_s5  ;;  %v1133_v33 = vsub.f32 %v7980_v32, %v1123_v60  ;;  %v710_v43 = vpop.f32.mrf.mxu3  ;;  %v723_v32 = vsel %vm296_vm0, %v8032_v50, -inf }
 0x3e6   :  { %v8049_v62 = vmul.f32 0.35355338, %v710_v43 }
 0x3e7   :  { %v8017_v23 = vpop.eup %6728  ;;  %v1137_v45 = vmul.f32 1.442695, %v1133_v33 }
 0x3e8   :  { %v906_v40 = vsel %vm296_vm0, %v8017_v23, 0.0  ;;  %v726_v6 = vsel %vm296_vm0, %v8049_v62, -inf }
 0x3e9   :  { %907 = vadd.xlane.f32.xlu2 %v906_v40 }
 0x3ec   :  { %v1126_v15 = vpop.xlane.xlu2 %1125 }
 0x3ed   :  { %v713_v16 = vpop.f32.mrf.mxu3  ;;  %v1134_v5 = vsub.f32 %v7984_v34, %v1126_v15 }
 0x3ee   :  { %v8039_v54 = vmul.f32 0.35355338, %v713_v16 }
 0x3ef   :  { %v1139_v4 = vmul.f32 1.442695, %v1134_v5 }
 0x3f0   :  { %v729_v59 = vsel %vm296_vm0, %v8039_v54, -inf }
 0x3f4   :  { %v6567_v39 = vpop.permute.xlu2 %6566  ;;  %v1129_v29 = vpop.xlane.xlu1 %1128 }
 0x3f5   :  { %v1135_v36 = vsub.f32 %v1119_v44, %v1129_v29  ;;  %v6568_v31 = vunpack.i.l.bf16 %v6567_v39  ;;  %v6569_v55 = vunpack.i.h.bf16 %v6567_v39  ;;  %v716_v9 = vpop.f32.mrf.mxu3 }
 0x3f6   :  { %v8054_v13 = vmul.f32 0.35355338, %v716_v9 }
 0x3f7   :  { %v1141_v42 = vmul.f32 1.442695, %v1135_v36  ;;  %957 = vmatpush.msrb.mxu1 %v6568_v31 }
 0x3f8   :  { %v732_v18 = vsel %vm296_vm0, %v8054_v13, -inf }
 0x3f9   :  { %6730 = vpow2.f32 %v1141_v42  ;;  %958 = vmatpush.msrb.mxu1 %v6569_v55 }
 0x3fa   :  { %6576 = vrot.lane.b32.xlu1 %v7993_v57, %s7386_s9  ;;  %6732 = vpow2.f32 %v1137_v45 }
 0x3fc   :  { %v1132_v44 = vpop.xlane.xlu1 %1131 }
 0x3fd   :  { %v1136_v1 = vsub.f32 %v7989_v46, %v1132_v44 }
 0x3ff   :  { %v8026_v35 = vpop.eup %6730  ;;  %v1143_v25 = vmul.f32 1.442695, %v1136_v1 }
 0x400   :  { %v1151_v17 = vsel %vm296_vm0, %v8026_v35, 0.0  ;;  %v8037_v51 = vpop.eup %6732 }
 0x401   :  { %1152 = vadd.xlane.f32.xlu2 %v1151_v17  ;;  %6734 = vpow2.f32 %v1143_v25  ;;  %v1145_v58 = vsel %vm296_vm0, %v8037_v51, 0.0 }
 0x402   :  { %6581 = vrot.lane.b32.xlu1 %v8013_v21, %s7386_s9  ;;  %6736 = vpow2.f32 %v1139_v4 }
 0x407   :  { %v8045_v46 = vpop.eup %6734 }
 0x408   :  { %v1154_v61 = vsel %vm296_vm0, %v8045_v46, 0.0  ;;  %v8058_v40 = vpop.eup %6736 }
 0x409   :  { %724 = vmax.xlane.f32.xlu2 %v723_v32  ;;  %v1148_v39 = vsel %vm296_vm0, %v8058_v40, 0.0 }
 0x40f   :  { %1146 = vadd.xlane.f32.xlu0 %v1145_v58 }
 0x411   :  { %730 = vmax.xlane.f32.xlu2 %v729_v59 }
 0x417   :  { %1155 = vadd.xlane.f32.xlu0 %v1154_v61 }
 0x41f   :  { %727 = vmax.xlane.f32.xlu0 %v726_v6 }
 0x427   :  { %733 = vmax.xlane.f32.xlu0 %v732_v18 }
 0x42c   :  { %1149 = vadd.xlane.f32.xlu1 %v1148_v39 }
 0x444   :  { %v899_v34 = vpop.xlane.xlu0 %898 }
 0x445   :  { %1277 = vrot.lane.b32.xlu1 %v7890_v47, %s7387_s17  ;;  %6738 = vrcp.f32 %v899_v34 }
 0x44b   :  { %v6739_v30 = vpop.eup %6738 }
 0x44c   :  { %v902_v15 = vpop.xlane.xlu1 %901  ;;  %v913_v42 = vmul.f32 %v6739_v30, %v7997_v56 }
 0x44d   :  { %1271 = vrot.lane.b32.xlu1 %v7843_v2, %s7387_s17  ;;  %6740 = vrcp.f32 %v902_v15 }
 0x453   :  { %v6741_v55 = vpop.eup %6740 }
 0x454   :  { %v905_v47 = vpop.xlane.xlu1 %904  ;;  %v914_v2 = vmul.f32 %v6741_v55, %v8001_v63 }
 0x455   :  { %1267 = vrot.lane.b32.xlu1 %v7871_v38, %s7387_s17  ;;  %6742 = vrcp.f32 %v905_v47 }
 0x457   :  { %v6572_v29 = vpop.permute.xlu0 %6571 }
 0x458   :  { %v6573_v36 = vunpack.i.l.bf16 %v6572_v29  ;;  %v6574_v31 = vunpack.i.h.bf16 %v6572_v29 }
 0x45a   :  { %959 = vmatpush.msrb.mxu1 %v6573_v36 }
 0x45b   :  { %v6743_v38 = vpop.eup %6742 }
 0x45c   :  { %960 = vmatpush.msrb.mxu1 %v6574_v31  ;;  %v908_v60 = vpop.xlane.xlu2 %907  ;;  %v915_v33 = vmul.f32 %v6743_v38, %v8005_v10 }
 0x45d   :  { %6207 = vmatmul.msk.f32.vlgmr.msrb.gmra.mxu1 %vm296_vm0, %v913_v42  ;;  %6744 = vrcp.f32 %v908_v60  ;;  %v662_v60 = vld [vmem:[#allocation5 + $0x8] sm:$0xff] }
 0x45e   :  { %1001 = vmatpush.msra.mxu2 %v662_v60 }
 0x463   :  { %v6745_v45 = vpop.eup %6744 }
 0x464   :  { %v916_v44 = vmul.f32 %v6745_v45, %v8017_v23 }
 0x465   :  { %6208 = vmatmul.msk.f32.gmra.mxu1 %vm296_vm0, %v914_v2 }
 0x46c   :  { %v6577_v43 = vpop.permute.xlu1 %6576 }
 0x46d   :  { %v6578_v17 = vunpack.i.l.bf16 %v6577_v43  ;;  %6209 = vmatmul.msk.f32.gmra.mxu1 %vm296_vm0, %v915_v33  ;;  %v6579_v56 = vunpack.i.h.bf16 %v6577_v43 }
 0x46f   :  { %1201 = vmatpush.msra.mxu1 %v6578_v17 }
 0x471   :  { %1202 = vmatpush.msra.mxu1 %v6579_v56 }
 0x474   :  { %v1153_v1 = vpop.xlane.xlu2 %1152  ;;  %v6582_v32 = vpop.permute.xlu1 %6581 }
 0x475   :  { %v6583_v63 = vunpack.i.l.bf16 %v6582_v32  ;;  %6210 = vmatmul.msk.f32.gmra.mxu1 %vm296_vm0, %v916_v44  ;;  %v6584_v16 = vunpack.i.h.bf16 %v6582_v32 }
 0x477   :  { %1203 = vmatpush.msra.mxu1 %v6583_v63 }
 0x479   :  { %1204 = vmatpush.msra.mxu1 %v6584_v16 }
 0x47c   :  { %v725_v25 = vpop.xlane.xlu2 %724 }
 0x47d   :  { %v735_v10 = vsub.f32 %v8032_v50, %v725_v25 }
 0x47f   :  { %v739_v58 = vmul.f32 1.442695, %v735_v10 }
 0x481   :  { %6746 = vpow2.f32 %v739_v58 }
 0x482   :  { %v1147_v59 = vpop.xlane.xlu0 %1146 }
 0x483   :  { %6748 = vrcp.f32 %v1147_v59 }
 0x484   :  { %v731_v61 = vpop.xlane.xlu2 %730 }
 0x485   :  { %v737_v5 = vsub.f32 %v8039_v54, %v731_v61 }
 0x487   :  { %v8078_v4 = vpop.eup %6746  ;;  %v743_v23 = vmul.f32 1.442695, %v737_v5 }
 0x488   :  { %v747_v6 = vsel %vm296_vm0, %v8078_v4, 0.0 }
 0x489   :  { %v6749_v9 = vpop.eup %6748  ;;  %6750 = vpow2.f32 %v743_v23  ;;  %748 = vadd.xlane.f32.xlu2 %v747_v6 }
 0x48a   :  { %v1161_v18 = vmul.f32 %v6749_v9, %v8037_v51  ;;  %v1156_v39 = vpop.xlane.xlu0 %1155 }
 0x48c   :  { %6227 = vmatmul.msk.f32.vlgmr.msra.gmra.mxu1 %vm296_vm0, %v1161_v18 }
 0x48f   :  { %v8084_v50 = vpop.eup %6750 }
 0x490   :  { %v753_v34 = vsel %vm296_vm0, %v8084_v50, 0.0 }
 0x491   :  { %754 = vadd.xlane.f32.xlu2 %v753_v34  ;;  %v8155_v34 = vpop.f32.mrf.mxu2 }
 0x492   :  { %v728_v54 = vpop.xlane.xlu0 %727 }
 0x493   :  { %v736_v15 = vsub.f32 %v8049_v62, %v728_v54 }
 0x495   :  { %v741_v29 = vmul.f32 1.442695, %v736_v15 }
 0x497   :  { %6752 = vpow2.f32 %v741_v29 }
 0x499   :  { %v8159_v54 = vpop.f32.mrf.mxu2 }
 0x49a   :  { %v734_v30 = vpop.xlane.xlu0 %733 }
 0x49b   :  { %v738_v36 = vsub.f32 %v8054_v13, %v734_v30 }
 0x49d   :  { %v8090_v31 = vpop.eup %6752  ;;  %v745_v51 = vmul.f32 1.442695, %v738_v36 }
 0x49e   :  { %v750_v42 = vsel %vm296_vm0, %v8090_v31, 0.0 }
 0x49f   :  { %6754 = vpow2.f32 %v745_v51  ;;  %v1150_v47 = vpop.xlane.xlu1 %1149  ;;  %751 = vadd.xlane.f32.xlu0 %v750_v42 }
 0x4a0   :  { %6756 = vrcp.f32 %v1150_v47 }
 0x4a1   :  { %6758 = vrcp.f32 %v1153_v1  ;;  %v8161_v15 = vpop.f32.mrf.mxu2 }
 0x4a2   :  { %6760 = vrcp.f32 %v1156_v39 }
 0x4a5   :  { %v8094_v55 = vpop.eup %6754 }
 0x4a6   :  { %v6757_v2 = vpop.eup %6756  ;;  %v756_v62 = vsel %vm296_vm0, %v8094_v55, 0.0 }
 0x4a7   :  { %757 = vadd.xlane.f32.xlu0 %v756_v62  ;;  %v1162_v13 = vmul.f32 %v6757_v2, %v8058_v40  ;;  %v6759_v38 = vpop.eup %6758  ;;  %v663_v40 = vld [vmem:[#allocation5 + $0x10] sm:$0xff] }
 0x4a8   :  { %v1163_v33 = vmul.f32 %v6759_v38, %v8026_v35  ;;  %v6761_v43 = vpop.eup %6760  ;;  %1245 = vmatpush.msrb.mxu2 %v663_v40 }
 0x4a9   :  { %1275 = vrot.lane.b32.xlu2 %v7873_v41, %s7387_s17  ;;  %6228 = vmatmul.msk.f32.gmra.mxu1 %vm296_vm0, %v1162_v13  ;;  %v1164_v17 = vmul.f32 %v6761_v43, %v8045_v46  ;;  %v8112_v41 = vpop.f32.mrf.mxu1  ;;  %v8163_v29 = vpop.f32.mrf.mxu2 }
 0x4b1   :  { %1265 = vrot.lane.b32.xlu2 %v7852_v24, %s7387_s17  ;;  %6229 = vmatmul.msk.f32.gmra.mxu1 %vm296_vm0, %v1163_v33  ;;  %v8116_v24 = vpop.f32.mrf.mxu1 }
 0x4b7   :  { %v1278_v32 = vpop.permute.xlu1 %1277 }
 0x4b9   :  { %6230 = vmatmul.msk.f32.gmra.mxu1 %vm296_vm0, %v1164_v17 }
 0x4bb   :  { %1273 = vrot.lane.b32.xlu0 %v7854_v27, %s7387_s17 }
 0x4bf   :  { %v1272_v39 = vpop.permute.xlu1 %1271 }
 0x4c3   :  { %1263 = vrot.lane.b32.xlu0 %v7841_v0, %s7387_s17  ;;  %v8126_v0 = vld [vmem:[#allocation5] sm:$0xff] }
 0x4c4   :  { %1042 = vmatpush.msrb.mxu3 %v8126_v0 }
 0x4cb   :  { %1269 = vrot.lane.b32.xlu0 %v7888_v28, %s7387_s17 }
 0x4da   :  { %v962_v35 = vpop.f32.mrf.mxu1 }
 0x4db   :  { %6211 = vmatmul.msk.f32.vlgmr.msra.gmra.mxu2 %vm665_vm11, %v962_v35 }
 0x4dc   :  { %6251 = vmatpush.xpose.msk.msra.mxu2 %vm665_vm11, %v8021_v26 }
 0x4e0   :  { %6252 = vmatpush.xpose.msk.msra.mxu2 %vm665_vm11, %v8009_v19 }
 0x4e2   :  { %v965_v27 = vpop.f32.mrf.mxu1 }
 0x4e3   :  { %6212 = vmatmul.msk.f32.gmra.mxu2 %vm665_vm11, %v965_v27  ;;  %v1268_v27 = vpop.permute.xlu1 %1267 }
 0x4e4   :  { %6253 = vmatpush.xpose.msk.msra.mxu2 %vm665_vm11, %v8116_v24 }
 0x4e8   :  { %6254 = vmatpush.xpose.msk.msra.mxu2 %vm665_vm11, %v8112_v41 }
 0x4ea   :  { %v968_v28 = vpop.f32.mrf.mxu1 }
 0x4eb   :  { %6213 = vmatmul.msk.f32.gmra.mxu2 %vm665_vm11, %v968_v28 }
 0x4f2   :  { %v971_v46 = vpop.f32.mrf.mxu1 }
 0x4f3   :  { %6214 = vmatmul.msk.f32.gmra.mxu2 %vm665_vm11, %v971_v46 }
 0x4fc   :  { %v749_v56 = vpop.xlane.xlu2 %748 }
 0x4fd   :  { %6762 = vrcp.f32 %v749_v56 }
 0x503   :  { %v6763_v45 = vpop.eup %6762 }
 0x504   :  { %v763_v44 = vmul.f32 %v6763_v45, %v8078_v4  ;;  %v755_v1 = vpop.xlane.xlu2 %754 }
 0x506   :  { %6195 = vmatmul.msk.f32.vlgmr.msra.gmra.mxu3 %vm296_vm0, %v763_v44 }
 0x507   :  { %6235 = vmatpush.xpose.msk.msra.mxu3 %vm665_vm11, %v1278_v32 }
 0x509   :  { %v1206_v63 = vpop.f32.mrf.mxu1 }
 0x50a   :  { %6231 = vmatmul.msk.f32.vlgmr.msrb.gmra.mxu2 %vm665_vm11, %v1206_v63 }
 0x50b   :  { %1805 = vmatpush.msrb.mxu2 %v662_v60 }
 0x50c   :  { %v1276_v16 = vpop.permute.xlu2 %1275 }
 0x50d   :  { %6236 = vmatpush.xpose.msk.msra.mxu3 %vm665_vm11, %v1276_v16 }
 0x512   :  { %v752_v25 = vpop.xlane.xlu0 %751 }
 0x513   :  { %6764 = vrcp.f32 %v752_v25 }
 0x514   :  { %6766 = vrcp.f32 %v755_v1  ;;  %v1266_v43 = vpop.permute.xlu2 %1265 }
 0x519   :  { %v6765_v10 = vpop.eup %6764 }
 0x51a   :  { %v764_v58 = vmul.f32 %v6765_v10, %v8090_v31  ;;  %v758_v59 = vpop.xlane.xlu0 %757  ;;  %v6767_v61 = vpop.eup %6766 }
 0x51b   :  { %6768 = vrcp.f32 %v758_v59  ;;  %v765_v5 = vmul.f32 %v6767_v61, %v8084_v50 }
 0x51c   :  { %6196 = vmatmul.msk.f32.gmra.mxu3 %vm296_vm0, %v764_v58 }
 0x521   :  { %v6769_v23 = vpop.eup %6768 }
 0x522   :  { %v766_v6 = vmul.f32 %v6769_v23, %v8094_v55 }
 0x524   :  { %6197 = vmatmul.msk.f32.gmra.mxu3 %vm296_vm0, %v765_v5 }
 0x526   :  { %v1209_v4 = vpop.f32.mrf.mxu1 }
 0x527   :  { %6232 = vmatmul.msk.f32.gmra.mxu2 %vm665_vm11, %v1209_v4 }
 0x52c   :  { %6198 = vmatmul.msk.f32.gmra.mxu3 %vm296_vm0, %v766_v6 }
 0x52d   :  { %v1274_v9 = vpop.permute.xlu0 %1273 }
 0x52e   :  { %v1212_v18 = vpop.f32.mrf.mxu1  ;;  %6237 = vmatpush.xpose.msk.msra.mxu3 %vm665_vm11, %v1274_v9 }
 0x52f   :  { %6233 = vmatmul.msk.f32.gmra.mxu2 %vm665_vm11, %v1212_v18 }
 0x532   :  { %6238 = vmatpush.xpose.msk.msra.mxu3 %vm665_vm11, %v1272_v39 }
 0x535   :  { %v1264_v38 = vpop.permute.xlu0 %1263 }
 0x536   :  { %v1215_v50 = vpop.f32.mrf.mxu1 }
 0x537   :  { %6234 = vmatmul.msk.f32.gmra.mxu2 %vm665_vm11, %v1215_v50 }
 0x53d   :  { %v1270_v45 = vpop.permute.xlu0 %1269 }
 0x53f   :  { %6255 = vmatmul.msk.f32.vlgmr.msra.gmra.mxu2 %vm665_vm11, %v7972_v11 }
 0x540   :  { %2049 = vmatpush.msra.mxu2 %v663_v40 }
 0x547   :  { %6256 = vmatmul.msk.f32.gmra.mxu2 %vm665_vm11, %v7974_v12 }
 0x54f   :  { %6257 = vmatmul.msk.f32.gmra.mxu2 %vm665_vm11, %v7947_v20 }
 0x557   :  { %6258 = vmatmul.msk.f32.gmra.mxu2 %vm665_vm11, %v7952_v52 }
 0x55e   :  { %v8165_v30 = vpop.f32.mrf.mxu2 }
 0x566   :  { %v8167_v36 = vpop.f32.mrf.mxu2 }
 0x56e   :  { %v8173_v51 = vpop.f32.mrf.mxu2 }
 0x576   :  { %v8176_v42 = vpop.f32.mrf.mxu2 }
 0x589   :  { %v796_v31 = vpop.f32.mrf.mxu3 }
 0x58a   :  { %6215 = vmatmul.msk.f32.vlgmr.msrb.gmra.mxu3 %vm665_vm11, %v796_v31 }
 0x58b   :  { %1595 = vmatpush.msrb.mxu3 %v8163_v29 }
 0x58d   :  { %1596 = vmatpush.msrb.mxu3 %v8161_v15  ;;  %v8179_v55 = vpop.f32.mrf.mxu2 }
 0x58f   :  { %1597 = vmatpush.msrb.mxu3 %v8159_v54 }
 0x591   :  { %1598 = vmatpush.msrb.mxu3 %v8155_v34 }
 0x59f   :  { %v799_v47 = vpop.f32.mrf.mxu3 }
 0x5a0   :  { %6216 = vmatmul.msk.f32.gmra.mxu3 %vm665_vm11, %v799_v47 }
 0x5a7   :  { %v802_v2 = vpop.f32.mrf.mxu3 }
 0x5a8   :  { %6217 = vmatmul.msk.f32.gmra.mxu3 %vm665_vm11, %v802_v2 }
 0x5aa   :  { %v8182_v62 = vpop.f32.mrf.mxu2 }
 0x5af   :  { %v805_v13 = vpop.f32.mrf.mxu3 }
 0x5b0   :  { %6218 = vmatmul.msk.f32.gmra.mxu3 %vm665_vm11, %v805_v13 }
 0x5b2   :  { %v8185_v60 = vpop.f32.mrf.mxu2 }
 0x5b8   :  { %6239 = vmatmul.msk.f32.vlgmr.msra.gmra.mxu3 %vm665_vm11, %v1264_v38 }
 0x5b9   :  { %1846 = vmatpush.msra.mxu3 %v8126_v0 }
 0x5ba   :  { %v8189_v33 = vpop.f32.mrf.mxu2 }
 0x5c0   :  { %6240 = vmatmul.msk.f32.gmra.mxu3 %vm665_vm11, %v1266_v43 }
 0x5c2   :  { %v1511_v17 = vpop.f32.mrf.mxu2 }
 0x5c3   :  { %v1523_v40 = vmul.f32 0.35355338, %v1511_v17 }
 0x5c5   :  { %v1527_v35 = vsel %vm296_vm0, %v1523_v40, -inf }
 0x5c6   :  { %1528 = vmax.xlane.f32.xlu2 %v1527_v35 }
 0x5c8   :  { %6241 = vmatmul.msk.f32.gmra.mxu3 %vm665_vm11, %v1268_v27 }
 0x5ca   :  { %v1514_v28 = vpop.f32.mrf.mxu2 }
 0x5cb   :  { %v1524_v46 = vmul.f32 0.35355338, %v1514_v28 }
 0x5cd   :  { %v1530_v56 = vsel %vm296_vm0, %v1524_v46, -inf }
 0x5ce   :  { %1531 = vmax.xlane.f32.xlu1 %v1530_v56 }
 0x5d0   :  { %6242 = vmatmul.msk.f32.gmra.mxu3 %vm665_vm11, %v1270_v45 }
 0x5d2   :  { %v1517_v0 = vpop.f32.mrf.mxu2 }
 0x5d3   :  { %v1525_v44 = vmul.f32 0.35355338, %v1517_v0 }
 0x5d5   :  { %v1533_v1 = vsel %vm296_vm0, %v1525_v44, -inf }
 0x5d6   :  { %1534 = vmax.xlane.f32.xlu0 %v1533_v1 }
 0x5da   :  { %v1520_v32 = vpop.f32.mrf.mxu2 }
 0x5db   :  { %v1526_v63 = vmul.f32 0.35355338, %v1520_v32 }
 0x5dd   :  { %v1536_v16 = vsel %vm296_vm0, %v1526_v63, -inf }
 0x5de   :  { %1537 = vmax.xlane.f32.xlu2 %v1536_v16 }
 0x60d   :  { %v8198_v25 = vpop.f32.mrf.mxu3 }
 0x623   :  { %v8200_v10 = vpop.f32.mrf.mxu3 }
 0x62b   :  { %v8202_v58 = vpop.f32.mrf.mxu3 }
 0x633   :  { %v8204_v59 = vpop.f32.mrf.mxu3 }
 0x639   :  { %v1529_v61 = vpop.xlane.xlu2 %1528 }
 0x63a   :  { %v1539_v5 = vsub.f32 %v1523_v40, %v1529_v61 }
 0x63b   :  { %v1312_v4 = vpop.f32.mrf.mxu3 }
 0x63c   :  { %v1543_v23 = vmul.f32 1.442695, %v1539_v5  ;;  %v1324_v40 = vmul.f32 0.35355338, %v1312_v4 }
 0x63e   :  { %6770 = vpow2.f32 %v1543_v23  ;;  %v1328_v56 = vsel %vm296_vm0, %v1324_v40, -inf }
 0x641   :  { %v1532_v6 = vpop.xlane.xlu1 %1531 }
 0x642   :  { %v1540_v9 = vsub.f32 %v1524_v46, %v1532_v6 }
 0x643   :  { %v1315_v18 = vpop.f32.mrf.mxu3 }
 0x644   :  { %v6771_v39 = vpop.eup %6770  ;;  %v1545_v50 = vmul.f32 1.442695, %v1540_v9 }
 0x645   :  { %v1551_v31 = vsel %vm296_vm0, %v6771_v39, 0.0 }
 0x646   :  { %6772 = vpow2.f32 %v1545_v50  ;;  %1552 = vadd.xlane.f32.xlu1 %v1551_v31 }
 0x649   :  { %v1535_v47 = vpop.xlane.xlu0 %1534 }
 0x64a   :  { %v1541_v2 = vsub.f32 %v1525_v44, %v1535_v47  ;;  %v1325_v44 = vmul.f32 0.35355338, %v1315_v18 }
 0x64b   :  { %v1318_v43 = vpop.f32.mrf.mxu3 }
 0x64c   :  { %v6773_v13 = vpop.eup %6772  ;;  %v1547_v38 = vmul.f32 1.442695, %v1541_v2  ;;  %v1326_v5 = vmul.f32 0.35355338, %v1318_v43 }
 0x64d   :  { %v1554_v17 = vsel %vm296_vm0, %v6773_v13, 0.0 }
 0x64e   :  { %6774 = vpow2.f32 %v1547_v38  ;;  %1555 = vadd.xlane.f32.xlu0 %v1554_v17  ;;  %v1334_v4 = vsel %vm296_vm0, %v1326_v5, -inf }
 0x651   :  { %v1538_v35 = vpop.xlane.xlu2 %1537 }
 0x652   :  { %v1542_v27 = vsub.f32 %v1526_v63, %v1538_v35  ;;  %v1331_v63 = vsel %vm296_vm0, %v1325_v44, -inf }
 0x653   :  { %v1321_v0 = vpop.f32.mrf.mxu3 }
 0x654   :  { %v6775_v28 = vpop.eup %6774  ;;  %v1549_v46 = vmul.f32 1.442695, %v1542_v27  ;;  %v8210_v1 = vmul.f32 0.35355338, %v1321_v0 }
 0x655   :  { %v1557_v45 = vsel %vm296_vm0, %v6775_v28, 0.0 }
 0x656   :  { %6776 = vpow2.f32 %v1549_v46  ;;  %1329 = vmax.xlane.f32.xlu0 %v1328_v56  ;;  %1558 = vadd.xlane.f32.xlu2 %v1557_v45  ;;  %v1337_v16 = vsel %vm296_vm0, %v8210_v1, -inf }
 0x65c   :  { %v8212_v32 = vpop.eup %6776 }
 0x65d   :  { %v1560_v61 = vsel %vm296_vm0, %v8212_v32, 0.0 }
 0x65e   :  { %1338 = vmax.xlane.f32.xlu0 %v1337_v16  ;;  %1332 = vmax.xlane.f32.xlu2 %v1331_v63 }
 0x65f   :  { %1561 = vadd.xlane.f32.xlu1 %v1560_v61 }
 0x667   :  { %1335 = vmax.xlane.f32.xlu1 %v1334_v4 }
 0x672   :  { %6591 = vrot.lane.b32.xlu0 %v8013_v21, %s7387_s17 }
 0x67a   :  { %1626 = vrot.lane.b32.xlu0 %v8021_v26, %s7385_s5 }
 0x680   :  { %6586 = vrot.lane.b32.xlu1 %v7993_v57, %s7387_s17 }
 0x682   :  { %1620 = vrot.lane.b32.xlu0 %v8112_v41, %s7385_s5 }
 0x688   :  { %1624 = vrot.lane.b32.xlu1 %v8009_v19, %s7385_s5 }
 0x68a   :  { %1614 = vrot.lane.b32.xlu0 %v7974_v12, %s7385_s5 }
 0x690   :  { %1612 = vrot.lane.b32.xlu1 %v7972_v11, %s7385_s5 }
 0x692   :  { %1874 = vrot.lane.b32.xlu0 %v8021_v26, %s7386_s9 }
 0x698   :  { %1616 = vrot.lane.b32.xlu1 %v7947_v20, %s7385_s5 }
 0x69a   :  { %2079 = vrot.lane.b32.xlu0 %v8009_v19, %s7387_s17 }
 0x6a0   :  { %2081 = vrot.lane.b32.xlu1 %v8021_v26, %s7387_s17 }
 0x6a2   :  { %2077 = vrot.lane.b32.xlu0 %v8116_v24, %s7387_s17 }
 0x6a8   :  { %1618 = vrot.lane.b32.xlu1 %v7952_v52, %s7385_s5 }
 0x6aa   :  { %1860 = vrot.lane.b32.xlu0 %v7972_v11, %s7386_s9 }
 0x6b0   :  { %1868 = vrot.lane.b32.xlu1 %v8112_v41, %s7386_s9 }
 0x6b2   :  { %2069 = vrot.lane.b32.xlu0 %v7974_v12, %s7387_s17 }
 0x6b8   :  { %2067 = vrot.lane.b32.xlu1 %v7972_v11, %s7387_s17 }
 0x6b9   :  { %v1553_v57 = vpop.xlane.xlu1 %1552 }
 0x6ba   :  { %6778 = vrcp.f32 %v1553_v57  ;;  %1866 = vrot.lane.b32.xlu0 %v7952_v52, %s7386_s9 }
 0x6c0   :  { %v6779_v21 = vpop.eup %6778  ;;  %1864 = vrot.lane.b32.xlu1 %v7947_v20, %s7386_s9 }
 0x6c1   :  { %v1567_v26 = vmul.f32 %v6779_v21, %v6771_v39  ;;  %v1556_v23 = vpop.xlane.xlu0 %1555  ;;  %v8264_v39 = vpack.i.bf16 %v8155_v34, %v8159_v54 }
 0x6c2   :  { %6780 = vrcp.f32 %v1556_v23 }
 0x6c3   :  { %6259 = vmatmul.msk.f32.vlgmr.msrb.gmra.mxu3 %vm296_vm0, %v1567_v26 }
 0x6c8   :  { %v6781_v6 = vpop.eup %6780  ;;  %2073 = vrot.lane.b32.xlu1 %v7952_v52, %s7387_s17 }
 0x6c9   :  { %v1330_v9 = vpop.xlane.xlu0 %1329  ;;  %v1559_v11 = vpop.xlane.xlu2 %1558  ;;  %v1568_v18 = vmul.f32 %v6781_v6, %v6773_v13 }
 0x6ca   :  { %v1340_v50 = vsub.f32 %v1324_v40, %v1330_v9  ;;  %6782 = vrcp.f32 %v1559_v11 }
 0x6cb   :  { %6260 = vmatmul.msk.f32.gmra.mxu3 %vm296_vm0, %v1568_v18 }
 0x6cc   :  { %v1344_v31 = vmul.f32 1.442695, %v1340_v50 }
 0x6ce   :  { %6784 = vpow2.f32 %v1344_v31 }
 0x6d0   :  { %v6783_v47 = vpop.eup %6782  ;;  %6601 = vrot.lane.b32.xlu1 %v8264_v39, %s7385_s5 }
 0x6d1   :  { %v1333_v2 = vpop.xlane.xlu2 %1332  ;;  %v1569_v38 = vmul.f32 %v6783_v47, %v6775_v28  ;;  %v1339_v54 = vpop.xlane.xlu0 %1338 }
 0x6d2   :  { %v1562_v52 = vpop.xlane.xlu1 %1561  ;;  %v1341_v43 = vsub.f32 %v1325_v44, %v1333_v2  ;;  %v1343_v56 = vsub.f32 %v8210_v1, %v1339_v54 }
 0x6d3   :  { %6786 = vrcp.f32 %v1562_v52  ;;  %6261 = vmatmul.msk.f32.gmra.mxu3 %vm296_vm0, %v1569_v38 }
 0x6d4   :  { %v8269_v13 = vpop.eup %6784  ;;  %v1346_v17 = vmul.f32 1.442695, %v1341_v43  ;;  %v1350_v44 = vmul.f32 1.442695, %v1343_v56 }
 0x6d5   :  { %v1352_v40 = vsel %vm296_vm0, %v8269_v13, 0.0 }
 0x6d6   :  { %1353 = vadd.xlane.f32.xlu2 %v1352_v40  ;;  %6788 = vpow2.f32 %v1346_v17 }
 0x6d9   :  { %v6787_v34 = vpop.eup %6786 }
 0x6da   :  { %v1336_v35 = vpop.xlane.xlu1 %1335  ;;  %v1570_v27 = vmul.f32 %v6787_v34, %v8212_v32 }
 0x6db   :  { %v1342_v46 = vsub.f32 %v1326_v5, %v1336_v35 }
 0x6dc   :  { %6262 = vmatmul.msk.f32.gmra.mxu3 %vm296_vm0, %v1570_v27  ;;  %v6789_v28 = vpop.eup %6788 }
 0x6dd   :  { %v1348_v45 = vmul.f32 1.442695, %v1342_v46  ;;  %v1355_v0 = vsel %vm296_vm0, %v6789_v28, 0.0 }
 0x6de   :  { %1356 = vadd.xlane.f32.xlu2 %v1355_v0 }
 0x6df   :  { %6790 = vpow2.f32 %v1348_v45 }
 0x6e0   :  { %6792 = vpow2.f32 %v1350_v44 }
 0x6e4   :  { %v6592_v16 = vpop.permute.xlu0 %6591 }
 0x6e5   :  { %v6791_v63 = vpop.eup %6790  ;;  %v6593_v23 = vunpack.i.l.bf16 %v6592_v16  ;;  %v6594_v6 = vunpack.i.h.bf16 %v6592_v16 }
 0x6e6   :  { %v1358_v61 = vsel %vm296_vm0, %v6791_v63, 0.0  ;;  %v6793_v4 = vpop.eup %6792 }
 0x6e7   :  { %1359 = vadd.xlane.f32.xlu2 %v1358_v61  ;;  %v1361_v5 = vsel %vm296_vm0, %v6793_v4, 0.0 }
 0x6ec   :  { %v1627_v32 = vpop.permute.xlu0 %1626 }
 0x6ef   :  { %1362 = vadd.xlane.f32.xlu2 %v1361_v5 }
 0x6f2   :  { %v6587_v57 = vpop.permute.xlu1 %6586 }
 0x6f3   :  { %v6588_v21 = vunpack.i.l.bf16 %v6587_v57  ;;  %v6589_v26 = vunpack.i.h.bf16 %v6587_v57 }
 0x6f4   :  { %v1621_v1 = vpop.permute.xlu0 %1620 }
 0x6f5   :  { %1408 = vmatpush.msrb.mxu0 %v6588_v21 }
 0x6f7   :  { %1409 = vmatpush.msrb.mxu0 %v6589_v26 }
 0x6f9   :  { %1410 = vmatpush.msrb.mxu0 %v6593_v23  ;;  %v8324_v23 = vld [vmem:[#allocation5 + $0x18] sm:$0xff] }
 0x6fa   :  { %v1625_v9 = vpop.permute.xlu1 %1624  ;;  %1452 = vmatpush.msrb.mxu1 %v8324_v23 }
 0x6fb   :  { %1411 = vmatpush.msrb.mxu0 %v6594_v6 }
 0x6fc   :  { %v1615_v11 = vpop.permute.xlu0 %1614 }
 0x6fd   :  { %6263 = vmatpush.xpose.msk.msra.mxu0 %vm665_vm11, %v1627_v32 }
 0x701   :  { %6264 = vmatpush.xpose.msk.msra.mxu0 %vm665_vm11, %v1625_v9 }
 0x702   :  { %v1613_v18 = vpop.permute.xlu1 %1612 }
 0x704   :  { %v1875_v50 = vpop.permute.xlu0 %1874 }
 0x707   :  { %1622 = vrot.lane.b32.xlu2 %v8116_v24, %s7385_s5 }
 0x70a   :  { %v1617_v31 = vpop.permute.xlu1 %1616 }
 0x70c   :  { %v2080_v47 = vpop.permute.xlu0 %2079 }
 0x70f   :  { %1872 = vrot.lane.b32.xlu2 %v8009_v19, %s7386_s9 }
 0x712   :  { %v2082_v2 = vpop.permute.xlu1 %2081 }
 0x713   :  { %6299 = vmatpush.xpose.msk.msrb.mxu3 %vm665_vm11, %v2082_v2 }
 0x714   :  { %v2078_v38 = vpop.permute.xlu0 %2077 }
 0x717   :  { %6300 = vmatpush.xpose.msk.msrb.mxu3 %vm665_vm11, %v2080_v47  ;;  %1870 = vrot.lane.b32.xlu2 %v8116_v24, %s7386_s9 }
 0x71b   :  { %6301 = vmatpush.xpose.msk.msrb.mxu3 %vm665_vm11, %v2078_v38 }
 0x71c   :  { %v1861_v61 = vpop.permute.xlu0 %1860 }
 0x71f   :  { %2075 = vrot.lane.b32.xlu2 %v8112_v41, %s7387_s17 }
 0x724   :  { %v2070_v5 = vpop.permute.xlu0 %2069 }
 0x727   :  { %1862 = vrot.lane.b32.xlu2 %v7974_v12, %s7386_s9 }
 0x72c   :  { %v1867_v26 = vpop.permute.xlu0 %1866 }
 0x72f   :  { %2071 = vrot.lane.b32.xlu2 %v7947_v20, %s7387_s17 }
 0x746   :  { %v1600_v19 = vpop.f32.mrf.mxu3 }
 0x747   :  { %6279 = vmatmul.msk.f32.vlgmr.msra.gmra.mxu3 %vm665_vm11, %v1600_v19 }
 0x749   :  { %v1354_v52 = vpop.xlane.xlu2 %1353 }
 0x74a   :  { %6794 = vrcp.f32 %v1354_v52 }
 0x74e   :  { %v1603_v43 = vpop.f32.mrf.mxu3 }
 0x74f   :  { %6280 = vmatmul.msk.f32.gmra.mxu3 %vm665_vm11, %v1603_v43 }
 0x750   :  { %v6795_v24 = vpop.eup %6794 }
 0x751   :  { %v1368_v17 = vmul.f32 %v6795_v24, %v8269_v13  ;;  %v1357_v40 = vpop.xlane.xlu2 %1356 }
 0x752   :  { %6796 = vrcp.f32 %v1357_v40 }
 0x753   :  { %6243 = vmatmul.msk.f32.vlgmr.msrb.gmra.mxu0 %vm296_vm0, %v1368_v17 }
 0x756   :  { %v1606_v41 = vpop.f32.mrf.mxu3 }
 0x757   :  { %6281 = vmatmul.msk.f32.gmra.mxu3 %vm665_vm11, %v1606_v41 }
 0x758   :  { %v6797_v12 = vpop.eup %6796 }
 0x759   :  { %v1369_v34 = vmul.f32 %v6797_v12, %v6789_v28  ;;  %v1619_v28 = vpop.permute.xlu1 %1618 }
 0x75a   :  { %v1360_v20 = vpop.xlane.xlu2 %1359 }
 0x75b   :  { %6798 = vrcp.f32 %v1360_v20  ;;  %6244 = vmatmul.msk.f32.gmra.mxu0 %vm296_vm0, %v1369_v34  ;;  %v8341_v34 = vpack.i.bf16 %v8161_v15, %v8163_v29 }
 0x75f   :  { %v1609_v54 = vpop.f32.mrf.mxu3 }
 0x760   :  { %6282 = vmatmul.msk.f32.gmra.mxu3 %vm665_vm11, %v1609_v54 }
 0x761   :  { %v6799_v35 = vpop.eup %6798  ;;  %v1869_v16 = vpop.permute.xlu1 %1868 }
 0x762   :  { %v1363_v27 = vpop.xlane.xlu2 %1362  ;;  %v1370_v46 = vmul.f32 %v6799_v35, %v6791_v63 }
 0x763   :  { %6800 = vrcp.f32 %v1363_v27 }
 0x764   :  { %6245 = vmatmul.msk.f32.gmra.mxu0 %vm296_vm0, %v1370_v46 }
 0x769   :  { %v6801_v13 = vpop.eup %6800 }
 0x76a   :  { %v1623_v56 = vpop.permute.xlu2 %1622  ;;  %v1371_v45 = vmul.f32 %v6801_v13, %v6793_v4  ;;  %v2068_v4 = vpop.permute.xlu1 %2067 }
 0x76b   :  { %6265 = vmatpush.xpose.msk.msra.mxu0 %vm665_vm11, %v1623_v56 }
 0x76c   :  { %6246 = vmatmul.msk.f32.gmra.mxu0 %vm296_vm0, %v1371_v45 }
 0x76f   :  { %6266 = vmatpush.xpose.msk.msra.mxu0 %vm665_vm11, %v1621_v1 }
 0x772   :  { %v1873_v0 = vpop.permute.xlu2 %1872  ;;  %v1865_v57 = vpop.permute.xlu1 %1864 }
 0x773   :  { %6283 = vmatpush.xpose.msk.msrb.mxu0 %vm665_vm11, %v1875_v50 }
 0x774   :  { %6267 = vmatmul.msk.f32.vlgmr.msra.gmra.mxu0 %vm665_vm11, %v1613_v18 }
 0x777   :  { %6284 = vmatpush.xpose.msk.msrb.mxu0 %vm665_vm11, %v1873_v0 }
 0x77a   :  { %v1871_v44 = vpop.permute.xlu2 %1870  ;;  %v2074_v1 = vpop.permute.xlu1 %2073 }
 0x77b   :  { %6285 = vmatpush.xpose.msk.msrb.mxu0 %vm665_vm11, %v1871_v44 }
 0x77c   :  { %6268 = vmatmul.msk.f32.gmra.mxu0 %vm665_vm11, %v1615_v11 }
 0x77f   :  { %6286 = vmatpush.xpose.msk.msrb.mxu0 %vm665_vm11, %v1869_v16 }
 0x782   :  { %v2076_v63 = vpop.permute.xlu2 %2075 }
 0x783   :  { %6302 = vmatpush.xpose.msk.msrb.mxu3 %vm665_vm11, %v2076_v63 }
 0x784   :  { %6269 = vmatmul.msk.f32.gmra.mxu0 %vm665_vm11, %v1617_v31 }
 0x786   :  { %6303 = vmatmul.msk.f32.vlgmr.msrb.gmra.mxu3 %vm665_vm11, %v2068_v4 }
 0x78a   :  { %v1863_v32 = vpop.permute.xlu2 %1862 }
 0x78c   :  { %6270 = vmatmul.msk.f32.gmra.mxu0 %vm665_vm11, %v1619_v28 }
 0x78e   :  { %6304 = vmatmul.msk.f32.gmra.mxu3 %vm665_vm11, %v2070_v5 }
 0x792   :  { %v2072_v21 = vpop.permute.xlu2 %2071 }
 0x794   :  { %6287 = vmatmul.msk.f32.vlgmr.msrb.gmra.mxu0 %vm665_vm11, %v1861_v61 }
 0x796   :  { %6305 = vmatmul.msk.f32.gmra.mxu3 %vm665_vm11, %v2072_v21 }
 0x79c   :  { %6288 = vmatmul.msk.f32.gmra.mxu0 %vm665_vm11, %v1863_v32 }
 0x79e   :  { %6306 = vmatmul.msk.f32.gmra.mxu3 %vm665_vm11, %v2074_v1 }
 0x7a4   :  { %6289 = vmatmul.msk.f32.gmra.mxu0 %vm665_vm11, %v1865_v57 }
 0x7ac   :  { %6290 = vmatmul.msk.f32.gmra.mxu0 %vm665_vm11, %v1867_v26 }
 0x7ca   :  { %v8333_v52 = vpop.f32.mrf.mxu3 }
 0x7d0   :  { %v1413_v6 = vpop.f32.mrf.mxu0 }
 0x7d1   :  { %6247 = vmatmul.msk.f32.vlgmr.msrb.gmra.mxu1 %vm665_vm11, %v1413_v6 }
 0x7d2   :  { %v8336_v40 = vpop.f32.mrf.mxu3 }
 0x7d8   :  { %v1416_v9 = vpop.f32.mrf.mxu0 }
 0x7d9   :  { %6248 = vmatmul.msk.f32.gmra.mxu1 %vm665_vm11, %v1416_v9 }
 0x7da   :  { %v8343_v54 = vpop.f32.mrf.mxu3 }
 0x7e1   :  { %v1419_v11 = vpop.f32.mrf.mxu0 }
 0x7e2   :  { %6249 = vmatmul.msk.f32.gmra.mxu1 %vm665_vm11, %v1419_v11 }
 0x7e3   :  { %v8349_v13 = vpop.f32.mrf.mxu3 }
 0x7e9   :  { %v1422_v18 = vpop.f32.mrf.mxu0 }
 0x7ea   :  { %6250 = vmatmul.msk.f32.gmra.mxu1 %vm665_vm11, %v1422_v18  ;;  %v6602_v18 = vpop.permute.xlu1 %6601 }
 0x7f1   :  { %v1661_v50 = vpop.f32.mrf.mxu0 }
 0x7f2   :  { %v1673_v31 = vmul.f32 0.35355338, %v1661_v50 }
 0x7f4   :  { %v1677_v47 = vsel %vm296_vm0, %v1673_v31, -inf }
 0x7f5   :  { %1678 = vmax.xlane.f32.xlu2 %v1677_v47 }
 0x7f9   :  { %v1664_v2 = vpop.f32.mrf.mxu0 }
 0x7fa   :  { %v1674_v38 = vmul.f32 0.35355338, %v1664_v2 }
 0x7fc   :  { %v1680_v19 = vsel %vm296_vm0, %v1674_v38, -inf }
 0x7fd   :  { %1681 = vmax.xlane.f32.xlu0 %v1680_v19 }
 0x801   :  { %v1667_v43 = vpop.f32.mrf.mxu0 }
 0x802   :  { %v1675_v24 = vmul.f32 0.35355338, %v1667_v43 }
 0x804   :  { %v1683_v17 = vsel %vm296_vm0, %v1675_v24, -inf }
 0x805   :  { %1684 = vmax.xlane.f32.xlu1 %v1683_v17 }
 0x809   :  { %v1670_v41 = vpop.f32.mrf.mxu0  ;;  %v8353_v28 = vpop.f32.mrf.mxu3 }
 0x80a   :  { %v1676_v12 = vmul.f32 0.35355338, %v1670_v41 }
 0x80c   :  { %v1686_v20 = vsel %vm296_vm0, %v1676_v12, -inf }
 0x80d   :  { %1687 = vmax.xlane.f32.xlu2 %v1686_v20 }
 0x811   :  { %6596 = vrot.lane.b32.xlu0 %v8341_v34, %s7385_s5  ;;  %v1909_v35 = vpop.f32.mrf.mxu0  ;;  %v2119_v44 = vpop.f32.mrf.mxu3 }
 0x812   :  { %v8359_v16 = vmul.f32 0.35355338, %v2119_v44  ;;  %v8363_v61 = vmul.f32 0.35355338, %v1909_v35 }
 0x814   :  { %v2135_v63 = vsel %vm296_vm0, %v8359_v16, -inf  ;;  %v1925_v32 = vsel %vm296_vm0, %v8363_v61, -inf }
 0x819   :  { %v1912_v27 = vpop.f32.mrf.mxu0  ;;  %v8365_v4 = vpop.f32.mrf.mxu3 }
 0x81a   :  { %v8347_v46 = vmul.f32 0.35355338, %v1912_v27 }
 0x81c   :  { %v1928_v56 = vsel %vm296_vm0, %v8347_v46, -inf }
 0x81d   :  { %1929 = vmax.xlane.f32.xlu1 %v1928_v56 }
 0x821   :  { %v1915_v45 = vpop.f32.mrf.mxu0  ;;  %v2125_v21 = vpop.f32.mrf.mxu3 }
 0x822   :  { %v8369_v5 = vmul.f32 0.35355338, %v1915_v45  ;;  %v8373_v1 = vmul.f32 0.35355338, %v2125_v21 }
 0x824   :  { %v1931_v57 = vsel %vm296_vm0, %v8369_v5, -inf  ;;  %v2141_v26 = vsel %vm296_vm0, %v8373_v1, -inf }
 0x829   :  { %v1918_v15 = vpop.f32.mrf.mxu0 }
 0x82a   :  { %v8355_v29 = vmul.f32 0.35355338, %v1918_v15 }
 0x82c   :  { %v1934_v0 = vsel %vm296_vm0, %v8355_v29, -inf }
 0x82d   :  { %1935 = vmax.xlane.f32.xlu1 %v1934_v0 }
 0x835   :  { %2136 = vmax.xlane.f32.xlu1 %v2135_v63  ;;  %v6603_v63 = vunpack.i.l.bf16 %v6602_v18 }
 0x83b   :  { %1926 = vmax.xlane.f32.xlu0 %v1925_v32  ;;  %v6604_v32 = vunpack.i.h.bf16 %v6602_v18 }
 0x843   :  { %1932 = vmax.xlane.f32.xlu0 %v1931_v57 }
 0x84b   :  { %2142 = vmax.xlane.f32.xlu0 %v2141_v26 }
 0x84e   :  { %6606 = vrot.lane.b32.xlu1 %v8341_v34, %s7386_s9 }
 0x868   :  { %v1679_v6 = vpop.xlane.xlu2 %1678 }
 0x869   :  { %v1689_v9 = vsub.f32 %v1673_v31, %v1679_v6 }
 0x86b   :  { %v1693_v11 = vmul.f32 1.442695, %v1689_v9 }
 0x86d   :  { %6802 = vpow2.f32 %v1693_v11 }
 0x870   :  { %v1682_v50 = vpop.xlane.xlu0 %1681 }
 0x871   :  { %v1690_v47 = vsub.f32 %v1674_v38, %v1682_v50 }
 0x873   :  { %v8379_v2 = vpop.eup %6802  ;;  %v1695_v19 = vmul.f32 1.442695, %v1690_v47 }
 0x874   :  { %v1701_v43 = vsel %vm296_vm0, %v8379_v2, 0.0 }
 0x875   :  { %6804 = vpow2.f32 %v1695_v19  ;;  %1702 = vadd.xlane.f32.xlu2 %v1701_v43 }
 0x878   :  { %v1685_v17 = vpop.xlane.xlu1 %1684 }
 0x879   :  { %v1691_v41 = vsub.f32 %v1675_v24, %v1685_v17 }
 0x87b   :  { %v8383_v20 = vpop.eup %6804  ;;  %v1697_v35 = vmul.f32 1.442695, %v1691_v41 }
 0x87c   :  { %v1704_v31 = vsel %vm296_vm0, %v8383_v20, 0.0 }
 0x87d   :  { %6806 = vpow2.f32 %v1697_v35  ;;  %1705 = vadd.xlane.f32.xlu2 %v1704_v31 }
 0x880   :  { %v1688_v27 = vpop.xlane.xlu2 %1687 }
 0x881   :  { %v1692_v38 = vsub.f32 %v1676_v12, %v1688_v27 }
 0x883   :  { %v8387_v56 = vpop.eup %6806  ;;  %v1699_v45 = vmul.f32 1.442695, %v1692_v38  ;;  %v6597_v15 = vpop.permute.xlu0 %6596  ;;  %v2128_v38 = vmul.f32 0.35355338, %v8353_v28 }
 0x884   :  { %v6598_v0 = vunpack.i.l.bf16 %v6597_v15  ;;  %v1707_v44 = vsel %vm296_vm0, %v8387_v56, 0.0  ;;  %v6599_v24 = vunpack.i.h.bf16 %v6597_v15 }
 0x885   :  { %6808 = vpow2.f32 %v1699_v45  ;;  %1708 = vadd.xlane.f32.xlu2 %v1707_v44  ;;  %v2132_v15 = vsel %vm296_vm0, %v2128_v38, -inf }
 0x886   :  { %1761 = vmatpush.msra.mxu1 %v6598_v0 }
 0x888   :  { %1762 = vmatpush.msra.mxu1 %v6599_v24 }
 0x88a   :  { %1763 = vmatpush.msra.mxu1 %v6603_v63 }
 0x88b   :  { %v6809_v57 = vpop.eup %6808 }
 0x88c   :  { %1764 = vmatpush.msra.mxu1 %v6604_v32  ;;  %v1710_v12 = vsel %vm296_vm0, %v6809_v57, 0.0 }
 0x88d   :  { %1711 = vadd.xlane.f32.xlu2 %v1710_v12 }
 0x890   :  { %v1930_v21 = vpop.xlane.xlu1 %1929 }
 0x891   :  { %v1938_v26 = vsub.f32 %v8347_v46, %v1930_v21 }
 0x893   :  { %v1943_v6 = vmul.f32 1.442695, %v1938_v26  ;;  %v8415_v26 = vmul.f32 0.35355338, %v8365_v4 }
 0x895   :  { %6810 = vpow2.f32 %v1943_v6 }
 0x89b   :  { %v8393_v9 = vpop.eup %6810 }
 0x89c   :  { %v1952_v11 = vsel %vm296_vm0, %v8393_v9, 0.0 }
 0x89d   :  { %1953 = vadd.xlane.f32.xlu1 %v1952_v11 }
 0x8a0   :  { %v8397_v50 = vpop.xlane.xlu1 %1935 }
 0x8a8   :  { %v2137_v18 = vpop.xlane.xlu1 %2136 }
 0x8a9   :  { %v2145_v47 = vsub.f32 %v8359_v16, %v2137_v18 }
 0x8ab   :  { %v2150_v19 = vmul.f32 1.442695, %v2145_v47 }
 0x8ad   :  { %6812 = vpow2.f32 %v2150_v19 }
 0x8ae   :  { %v1927_v43 = vpop.xlane.xlu0 %1926 }
 0x8af   :  { %v1937_v17 = vsub.f32 %v8363_v61, %v1927_v43 }
 0x8b1   :  { %v1941_v41 = vmul.f32 1.442695, %v1937_v17 }
 0x8b3   :  { %v8401_v46 = vpop.eup %6812  ;;  %6814 = vpow2.f32 %v1941_v41 }
 0x8b4   :  { %v2159_v35 = vsel %vm296_vm0, %v8401_v46, 0.0 }
 0x8b5   :  { %2160 = vadd.xlane.f32.xlu1 %v2159_v35 }
 0x8b6   :  { %v1933_v19 = vpop.xlane.xlu0 %1932 }
 0x8b9   :  { %v6815_v31 = vpop.eup %6814 }
 0x8ba   :  { %v1949_v27 = vsel %vm296_vm0, %v6815_v31, 0.0 }
 0x8bb   :  { %1950 = vadd.xlane.f32.xlu2 %v1949_v27 }
 0x8c0   :  { %v6607_v16 = vpop.permute.xlu1 %6606 }
 0x8c1   :  { %v6608_v45 = vunpack.i.l.bf16 %v6607_v16  ;;  %v6609_v0 = vunpack.i.h.bf16 %v6607_v16 }
 0x8c3   :  { %2005 = vmatpush.msrb.mxu1 %v6608_v45  ;;  %2133 = vmax.xlane.f32.xlu2 %v2132_v15 }
 0x8c5   :  { %2006 = vmatpush.msrb.mxu1 %v6609_v0 }
 0x8db   :  { %6611 = vrot.lane.b32.xlu2 %v8264_v39, %s7386_s9 }
 0x8e8   :  { %v1703_v61 = vpop.xlane.xlu2 %1702 }
 0x8e9   :  { %6816 = vrcp.f32 %v1703_v61 }
 0x8ef   :  { %v6817_v44 = vpop.eup %6816 }
 0x8f0   :  { %v1717_v24 = vmul.f32 %v6817_v44, %v8379_v2  ;;  %v1706_v63 = vpop.xlane.xlu2 %1705  ;;  %v2138_v2 = vsel %vm296_vm0, %v8415_v26, -inf }
 0x8f1   :  { %6818 = vrcp.f32 %v1706_v63 }
 0x8f2   :  { %6271 = vmatmul.msk.f32.vlgmr.msra.gmra.mxu1 %vm296_vm0, %v1717_v24 }
 0x8f7   :  { %v6819_v28 = vpop.eup %6818 }
 0x8f8   :  { %v1709_v32 = vpop.xlane.xlu2 %1708  ;;  %v1718_v12 = vmul.f32 %v6819_v28, %v8383_v20  ;;  %v8424_v20 = vpop.f32.mrf.mxu1 }
 0x8f9   :  { %6820 = vrcp.f32 %v1709_v32 }
 0x8fa   :  { %6272 = vmatmul.msk.f32.gmra.mxu1 %vm296_vm0, %v1718_v12 }
 0x8ff   :  { %v6821_v21 = vpop.eup %6820 }
 0x900   :  { %v1712_v6 = vpop.xlane.xlu2 %1711  ;;  %v1719_v11 = vmul.f32 %v6821_v21, %v8387_v56  ;;  %v1457_v43 = vpop.f32.mrf.mxu1  ;;  %v1939_v56 = vsub.f32 %v8369_v5, %v1933_v19 }
 0x901   :  { %6822 = vrcp.f32 %v1712_v6 }
 0x902   :  { %6273 = vmatmul.msk.f32.gmra.mxu1 %vm296_vm0, %v1719_v11  ;;  %v1945_v17 = vmul.f32 1.442695, %v1939_v56 }
 0x904   :  { %2139 = vmax.xlane.f32.xlu2 %v2138_v2 }
 0x907   :  { %v6823_v18 = vpop.eup %6822 }
 0x908   :  { %v1720_v47 = vmul.f32 %v6823_v18, %v6809_v57  ;;  %v1048_v57 = vadd.f32 %v8200_v10, %v8167_v36  ;;  %v8429_v16 = vpop.f32.mrf.mxu1  ;;  %v1054_v36 = vadd.f32 %v8204_v59, %v8176_v42  ;;  %v8447_v42 = vld [vmem:[%s10102_s21] ss:$0 sm:$0xff]  ;;  %v2143_v18 = vpop.xlane.xlu0 %2142 }
 0x90a   :  { %6274 = vmatmul.msk.f32.gmra.mxu1 %vm296_vm0, %v1720_v47  ;;  %v1262_v12 = vadd.f32 %v8189_v33, %v1054_v36 }
 0x910   :  { %v1954_v45 = vpop.xlane.xlu1 %1953  ;;  %v1463_v32 = vpop.f32.mrf.mxu1 }
 0x91c   :  { %6616 = vrot.lane.b32.xlu2 %v8341_v34, %s7387_s17  ;;  %v1260_v34 = vadd.f32 %v8182_v62, %v1048_v57 }
 0x91e   :  { %v1467_v5 = vadd.f32 %v1457_v43, %v1260_v34  ;;  %v2147_v43 = vsub.f32 %v8373_v1, %v2143_v18 }
 0x920   :  { %v2275_v63 = vadd.f32 %v1467_v5, %v7664_v14 }
 0x922   :  { %v8450_v21 = vadd.f32 %v8447_v42, %v2275_v63 }
 0x924   :  { %v2299_v11 = vsel %vm296_vm0, %v8450_v21, 0.0 }
 0x92e   :  { %v1951_v4 = vpop.xlane.xlu2 %1950 }
 0x92f   :  { %6824 = vrcp.f32 %v1951_v4 }
 0x930   :  { %6826 = vpow2.f32 %v1945_v17  ;;  %v2154_v17 = vmul.f32 1.442695, %v2147_v43 }
 0x935   :  { %v6825_v0 = vpop.eup %6824 }
 0x936   :  { %v2134_v41 = vpop.xlane.xlu2 %2133  ;;  %v8432_v44 = vpop.eup %6826  ;;  %v1965_v10 = vmul.f32 %v6825_v0, %v6815_v31  ;;  %v1469_v31 = vadd.f32 %v1463_v32, %v1262_v12 }
 0x937   :  { %v2144_v35 = vsub.f32 %v2128_v38, %v2134_v41  ;;  %v1955_v28 = vsel %vm296_vm0, %v8432_v44, 0.0 }
 0x938   :  { %v2277_v6 = vadd.f32 %v1469_v31, %v7654_v8 }
 0x939   :  { %v2148_v27 = vmul.f32 1.442695, %v2144_v35 }
 0x93b   :  { %6828 = vpow2.f32 %v2148_v27 }
 0x93c   :  { %6830 = vrcp.f32 %v1954_v45 }
 0x93e   :  { %v6612_v15 = vpop.permute.xlu2 %6611 }
 0x93f   :  { %v6613_v61 = vunpack.i.l.bf16 %v6612_v15  ;;  %v6614_v38 = vunpack.i.h.bf16 %v6612_v15 }
 0x941   :  { %v8434_v24 = vpop.eup %6828  ;;  %2007 = vmatpush.msrb.mxu1 %v6613_v61 }
 0x942   :  { %v2156_v62 = vsel %vm296_vm0, %v8434_v24, 0.0  ;;  %v6831_v59 = vpop.eup %6830 }
 0x943   :  { %2157 = vadd.xlane.f32.xlu0 %v2156_v62  ;;  %2008 = vmatpush.msrb.mxu1 %v6614_v38  ;;  %v1966_v14 = vmul.f32 %v6831_v59, %v8393_v9  ;;  %v1940_v9 = vsub.f32 %v8355_v29, %v8397_v50  ;;  %v2161_v59 = vpop.xlane.xlu1 %2160 }
 0x944   :  { %6291 = vmatmul.msk.f32.vlgmr.msrb.gmra.mxu1 %vm296_vm0, %v1965_v10 }
 0x945   :  { %1956 = vadd.xlane.f32.xlu2 %v1955_v28  ;;  %2256 = vmatpush.msra.mxu1 %v8324_v23  ;;  %v8458_v23 = vadd.f32 %v8447_v42, %v2277_v6  ;;  %v1947_v2 = vmul.f32 1.442695, %v1940_v9 }
 0x947   :  { %v2305_v33 = vsel %vm296_vm0, %v8458_v23, 0.0  ;;  %6832 = vpow2.f32 %v1947_v2 }
 0x94c   :  { %6292 = vmatmul.msk.f32.gmra.mxu1 %vm296_vm0, %v1966_v14 }
 0x94d   :  { %2300 = vadd.xlane.f32.xlu2 %v2299_v11 }
 0x955   :  { %2306 = vadd.xlane.f32.xlu2 %v2305_v33 }
 0x957   :  { %6621 = vrot.lane.b32.xlu0 %v8264_v39, %s7387_s17  ;;  %v8470_v39 = vpop.eup %6832 }
 0x958   :  { %v1958_v35 = vsel %vm296_vm0, %v8470_v39, 0.0 }
 0x96f   :  { %v1766_v8 = vpop.f32.mrf.mxu1 }
 0x970   :  { %6275 = vmatmul.msk.f32.vlgmr.msrb.gmra.mxu2 %vm665_vm11, %v1766_v8 }
 0x977   :  { %v1769_v47 = vpop.f32.mrf.mxu1  ;;  %v2140_v4 = vpop.xlane.xlu2 %2139 }
 0x978   :  { %v2146_v19 = vsub.f32 %v8415_v26, %v2140_v4  ;;  %6276 = vmatmul.msk.f32.gmra.mxu2 %vm665_vm11, %v1769_v47  ;;  %v1045_v26 = vadd.f32 %v8198_v25, %v8165_v30  ;;  %v1051_v30 = vadd.f32 %v8202_v58, %v8173_v51 }
 0x97a   :  { %v2152_v56 = vmul.f32 1.442695, %v2146_v19  ;;  %v1259_v34 = vadd.f32 %v8179_v55, %v1045_v26  ;;  %v1261_v5 = vadd.f32 %v8185_v60, %v1051_v30 }
 0x97c   :  { %6834 = vpow2.f32 %v2152_v56  ;;  %v1466_v45 = vadd.f32 %v8424_v20, %v1259_v34  ;;  %v1468_v38 = vadd.f32 %v8429_v16, %v1261_v5 }
 0x97d   :  { %6836 = vpow2.f32 %v2154_v17 }
 0x97e   :  { %v2274_v25 = vadd.f32 %v1466_v45, %v7652_v7  ;;  %v2276_v20 = vadd.f32 %v1468_v38, %v7647_v3 }
 0x97f   :  { %v1772_v29 = vpop.f32.mrf.mxu1  ;;  %v6617_v50 = vpop.permute.xlu2 %6616 }
 0x980   :  { %v6618_v41 = vunpack.i.l.bf16 %v6617_v50  ;;  %6277 = vmatmul.msk.f32.gmra.mxu2 %vm665_vm11, %v1772_v29  ;;  %v6619_v1 = vunpack.i.h.bf16 %v6617_v50  ;;  %v8491_v55 = vadd.f32 %v8447_v42, %v2274_v25  ;;  %v8497_v51 = vadd.f32 %v8447_v42, %v2276_v20 }
 0x981   :  { %1959 = vadd.xlane.f32.xlu0 %v1958_v35 }
 0x982   :  { %v8477_v27 = vpop.eup %6834  ;;  %2212 = vmatpush.msra.mxu0 %v6618_v41  ;;  %v2296_v36 = vsel %vm296_vm0, %v8491_v55, 0.0  ;;  %v2302_v7 = vsel %vm296_vm0, %v8497_v51, 0.0 }
 0x983   :  { %v2162_v57 = vsel %vm296_vm0, %v8477_v27, 0.0  ;;  %v6837_v0 = vpop.eup %6836 }
 0x984   :  { %2163 = vadd.xlane.f32.xlu1 %v2162_v57  ;;  %2213 = vmatpush.msra.mxu0 %v6619_v1  ;;  %v2165_v61 = vsel %vm296_vm0, %v6837_v0, 0.0 }
 0x987   :  { %v1775_v15 = vpop.f32.mrf.mxu1 }
 0x988   :  { %6278 = vmatmul.msk.f32.gmra.mxu2 %vm665_vm11, %v1775_v15 }
 0x98c   :  { %2166 = vadd.xlane.f32.xlu1 %v2165_v61 }
 0x994   :  { %2297 = vadd.xlane.f32.xlu1 %v2296_v36  ;;  %v2497_v36 = vld [vmem:[#allocation7 + $0x18] sm:$0xff] }
 0x995   :  { %2538 = vmatpush.msrb.mxu2 %v2497_v36 }
 0x99c   :  { %2303 = vadd.xlane.f32.xlu1 %v2302_v7 }
 0x9b6   :  { %v2158_v62 = vpop.xlane.xlu0 %2157 }
 0x9b8   :  { %v1957_v58 = vpop.xlane.xlu2 %1956 }
 0x9b9   :  { %6838 = vrcp.f32 %v1957_v58  ;;  %v2496_v58 = vld [vmem:[#allocation7 + $0x10] sm:$0xff] }
 0x9ba   :  { %6840 = vrcp.f32 %v2158_v62  ;;  %2539 = vmatpush.msrb.mxu2 %v2496_v58  ;;  %v2494_v62 = vld [vmem:[#allocation7] sm:$0xff] }
 0x9bb   :  { %6842 = vrcp.f32 %v2161_v59 }
 0x9bf   :  { %v6839_v60 = vpop.eup %6838 }
 0x9c0   :  { %v2301_v16 = vpop.xlane.xlu2 %2300  ;;  %v1967_v10 = vmul.f32 %v6839_v60, %v8432_v44  ;;  %v6841_v14 = vpop.eup %6840 }
 0x9c1   :  { %v2321_v3 = vmul.f32 %v2301_v16, %v7668_v22  ;;  %v2010_v63 = vpop.f32.mrf.mxu1  ;;  %v2172_v33 = vmul.f32 %v6841_v14, %v8434_v24  ;;  %v6843_v9 = vpop.eup %6842  ;;  %v2495_v16 = vld [vmem:[#allocation7 + $0x8] sm:$0xff] }
 0x9c2   :  { %6293 = vmatmul.msk.f32.gmra.mxu1 %vm296_vm0, %v1967_v10  ;;  %6295 = vmatmul.msk.f32.vlgmr.msra.gmra.mxu2 %vm665_vm11, %v2010_v63  ;;  %v2173_v8 = vmul.f32 %v6843_v9, %v8401_v46 }
 0x9c3   :  { %v8506_v28 = vsub.f32 %v8450_v21, %v2321_v3  ;;  %2540 = vmatpush.msrb.mxu2 %v2495_v16 }
 0x9c5   :  { %v2337_v32 = vmul.f32 %v8506_v28, %v8506_v28  ;;  %2541 = vmatpush.msrb.mxu2 %v2494_v62 }
 0x9c7   :  { %v2347_v12 = vsel %vm296_vm0, %v2337_v32, 0.0 }
 0x9c8   :  { %2348 = vadd.xlane.f32.xlu0 %v2347_v12  ;;  %v2307_v46 = vpop.xlane.xlu2 %2306 }
 0x9c9   :  { %v6622_v44 = vpop.permute.xlu0 %6621  ;;  %v2013_v31 = vpop.f32.mrf.mxu1  ;;  %v2323_v41 = vmul.f32 %v2307_v46, %v7668_v22 }
 0x9ca   :  { %v6623_v6 = vunpack.i.l.bf16 %v6622_v44  ;;  %6296 = vmatmul.msk.f32.gmra.mxu2 %vm665_vm11, %v2013_v31  ;;  %v6624_v11 = vunpack.i.h.bf16 %v6622_v44 }
 0x9cb   :  { %v8529_v26 = vsub.f32 %v8458_v23, %v2323_v41 }
 0x9cc   :  { %2214 = vmatpush.msra.mxu0 %v6623_v6 }
 0x9cd   :  { %v2339_v45 = vmul.f32 %v8529_v26, %v8529_v26 }
 0x9ce   :  { %2215 = vmatpush.msra.mxu0 %v6624_v11 }
 0x9cf   :  { %6307 = vmatmul.msk.f32.vlgmr.msra.gmra.mxu0 %vm296_vm0, %v2172_v33  ;;  %v2353_v30 = vsel %vm296_vm0, %v2339_v45, 0.0 }
 0x9d7   :  { %6308 = vmatmul.msk.f32.gmra.mxu0 %vm296_vm0, %v2173_v8 }
 0x9f4   :  { %v1960_v2 = vpop.xlane.xlu0 %1959 }
 0x9f5   :  { %6844 = vrcp.f32 %v1960_v2 }
 0x9f7   :  { %v2164_v18 = vpop.xlane.xlu1 %2163 }
 0x9f8   :  { %6846 = vrcp.f32 %v2164_v18 }
 0x9fb   :  { %v6845_v47 = vpop.eup %6844 }
 0x9fc   :  { %v1968_v4 = vmul.f32 %v6845_v47, %v8470_v39 }
 0x9fe   :  { %v6847_v19 = vpop.eup %6846  ;;  %6294 = vmatmul.msk.f32.gmra.mxu1 %vm296_vm0, %v1968_v4 }
 0x9ff   :  { %v2167_v43 = vpop.xlane.xlu1 %2166  ;;  %v2174_v24 = vmul.f32 %v6847_v19, %v8477_v27 }
 0xa00   :  { %6848 = vrcp.f32 %v2167_v43 }
 0xa01   :  { %6309 = vmatmul.msk.f32.gmra.mxu0 %vm296_vm0, %v2174_v24 }
 0xa06   :  { %v6849_v56 = vpop.eup %6848 }
 0xa07   :  { %v2298_v17 = vpop.xlane.xlu1 %2297  ;;  %v2175_v29 = vmul.f32 %v6849_v56, %v6837_v0 }
 0xa08   :  { %v2320_v50 = vmul.f32 %v2298_v17, %v7668_v22 }
 0xa09   :  { %6310 = vmatmul.msk.f32.gmra.mxu0 %vm296_vm0, %v2175_v29 }
 0xa0a   :  { %v8524_v39 = vsub.f32 %v8491_v55, %v2320_v50 }
 0xa0c   :  { %v2336_v35 = vmul.f32 %v8524_v39, %v8524_v39 }
 0xa0e   :  { %v2344_v27 = vsel %vm296_vm0, %v2336_v35, 0.0 }
 0xa0f   :  { %2345 = vadd.xlane.f32.xlu1 %v2344_v27  ;;  %v2304_v1 = vpop.xlane.xlu1 %2303  ;;  %v8553_v27 = vld [vmem:[%s10103_s25] ss:$0 sm:$0xff] }
 0xa10   :  { %v2322_v57 = vmul.f32 %v2304_v1, %v7668_v22 }
 0xa12   :  { %v8534_v34 = vsub.f32 %v8497_v51, %v2322_v57 }
 0xa14   :  { %v2338_v15 = vmul.f32 %v8534_v34, %v8534_v34 }
 0xa16   :  { %v2350_v0 = vsel %vm296_vm0, %v2338_v15, 0.0 }
 0xa17   :  { %2351 = vadd.xlane.f32.xlu2 %v2350_v0  ;;  %2354 = vadd.xlane.f32.xlu1 %v2353_v30  ;;  %v8557_v0 = vld [vmem:[%s10104_s29] ss:$0 sm:$0xff] }
 0xa3b   :  { %v2349_v38 = vpop.xlane.xlu0 %2348 }
 0xa3c   :  { %v2369_v20 = vmul.f32 %v2349_v38, %v7668_v22 }
 0xa3e   :  { %v2377_v7 = vadd.f32 1e-05, %v2369_v20  ;;  %v1807_v20 = vpop.f32.mrf.mxu2 }
 0xa3f   :  { %v2016_v25 = vpop.f32.mrf.mxu1 }
 0xa40   :  { %6297 = vmatmul.msk.f32.gmra.mxu2 %vm665_vm11, %v2016_v25  ;;  %6850 = vrsqrt.f32 %v2377_v7  ;;  %vm2400_vm1 = vweird.f32 %v2377_v7 }
 0xa46   :  { %v6851_v63 = vpop.eup %6850  ;;  %v1810_v62 = vpop.f32.mrf.mxu2 }
 0xa47   :  { %v2395_v59 = vmul.f32 %v6851_v63, %v2377_v7  ;;  %vm2401_vm13 = vweird.f32 %v6851_v63 }
 0xa48   :  { %vm2402_vm2 = vmor %vm2400_vm1, %vm2401_vm13 }
 0xa49   :  { %v2396_v31 = vmul.f32 %v6851_v63, %v2395_v59 }
 0xa4b   :  { %v2397_v18 = vmul.f32 0.5, %v2396_v31 }
 0xa4c   :  { %v2217_v61 = vpop.f32.mrf.mxu0 }
 0xa4d   :  { %6311 = vmatmul.msk.f32.vlgmr.msra.gmra.mxu1 %vm665_vm11, %v2217_v61  ;;  %v2398_v19 = vsub.f32 1.5, %v2397_v18 }
 0xa4e   :  { %v1813_v59 = vpop.f32.mrf.mxu2 }
 0xa4f   :  { %v2399_v17 = vmul.f32 %v6851_v63, %v2398_v19 }
 0xa51   :  { %v2403_v45 = vsel %vm2402_vm2, %v6851_v63, %v2399_v17 }
 0xa52   :  { %v2465_v61 = vmul.f32 %v2403_v45, %v8506_v28 }
 0xa54   :  { %v2220_v5 = vpop.f32.mrf.mxu0 }
 0xa55   :  { %6312 = vmatmul.msk.f32.gmra.mxu1 %vm665_vm11, %v2220_v5 }
 0xa56   :  { %v1816_v31 = vpop.f32.mrf.mxu2 }
 0xa7b   :  { %v2019_v60 = vpop.f32.mrf.mxu1 }
 0xa7c   :  { %6298 = vmatmul.msk.f32.gmra.mxu2 %vm665_vm11, %v2019_v60 }
 0xa7e   :  { %v2223_v10 = vpop.f32.mrf.mxu0 }
 0xa7f   :  { %6313 = vmatmul.msk.f32.gmra.mxu1 %vm665_vm11, %v2223_v10 }
 0xa82   :  { %v2346_v3 = vpop.xlane.xlu1 %2345 }
 0xa83   :  { %v2368_v32 = vmul.f32 %v2346_v3, %v7668_v22 }
 0xa85   :  { %v2376_v12 = vadd.f32 1e-05, %v2368_v32 }
 0xa86   :  { %v2226_v44 = vpop.f32.mrf.mxu0 }
 0xa87   :  { %6852 = vrsqrt.f32 %v2376_v12  ;;  %6314 = vmatmul.msk.f32.gmra.mxu1 %vm665_vm11, %v2226_v44  ;;  %vm2390_vm14 = vweird.f32 %v2376_v12 }
 0xa8a   :  { %v2355_v14 = vpop.xlane.xlu1 %2354  ;;  %v2352_v6 = vpop.xlane.xlu2 %2351 }
 0xa8b   :  { %v2371_v11 = vmul.f32 %v2355_v14, %v7668_v22  ;;  %v2370_v33 = vmul.f32 %v2352_v6, %v7668_v22  ;;  %v2051_v14 = vpop.f32.mrf.mxu2  ;;  %v1849_v6 = vadd.f32 %v8333_v52, %v1807_v20 }
 0xa8d   :  { %v6853_v9 = vpop.eup %6852  ;;  %v2379_v8 = vadd.f32 1e-05, %v2371_v11  ;;  %v2378_v2 = vadd.f32 1e-05, %v2370_v33  ;;  %v2063_v11 = vadd.f32 %v2051_v14, %v1849_v6  ;;  %v2899_v14 = vld [vmem:[%s10106_s15 + $0x20] sm:$0xff] }
 0xa8e   :  { %v2385_v47 = vmul.f32 %v6853_v9, %v2376_v12  ;;  %vm2391_vm12 = vweird.f32 %v6853_v9 }
 0xa8f   :  { %6854 = vrsqrt.f32 %v2379_v8  ;;  %vm2392_vm15 = vmor %vm2390_vm14, %vm2391_vm12  ;;  %vm2410_vm4 = vweird.f32 %v2378_v2  ;;  %vm2420_vm7 = vweird.f32 %v2379_v8 }
 0xa90   :  { %v2386_v4 = vmul.f32 %v6853_v9, %v2385_v47  ;;  %6856 = vrsqrt.f32 %v2378_v2 }
 0xa92   :  { %v2387_v43 = vmul.f32 0.5, %v2386_v4 }
 0xa94   :  { %v2388_v24 = vsub.f32 1.5, %v2387_v43 }
 0xa95   :  { %v6855_v56 = vpop.eup %6854 }
 0xa96   :  { %v6857_v46 = vpop.eup %6856  ;;  %v2389_v29 = vmul.f32 %v6853_v9, %v2388_v24  ;;  %v2415_v50 = vmul.f32 %v6855_v56, %v2379_v8  ;;  %vm2421_vm6 = vweird.f32 %v6855_v56  ;;  %v2054_v8 = vpop.f32.mrf.mxu2 }
 0xa97   :  { %v2405_v41 = vmul.f32 %v6857_v46, %v2378_v2  ;;  %vm2411_vm3 = vweird.f32 %v6857_v46  ;;  %vm2422_vm8 = vmor %vm2420_vm7, %vm2421_vm6  ;;  %v1852_v2 = vadd.f32 %v8336_v40, %v1810_v62 }
 0xa98   :  { %v2393_v35 = vsel %vm2392_vm15, %v6853_v9, %v2389_v29  ;;  %v2416_v15 = vmul.f32 %v6855_v56, %v2415_v50  ;;  %vm2412_vm5 = vmor %vm2410_vm4, %vm2411_vm3 }
 0xa99   :  { %v2464_v1 = vmul.f32 %v2393_v35, %v8524_v39  ;;  %v2406_v57 = vmul.f32 %v6857_v46, %v2405_v41  ;;  %v2476_v39 = vmul.f32 %v8553_v27, %v2465_v61  ;;  %v2064_v47 = vadd.f32 %v2054_v8, %v1852_v2 }
 0xa9a   :  { %v2417_v36 = vmul.f32 0.5, %v2416_v15  ;;  %v1858_v35 = vadd.f32 %v8349_v13, %v1816_v31  ;;  %v8603_v13 = vld [vmem:[%s10105_s14] ss:$0 sm:$0xff] }
 0xa9b   :  { %v2475_v30 = vmul.f32 %v8553_v27, %v2464_v1  ;;  %v2407_v25 = vmul.f32 0.5, %v2406_v57  ;;  %v2487_v10 = vadd.f32 %v8557_v0, %v2476_v39 }
 0xa9c   :  { %v2418_v58 = vsub.f32 1.5, %v2417_v36 }
 0xa9d   :  { %v2486_v5 = vadd.f32 %v8557_v0, %v2475_v30  ;;  %v2408_v38 = vsub.f32 1.5, %v2407_v25 }
 0xa9e   :  { %v2419_v28 = vmul.f32 %v6855_v56, %v2418_v58 }
 0xa9f   :  { %v2409_v7 = vmul.f32 %v6857_v46, %v2408_v38  ;;  %6315 = vmatmul.msk.f32.vlgmr.msrb.gmra.mxu2 %vm296_vm0, %v2486_v5 }
 0xaa0   :  { %v2423_v63 = vsel %vm2422_vm8, %v6855_v56, %v2419_v28  ;;  %v1855_v56 = vadd.f32 %v8343_v54, %v1813_v59  ;;  %v2900_v59 = vld [vmem:[%s10106_s15 + $0x28] sm:$0xff] }
 0xaa1   :  { %v2413_v60 = vsel %vm2412_vm5, %v6857_v46, %v2409_v7  ;;  %v2467_v32 = vmul.f32 %v2423_v63, %v8529_v26 }
 0xaa2   :  { %v2466_v16 = vmul.f32 %v2413_v60, %v8534_v34 }
 0xaa3   :  { %v2478_v34 = vmul.f32 %v8553_v27, %v2467_v32 }
 0xaa4   :  { %v2477_v3 = vmul.f32 %v8553_v27, %v2466_v16  ;;  %v2902_v16 = vld [vmem:[%s10106_s15 + $0x38] sm:$0xff] }
 0xaa5   :  { %v2489_v44 = vadd.f32 %v8557_v0, %v2478_v34  ;;  %2936 = vmatpush.msra.mxu3 %v2902_v16 }
 0xaa6   :  { %v2488_v12 = vadd.f32 %v8557_v0, %v2477_v3  ;;  %v2901_v3 = vld [vmem:[%s10106_s15 + $0x30] sm:$0xff] }
 0xaa7   :  { %6316 = vmatmul.msk.f32.gmra.mxu2 %vm296_vm0, %v2487_v10  ;;  %2937 = vmatpush.msra.mxu3 %v2901_v3 }
 0xaa9   :  { %2938 = vmatpush.msra.mxu3 %v2900_v59 }
 0xaab   :  { %2939 = vmatpush.msra.mxu3 %v2899_v14 }
 0xaaf   :  { %6317 = vmatmul.msk.f32.gmra.mxu2 %vm296_vm0, %v2488_v12 }
 0xab7   :  { %6318 = vmatmul.msk.f32.gmra.mxu2 %vm296_vm0, %v2489_v44 }
 0xac3   :  { %v2057_v40 = vpop.f32.mrf.mxu2 }
 0xac4   :  { %v2065_v46 = vadd.f32 %v2057_v40, %v1855_v56 }
 0xaca   :  { %v2258_v33 = vpop.f32.mrf.mxu1 }
 0xacb   :  { %v2270_v9 = vadd.f32 %v2258_v33, %v2063_v11 }
 0xacd   :  { %v2278_v26 = vadd.f32 %v2270_v9, %v7707_v49 }
 0xacf   :  { %v8578_v18 = vadd.f32 %v8447_v42, %v2278_v26  ;;  %v2898_v26 = vld [vmem:[%s10106_s15 + $0x18] sm:$0xff] }
 0xad0   :  { %2940 = vmatpush.msra.mxu3 %v2898_v26 }
 0xad1   :  { %v2308_v4 = vsel %vm296_vm0, %v8578_v18, 0.0 }
 0xad2   :  { %2309 = vadd.xlane.f32.xlu0 %v2308_v4  ;;  %v2261_v19 = vpop.f32.mrf.mxu1 }
 0xad3   :  { %v2271_v43 = vadd.f32 %v2261_v19, %v2064_v47  ;;  %v2897_v19 = vld [vmem:[%s10106_s15 + $0x10] sm:$0xff] }
 0xad4   :  { %2941 = vmatpush.msra.mxu3 %v2897_v19 }
 0xad5   :  { %v2279_v52 = vadd.f32 %v2271_v43, %v7686_v37 }
 0xad7   :  { %v8584_v24 = vadd.f32 %v8447_v42, %v2279_v52 }
 0xad9   :  { %v2311_v49 = vsel %vm296_vm0, %v8584_v24, 0.0 }
 0xada   :  { %2312 = vadd.xlane.f32.xlu2 %v2311_v49 }
 0xafc   :  { %v2264_v17 = vpop.f32.mrf.mxu1 }
 0xafd   :  { %v2272_v29 = vadd.f32 %v2264_v17, %v2065_v46  ;;  %v2896_v17 = vld [vmem:[%s10106_s15 + $0x8] sm:$0xff] }
 0xafe   :  { %2942 = vmatpush.msra.mxu3 %v2896_v17 }
 0xaff   :  { %v2280_v50 = vadd.f32 %v2272_v29, %v7705_v48  ;;  %v2060_v41 = vpop.f32.mrf.mxu2 }
 0xb00   :  { %v2066_v1 = vadd.f32 %v2060_v41, %v1858_v35 }
 0xb01   :  { %v8592_v37 = vadd.f32 %v8447_v42, %v2280_v50 }
 0xb03   :  { %v2314_v57 = vsel %vm296_vm0, %v8592_v37, 0.0 }
 0xb04   :  { %v2267_v45 = vpop.f32.mrf.mxu1  ;;  %2315 = vadd.xlane.f32.xlu1 %v2314_v57 }
 0xb05   :  { %v2273_v15 = vadd.f32 %v2267_v45, %v2066_v1  ;;  %v2895_v45 = vld [vmem:[%s10106_s15] sm:$0xff] }
 0xb06   :  { %2943 = vmatpush.msra.mxu3 %v2895_v45 }
 0xb07   :  { %v2281_v54 = vadd.f32 %v2273_v15, %v7714_v53 }
 0xb09   :  { %v8598_v30 = vadd.f32 %v8447_v42, %v2281_v54 }
 0xb0b   :  { %v2317_v48 = vsel %vm296_vm0, %v8598_v30, 0.0 }
 0xb0c   :  { %2318 = vadd.xlane.f32.xlu0 %v2317_v48 }
 0xb22   :  { %v2543_v25 = vpop.f32.mrf.mxu2 }
 0xb23   :  { %v8606_v61 = vadd.f32 %v8603_v13, %v2543_v25 }
 0xb25   :  { %v8609_v5 = vmul.f32 0.70710677, %v8606_v61 }
 0xb27   :  { %vm2583_vm9 = vcmp.ge.f32.partialorder %v8609_v5, 0.0  ;;  %v2591_v53 = vsub.f32 0.0, %v8609_v5 }
 0xb29   :  { %v2599_v42 = vsel %vm2583_vm9, %v8609_v5, %v2591_v53 }
 0xb2a   :  { %v2607_v38 = vmul.f32 0.3275911, %v2599_v42  ;;  %v2546_v20 = vpop.f32.mrf.mxu2  ;;  %v2815_v8 = vsub.f32 0.0, %v2599_v42 }
 0xb2b   :  { %v8617_v36 = vadd.f32 %v8603_v13, %v2546_v20 }
 0xb2c   :  { %v2615_v7 = vadd.f32 1.0, %v2607_v38  ;;  %v2823_v50 = vmul.f32 %v2815_v8, %v2599_v42 }
 0xb2d   :  { %v8620_v39 = vmul.f32 0.70710677, %v8617_v36 }
 0xb2e   :  { %6858 = vrcp.f32 %v2615_v7  ;;  %v2634_v6 = vand.u32 2147483648, %v2615_v7  ;;  %v2632_v33 = vand.u32 2147483647, %v2615_v7  ;;  %vm2628_vm14 = vweird.f32 %v2615_v7 }
 0xb2f   :  { %vm2584_vm10 = vcmp.ge.f32.partialorder %v8620_v39, 0.0  ;;  %v2592_v58 = vsub.f32 0.0, %v8620_v39  ;;  %v2831_v25 = vmul.f32 1.442695, %v2823_v50 }
 0xb30   :  { %v2635_v52 = vor.u32 1.1754944e-38, %v2634_v6  ;;  %vm2633_vm1 = vcmp.eq.f32.partialorder %v2632_v33, 8.507059e+37 }
 0xb31   :  { %v8627_v60 = vsel %vm2584_vm10, %v8620_v39, %v2592_v58 }
 0xb32   :  { %v2608_v10 = vmul.f32 0.3275911, %v8627_v60  ;;  %v2549_v28 = vpop.f32.mrf.mxu2  ;;  %v2816_v20 = vsub.f32 0.0, %v8627_v60 }
 0xb33   :  { %v8632_v62 = vadd.f32 %v8603_v13, %v2549_v28 }
 0xb34   :  { %v6859_v63 = vpop.eup %6858  ;;  %v8635_v32 = vadd.f32 1.0, %v2608_v10  ;;  %v2824_v14 = vmul.f32 %v2816_v20, %v8627_v60 }
 0xb35   :  { %v2624_v12 = vmul.f32 %v6859_v63, %v2615_v7  ;;  %v8638_v34 = vmul.f32 0.70710677, %v8632_v62  ;;  %vm2629_vm13 = vweird.f32 %v6859_v63 }
 0xb36   :  { %6860 = vrcp.f32 %v8635_v32  ;;  %vm2630_vm15 = vmor %vm2628_vm14, %vm2629_vm13  ;;  %v2649_v1 = vand.u32 2147483648, %v8635_v32  ;;  %v2647_v48 = vand.u32 2147483647, %v8635_v32  ;;  %vm2643_vm4 = vweird.f32 %v8635_v32 }
 0xb37   :  { %v2625_v44 = vsub.f32 1.0, %v2624_v12  ;;  %vm2585_vm12 = vcmp.ge.f32.partialorder %v8638_v34, 0.0  ;;  %v2593_v31 = vsub.f32 0.0, %v8638_v34 }
 0xb38   :  { %v2650_v58 = vor.u32 1.1754944e-38, %v2649_v1  ;;  %vm2648_vm6 = vcmp.eq.f32.partialorder %v2647_v48, 8.507059e+37 }
 0xb39   :  { %v2626_v11 = vmul.f32 %v6859_v63, %v2625_v44  ;;  %v8648_v9 = vsel %vm2585_vm12, %v8638_v34, %v2593_v31 }
 0xb3a   :  { %v2609_v2 = vmul.f32 0.3275911, %v8648_v9  ;;  %v2552_v47 = vpop.f32.mrf.mxu2 }
 0xb3b   :  { %v2627_v4 = vadd.f32 %v6859_v63, %v2626_v11  ;;  %v8656_v40 = vadd.f32 %v8603_v13, %v2552_v47 }
 0xb3c   :  { %v6861_v43 = vpop.eup %6860  ;;  %v8653_v49 = vadd.f32 1.0, %v2609_v2 }
 0xb3d   :  { %v2631_v56 = vsel %vm2630_vm15, %v6859_v63, %v2627_v4  ;;  %v2639_v46 = vmul.f32 %v6861_v43, %v8635_v32  ;;  %v8666_v57 = vmul.f32 0.70710677, %v8656_v40  ;;  %vm2644_vm2 = vweird.f32 %v6861_v43 }
 0xb3e   :  { %v8660_v29 = vsel %vm2633_vm1, %v2635_v52, %v2631_v56  ;;  %6862 = vrcp.f32 %v8653_v49  ;;  %vm2645_vm5 = vmor %vm2643_vm4, %vm2644_vm2  ;;  %v2662_v11 = vand.u32 2147483647, %v8653_v49  ;;  %v2664_v33 = vand.u32 2147483648, %v8653_v49 }
 0xb3f   :  { %v2743_v41 = vmul.f32 1.0614054, %v8660_v29  ;;  %v2640_v35 = vsub.f32 1.0, %v2639_v46  ;;  %vm2586_vm3 = vcmp.ge.f32.partialorder %v8666_v57, 0.0  ;;  %v2594_v53 = vsub.f32 0.0, %v8666_v57 }
 0xb40   :  { %6864 = vpow2.f32 %v2831_v25  ;;  %vm2658_vm8 = vweird.f32 %v8653_v49  ;;  %v2833_v56 = vmul.f32 1.442695, %v2824_v14  ;;  %v2665_v46 = vor.u32 1.1754944e-38, %v2664_v33 }
 0xb41   :  { %v2751_v15 = vadd.f32 -1.4531521, %v2743_v41  ;;  %v2641_v54 = vmul.f32 %v6861_v43, %v2640_v35  ;;  %v8678_v16 = vsel %vm2586_vm3, %v8666_v57, %v2594_v53  ;;  %vm2663_vm14 = vcmp.eq.f32.partialorder %v2662_v11, 8.507059e+37 }
 0xb42   :  { %v2610_v32 = vmul.f32 0.3275911, %v8678_v16  ;;  %vm2903_vm4 = vcmask 523264  }
 0xb43   :  { %v2759_v42 = vmul.f32 %v2751_v15, %v8660_v29  ;;  %v2642_v38 = vadd.f32 %v6861_v43, %v2641_v54  ;;  %v2817_v15 = vsub.f32 0.0, %v8648_v9 }
 0xb44   :  { %v6863_v7 = vpop.eup %6862  ;;  %v8690_v26 = vadd.f32 1.0, %v2610_v32 }
 0xb45   :  { %v2767_v10 = vadd.f32 1.4214138, %v2759_v42  ;;  %v2646_v28 = vsel %vm2645_vm5, %v6861_v43, %v2642_v38  ;;  %v2654_v3 = vmul.f32 %v6863_v7, %v8653_v49  ;;  %v2310_v63 = vpop.xlane.xlu0 %2309  ;;  %vm2659_vm7 = vweird.f32 %v6863_v7 }
 0xb46   :  { %v8681_v12 = vsel %vm2648_vm6, %v2650_v58, %v2646_v28  ;;  %v2324_v59 = vmul.f32 %v2310_v63, %v7668_v22  ;;  %6866 = vrcp.f32 %v8690_v26  ;;  %v6865_v52 = vpop.eup %6864  ;;  %vm2660_vm13 = vmor %vm2658_vm8, %vm2659_vm7  ;;  %v2825_v28 = vmul.f32 %v2817_v15, %v8648_v9 }
 0xb47   :  { %v2775_v44 = vmul.f32 %v2767_v10, %v8660_v29  ;;  %v2744_v31 = vmul.f32 1.0614054, %v8681_v12  ;;  %v2655_v6 = vsub.f32 1.0, %v2654_v3  ;;  %6868 = vpow2.f32 %v2833_v56 }
 0xb48   :  { %v8693_v8 = vsub.f32 %v8578_v18, %v2324_v59  ;;  %v2835_v9 = vmul.f32 1.442695, %v2825_v28  ;;  %vm2673_vm1 = vweird.f32 %v8690_v26 }
 0xb49   :  { %v2783_v2 = vadd.f32 -0.28449672, %v2775_v44  ;;  %v2752_v47 = vadd.f32 -1.4531521, %v2744_v31  ;;  %v2656_v4 = vmul.f32 %v6863_v7, %v2655_v6  ;;  %v2677_v44 = vand.u32 2147483647, %v8690_v26 }
 0xb4a   :  { %v2340_v17 = vmul.f32 %v8693_v8, %v8693_v8  ;;  %v2679_v31 = vand.u32 2147483648, %v8690_v26  ;;  %6870 = vpow2.f32 %v2835_v9 }
 0xb4b   :  { %v2791_v19 = vmul.f32 %v2783_v2, %v8660_v29  ;;  %v2760_v60 = vmul.f32 %v2752_v47, %v8681_v12  ;;  %v2657_v43 = vadd.f32 %v6863_v7, %v2656_v4  ;;  %vm2678_vm5 = vcmp.eq.f32.partialorder %v2677_v44, 8.507059e+37 }
 0xb4c   :  { %v2356_v54 = vsel %vm296_vm0, %v2340_v17, 0.0  ;;  %v6867_v42 = vpop.eup %6866 }
 0xb4d   :  { %v2799_v50 = vadd.f32 0.2548296, %v2791_v19  ;;  %v2768_v41 = vadd.f32 1.4214138, %v2760_v60  ;;  %v2661_v35 = vsel %vm2660_vm13, %v6863_v7, %v2657_v43  ;;  %v2313_v1 = vpop.xlane.xlu2 %2312  ;;  %2357 = vadd.xlane.f32.xlu2 %v2356_v54  ;;  %v2669_v10 = vmul.f32 %v6867_v42, %v8690_v26  ;;  %v6869_v43 = vpop.eup %6868 }
 0xb4e   :  { %v2666_v45 = vsel %vm2663_vm14, %v2665_v46, %v2661_v35  ;;  %v2325_v48 = vmul.f32 %v2313_v1, %v7668_v22  ;;  %vm2674_vm15 = vweird.f32 %v6867_v42  ;;  %v2680_v46 = vor.u32 1.1754944e-38, %v2679_v31 }
 0xb4f   :  { %v2807_v49 = vmul.f32 %v2799_v50, %v8660_v29  ;;  %v2776_v25 = vmul.f32 %v2768_v41, %v8681_v12  ;;  %v2745_v53 = vmul.f32 1.0614054, %v2666_v45  ;;  %v2670_v59 = vsub.f32 1.0, %v2669_v10  ;;  %vm2675_vm2 = vmor %vm2673_vm1, %vm2674_vm15 }
 0xb50   :  { %v8707_v38 = vsub.f32 %v8584_v24, %v2325_v48  ;;  %v2818_v35 = vsub.f32 0.0, %v8678_v16 }
 0xb51   :  { %v2847_v20 = vmul.f32 %v6865_v52, %v2807_v49  ;;  %v2784_v7 = vadd.f32 -0.28449672, %v2776_v25  ;;  %v2753_v58 = vadd.f32 -1.4531521, %v2745_v53  ;;  %v2671_v2 = vmul.f32 %v6867_v42, %v2670_v59 }
 0xb52   :  { %v2341_v3 = vmul.f32 %v8707_v38, %v8707_v38  ;;  %v2567_v52 = vmul.f32 0.5, %v8606_v61  ;;  %v2826_v49 = vmul.f32 %v2818_v35, %v8678_v16 }
 0xb53   :  { %v2855_v29 = vsub.f32 1.0, %v2847_v20  ;;  %v2792_v63 = vmul.f32 %v2784_v7, %v8681_v12  ;;  %v2761_v32 = vmul.f32 %v2753_v58, %v2666_v45  ;;  %v2672_v60 = vadd.f32 %v6867_v42, %v2671_v2  ;;  %v6871_v20 = vpop.eup %6870 }
 0xb54   :  { %v2359_v14 = vsel %vm296_vm0, %v2341_v3, 0.0  ;;  %v2568_v7 = vmul.f32 0.5, %v8617_v36 }
 0xb55   :  { %v2863_v6 = vsub.f32 0.0, %v2855_v29  ;;  %v2800_v11 = vadd.f32 0.2548296, %v2792_v63  ;;  %v2769_v33 = vadd.f32 1.4214138, %v2761_v32  ;;  %2360 = vadd.xlane.f32.xlu1 %v2359_v14  ;;  %v2676_v41 = vsel %vm2675_vm2, %v6867_v42, %v2672_v60 }
 0xb56   :  { %v2681_v5 = vsel %vm2678_vm5, %v2680_v46, %v2676_v41 }
 0xb57   :  { %v2871_v47 = vsel %vm2583_vm9, %v2855_v29, %v2863_v6  ;;  %v2808_v4 = vmul.f32 %v2800_v11, %v8681_v12  ;;  %v2777_v19 = vmul.f32 %v2769_v33, %v2666_v45  ;;  %v2746_v15 = vmul.f32 1.0614054, %v2681_v5 }
 0xb58   :  { %v2879_v56 = vadd.f32 1.0, %v2871_v47  ;;  %v2837_v29 = vmul.f32 1.442695, %v2826_v49 }
 0xb59   :  { %v2848_v17 = vmul.f32 %v6869_v43, %v2808_v4  ;;  %v2785_v50 = vadd.f32 -0.28449672, %v2777_v19  ;;  %v2754_v48 = vadd.f32 -1.4531521, %v2746_v15  ;;  %v2570_v4 = vmul.f32 0.5, %v8656_v40 }
 0xb5a   :  { %v2887_v26 = vmul.f32 %v2879_v56, %v2567_v52  ;;  %6872 = vpow2.f32 %v2837_v29 }
 0xb5b   :  { %v2856_v12 = vsub.f32 1.0, %v2848_v17  ;;  %v2793_v1 = vmul.f32 %v2785_v50, %v2666_v45  ;;  %v2762_v42 = vmul.f32 %v2754_v48, %v2681_v5 }
 0xb5c   :  { %6323 = vmatmul.msk.f32.vlgmr.msra.gmra.mxu3 %vm2903_vm4, %v2887_v26 }
 0xb5d   :  { %v2864_v61 = vsub.f32 0.0, %v2856_v12  ;;  %v2801_v54 = vadd.f32 0.2548296, %v2793_v1  ;;  %v2770_v28 = vadd.f32 1.4214138, %v2762_v42 }
 0xb5f   :  { %v2872_v25 = vsel %vm2584_vm10, %v2856_v12, %v2864_v61  ;;  %v2809_v53 = vmul.f32 %v2801_v54, %v2666_v45  ;;  %v2778_v32 = vmul.f32 %v2770_v28, %v2681_v5  ;;  %v2569_v45 = vmul.f32 0.5, %v8632_v62 }
 0xb60   :  { %v2880_v58 = vadd.f32 1.0, %v2872_v25  ;;  %v6873_v11 = vpop.eup %6872 }
 0xb61   :  { %v2849_v10 = vmul.f32 %v6871_v20, %v2809_v53  ;;  %v2786_v44 = vadd.f32 -0.28449672, %v2778_v32 }
 0xb62   :  { %v2888_v3 = vmul.f32 %v2880_v58, %v2568_v7 }
 0xb63   :  { %v2857_v63 = vsub.f32 1.0, %v2849_v10  ;;  %v2794_v16 = vmul.f32 %v2786_v44, %v2681_v5 }
 0xb64   :  { %6324 = vmatmul.msk.f32.gmra.mxu3 %vm2903_vm4, %v2888_v3 }
 0xb65   :  { %v2865_v59 = vsub.f32 0.0, %v2857_v63  ;;  %v2802_v36 = vadd.f32 0.2548296, %v2794_v16 }
 0xb67   :  { %v2873_v39 = vsel %vm2585_vm12, %v2857_v63, %v2865_v59  ;;  %v2810_v6 = vmul.f32 %v2802_v36, %v2681_v5  ;;  %v8758_v59 = vld [vmem:[%s10107_s16] ss:$0 sm:$0xff] }
 0xb68   :  { %v2881_v31 = vadd.f32 1.0, %v2873_v39 }
 0xb69   :  { %v2850_v33 = vmul.f32 %v6873_v11, %v2810_v6 }
 0xb6a   :  { %v2889_v14 = vmul.f32 %v2881_v31, %v2569_v45 }
 0xb6b   :  { %v2858_v2 = vsub.f32 1.0, %v2850_v33 }
 0xb6c   :  { %6325 = vmatmul.msk.f32.gmra.mxu3 %vm2903_vm4, %v2889_v14 }
 0xb6d   :  { %v2866_v9 = vsub.f32 0.0, %v2858_v2 }
 0xb6f   :  { %v2874_v47 = vsel %vm2586_vm3, %v2858_v2, %v2866_v9 }
 0xb70   :  { %v2882_v34 = vadd.f32 1.0, %v2874_v47 }
 0xb72   :  { %v2890_v19 = vmul.f32 %v2882_v34, %v2570_v4 }
 0xb74   :  { %6326 = vmatmul.msk.f32.gmra.mxu3 %vm2903_vm4, %v2890_v19 }
 0xb77   :  { %v2316_v60 = vpop.xlane.xlu1 %2315 }
 0xb78   :  { %v2326_v62 = vmul.f32 %v2316_v60, %v7668_v22 }
 0xb7a   :  { %v8740_v43 = vsub.f32 %v8592_v37, %v2326_v62 }
 0xb7c   :  { %v2342_v52 = vmul.f32 %v8740_v43, %v8740_v43 }
 0xb7e   :  { %v2362_v56 = vsel %vm296_vm0, %v2342_v52, 0.0 }
 0xb7f   :  { %v2319_v46 = vpop.xlane.xlu0 %2318  ;;  %2363 = vadd.xlane.f32.xlu0 %v2362_v56 }
 0xb80   :  { %v2327_v57 = vmul.f32 %v2319_v46, %v7668_v22 }
 0xb82   :  { %v8747_v40 = vsub.f32 %v8598_v30, %v2327_v57 }
 0xb84   :  { %v2343_v17 = vmul.f32 %v8747_v40, %v8747_v40 }
 0xb86   :  { %v2365_v50 = vsel %vm296_vm0, %v2343_v17, 0.0 }
 0xb87   :  { %2366 = vadd.xlane.f32.xlu2 %v2365_v50 }
 0xbc0   :  { %v2358_v41 = vpop.xlane.xlu2 %2357 }
 0xbc1   :  { %v2372_v26 = vmul.f32 %v2358_v41, %v7668_v22 }
 0xbc3   :  { %v2380_v5 = vadd.f32 1e-05, %v2372_v26 }
 0xbc5   :  { %6874 = vrsqrt.f32 %v2380_v5  ;;  %vm2430_vm10 = vweird.f32 %v2380_v5 }
 0xbc8   :  { %v2361_v35 = vpop.xlane.xlu1 %2360 }
 0xbc9   :  { %v2373_v12 = vmul.f32 %v2361_v35, %v7668_v22 }
 0xbcb   :  { %v2381_v1 = vadd.f32 1e-05, %v2373_v12  ;;  %v6875_v15 = vpop.eup %6874 }
 0xbcc   :  { %v2425_v61 = vmul.f32 %v6875_v15, %v2380_v5  ;;  %vm2431_vm9 = vweird.f32 %v6875_v15 }
 0xbcd   :  { %6876 = vrsqrt.f32 %v2381_v1  ;;  %vm2432_vm12 = vmor %vm2430_vm10, %vm2431_vm9  ;;  %vm2440_vm6 = vweird.f32 %v2381_v1 }
 0xbce   :  { %v2426_v54 = vmul.f32 %v6875_v15, %v2425_v61 }
 0xbd0   :  { %v2427_v48 = vmul.f32 0.5, %v2426_v54 }
 0xbd2   :  { %v2428_v25 = vsub.f32 1.5, %v2427_v48 }
 0xbd3   :  { %v6877_v49 = vpop.eup %6876 }
 0xbd4   :  { %v2435_v53 = vmul.f32 %v6877_v49, %v2381_v1  ;;  %v2429_v42 = vmul.f32 %v6875_v15, %v2428_v25  ;;  %vm2441_vm3 = vweird.f32 %v6877_v49 }
 0xbd5   :  { %vm2442_vm7 = vmor %vm2440_vm6, %vm2441_vm3 }
 0xbd6   :  { %v2436_v20 = vmul.f32 %v6877_v49, %v2435_v53  ;;  %v2433_v7 = vsel %vm2432_vm12, %v6875_v15, %v2429_v42 }
 0xbd7   :  { %v2468_v10 = vmul.f32 %v2433_v7, %v8693_v8 }
 0xbd8   :  { %v2437_v58 = vmul.f32 0.5, %v2436_v20 }
 0xbd9   :  { %v2479_v3 = vmul.f32 %v8553_v27, %v2468_v10 }
 0xbda   :  { %v2438_v28 = vsub.f32 1.5, %v2437_v58 }
 0xbdb   :  { %v2490_v63 = vadd.f32 %v8557_v0, %v2479_v3 }
 0xbdc   :  { %v2439_v29 = vmul.f32 %v6877_v49, %v2438_v28 }
 0xbdd   :  { %6319 = vmatmul.msk.f32.gmra.mxu2 %vm296_vm0, %v2490_v63 }
 0xbde   :  { %v2443_v32 = vsel %vm2442_vm7, %v6877_v49, %v2439_v29 }
 0xbdf   :  { %v2469_v44 = vmul.f32 %v2443_v32, %v8707_v38  ;;  %v2945_v39 = vpop.f32.mrf.mxu3 }
 0xbe0   :  { %v2969_v16 = vadd.f32 %v2945_v39, %v8491_v55 }
 0xbe1   :  { %v2480_v8 = vmul.f32 %v8553_v27, %v2469_v44 }
 0xbe2   :  { %v8765_v45 = vadd.f32 %v8758_v59, %v2969_v16 }
 0xbe3   :  { %v2491_v31 = vadd.f32 %v8557_v0, %v2480_v8 }
 0xbe4   :  { %v2991_v36 = vsel %vm296_vm0, %v8765_v45, 0.0 }
 0xbe5   :  { %2992 = vadd.xlane.f32.xlu1 %v2991_v36  ;;  %6320 = vmatmul.msk.f32.gmra.mxu2 %vm296_vm0, %v2491_v31 }
 0xbe7   :  { %v2948_v14 = vpop.f32.mrf.mxu3 }
 0xbe8   :  { %v2970_v38 = vadd.f32 %v2948_v14, %v8450_v21 }
 0xbea   :  { %v8773_v6 = vadd.f32 %v8758_v59, %v2970_v38 }
 0xbec   :  { %v2994_v55 = vsel %vm296_vm0, %v8773_v6, 0.0 }
 0xbed   :  { %2995 = vadd.xlane.f32.xlu0 %v2994_v55 }
 0xbef   :  { %v2951_v11 = vpop.f32.mrf.mxu3 }
 0xbf0   :  { %v2971_v33 = vadd.f32 %v2951_v11, %v8497_v51 }
 0xbf2   :  { %v8779_v2 = vadd.f32 %v8758_v59, %v2971_v33  ;;  %v2364_v9 = vpop.xlane.xlu0 %2363 }
 0xbf3   :  { %v2374_v47 = vmul.f32 %v2364_v9, %v7668_v22 }
 0xbf4   :  { %v2997_v4 = vsel %vm296_vm0, %v8779_v2, 0.0 }
 0xbf5   :  { %v2382_v21 = vadd.f32 1e-05, %v2374_v47  ;;  %2998 = vadd.xlane.f32.xlu2 %v2997_v4 }
 0xbf7   :  { %6878 = vrsqrt.f32 %v2382_v21  ;;  %v2954_v19 = vpop.f32.mrf.mxu3  ;;  %vm2450_vm13 = vweird.f32 %v2382_v21 }
 0xbf8   :  { %v2972_v62 = vadd.f32 %v2954_v19, %v8458_v23 }
 0xbfa   :  { %v2367_v34 = vpop.xlane.xlu2 %2366  ;;  %v8787_v46 = vadd.f32 %v8758_v59, %v2972_v62 }
 0xbfb   :  { %v2375_v60 = vmul.f32 %v2367_v34, %v7668_v22 }
 0xbfc   :  { %v3000_v17 = vsel %vm296_vm0, %v8787_v46, 0.0 }
 0xbfd   :  { %v6879_v52 = vpop.eup %6878  ;;  %v2383_v51 = vadd.f32 1e-05, %v2375_v60  ;;  %3001 = vadd.xlane.f32.xlu1 %v3000_v17 }
 0xbfe   :  { %v2445_v56 = vmul.f32 %v6879_v52, %v2382_v21  ;;  %vm2451_vm8 = vweird.f32 %v6879_v52 }
 0xbff   :  { %6880 = vrsqrt.f32 %v2383_v51  ;;  %vm2452_vm14 = vmor %vm2450_vm13, %vm2451_vm8  ;;  %vm2460_vm1 = vweird.f32 %v2383_v51 }
 0xc00   :  { %v2446_v57 = vmul.f32 %v6879_v52, %v2445_v56 }
 0xc02   :  { %v2447_v50 = vmul.f32 0.5, %v2446_v57 }
 0xc04   :  { %v2448_v41 = vsub.f32 1.5, %v2447_v50 }
 0xc05   :  { %v6881_v26 = vpop.eup %6880 }
 0xc06   :  { %v2449_v5 = vmul.f32 %v6879_v52, %v2448_v41  ;;  %v2455_v35 = vmul.f32 %v6881_v26, %v2383_v51  ;;  %vm2461_vm15 = vweird.f32 %v6881_v26 }
 0xc07   :  { %vm2462_vm2 = vmor %vm2460_vm1, %vm2461_vm15 }
 0xc08   :  { %v2453_v23 = vsel %vm2452_vm14, %v6879_v52, %v2449_v5  ;;  %v2456_v12 = vmul.f32 %v6881_v26, %v2455_v35 }
 0xc09   :  { %v2470_v1 = vmul.f32 %v2453_v23, %v8740_v43 }
 0xc0a   :  { %v2457_v15 = vmul.f32 0.5, %v2456_v12 }
 0xc0b   :  { %v2481_v61 = vmul.f32 %v8553_v27, %v2470_v1 }
 0xc0c   :  { %v2458_v54 = vsub.f32 1.5, %v2457_v15 }
 0xc0d   :  { %v2492_v48 = vadd.f32 %v8557_v0, %v2481_v61 }
 0xc0e   :  { %v2459_v49 = vmul.f32 %v6881_v26, %v2458_v54 }
 0xc0f   :  { %6321 = vmatmul.msk.f32.gmra.mxu2 %vm296_vm0, %v2492_v48 }
 0xc10   :  { %v2463_v25 = vsel %vm2462_vm2, %v6881_v26, %v2459_v49 }
 0xc11   :  { %v2471_v53 = vmul.f32 %v2463_v25, %v8747_v40 }
 0xc13   :  { %v2482_v42 = vmul.f32 %v8553_v27, %v2471_v53 }
 0xc15   :  { %v2493_v20 = vadd.f32 %v8557_v0, %v2482_v42 }
 0xc17   :  { %6322 = vmatmul.msk.f32.gmra.mxu2 %vm296_vm0, %v2493_v20 }
 0xc58   :  { %v2993_v43 = vpop.xlane.xlu1 %2992 }
 0xc59   :  { %v3015_v7 = vmul.f32 %v2993_v43, %v7668_v22 }
 0xc5b   :  { %v8801_v58 = vsub.f32 %v8765_v45, %v3015_v7 }
 0xc5d   :  { %v3031_v10 = vmul.f32 %v8801_v58, %v8801_v58 }
 0xc5f   :  { %v3039_v28 = vsel %vm296_vm0, %v3031_v10, 0.0 }
 0xc60   :  { %v2996_v3 = vpop.xlane.xlu0 %2995  ;;  %3040 = vadd.xlane.f32.xlu0 %v3039_v28  ;;  %v2555_v27 = vpop.f32.mrf.mxu2 }
 0xc61   :  { %v3016_v40 = vmul.f32 %v2996_v3, %v7668_v22  ;;  %v8811_v29 = vadd.f32 %v8603_v13, %v2555_v27 }
 0xc63   :  { %v8808_v0 = vsub.f32 %v8773_v6, %v3016_v40  ;;  %v8814_v63 = vmul.f32 0.70710677, %v8811_v29 }
 0xc65   :  { %v3032_v32 = vmul.f32 %v8808_v0, %v8808_v0  ;;  %vm2587_vm5 = vcmp.ge.f32.partialorder %v8814_v63, 0.0  ;;  %v2595_v44 = vsub.f32 0.0, %v8814_v63 }
 0xc67   :  { %v3042_v39 = vsel %vm296_vm0, %v3032_v32, 0.0  ;;  %v2603_v8 = vsel %vm2587_vm5, %v8814_v63, %v2595_v44 }
 0xc68   :  { %3043 = vadd.xlane.f32.xlu2 %v3042_v39  ;;  %v2999_v16 = vpop.xlane.xlu2 %2998  ;;  %v2611_v36 = vmul.f32 0.3275911, %v2603_v8  ;;  %v2558_v14 = vpop.f32.mrf.mxu2  ;;  %v2819_v54 = vsub.f32 0.0, %v2603_v8 }
 0xc69   :  { %v3017_v31 = vmul.f32 %v2999_v16, %v7668_v22  ;;  %v8826_v38 = vadd.f32 %v8603_v13, %v2558_v14 }
 0xc6a   :  { %v2619_v11 = vadd.f32 1.0, %v2611_v36  ;;  %v2827_v43 = vmul.f32 %v2819_v54, %v2603_v8 }
 0xc6b   :  { %v8829_v55 = vsub.f32 %v8779_v2, %v3017_v31  ;;  %v8832_v33 = vmul.f32 0.70710677, %v8826_v38 }
 0xc6c   :  { %6882 = vrcp.f32 %v2619_v11  ;;  %v2694_v17 = vand.u32 2147483648, %v2619_v11  ;;  %v2692_v41 = vand.u32 2147483647, %v2619_v11  ;;  %vm2688_vm12 = vweird.f32 %v2619_v11 }
 0xc6d   :  { %v3033_v9 = vmul.f32 %v8829_v55, %v8829_v55  ;;  %vm2588_vm9 = vcmp.ge.f32.partialorder %v8832_v33, 0.0  ;;  %v2596_v47 = vsub.f32 0.0, %v8832_v33  ;;  %v2839_v27 = vmul.f32 1.442695, %v2827_v43 }
 0xc6e   :  { %v2695_v12 = vor.u32 1.1754944e-38, %v2694_v17  ;;  %vm2693_vm6 = vcmp.eq.f32.partialorder %v2692_v41, 8.507059e+37 }
 0xc6f   :  { %v3045_v4 = vsel %vm296_vm0, %v3033_v9, 0.0  ;;  %v2604_v21 = vsel %vm2588_vm9, %v8832_v33, %v2596_v47 }
 0xc70   :  { %3046 = vadd.xlane.f32.xlu1 %v3045_v4  ;;  %v2612_v34 = vmul.f32 0.3275911, %v2604_v21  ;;  %v3002_v62 = vpop.xlane.xlu1 %3001  ;;  %v2820_v44 = vsub.f32 0.0, %v2604_v21 }
 0xc71   :  { %v3018_v51 = vmul.f32 %v3002_v62, %v7668_v22 }
 0xc72   :  { %v6883_v19 = vpop.eup %6882  ;;  %v2620_v60 = vadd.f32 1.0, %v2612_v34  ;;  %v2828_v14 = vmul.f32 %v2820_v44, %v2604_v21 }
 0xc73   :  { %v2684_v52 = vmul.f32 %v6883_v19, %v2619_v11  ;;  %v8844_v57 = vsub.f32 %v8787_v46, %v3018_v51  ;;  %vm2689_vm10 = vweird.f32 %v6883_v19 }
 0xc74   :  { %6884 = vrcp.f32 %v2620_v60  ;;  %vm2690_vm3 = vmor %vm2688_vm12, %vm2689_vm10  ;;  %v2709_v25 = vand.u32 2147483648, %v2620_v60  ;;  %v2707_v20 = vand.u32 2147483647, %v2620_v60  ;;  %vm2703_vm8 = vweird.f32 %v2620_v60 }
 0xc75   :  { %v2685_v56 = vsub.f32 1.0, %v2684_v52  ;;  %v3034_v26 = vmul.f32 %v8844_v57, %v8844_v57  ;;  %6886 = vpow2.f32 %v2839_v27  ;;  %v2841_v4 = vmul.f32 1.442695, %v2828_v14 }
 0xc76   :  { %v2710_v28 = vor.u32 1.1754944e-38, %v2709_v25  ;;  %vm2708_vm14 = vcmp.eq.f32.partialorder %v2707_v20, 8.507059e+37 }
 0xc77   :  { %v2686_v50 = vmul.f32 %v6883_v19, %v2685_v56  ;;  %v3048_v35 = vsel %vm296_vm0, %v3034_v26, 0.0  ;;  %6888 = vpow2.f32 %v2841_v4 }
 0xc78   :  { %3049 = vadd.xlane.f32.xlu0 %v3048_v35 }
 0xc79   :  { %v2687_v5 = vadd.f32 %v6883_v19, %v2686_v50 }
 0xc7a   :  { %v6885_v23 = vpop.eup %6884 }
 0xc7b   :  { %v2691_v1 = vsel %vm2690_vm3, %v6883_v19, %v2687_v5  ;;  %v2699_v15 = vmul.f32 %v6885_v23, %v2620_v60  ;;  %vm2704_vm7 = vweird.f32 %v6885_v23  ;;  %v6887_v60 = vpop.eup %6886 }
 0xc7c   :  { %v2696_v61 = vsel %vm2693_vm6, %v2695_v12, %v2691_v1  ;;  %vm2705_vm13 = vmor %vm2703_vm8, %vm2704_vm7  ;;  %v2571_v1 = vmul.f32 0.5, %v8811_v29 }
 0xc7d   :  { %v2747_v48 = vmul.f32 1.0614054, %v2696_v61  ;;  %v2700_v49 = vsub.f32 1.0, %v2699_v15  ;;  %v6889_v12 = vpop.eup %6888 }
 0xc7f   :  { %v2755_v53 = vadd.f32 -1.4531521, %v2747_v48  ;;  %v2701_v42 = vmul.f32 %v6885_v23, %v2700_v49 }
 0xc81   :  { %v2763_v7 = vmul.f32 %v2755_v53, %v2696_v61  ;;  %v2702_v10 = vadd.f32 %v6885_v23, %v2701_v42 }
 0xc83   :  { %v2771_v3 = vadd.f32 1.4214138, %v2763_v7  ;;  %v2706_v40 = vsel %vm2705_vm13, %v6885_v23, %v2702_v10  ;;  %v2572_v10 = vmul.f32 0.5, %v8826_v38 }
 0xc84   :  { %v2711_v32 = vsel %vm2708_vm14, %v2710_v28, %v2706_v40 }
 0xc85   :  { %v2779_v39 = vmul.f32 %v2771_v3, %v2696_v61  ;;  %v2748_v16 = vmul.f32 1.0614054, %v2711_v32 }
 0xc87   :  { %v2787_v31 = vadd.f32 -0.28449672, %v2779_v39  ;;  %v2756_v36 = vadd.f32 -1.4531521, %v2748_v16 }
 0xc89   :  { %v2795_v11 = vmul.f32 %v2787_v31, %v2696_v61  ;;  %v2764_v9 = vmul.f32 %v2756_v36, %v2711_v32 }
 0xc8b   :  { %v2803_v8 = vadd.f32 0.2548296, %v2795_v11  ;;  %v2772_v47 = vadd.f32 1.4214138, %v2764_v9 }
 0xc8d   :  { %v2811_v34 = vmul.f32 %v2803_v8, %v2696_v61  ;;  %v2780_v19 = vmul.f32 %v2772_v47, %v2711_v32 }
 0xc8f   :  { %v2851_v62 = vmul.f32 %v6887_v60, %v2811_v34  ;;  %v2788_v52 = vadd.f32 -0.28449672, %v2780_v19 }
 0xc91   :  { %v2859_v56 = vsub.f32 1.0, %v2851_v62  ;;  %v2796_v17 = vmul.f32 %v2788_v52, %v2711_v32 }
 0xc92   :  { %v2561_v51 = vpop.f32.mrf.mxu2 }
 0xc93   :  { %v8850_v50 = vadd.f32 %v8603_v13, %v2561_v51  ;;  %v2867_v41 = vsub.f32 0.0, %v2859_v56  ;;  %v2804_v26 = vadd.f32 0.2548296, %v2796_v17 }
 0xc95   :  { %v8853_v21 = vmul.f32 0.70710677, %v8850_v50  ;;  %v2875_v5 = vsel %vm2587_vm5, %v2859_v56, %v2867_v41  ;;  %v2812_v35 = vmul.f32 %v2804_v26, %v2711_v32 }
 0xc96   :  { %v2883_v15 = vadd.f32 1.0, %v2875_v5 }
 0xc97   :  { %vm2589_vm15 = vcmp.ge.f32.partialorder %v8853_v21, 0.0  ;;  %v2597_v23 = vsub.f32 0.0, %v8853_v21  ;;  %v2852_v61 = vmul.f32 %v6889_v12, %v2812_v35 }
 0xc98   :  { %v2891_v48 = vmul.f32 %v2883_v15, %v2571_v1 }
 0xc99   :  { %v2605_v54 = vsel %vm2589_vm15, %v8853_v21, %v2597_v23  ;;  %v2860_v53 = vsub.f32 1.0, %v2852_v61 }
 0xc9a   :  { %v2613_v49 = vmul.f32 0.3275911, %v2605_v54  ;;  %v2564_v25 = vpop.f32.mrf.mxu2  ;;  %6327 = vmatmul.msk.f32.gmra.mxu3 %vm2903_vm4, %v2891_v48  ;;  %v2821_v47 = vsub.f32 0.0, %v2605_v54 }
 0xc9b   :  { %v8864_v63 = vadd.f32 %v8603_v13, %v2564_v25  ;;  %v2868_v20 = vsub.f32 0.0, %v2860_v53 }
 0xc9c   :  { %v2621_v42 = vadd.f32 1.0, %v2613_v49  ;;  %v2829_v51 = vmul.f32 %v2821_v47, %v2605_v54  ;;  %v3306_v47 = vld [vmem:[#allocation11 + $0x18] sm:$0xff] }
 0xc9d   :  { %v8868_v43 = vmul.f32 0.70710677, %v8864_v63  ;;  %v2876_v29 = vsel %vm2588_vm9, %v2860_v53, %v2868_v20  ;;  %3319 = vmatpush.msra.mxu2 %v3306_v47 }
 0xc9e   :  { %6890 = vrcp.f32 %v2621_v42  ;;  %v2884_v28 = vadd.f32 1.0, %v2876_v29  ;;  %v2724_v39 = vand.u32 2147483648, %v2621_v42  ;;  %v2722_v31 = vand.u32 2147483647, %v2621_v42 }
 0xc9f   :  { %vm2590_vm1 = vcmp.ge.f32.partialorder %v8868_v43, 0.0  ;;  %v2598_v7 = vsub.f32 0.0, %v8868_v43  ;;  %vm2718_vm5 = vweird.f32 %v2621_v42  ;;  %v2843_v35 = vmul.f32 1.442695, %v2829_v51  ;;  %v3304_v51 = vld [vmem:[#allocation11 + $0x8] sm:$0xff] }
 0xca0   :  { %v2892_v3 = vmul.f32 %v2884_v28, %v2572_v10  ;;  %v2725_v14 = vor.u32 1.1754944e-38, %v2724_v39  ;;  %vm2723_vm10 = vcmp.eq.f32.partialorder %v2722_v31, 8.507059e+37 }
 0xca1   :  { %v2606_v13 = vsel %vm2590_vm1, %v8868_v43, %v2598_v7  ;;  %v3189_v43 = vld [vmem:[#allocation8] sm:$0xff] }
 0xca2   :  { %v2614_v40 = vmul.f32 0.3275911, %v2606_v13  ;;  %6328 = vmatmul.msk.f32.gmra.mxu3 %vm2903_vm4, %v2892_v3  ;;  %v2822_v12 = vsub.f32 0.0, %v2606_v13 }
 0xca4   :  { %v6891_v27 = vpop.eup %6890  ;;  %v2622_v32 = vadd.f32 1.0, %v2614_v40  ;;  %v2830_v49 = vmul.f32 %v2822_v12, %v2606_v13 }
 0xca5   :  { %v2714_v44 = vmul.f32 %v6891_v27, %v2621_v42  ;;  %vm2719_vm2 = vweird.f32 %v6891_v27 }
 0xca6   :  { %6892 = vrcp.f32 %v2622_v32  ;;  %vm2720_vm9 = vmor %vm2718_vm5, %vm2719_vm2  ;;  %v2739_v19 = vand.u32 2147483648, %v2622_v32  ;;  %v2737_v52 = vand.u32 2147483647, %v2622_v32  ;;  %vm2733_vm3 = vweird.f32 %v2622_v32 }
 0xca7   :  { %v2715_v33 = vsub.f32 1.0, %v2714_v44  ;;  %6894 = vpow2.f32 %v2843_v35  ;;  %v2845_v20 = vmul.f32 1.442695, %v2830_v49 }
 0xca8   :  { %v2740_v41 = vor.u32 1.1754944e-38, %v2739_v19  ;;  %vm2738_vm7 = vcmp.eq.f32.partialorder %v2737_v52, 8.507059e+37  ;;  %v3305_v19 = vld [vmem:[#allocation11 + $0x10] sm:$0xff]  ;;  %v3259_v52 = vld [vmem:[#allocation10 + $0x8] sm:$0xff] }
 0xca9   :  { %v2716_v16 = vmul.f32 %v6891_v27, %v2715_v33  ;;  %6896 = vpow2.f32 %v2845_v20  ;;  %3320 = vmatpush.msra.mxu2 %v3305_v19 }
 0xcab   :  { %v2717_v36 = vadd.f32 %v6891_v27, %v2716_v16  ;;  %v2573_v16 = vmul.f32 0.5, %v8850_v50  ;;  %v2574_v50 = vmul.f32 0.5, %v8864_v63  ;;  %3321 = vmatpush.msra.mxu2 %v3304_v51 }
 0xcac   :  { %v6893_v38 = vpop.eup %6892 }
 0xcad   :  { %v2721_v11 = vsel %vm2720_vm9, %v6891_v27, %v2717_v36  ;;  %v2729_v9 = vmul.f32 %v6893_v38, %v2622_v32  ;;  %vm2734_vm12 = vweird.f32 %v6893_v38  ;;  %v6895_v10 = vpop.eup %6894 }
 0xcae   :  { %v2726_v8 = vsel %vm2723_vm10, %v2725_v14, %v2721_v11  ;;  %vm2735_vm6 = vmor %vm2733_vm3, %vm2734_vm12 }
 0xcaf   :  { %v2749_v4 = vmul.f32 1.0614054, %v2726_v8  ;;  %v2730_v34 = vsub.f32 1.0, %v2729_v9  ;;  %v6897_v13 = vpop.eup %6896  ;;  %v3192_v9 = vld [vmem:[#allocation8 + $0x18] sm:$0xff] }
 0xcb0   :  { %3229 = vmatpush.msrb.mxu0 %v3192_v9 }
 0xcb1   :  { %v2757_v60 = vadd.f32 -1.4531521, %v2749_v4  ;;  %v2731_v62 = vmul.f32 %v6893_v38, %v2730_v34  ;;  %v3191_v4 = vld [vmem:[#allocation8 + $0x10] sm:$0xff] }
 0xcb2   :  { %v3260_v34 = vld [vmem:[#allocation10 + $0x10] sm:$0xff]  ;;  %3230 = vmatpush.msrb.mxu0 %v3191_v4 }
 0xcb3   :  { %v2765_v56 = vmul.f32 %v2757_v60, %v2726_v8  ;;  %v2732_v17 = vadd.f32 %v6893_v38, %v2731_v62  ;;  %v3190_v62 = vld [vmem:[#allocation8 + $0x8] sm:$0xff] }
 0xcb4   :  { %3231 = vmatpush.msrb.mxu0 %v3190_v62 }
 0xcb5   :  { %v2773_v26 = vadd.f32 1.4214138, %v2765_v56  ;;  %v2736_v5 = vsel %vm2735_vm6, %v6893_v38, %v2732_v17 }
 0xcb6   :  { %v2741_v23 = vsel %vm2738_vm7, %v2740_v41, %v2736_v5  ;;  %v3258_v41 = vld [vmem:[#allocation10] sm:$0xff]  ;;  %3232 = vmatpush.msrb.mxu0 %v3189_v43 }
 0xcb7   :  { %v2781_v1 = vmul.f32 %v2773_v26, %v2726_v8  ;;  %v2750_v15 = vmul.f32 1.0614054, %v2741_v23  ;;  %v3303_v26 = vld [vmem:[#allocation11] sm:$0xff] }
 0xcb8   :  { %3322 = vmatpush.msra.mxu2 %v3303_v26 }
 0xcb9   :  { %v2789_v61 = vadd.f32 -0.28449672, %v2781_v1  ;;  %v2758_v48 = vadd.f32 -1.4531521, %v2750_v15 }
 0xcbb   :  { %v2797_v25 = vmul.f32 %v2789_v61, %v2726_v8  ;;  %v2766_v53 = vmul.f32 %v2758_v48, %v2741_v23 }
 0xcbd   :  { %v2805_v54 = vadd.f32 0.2548296, %v2797_v25  ;;  %v2774_v42 = vadd.f32 1.4214138, %v2766_v53 }
 0xcbf   :  { %v2813_v29 = vmul.f32 %v2805_v54, %v2726_v8  ;;  %v2782_v7 = vmul.f32 %v2774_v42, %v2741_v23  ;;  %v3261_v8 = vld [vmem:[#allocation10 + $0x18] sm:$0xff] }
 0xcc0   :  { %3274 = vmatpush.msrb.mxu1 %v3261_v8 }
 0xcc1   :  { %v2853_v28 = vmul.f32 %v6895_v10, %v2813_v29  ;;  %v2790_v3 = vadd.f32 -0.28449672, %v2782_v7  ;;  %v8891_v7 = vld [vmem:[%s10108_s13] ss:$0 sm:$0xff] }
 0xcc2   :  { %3275 = vmatpush.msrb.mxu1 %v3260_v34 }
 0xcc3   :  { %v2861_v40 = vsub.f32 1.0, %v2853_v28  ;;  %v2798_v27 = vmul.f32 %v2790_v3, %v2741_v23  ;;  %v8894_v3 = vld [vmem:[%s10109_s28] ss:$0 sm:$0xff] }
 0xcc4   :  { %3276 = vmatpush.msrb.mxu1 %v3259_v52 }
 0xcc5   :  { %v2869_v32 = vsub.f32 0.0, %v2861_v40  ;;  %v2806_v44 = vadd.f32 0.2548296, %v2798_v27 }
 0xcc6   :  { %3277 = vmatpush.msrb.mxu1 %v3258_v41 }
 0xcc7   :  { %v2877_v33 = vsel %vm2589_vm15, %v2861_v40, %v2869_v32  ;;  %v2814_v39 = vmul.f32 %v2806_v44, %v2741_v23 }
 0xcc8   :  { %v2885_v31 = vadd.f32 1.0, %v2877_v33 }
 0xcc9   :  { %v2854_v36 = vmul.f32 %v6897_v13, %v2814_v39 }
 0xcca   :  { %v2893_v38 = vmul.f32 %v2885_v31, %v2573_v16 }
 0xccb   :  { %v2862_v14 = vsub.f32 1.0, %v2854_v36 }
 0xccc   :  { %6329 = vmatmul.msk.f32.gmra.mxu3 %vm2903_vm4, %v2893_v38 }
 0xccd   :  { %v2870_v11 = vsub.f32 0.0, %v2862_v14 }
 0xccf   :  { %v2878_v21 = vsel %vm2590_vm1, %v2862_v14, %v2870_v11 }
 0xcd0   :  { %v2886_v60 = vadd.f32 1.0, %v2878_v21 }
 0xcd2   :  { %v2894_v56 = vmul.f32 %v2886_v60, %v2574_v50 }
 0xcd3   :  { %v3041_v17 = vpop.xlane.xlu0 %3040 }
 0xcd4   :  { %v3063_v5 = vmul.f32 %v3041_v17, %v7668_v22  ;;  %6330 = vmatmul.msk.f32.gmra.mxu3 %vm2903_vm4, %v2894_v56 }
 0xcd6   :  { %v3071_v63 = vadd.f32 1e-05, %v3063_v5 }
 0xcd8   :  { %6898 = vrsqrt.f32 %v3071_v63  ;;  %vm3085_vm13 = vweird.f32 %v3071_v63 }
 0xcdb   :  { %v3044_v35 = vpop.xlane.xlu2 %3043 }
 0xcdc   :  { %v3064_v23 = vmul.f32 %v3044_v35, %v7668_v22 }
 0xcde   :  { %v6899_v12 = vpop.eup %6898  ;;  %v3072_v1 = vadd.f32 1e-05, %v3064_v23 }
 0xcdf   :  { %v3080_v15 = vmul.f32 %v6899_v12, %v3071_v63  ;;  %vm3086_vm8 = vweird.f32 %v6899_v12 }
 0xce0   :  { %6900 = vrsqrt.f32 %v3072_v1  ;;  %vm3087_vm14 = vmor %vm3085_vm13, %vm3086_vm8  ;;  %vm3095_vm1 = vweird.f32 %v3072_v1 }
 0xce1   :  { %v3081_v61 = vmul.f32 %v6899_v12, %v3080_v15 }
 0xce3   :  { %v3082_v48 = vmul.f32 0.5, %v3081_v61  ;;  %v3047_v49 = vpop.xlane.xlu1 %3046 }
 0xce4   :  { %v3065_v25 = vmul.f32 %v3047_v49, %v7668_v22 }
 0xce5   :  { %v3083_v53 = vsub.f32 1.5, %v3082_v48 }
 0xce6   :  { %v6901_v54 = vpop.eup %6900  ;;  %v3073_v42 = vadd.f32 1e-05, %v3065_v25 }
 0xce7   :  { %v3084_v20 = vmul.f32 %v6899_v12, %v3083_v53  ;;  %v3090_v29 = vmul.f32 %v6901_v54, %v3072_v1  ;;  %vm3096_vm15 = vweird.f32 %v6901_v54 }
 0xce8   :  { %6902 = vrsqrt.f32 %v3073_v42  ;;  %vm3097_vm2 = vmor %vm3095_vm1, %vm3096_vm15  ;;  %vm3105_vm9 = vweird.f32 %v3073_v42 }
 0xce9   :  { %v3088_v10 = vsel %vm3087_vm14, %v6899_v12, %v3084_v20  ;;  %v3091_v28 = vmul.f32 %v6901_v54, %v3090_v29 }
 0xcea   :  { %v3159_v40 = vmul.f32 %v3088_v10, %v8801_v58 }
 0xceb   :  { %v3092_v27 = vmul.f32 0.5, %v3091_v28  ;;  %v3050_v31 = vpop.xlane.xlu0 %3049 }
 0xcec   :  { %v3170_v32 = vmul.f32 %v8891_v7, %v3159_v40  ;;  %v3066_v36 = vmul.f32 %v3050_v31, %v7668_v22 }
 0xced   :  { %v3093_v44 = vsub.f32 1.5, %v3092_v27 }
 0xcee   :  { %v6903_v33 = vpop.eup %6902  ;;  %v3181_v39 = vadd.f32 %v8894_v3, %v3170_v32  ;;  %v3074_v11 = vadd.f32 1e-05, %v3066_v36 }
 0xcef   :  { %v3094_v13 = vmul.f32 %v6901_v54, %v3093_v44  ;;  %v3100_v16 = vmul.f32 %v6903_v33, %v3073_v42  ;;  %vm3106_vm5 = vweird.f32 %v6903_v33 }
 0xcf0   :  { %6331 = vmatmul.msk.f32.vlgmr.msrb.gmra.mxu0 %vm296_vm0, %v3181_v39  ;;  %6339 = vmatmul.msk.f32.vlgmr.msrb.gmra.mxu1 %vm296_vm0, %v3181_v39  ;;  %6904 = vrsqrt.f32 %v3074_v11  ;;  %vm3107_vm10 = vmor %vm3105_vm9, %vm3106_vm5  ;;  %vm3115_vm3 = vweird.f32 %v3074_v11 }
 0xcf1   :  { %v3098_v58 = vsel %vm3097_vm2, %v6901_v54, %v3094_v13  ;;  %v3101_v38 = vmul.f32 %v6903_v33, %v3100_v16  ;;  %6347 = vmatmul.msk.f32.vlgmr.msra.gmra.mxu2 %vm296_vm0, %v3181_v39 }
 0xcf2   :  { %v3160_v14 = vmul.f32 %v3098_v58, %v8808_v0 }
 0xcf3   :  { %v3102_v9 = vmul.f32 0.5, %v3101_v38 }
 0xcf4   :  { %v3171_v8 = vmul.f32 %v8891_v7, %v3160_v14 }
 0xcf5   :  { %v3103_v47 = vsub.f32 1.5, %v3102_v9 }
 0xcf6   :  { %v3182_v21 = vadd.f32 %v8894_v3, %v3171_v8  ;;  %v6905_v0 = vpop.eup %6904 }
 0xcf7   :  { %v3104_v4 = vmul.f32 %v6903_v33, %v3103_v47  ;;  %v3110_v50 = vmul.f32 %v6905_v0, %v3074_v11  ;;  %vm3116_vm12 = vweird.f32 %v6905_v0 }
 0xcf8   :  { %6332 = vmatmul.msk.f32.gmra.mxu0 %vm296_vm0, %v3182_v21  ;;  %6340 = vmatmul.msk.f32.gmra.mxu1 %vm296_vm0, %v3182_v21  ;;  %vm3117_vm6 = vmor %vm3115_vm3, %vm3116_vm12 }
 0xcf9   :  { %v3108_v34 = vsel %vm3107_vm10, %v6903_v33, %v3104_v4  ;;  %6348 = vmatmul.msk.f32.gmra.mxu2 %vm296_vm0, %v3182_v21  ;;  %v3111_v62 = vmul.f32 %v6905_v0, %v3110_v50 }
 0xcfa   :  { %v3161_v19 = vmul.f32 %v3108_v34, %v8829_v55 }
 0xcfb   :  { %v3112_v51 = vmul.f32 0.5, %v3111_v62 }
 0xcfc   :  { %v3172_v60 = vmul.f32 %v8891_v7, %v3161_v19 }
 0xcfd   :  { %v3113_v56 = vsub.f32 1.5, %v3112_v51 }
 0xcfe   :  { %v3183_v52 = vadd.f32 %v8894_v3, %v3172_v60 }
 0xcff   :  { %v3114_v17 = vmul.f32 %v6905_v0, %v3113_v56 }
 0xd00   :  { %6333 = vmatmul.msk.f32.gmra.mxu0 %vm296_vm0, %v3183_v52  ;;  %6341 = vmatmul.msk.f32.gmra.mxu1 %vm296_vm0, %v3183_v52 }
 0xd01   :  { %6349 = vmatmul.msk.f32.gmra.mxu2 %vm296_vm0, %v3183_v52  ;;  %v3118_v43 = vsel %vm3117_vm6, %v6905_v0, %v3114_v17 }
 0xd02   :  { %v3162_v55 = vmul.f32 %v3118_v43, %v8844_v57 }
 0xd04   :  { %v3173_v41 = vmul.f32 %v8891_v7, %v3162_v55 }
 0xd06   :  { %v3184_v26 = vadd.f32 %v8894_v3, %v3173_v41 }
 0xd08   :  { %6334 = vmatmul.msk.f32.gmra.mxu0 %vm296_vm0, %v3184_v26  ;;  %6342 = vmatmul.msk.f32.gmra.mxu1 %vm296_vm0, %v3184_v26 }
 0xd09   :  { %6350 = vmatmul.msk.f32.gmra.mxu2 %vm296_vm0, %v3184_v26 }
 0xd1d   :  { %v2957_v5 = vpop.f32.mrf.mxu3 }
 0xd1e   :  { %v2973_v63 = vadd.f32 %v2957_v5, %v8578_v18 }
 0xd20   :  { %v8923_v35 = vadd.f32 %v8758_v59, %v2973_v63 }
 0xd22   :  { %v3003_v23 = vsel %vm296_vm0, %v8923_v35, 0.0 }
 0xd23   :  { %3004 = vadd.xlane.f32.xlu2 %v3003_v23 }
 0xd25   :  { %v2960_v57 = vpop.f32.mrf.mxu3 }
 0xd26   :  { %v2974_v12 = vadd.f32 %v2960_v57, %v8584_v24 }
 0xd28   :  { %v8929_v1 = vadd.f32 %v8758_v59, %v2974_v12 }
 0xd2a   :  { %v3006_v15 = vsel %vm296_vm0, %v8929_v1, 0.0 }
 0xd2b   :  { %3007 = vadd.xlane.f32.xlu1 %v3006_v15 }
 0xd4f   :  { %v2963_v61 = vpop.f32.mrf.mxu3 }
 0xd50   :  { %v2975_v18 = vadd.f32 %v2963_v61, %v8592_v37 }
 0xd52   :  { %v8935_v48 = vadd.f32 %v8758_v59, %v2975_v18 }
 0xd54   :  { %v3009_v49 = vsel %vm296_vm0, %v8935_v48, 0.0 }
 0xd55   :  { %3010 = vadd.xlane.f32.xlu0 %v3009_v49 }
 0xd57   :  { %v2966_v25 = vpop.f32.mrf.mxu3 }
 0xd58   :  { %v2976_v24 = vadd.f32 %v2966_v25, %v8598_v30 }
 0xd5a   :  { %v8941_v53 = vadd.f32 %v8758_v59, %v2976_v24 }
 0xd5c   :  { %v3012_v54 = vsel %vm296_vm0, %v8941_v53, 0.0 }
 0xd5d   :  { %3013 = vadd.xlane.f32.xlu2 %v3012_v54 }
 0xd6d   :  { %v8945_v42 = vpop.f32.mrf.mxu1  ;;  %v8966_v40 = vpop.f32.mrf.mxu0 }
 0xd74   :  { %v8947_v37 = vpop.f32.mrf.mxu2 }
 0xd75   :  { %v8949_v20 = vpop.f32.mrf.mxu1  ;;  %v8981_v33 = vpop.f32.mrf.mxu0 }
 0xd7c   :  { %v8951_v29 = vpop.f32.mrf.mxu2 }
 0xd7d   :  { %v8953_v10 = vpop.f32.mrf.mxu1  ;;  %v8994_v38 = vpop.f32.mrf.mxu0 }
 0xd84   :  { %v8955_v28 = vpop.f32.mrf.mxu2 }
 0xd85   :  { %v8957_v30 = vpop.f32.mrf.mxu1  ;;  %v8999_v11 = vpop.f32.mrf.mxu0 }
 0xd86   :  { %6355 = vmatpush.xpose.msk.msrb.mxu3 %vm665_vm11, %v8957_v30 }
 0xd8a   :  { %6356 = vmatpush.xpose.msk.msrb.mxu3 %vm665_vm11, %v8953_v10 }
 0xd8c   :  { %v8963_v59 = vpop.f32.mrf.mxu2 }
 0xd8d   :  { %3477 = vmatpush.msra.mxu0 %v8963_v59 }
 0xd8e   :  { %6357 = vmatpush.xpose.msk.msrb.mxu3 %vm665_vm11, %v8949_v20 }
 0xd8f   :  { %3478 = vmatpush.msra.mxu0 %v8955_v28 }
 0xd91   :  { %3479 = vmatpush.msra.mxu0 %v8951_v29 }
 0xd92   :  { %6358 = vmatpush.xpose.msk.msrb.mxu3 %vm665_vm11, %v8945_v42 }
 0xd93   :  { %3480 = vmatpush.msra.mxu0 %v8947_v37 }
 0xd95   :  { %6359 = vmatmul.msk.f32.vlgmr.msrb.gmra.mxu3 %vm665_vm11, %v8966_v40 }
 0xd96   :  { %v3005_v27 = vpop.xlane.xlu2 %3004 }
 0xd97   :  { %v3019_v32 = vmul.f32 %v3005_v27, %v7668_v22 }
 0xd99   :  { %v8979_v44 = vsub.f32 %v8923_v35, %v3019_v32 }
 0xd9b   :  { %v3035_v39 = vmul.f32 %v8979_v44, %v8979_v44 }
 0xd9d   :  { %v3051_v13 = vsel %vm296_vm0, %v3035_v39, 0.0  ;;  %6360 = vmatmul.msk.f32.gmra.mxu3 %vm665_vm11, %v8981_v33 }
 0xd9e   :  { %v3008_v16 = vpop.xlane.xlu1 %3007  ;;  %3052 = vadd.xlane.f32.xlu1 %v3051_v13 }
 0xd9f   :  { %v3020_v31 = vmul.f32 %v3008_v16, %v7668_v22 }
 0xda1   :  { %v8990_v36 = vsub.f32 %v8929_v1, %v3020_v31 }
 0xda3   :  { %v3036_v58 = vmul.f32 %v8990_v36, %v8990_v36 }
 0xda5   :  { %v3054_v14 = vsel %vm296_vm0, %v3036_v58, 0.0  ;;  %6361 = vmatmul.msk.f32.gmra.mxu3 %vm665_vm11, %v8994_v38 }
 0xda6   :  { %3055 = vadd.xlane.f32.xlu0 %v3054_v14 }
 0xdad   :  { %6362 = vmatmul.msk.f32.gmra.mxu3 %vm665_vm11, %v8999_v11 }
 0xdba   :  { %3508 = vrot.lane.b32.xlu0 %v8957_v30, %s7385_s5 }
 0xdc2   :  { %3502 = vrot.lane.b32.xlu0 %v8945_v42, %s7385_s5 }
 0xdc8   :  { %v3011_v9 = vpop.xlane.xlu0 %3010 }
 0xdc9   :  { %v3021_v8 = vmul.f32 %v3011_v9, %v7668_v22 }
 0xdca   :  { %3496 = vrot.lane.b32.xlu0 %v8981_v33, %s7385_s5 }
 0xdcb   :  { %v9009_v47 = vsub.f32 %v8935_v48, %v3021_v8 }
 0xdcd   :  { %v3037_v21 = vmul.f32 %v9009_v47, %v9009_v47 }
 0xdcf   :  { %v3057_v4 = vsel %vm296_vm0, %v3037_v21, 0.0 }
 0xdd0   :  { %3058 = vadd.xlane.f32.xlu2 %v3057_v4  ;;  %v3014_v34 = vpop.xlane.xlu2 %3013 }
 0xdd1   :  { %v3022_v0 = vmul.f32 %v3014_v34, %v7668_v22 }
 0xdd2   :  { %3498 = vrot.lane.b32.xlu0 %v8994_v38, %s7385_s5 }
 0xdd3   :  { %v9018_v19 = vsub.f32 %v8941_v53, %v3022_v0 }
 0xdd5   :  { %v3038_v50 = vmul.f32 %v9018_v19, %v9018_v19 }
 0xdd7   :  { %v3060_v60 = vsel %vm296_vm0, %v3038_v50, 0.0 }
 0xdd8   :  { %3061 = vadd.xlane.f32.xlu1 %v3060_v60 }
 0xdda   :  { %3500 = vrot.lane.b32.xlu0 %v8999_v11, %s7385_s5 }
 0xde2   :  { %3746 = vrot.lane.b32.xlu0 %v8994_v38, %s7386_s9 }
 0xde8   :  { %3506 = vrot.lane.b32.xlu2 %v8953_v10, %s7385_s5 }
 0xdf0   :  { %3494 = vrot.lane.b32.xlu2 %v8966_v40, %s7385_s5 }
 0xdf1   :  { %3504 = vrot.lane.b32.xlu1 %v8949_v20, %s7385_s5 }
 0xdf8   :  { %3754 = vrot.lane.b32.xlu2 %v8953_v10, %s7386_s9 }
 0xdf9   :  { %3756 = vrot.lane.b32.xlu1 %v8957_v30, %s7386_s9 }
 0xe00   :  { %3750 = vrot.lane.b32.xlu2 %v8945_v42, %s7386_s9 }
 0xe01   :  { %3752 = vrot.lane.b32.xlu1 %v8949_v20, %s7386_s9 }
 0xe08   :  { %3744 = vrot.lane.b32.xlu2 %v8981_v33, %s7386_s9 }
 0xe09   :  { %3742 = vrot.lane.b32.xlu1 %v8966_v40, %s7386_s9 }
 0xe11   :  { %3748 = vrot.lane.b32.xlu1 %v8999_v11, %s7386_s9  ;;  %v3053_v62 = vpop.xlane.xlu1 %3052 }
 0xe12   :  { %v3067_v52 = vmul.f32 %v3053_v62, %v7668_v22 }
 0xe14   :  { %v3075_v51 = vadd.f32 1e-05, %v3067_v52 }
 0xe16   :  { %6906 = vrsqrt.f32 %v3075_v51  ;;  %vm3125_vm8 = vweird.f32 %v3075_v51 }
 0xe19   :  { %v3056_v56 = vpop.xlane.xlu0 %3055 }
 0xe1a   :  { %v3068_v17 = vmul.f32 %v3056_v56, %v7668_v22 }
 0xe1c   :  { %v6907_v43 = vpop.eup %6906  ;;  %v3076_v55 = vadd.f32 1e-05, %v3068_v17 }
 0xe1d   :  { %v3120_v41 = vmul.f32 %v6907_v43, %v3075_v51  ;;  %vm3126_vm7 = vweird.f32 %v6907_v43 }
 0xe1e   :  { %6908 = vrsqrt.f32 %v3076_v55  ;;  %vm3127_vm13 = vmor %vm3125_vm8, %vm3126_vm7  ;;  %vm3135_vm15 = vweird.f32 %v3076_v55 }
 0xe1f   :  { %v3121_v26 = vmul.f32 %v6907_v43, %v3120_v41 }
 0xe21   :  { %v3122_v5 = vmul.f32 0.5, %v3121_v26 }
 0xe23   :  { %v3123_v63 = vsub.f32 1.5, %v3122_v5 }
 0xe24   :  { %v6909_v23 = vpop.eup %6908 }
 0xe25   :  { %v3124_v57 = vmul.f32 %v6907_v43, %v3123_v63  ;;  %v3130_v12 = vmul.f32 %v6909_v23, %v3076_v55  ;;  %vm3136_vm14 = vweird.f32 %v6909_v23 }
 0xe26   :  { %vm3137_vm1 = vmor %vm3135_vm15, %vm3136_vm14 }
 0xe27   :  { %v3128_v15 = vsel %vm3127_vm13, %v6907_v43, %v3124_v57  ;;  %v3131_v61 = vmul.f32 %v6909_v23, %v3130_v12 }
 0xe28   :  { %v3163_v18 = vmul.f32 %v3128_v15, %v8979_v44 }
 0xe29   :  { %v3132_v49 = vmul.f32 0.5, %v3131_v61 }
 0xe2a   :  { %v3174_v25 = vmul.f32 %v8891_v7, %v3163_v18 }
 0xe2b   :  { %v3133_v24 = vsub.f32 1.5, %v3132_v49 }
 0xe2c   :  { %v3509_v54 = vpop.permute.xlu0 %3508  ;;  %v3185_v27 = vadd.f32 %v8894_v3, %v3174_v25 }
 0xe2d   :  { %v3134_v32 = vmul.f32 %v6909_v23, %v3133_v24  ;;  %6367 = vmatpush.xpose.msk.msra.mxu1 %vm665_vm11, %v3509_v54 }
 0xe2e   :  { %6335 = vmatmul.msk.f32.gmra.mxu0 %vm296_vm0, %v3185_v27  ;;  %6343 = vmatmul.msk.f32.gmra.mxu1 %vm296_vm0, %v3185_v27 }
 0xe2f   :  { %v3138_v39 = vsel %vm3137_vm1, %v6909_v23, %v3134_v32  ;;  %6351 = vmatmul.msk.f32.gmra.mxu2 %vm296_vm0, %v3185_v27 }
 0xe30   :  { %v3164_v44 = vmul.f32 %v3138_v39, %v8990_v36 }
 0xe32   :  { %v3175_v13 = vmul.f32 %v8891_v7, %v3164_v44 }
 0xe34   :  { %v3186_v16 = vadd.f32 %v8894_v3, %v3175_v13  ;;  %v3503_v57 = vpop.permute.xlu0 %3502 }
 0xe36   :  { %6336 = vmatmul.msk.f32.gmra.mxu0 %vm296_vm0, %v3186_v16  ;;  %6344 = vmatmul.msk.f32.gmra.mxu1 %vm296_vm0, %v3186_v16 }
 0xe37   :  { %6352 = vmatmul.msk.f32.gmra.mxu2 %vm296_vm0, %v3186_v16 }
 0xe43   :  { %v3059_v31 = vpop.xlane.xlu2 %3058 }
 0xe44   :  { %v3069_v58 = vmul.f32 %v3059_v31, %v7668_v22 }
 0xe46   :  { %v3077_v14 = vadd.f32 1e-05, %v3069_v58 }
 0xe48   :  { %6910 = vrsqrt.f32 %v3077_v14  ;;  %vm3145_vm5 = vweird.f32 %v3077_v14 }
 0xe4b   :  { %v3062_v9 = vpop.xlane.xlu1 %3061  ;;  %v3507_v8 = vpop.permute.xlu2 %3506 }
 0xe4c   :  { %v3070_v21 = vmul.f32 %v3062_v9, %v7668_v22  ;;  %6368 = vmatpush.xpose.msk.msra.mxu1 %vm665_vm11, %v3507_v8 }
 0xe4e   :  { %v6911_v36 = vpop.eup %6910  ;;  %v3078_v4 = vadd.f32 1e-05, %v3070_v21 }
 0xe4f   :  { %v3140_v34 = vmul.f32 %v6911_v36, %v3077_v14  ;;  %vm3146_vm2 = vweird.f32 %v6911_v36 }
 0xe50   :  { %6912 = vrsqrt.f32 %v3078_v4  ;;  %vm3147_vm9 = vmor %vm3145_vm5, %vm3146_vm2  ;;  %vm3155_vm12 = vweird.f32 %v3078_v4 }
 0xe51   :  { %v3141_v0 = vmul.f32 %v6911_v36, %v3140_v34 }
 0xe53   :  { %v3142_v50 = vmul.f32 0.5, %v3141_v0  ;;  %v3495_v12 = vpop.permute.xlu2 %3494 }
 0xe55   :  { %v3143_v60 = vsub.f32 1.5, %v3142_v50 }
 0xe56   :  { %v6913_v62 = vpop.eup %6912 }
 0xe57   :  { %v3144_v52 = vmul.f32 %v6911_v36, %v3143_v60  ;;  %v3150_v51 = vmul.f32 %v6913_v62, %v3078_v4  ;;  %vm3156_vm10 = vweird.f32 %v6913_v62 }
 0xe58   :  { %vm3157_vm3 = vmor %vm3155_vm12, %vm3156_vm10 }
 0xe59   :  { %v3148_v56 = vsel %vm3147_vm9, %v6911_v36, %v3144_v52  ;;  %v3151_v17 = vmul.f32 %v6913_v62, %v3150_v51 }
 0xe5a   :  { %v3165_v43 = vmul.f32 %v3148_v56, %v9009_v47 }
 0xe5b   :  { %v3152_v55 = vmul.f32 0.5, %v3151_v17  ;;  %v3755_v25 = vpop.permute.xlu2 %3754 }
 0xe5c   :  { %v3176_v41 = vmul.f32 %v8891_v7, %v3165_v43 }
 0xe5d   :  { %v3153_v26 = vsub.f32 1.5, %v3152_v55 }
 0xe5e   :  { %v3187_v5 = vadd.f32 %v8894_v3, %v3176_v41 }
 0xe5f   :  { %v3154_v63 = vmul.f32 %v6913_v62, %v3153_v26 }
 0xe60   :  { %6337 = vmatmul.msk.f32.gmra.mxu0 %vm296_vm0, %v3187_v5  ;;  %6345 = vmatmul.msk.f32.gmra.mxu1 %vm296_vm0, %v3187_v5 }
 0xe61   :  { %v3158_v23 = vsel %vm3157_vm3, %v6913_v62, %v3154_v63  ;;  %6353 = vmatmul.msk.f32.gmra.mxu2 %vm296_vm0, %v3187_v5 }
 0xe62   :  { %v3166_v47 = vmul.f32 %v3158_v23, %v9018_v19  ;;  %v3497_v19 = vpop.permute.xlu0 %3496 }
 0xe63   :  { %v3505_v15 = vpop.permute.xlu1 %3504  ;;  %v3751_v24 = vpop.permute.xlu2 %3750 }
 0xe64   :  { %6369 = vmatpush.xpose.msk.msra.mxu1 %vm665_vm11, %v3505_v15  ;;  %v3177_v61 = vmul.f32 %v8891_v7, %v3166_v47 }
 0xe66   :  { %v3188_v18 = vadd.f32 %v8894_v3, %v3177_v61 }
 0xe68   :  { %6338 = vmatmul.msk.f32.gmra.mxu0 %vm296_vm0, %v3188_v18  ;;  %6346 = vmatmul.msk.f32.gmra.mxu1 %vm296_vm0, %v3188_v18 }
 0xe69   :  { %6354 = vmatmul.msk.f32.gmra.mxu2 %vm296_vm0, %v3188_v18  ;;  %6370 = vmatpush.xpose.msk.msra.mxu1 %vm665_vm11, %v3503_v57 }
 0xe6a   :  { %v3499_v3 = vpop.permute.xlu0 %3498 }
 0xe6b   :  { %v3757_v49 = vpop.permute.xlu1 %3756  ;;  %v3745_v32 = vpop.permute.xlu2 %3744 }
 0xe6c   :  { %6387 = vmatpush.xpose.msk.msrb.mxu2 %vm665_vm11, %v3757_v49  ;;  %v9131_v49 = vpack.i.bf16 %v8955_v28, %v8963_v59 }
 0xe70   :  { %6371 = vmatmul.msk.f32.vlgmr.msra.gmra.mxu1 %vm665_vm11, %v3495_v12  ;;  %6388 = vmatpush.xpose.msk.msrb.mxu2 %vm665_vm11, %v3755_v25 }
 0xe72   :  { %v3501_v27 = vpop.permute.xlu0 %3500 }
 0xe73   :  { %v3753_v7 = vpop.permute.xlu1 %3752 }
 0xe74   :  { %6389 = vmatpush.xpose.msk.msrb.mxu2 %vm665_vm11, %v3753_v7 }
 0xe78   :  { %6372 = vmatmul.msk.f32.gmra.mxu1 %vm665_vm11, %v3497_v19  ;;  %6390 = vmatpush.xpose.msk.msrb.mxu2 %vm665_vm11, %v3751_v24 }
 0xe7a   :  { %v3747_v39 = vpop.permute.xlu0 %3746 }
 0xe7b   :  { %v3743_v54 = vpop.permute.xlu1 %3742 }
 0xe7c   :  { %6391 = vmatmul.msk.f32.vlgmr.msrb.gmra.mxu2 %vm665_vm11, %v3743_v54 }
 0xe80   :  { %6373 = vmatmul.msk.f32.gmra.mxu1 %vm665_vm11, %v3499_v3 }
 0xe83   :  { %v3749_v44 = vpop.permute.xlu1 %3748 }
 0xe84   :  { %6392 = vmatmul.msk.f32.gmra.mxu2 %vm665_vm11, %v3745_v32 }
 0xe88   :  { %6374 = vmatmul.msk.f32.gmra.mxu1 %vm665_vm11, %v3501_v27 }
 0xe8c   :  { %6393 = vmatmul.msk.f32.gmra.mxu2 %vm665_vm11, %v3747_v39 }
 0xe94   :  { %6394 = vmatmul.msk.f32.gmra.mxu2 %vm665_vm11, %v3749_v44  ;;  %v9145_v44 = vpack.i.bf16 %v8947_v37, %v8951_v29  ;;  %v3393_v37 = vpop.f32.mrf.mxu3 }
 0xeab   :  { %v9093_v13 = vpop.f32.mrf.mxu1 }
 0xeb2   :  { %v9097_v31 = vpop.f32.mrf.mxu2 }
 0xeb3   :  { %v9095_v16 = vpop.f32.mrf.mxu1 }
 0xeba   :  { %v9101_v14 = vpop.f32.mrf.mxu2 }
 0xedd   :  { %v9099_v58 = vpop.f32.mrf.mxu1 }
 0xee4   :  { %v9105_v8 = vpop.f32.mrf.mxu2 }
 0xee5   :  { %v9103_v9 = vpop.f32.mrf.mxu1 }
 0xeec   :  { %v9108_v50 = vpop.f32.mrf.mxu2 }
 0xeed   :  { %v3543_v21 = vpop.f32.mrf.mxu1 }
 0xeee   :  { %v3555_v36 = vmul.f32 0.35355338, %v3543_v21 }
 0xef0   :  { %v3559_v4 = vsel %vm296_vm0, %v3555_v36, -inf }
 0xef1   :  { %3560 = vmax.xlane.f32.xlu2 %v3559_v4 }
 0xef5   :  { %v3546_v34 = vpop.f32.mrf.mxu1 }
 0xef6   :  { %v3556_v0 = vmul.f32 0.35355338, %v3546_v34 }
 0xef8   :  { %v3562_v60 = vsel %vm296_vm0, %v3556_v0, -inf }
 0xef9   :  { %3563 = vmax.xlane.f32.xlu0 %v3562_v60 }
 0xefd   :  { %v3549_v43 = vpop.f32.mrf.mxu1 }
 0xefe   :  { %v3557_v41 = vmul.f32 0.35355338, %v3549_v43 }
 0xeff   :  { %v3791_v62 = vpop.f32.mrf.mxu2 }
 0xf00   :  { %v9111_v52 = vmul.f32 0.35355338, %v3791_v62  ;;  %v3565_v63 = vsel %vm296_vm0, %v3557_v41, -inf }
 0xf02   :  { %v3807_v51 = vsel %vm296_vm0, %v9111_v52, -inf }
 0xf03   :  { %3808 = vmax.xlane.f32.xlu0 %v3807_v51 }
 0xf05   :  { %v3552_v57 = vpop.f32.mrf.mxu1 }
 0xf06   :  { %v3558_v47 = vmul.f32 0.35355338, %v3552_v57  ;;  %v3396_v57 = vpop.f32.mrf.mxu3 }
 0xf07   :  { %v3794_v56 = vpop.f32.mrf.mxu2 }
 0xf08   :  { %v9115_v17 = vmul.f32 0.35355338, %v3794_v56  ;;  %v3568_v12 = vsel %vm296_vm0, %v3558_v47, -inf }
 0xf0a   :  { %v3810_v55 = vsel %vm296_vm0, %v9115_v17, -inf }
 0xf0b   :  { %3811 = vmax.xlane.f32.xlu1 %v3810_v55 }
 0xf0f   :  { %v3797_v26 = vpop.f32.mrf.mxu2 }
 0xf10   :  { %v9119_v5 = vmul.f32 0.35355338, %v3797_v26  ;;  %v9158_v26 = vmul.f32 0.35355338, %v3393_v37 }
 0xf12   :  { %v3813_v23 = vsel %vm296_vm0, %v9119_v5, -inf }
 0xf13   :  { %3566 = vmax.xlane.f32.xlu1 %v3565_v63  ;;  %3814 = vmax.xlane.f32.xlu2 %v3813_v23 }
 0xf17   :  { %v3800_v15 = vpop.f32.mrf.mxu2 }
 0xf18   :  { %v9125_v61 = vmul.f32 0.35355338, %v3800_v15  ;;  %v3409_v15 = vsel %vm296_vm0, %v9158_v26, -inf }
 0xf1a   :  { %v3816_v18 = vsel %vm296_vm0, %v9125_v61, -inf }
 0xf1b   :  { %3569 = vmax.xlane.f32.xlu2 %v3568_v12 }
 0xf23   :  { %3817 = vmax.xlane.f32.xlu2 %v3816_v18 }
 0xf2c   :  { %6626 = vrot.lane.b32.xlu1 %v9131_v49, %s7385_s5 }
 0xf64   :  { %v3561_v19 = vpop.xlane.xlu2 %3560 }
 0xf65   :  { %v3571_v25 = vsub.f32 %v3555_v36, %v3561_v19  ;;  %v9163_v19 = vmul.f32 0.35355338, %v3396_v57 }
 0xf67   :  { %v3575_v7 = vmul.f32 1.442695, %v3571_v25 }
 0xf69   :  { %6914 = vpow2.f32 %v3575_v7  ;;  %v3412_v7 = vsel %vm296_vm0, %v9163_v19, -inf }
 0xf6c   :  { %v3564_v3 = vpop.xlane.xlu0 %3563 }
 0xf6d   :  { %v3572_v24 = vsub.f32 %v3556_v0, %v3564_v3 }
 0xf6f   :  { %v9135_v54 = vpop.eup %6914  ;;  %v3577_v27 = vmul.f32 1.442695, %v3572_v24  ;;  %v3399_v24 = vpop.f32.mrf.mxu3 }
 0xf70   :  { %v3583_v32 = vsel %vm296_vm0, %v9135_v54, 0.0 }
 0xf71   :  { %6916 = vpow2.f32 %v3577_v27  ;;  %3584 = vadd.xlane.f32.xlu0 %v3583_v32  ;;  %v9172_v32 = vmul.f32 0.35355338, %v3399_v24 }
 0xf76   :  { %v3809_v43 = vpop.xlane.xlu0 %3808 }
 0xf77   :  { %v9139_v39 = vpop.eup %6916 }
 0xf78   :  { %v3586_v28 = vsel %vm296_vm0, %v9139_v39, 0.0 }
 0xf79   :  { %3587 = vadd.xlane.f32.xlu2 %v3586_v28 }
 0xf7e   :  { %v3812_v59 = vpop.xlane.xlu1 %3811 }
 0xf85   :  { %6631 = vrot.lane.b32.xlu0 %v9145_v44, %s7385_s5 }
 0xf86   :  { %v3567_v21 = vpop.xlane.xlu1 %3566  ;;  %v3815_v36 = vpop.xlane.xlu2 %3814 }
 0xf87   :  { %v3573_v4 = vsub.f32 %v3557_v41, %v3567_v21  ;;  %v3819_v41 = vsub.f32 %v9111_v52, %v3809_v43  ;;  %v3821_v18 = vsub.f32 %v9119_v5, %v3815_v36  ;;  %v3415_v21 = vsel %vm296_vm0, %v9172_v32, -inf }
 0xf89   :  { %v3579_v34 = vmul.f32 1.442695, %v3573_v4  ;;  %v3827_v25 = vmul.f32 1.442695, %v3821_v18 }
 0xf8b   :  { %6918 = vpow2.f32 %v3579_v34 }
 0xf8e   :  { %v3570_v0 = vpop.xlane.xlu2 %3569 }
 0xf8f   :  { %v3574_v60 = vsub.f32 %v3558_v47, %v3570_v0  ;;  %v3823_v47 = vmul.f32 1.442695, %v3819_v41  ;;  %v3402_v0 = vpop.f32.mrf.mxu3 }
 0xf91   :  { %v9149_v62 = vpop.eup %6918  ;;  %v3581_v51 = vmul.f32 1.442695, %v3574_v60  ;;  %v9188_v60 = vmul.f32 0.35355338, %v3402_v0 }
 0xf92   :  { %v3589_v56 = vsel %vm296_vm0, %v9149_v62, 0.0 }
 0xf93   :  { %6920 = vpow2.f32 %v3581_v51  ;;  %3590 = vadd.xlane.f32.xlu2 %v3589_v56  ;;  %v3418_v51 = vsel %vm296_vm0, %v9188_v60, -inf  ;;  %v3820_v56 = vsub.f32 %v9115_v17, %v3812_v59 }
 0xf94   :  { %6922 = vpow2.f32 %v3823_v47 }
 0xf95   :  { %6924 = vpow2.f32 %v3827_v25  ;;  %v3825_v37 = vmul.f32 1.442695, %v3820_v56 }
 0xf96   :  { %v3818_v52 = vpop.xlane.xlu2 %3817 }
 0xf97   :  { %v3822_v27 = vsub.f32 %v9125_v61, %v3818_v52 }
 0xf99   :  { %v9153_v29 = vpop.eup %6920  ;;  %v3829_v28 = vmul.f32 1.442695, %v3822_v27 }
 0xf9a   :  { %v3592_v55 = vsel %vm296_vm0, %v9153_v29, 0.0  ;;  %v9167_v3 = vpop.eup %6922 }
 0xf9b   :  { %3593 = vadd.xlane.f32.xlu1 %v3592_v55  ;;  %v3831_v5 = vsel %vm296_vm0, %v9167_v3, 0.0  ;;  %v9178_v36 = vpop.eup %6924  ;;  %6926 = vpow2.f32 %v3829_v28 }
 0xf9c   :  { %v3837_v61 = vsel %vm296_vm0, %v9178_v36, 0.0  ;;  %6928 = vpow2.f32 %v3825_v37 }
 0xf9e   :  { %v6627_v63 = vpop.permute.xlu1 %6626 }
 0xf9f   :  { %v6628_v23 = vunpack.i.l.bf16 %v6627_v63  ;;  %v6629_v12 = vunpack.i.h.bf16 %v6627_v63 }
 0xfa1   :  { %3643 = vmatpush.msra.mxu3 %v6628_v23  ;;  %v9184_v4 = vpop.eup %6926 }
 0xfa2   :  { %v3840_v34 = vsel %vm296_vm0, %v9184_v4, 0.0  ;;  %v9193_v43 = vpop.eup %6928 }
 0xfa3   :  { %3644 = vmatpush.msra.mxu3 %v6629_v12  ;;  %3410 = vmax.xlane.f32.xlu1 %v3409_v15  ;;  %v3834_v55 = vsel %vm296_vm0, %v9193_v43, 0.0 }
 0xfab   :  { %6636 = vrot.lane.b32.xlu2 %v9131_v49, %s7386_s9  ;;  %3413 = vmax.xlane.f32.xlu1 %v3412_v7 }
 0xfaf   :  { %3832 = vadd.xlane.f32.xlu0 %v3831_v5 }
 0xfb3   :  { %6641 = vrot.lane.b32.xlu2 %v9145_v44, %s7386_s9  ;;  %3416 = vmax.xlane.f32.xlu1 %v3415_v21 }
 0xfb7   :  { %3838 = vadd.xlane.f32.xlu0 %v3837_v61 }
 0xfbf   :  { %3841 = vadd.xlane.f32.xlu0 %v3840_v34 }
 0xfc7   :  { %3419 = vmax.xlane.f32.xlu0 %v3418_v51 }
 0xfdc   :  { %3835 = vadd.xlane.f32.xlu2 %v3834_v55 }
 0xfe4   :  { %v3585_v41 = vpop.xlane.xlu0 %3584 }
 0xfe5   :  { %6930 = vrcp.f32 %v3585_v41 }
 0xfeb   :  { %v6931_v57 = vpop.eup %6930 }
 0xfec   :  { %v3588_v63 = vpop.xlane.xlu2 %3587  ;;  %v3599_v15 = vmul.f32 %v6931_v57, %v9135_v54 }
 0xfed   :  { %6932 = vrcp.f32 %v3588_v63 }
 0xff3   :  { %v6933_v17 = vpop.eup %6932 }
 0xff4   :  { %v3600_v59 = vmul.f32 %v6933_v17, %v9139_v39 }
 0xff7   :  { %v6632_v23 = vpop.permute.xlu0 %6631 }
 0xff8   :  { %v6633_v47 = vunpack.i.l.bf16 %v6632_v23  ;;  %v6634_v12 = vunpack.i.h.bf16 %v6632_v23 }
 0xffa   :  { %3645 = vmatpush.msra.mxu3 %v6633_v47 }
 0xffc   :  { %3646 = vmatpush.msra.mxu3 %v6634_v12 }
 0xffd   :  { %6375 = vmatmul.msk.f32.vlgmr.msra.gmra.mxu3 %vm296_vm0, %v3599_v15 }
0x1005   :  { %6376 = vmatmul.msk.f32.gmra.mxu3 %vm296_vm0, %v3600_v59 }
0x1006   :  { %v3591_v18 = vpop.xlane.xlu2 %3590 }
0x1007   :  { %6934 = vrcp.f32 %v3591_v18 }
0x100d   :  { %v6935_v25 = vpop.eup %6934 }
0x100e   :  { %v3594_v52 = vpop.xlane.xlu1 %3593  ;;  %v6637_v7 = vpop.permute.xlu2 %6636  ;;  %v3601_v24 = vmul.f32 %v6935_v25, %v9149_v62 }
0x100f   :  { %6936 = vrcp.f32 %v3594_v52  ;;  %v6638_v27 = vunpack.i.l.bf16 %v6637_v7  ;;  %v6639_v54 = vunpack.i.h.bf16 %v6637_v7 }
0x1010   :  { %6377 = vmatmul.msk.f32.gmra.mxu3 %vm296_vm0, %v3601_v24 }
0x1011   :  { %3887 = vmatpush.msrb.mxu3 %v6638_v27 }
0x1013   :  { %3888 = vmatpush.msrb.mxu3 %v6639_v54 }
0x1015   :  { %v6937_v5 = vpop.eup %6936 }
0x1016   :  { %v3411_v28 = vpop.xlane.xlu1 %3410  ;;  %v6642_v21 = vpop.permute.xlu2 %6641  ;;  %v3602_v39 = vmul.f32 %v6937_v5, %v9153_v29 }
0x1017   :  { %v3421_v61 = vsub.f32 %v9158_v26, %v3411_v28  ;;  %v6643_v34 = vunpack.i.l.bf16 %v6642_v21  ;;  %v6644_v51 = vunpack.i.h.bf16 %v6642_v21 }
0x1018   :  { %6378 = vmatmul.msk.f32.gmra.mxu3 %vm296_vm0, %v3602_v39 }
0x1019   :  { %v3425_v0 = vmul.f32 1.442695, %v3421_v61  ;;  %3889 = vmatpush.msrb.mxu3 %v6643_v34 }
0x101b   :  { %6938 = vpow2.f32 %v3425_v0  ;;  %3890 = vmatpush.msrb.mxu3 %v6644_v51 }
0x101e   :  { %v3414_v62 = vpop.xlane.xlu1 %3413 }
0x101f   :  { %v3422_v56 = vsub.f32 %v9163_v19, %v3414_v62 }
0x1021   :  { %v6939_v37 = vpop.eup %6938  ;;  %v3427_v55 = vmul.f32 1.442695, %v3422_v56 }
0x1022   :  { %v3833_v41 = vpop.xlane.xlu0 %3832  ;;  %v3433_v63 = vsel %vm296_vm0, %v6939_v37, 0.0 }
0x1023   :  { %6940 = vpow2.f32 %v3427_v55  ;;  %3434 = vadd.xlane.f32.xlu1 %v3433_v63 }
0x1024   :  { %6942 = vrcp.f32 %v3833_v41 }
0x1026   :  { %v3417_v29 = vpop.xlane.xlu1 %3416 }
0x1027   :  { %v3423_v26 = vsub.f32 %v9172_v32, %v3417_v29 }
0x1029   :  { %v6941_v23 = vpop.eup %6940  ;;  %v3429_v57 = vmul.f32 1.442695, %v3423_v26 }
0x102a   :  { %v6943_v47 = vpop.eup %6942  ;;  %v3839_v12 = vpop.xlane.xlu0 %3838  ;;  %v3436_v15 = vsel %vm296_vm0, %v6941_v23, 0.0 }
0x102b   :  { %v3847_v17 = vmul.f32 %v6943_v47, %v9167_v3  ;;  %6944 = vpow2.f32 %v3429_v57  ;;  %3437 = vadd.xlane.f32.xlu0 %v3436_v15  ;;  %v9262_v57 = vpop.f32.mrf.mxu0 }
0x102d   :  { %6395 = vmatmul.msk.f32.vlgmr.msrb.gmra.mxu3 %vm296_vm0, %v3847_v17 }
0x1031   :  { %v6945_v19 = vpop.eup %6944 }
0x1032   :  { %v3842_v59 = vpop.xlane.xlu0 %3841  ;;  %v3439_v18 = vsel %vm296_vm0, %v6945_v19, 0.0 }
0x1033   :  { %3440 = vadd.xlane.f32.xlu1 %v3439_v18 }
0x103a   :  { %v3420_v25 = vpop.xlane.xlu0 %3419 }
0x103b   :  { %v3424_v32 = vsub.f32 %v9188_v60, %v3420_v25 }
0x103d   :  { %v3431_v52 = vmul.f32 1.442695, %v3424_v32 }
0x103f   :  { %6946 = vpow2.f32 %v3431_v52  ;;  %3963 = vrot.lane.b32.xlu0 %v8957_v30, %s7387_s17 }
0x1045   :  { %v6947_v7 = vpop.eup %6946 }
0x1046   :  { %v3442_v3 = vsel %vm296_vm0, %v6947_v7, 0.0 }
0x1047   :  { %3957 = vrot.lane.b32.xlu0 %v8945_v42, %s7387_s17  ;;  %3443 = vadd.xlane.f32.xlu2 %v3442_v3 }
0x104c   :  { %3961 = vrot.lane.b32.xlu1 %v8953_v10, %s7387_s17 }
0x104f   :  { %3949 = vrot.lane.b32.xlu0 %v8966_v40, %s7387_s17  ;;  %v3836_v24 = vpop.xlane.xlu2 %3835 }
0x1050   :  { %6948 = vrcp.f32 %v3836_v24 }
0x1051   :  { %6950 = vrcp.f32 %v3839_v12  ;;  %v9265_v12 = vpop.f32.mrf.mxu0 }
0x1052   :  { %6952 = vrcp.f32 %v3842_v59 }
0x1054   :  { %3951 = vrot.lane.b32.xlu1 %v8981_v33, %s7387_s17 }
0x1056   :  { %v6949_v60 = vpop.eup %6948 }
0x1057   :  { %3955 = vrot.lane.b32.xlu0 %v8999_v11, %s7387_s17  ;;  %v3848_v30 = vmul.f32 %v6949_v60, %v9193_v43  ;;  %v6951_v42 = vpop.eup %6950  ;;  %v9237_v11 = vld [vmem:[#allocation13] sm:$0xff] }
0x1058   :  { %v3849_v10 = vmul.f32 %v6951_v42, %v9178_v36  ;;  %v6953_v40 = vpop.eup %6952  ;;  %3728 = vmatpush.msrb.mxu1 %v9237_v11 }
0x1059   :  { %6396 = vmatmul.msk.f32.gmra.mxu3 %vm296_vm0, %v3848_v30  ;;  %v3850_v33 = vmul.f32 %v6953_v40, %v9184_v4  ;;  %v3350_v4 = vld [vmem:[#allocation13 + $0x10] sm:$0xff]  ;;  %v9268_v17 = vpop.f32.mrf.mxu0 }
0x105f   :  { %3959 = vrot.lane.b32.xlu2 %v8949_v20, %s7387_s17 }
0x1061   :  { %6397 = vmatmul.msk.f32.gmra.mxu3 %vm296_vm0, %v3849_v10 }
0x1067   :  { %3953 = vrot.lane.b32.xlu2 %v8994_v38, %s7387_s17  ;;  %v3349_v38 = vld [vmem:[#allocation13 + $0x8] sm:$0xff] }
0x1068   :  { %3687 = vmatpush.msrb.mxu0 %v3349_v38 }
0x1069   :  { %6398 = vmatmul.msk.f32.gmra.mxu3 %vm296_vm0, %v3850_v33 }
0x1096   :  { %v3435_v43 = vpop.xlane.xlu1 %3434 }
0x1097   :  { %6954 = vrcp.f32 %v3435_v43 }
0x109d   :  { %v6955_v27 = vpop.eup %6954 }
0x109e   :  { %v3449_v20 = vmul.f32 %v6955_v27, %v6939_v37  ;;  %v3438_v54 = vpop.xlane.xlu0 %3437  ;;  %v3648_v37 = vpop.f32.mrf.mxu3 }
0x109f   :  { %6956 = vrcp.f32 %v3438_v54 }
0x10a0   :  { %6363 = vmatmul.msk.f32.vlgmr.msra.gmra.mxu0 %vm296_vm0, %v3449_v20 }
0x10a1   :  { %3931 = vmatpush.msra.mxu0 %v3350_v4 }
0x10a5   :  { %v6957_v36 = vpop.eup %6956 }
0x10a6   :  { %v3441_v5 = vpop.xlane.xlu1 %3440  ;;  %v3450_v28 = vmul.f32 %v6957_v36, %v6941_v23  ;;  %v3651_v41 = vpop.f32.mrf.mxu3 }
0x10a7   :  { %6958 = vrcp.f32 %v3441_v5 }
0x10a8   :  { %6364 = vmatmul.msk.f32.gmra.mxu0 %vm296_vm0, %v3450_v28 }
0x10ad   :  { %v6959_v21 = vpop.eup %6958 }
0x10ae   :  { %v3451_v39 = vmul.f32 %v6959_v21, %v6945_v19  ;;  %v3654_v63 = vpop.f32.mrf.mxu3  ;;  %v9274_v19 = vpop.f32.mrf.mxu0 }
0x10b0   :  { %6365 = vmatmul.msk.f32.gmra.mxu0 %vm296_vm0, %v3451_v39 }
0x10b1   :  { %v3964_v61 = vpop.permute.xlu0 %3963 }
0x10b2   :  { %6403 = vmatpush.xpose.msk.msra.mxu1 %vm665_vm11, %v3964_v61 }
0x10b6   :  { %v3657_v29 = vpop.f32.mrf.mxu3 }
0x10b9   :  { %v3958_v55 = vpop.permute.xlu0 %3957 }
0x10ba   :  { %v3444_v34 = vpop.xlane.xlu2 %3443 }
0x10bb   :  { %6960 = vrcp.f32 %v3444_v34 }
0x10be   :  { %v3962_v0 = vpop.permute.xlu1 %3961  ;;  %v3892_v26 = vpop.f32.mrf.mxu3 }
0x10bf   :  { %6404 = vmatpush.xpose.msk.msra.mxu1 %vm665_vm11, %v3962_v0 }
0x10c1   :  { %v6961_v51 = vpop.eup %6960  ;;  %v3950_v52 = vpop.permute.xlu0 %3949 }
0x10c2   :  { %v3960_v62 = vpop.permute.xlu2 %3959  ;;  %v3452_v56 = vmul.f32 %v6961_v51, %v6947_v7 }
0x10c3   :  { %6405 = vmatpush.xpose.msk.msra.mxu1 %vm665_vm11, %v3960_v62 }
0x10c4   :  { %6366 = vmatmul.msk.f32.gmra.mxu0 %vm296_vm0, %v3452_v56 }
0x10c6   :  { %v3952_v3 = vpop.permute.xlu1 %3951 }
0x10c7   :  { %6406 = vmatpush.xpose.msk.msra.mxu1 %vm665_vm11, %v3958_v55 }
0x10c9   :  { %v3956_v42 = vpop.permute.xlu0 %3955 }
0x10ca   :  { %v3954_v60 = vpop.permute.xlu2 %3953 }
0x10cc   :  { %6379 = vmatmul.msk.f32.vlgmr.msrb.gmra.mxu0 %vm665_vm11, %v3648_v37 }
0x10cd   :  { %6419 = vmatpush.xpose.msk.msrb.mxu0 %vm665_vm11, %v9103_v9 }
0x10d1   :  { %6420 = vmatpush.xpose.msk.msrb.mxu0 %vm665_vm11, %v9099_v58 }
0x10d4   :  { %6380 = vmatmul.msk.f32.gmra.mxu0 %vm665_vm11, %v3651_v41 }
0x10d5   :  { %6421 = vmatpush.xpose.msk.msrb.mxu0 %vm665_vm11, %v9095_v16 }
0x10d9   :  { %6422 = vmatpush.xpose.msk.msrb.mxu0 %vm665_vm11, %v9093_v13 }
0x10dc   :  { %6381 = vmatmul.msk.f32.gmra.mxu0 %vm665_vm11, %v3654_v63  ;;  %v3895_v23 = vpop.f32.mrf.mxu3 }
0x10e4   :  { %6382 = vmatmul.msk.f32.gmra.mxu0 %vm665_vm11, %v3657_v29  ;;  %v3898_v47 = vpop.f32.mrf.mxu3 }
0x10ec   :  { %6399 = vmatmul.msk.f32.vlgmr.msra.gmra.mxu0 %vm665_vm11, %v3892_v26  ;;  %v3901_v15 = vpop.f32.mrf.mxu3 }
0x10ed   :  { %4491 = vmatpush.msra.mxu0 %v3349_v38 }
0x10f4   :  { %6400 = vmatmul.msk.f32.gmra.mxu0 %vm665_vm11, %v3895_v23 }
0x10fc   :  { %6401 = vmatmul.msk.f32.gmra.mxu0 %vm665_vm11, %v3898_v47 }
0x1104   :  { %6402 = vmatmul.msk.f32.gmra.mxu0 %vm665_vm11, %v3901_v15 }
0x110c   :  { %6423 = vmatmul.msk.f32.vlgmr.msrb.gmra.mxu0 %vm665_vm11, %v9262_v57 }
0x110d   :  { %4735 = vmatpush.msrb.mxu0 %v3350_v4 }
0x1114   :  { %6424 = vmatmul.msk.f32.gmra.mxu0 %vm665_vm11, %v9265_v12 }
0x111c   :  { %6425 = vmatmul.msk.f32.gmra.mxu0 %vm665_vm11, %v9268_v17 }
0x111d   :  { %v3482_v59 = vpop.f32.mrf.mxu0 }
0x111e   :  { %6383 = vmatmul.msk.f32.vlgmr.msrb.gmra.mxu1 %vm665_vm11, %v3482_v59 }
0x111f   :  { %4281 = vmatpush.msrb.mxu1 %v9108_v50 }
0x1121   :  { %4282 = vmatpush.msrb.mxu1 %v9105_v8 }
0x1123   :  { %4283 = vmatpush.msrb.mxu1 %v9101_v14 }
0x1124   :  { %6426 = vmatmul.msk.f32.gmra.mxu0 %vm665_vm11, %v9274_v19 }
0x1125   :  { %4284 = vmatpush.msrb.mxu1 %v9097_v31  ;;  %v3485_v18 = vpop.f32.mrf.mxu0 }
0x1126   :  { %6384 = vmatmul.msk.f32.gmra.mxu1 %vm665_vm11, %v3485_v18 }
0x112d   :  { %v3488_v25 = vpop.f32.mrf.mxu0 }
0x112e   :  { %6385 = vmatmul.msk.f32.gmra.mxu1 %vm665_vm11, %v3488_v25 }
0x1141   :  { %v3491_v32 = vpop.f32.mrf.mxu0 }
0x1142   :  { %6386 = vmatmul.msk.f32.gmra.mxu1 %vm665_vm11, %v3491_v32 }
0x1149   :  { %v9288_v7 = vpop.f32.mrf.mxu0 }
0x114a   :  { %6407 = vmatmul.msk.f32.vlgmr.msra.gmra.mxu1 %vm665_vm11, %v3950_v52 }
0x114b   :  { %4532 = vmatpush.msra.mxu1 %v9237_v11 }
0x1151   :  { %v9292_v24 = vpop.f32.mrf.mxu0 }
0x1152   :  { %6408 = vmatmul.msk.f32.gmra.mxu1 %vm665_vm11, %v3952_v3 }
0x1159   :  { %v9295_v30 = vpop.f32.mrf.mxu0 }
0x115a   :  { %6409 = vmatmul.msk.f32.gmra.mxu1 %vm665_vm11, %v3954_v60 }
0x1161   :  { %v9298_v10 = vpop.f32.mrf.mxu0 }
0x1162   :  { %6410 = vmatmul.msk.f32.gmra.mxu1 %vm665_vm11, %v3956_v42 }
0x1169   :  { %v9301_v40 = vpop.f32.mrf.mxu0 }
0x1171   :  { %v9303_v33 = vpop.f32.mrf.mxu0 }
0x1179   :  { %v9305_v11 = vpop.f32.mrf.mxu0 }
0x1181   :  { %v9307_v43 = vpop.f32.mrf.mxu0 }
0x1189   :  { %v4197_v27 = vpop.f32.mrf.mxu0 }
0x118a   :  { %v4209_v20 = vmul.f32 0.35355338, %v4197_v27 }
0x118c   :  { %v4213_v54 = vsel %vm296_vm0, %v4209_v20, -inf }
0x118d   :  { %4214 = vmax.xlane.f32.xlu1 %v4213_v54 }
0x1191   :  { %v4200_v36 = vpop.f32.mrf.mxu0 }
0x1192   :  { %v4210_v5 = vmul.f32 0.35355338, %v4200_v36 }
0x1194   :  { %v4216_v28 = vsel %vm296_vm0, %v4210_v5, -inf }
0x1195   :  { %4217 = vmax.xlane.f32.xlu2 %v4216_v28 }
0x1199   :  { %v4203_v38 = vpop.f32.mrf.mxu0 }
0x119a   :  { %v4211_v4 = vmul.f32 0.35355338, %v4203_v38 }
0x119b   :  { %v9313_v0 = vpop.f32.mrf.mxu1 }
0x119c   :  { %v4219_v21 = vsel %vm296_vm0, %v4211_v4, -inf }
0x119d   :  { %4220 = vmax.xlane.f32.xlu0 %v4219_v21 }
0x11a1   :  { %v4206_v39 = vpop.f32.mrf.mxu0 }
0x11a2   :  { %v4212_v61 = vmul.f32 0.35355338, %v4206_v39 }
0x11a3   :  { %v9315_v51 = vpop.f32.mrf.mxu1 }
0x11a4   :  { %v4222_v34 = vsel %vm296_vm0, %v4212_v61, -inf }
0x11a5   :  { %4223 = vmax.xlane.f32.xlu1 %v4222_v34 }
0x11ab   :  { %v9317_v62 = vpop.f32.mrf.mxu1 }
0x11bf   :  { %v9319_v56 = vpop.f32.mrf.mxu1 }
0x11c7   :  { %v3998_v37 = vpop.f32.mrf.mxu1 }
0x11c8   :  { %v4010_v42 = vmul.f32 0.35355338, %v3998_v37 }
0x11cf   :  { %v4001_v26 = vpop.f32.mrf.mxu1 }
0x11d7   :  { %v4004_v52 = vpop.f32.mrf.mxu1 }
0x11df   :  { %v4007_v38 = vpop.f32.mrf.mxu1 }
0x11e0   :  { %v9325_v21 = vmul.f32 0.35355338, %v4007_v38 }
0x11e2   :  { %v4023_v34 = vsel %vm296_vm0, %v9325_v21, -inf }
0x1200   :  { %v4215_v55 = vpop.xlane.xlu1 %4214 }
0x1201   :  { %v4225_v41 = vsub.f32 %v4209_v20, %v4215_v55  ;;  %v4012_v55 = vmul.f32 0.35355338, %v4004_v52 }
0x1203   :  { %v4229_v63 = vmul.f32 1.442695, %v4225_v41  ;;  %v4020_v41 = vsel %vm296_vm0, %v4012_v55, -inf }
0x1205   :  { %6962 = vpow2.f32 %v4229_v63 }
0x1208   :  { %v4218_v29 = vpop.xlane.xlu2 %4217 }
0x1209   :  { %v4226_v23 = vsub.f32 %v4210_v5, %v4218_v29  ;;  %v4014_v5 = vsel %vm296_vm0, %v4010_v42, -inf }
0x120b   :  { %v6963_v47 = vpop.eup %6962  ;;  %v4231_v15 = vmul.f32 1.442695, %v4226_v23 }
0x120c   :  { %v4237_v59 = vsel %vm296_vm0, %v6963_v47, 0.0 }
0x120d   :  { %6964 = vpow2.f32 %v4231_v15  ;;  %4238 = vadd.xlane.f32.xlu2 %v4237_v59 }
0x1210   :  { %v4221_v18 = vpop.xlane.xlu0 %4220 }
0x1211   :  { %v4227_v25 = vsub.f32 %v4211_v4, %v4221_v18  ;;  %v4011_v4 = vmul.f32 0.35355338, %v4001_v26 }
0x1213   :  { %v6965_v32 = vpop.eup %6964  ;;  %v4233_v3 = vmul.f32 1.442695, %v4227_v25  ;;  %v4017_v37 = vsel %vm296_vm0, %v4011_v4, -inf }
0x1214   :  { %v4240_v60 = vsel %vm296_vm0, %v6965_v32, 0.0 }
0x1215   :  { %6966 = vpow2.f32 %v4233_v3  ;;  %4241 = vadd.xlane.f32.xlu0 %v4240_v60 }
0x1218   :  { %v4224_v27 = vpop.xlane.xlu1 %4223 }
0x1219   :  { %v4228_v20 = vsub.f32 %v4212_v61, %v4224_v27 }
0x121b   :  { %v6967_v54 = vpop.eup %6966  ;;  %v4235_v36 = vmul.f32 1.442695, %v4228_v20 }
0x121c   :  { %v4243_v28 = vsel %vm296_vm0, %v6967_v54, 0.0 }
0x121d   :  { %6968 = vpow2.f32 %v4235_v36  ;;  %4015 = vmax.xlane.f32.xlu0 %v4014_v5  ;;  %4244 = vadd.xlane.f32.xlu1 %v4243_v28 }
0x1223   :  { %v6969_v39 = vpop.eup %6968 }
0x1224   :  { %v4246_v61 = vsel %vm296_vm0, %v6969_v39, 0.0 }
0x1225   :  { %4024 = vmax.xlane.f32.xlu0 %v4023_v34  ;;  %4018 = vmax.xlane.f32.xlu1 %v4017_v37 }
0x1226   :  { %4247 = vadd.xlane.f32.xlu2 %v4246_v61 }
0x122e   :  { %4021 = vmax.xlane.f32.xlu2 %v4020_v41 }
0x1239   :  { %6651 = vrot.lane.b32.xlu0 %v9145_v44, %s7387_s17 }
0x1241   :  { %4310 = vrot.lane.b32.xlu0 %v9099_v58, %s7385_s5 }
0x1246   :  { %6646 = vrot.lane.b32.xlu2 %v9131_v49, %s7387_s17 }
0x1249   :  { %4298 = vrot.lane.b32.xlu0 %v9262_v57, %s7385_s5 }
0x124e   :  { %4312 = vrot.lane.b32.xlu2 %v9103_v9, %s7385_s5 }
0x1251   :  { %4302 = vrot.lane.b32.xlu0 %v9268_v17, %s7385_s5 }
0x1256   :  { %4306 = vrot.lane.b32.xlu2 %v9093_v13, %s7385_s5 }
0x1259   :  { %4767 = vrot.lane.b32.xlu0 %v9103_v9, %s7387_s17 }
0x125e   :  { %4300 = vrot.lane.b32.xlu2 %v9265_v12, %s7385_s5 }
0x1261   :  { %4304 = vrot.lane.b32.xlu0 %v9274_v19, %s7385_s5 }
0x1266   :  { %4560 = vrot.lane.b32.xlu2 %v9103_v9, %s7386_s9 }
0x1269   :  { %4554 = vrot.lane.b32.xlu0 %v9093_v13, %s7386_s9 }
0x126e   :  { %4558 = vrot.lane.b32.xlu2 %v9099_v58, %s7386_s9 }
0x1271   :  { %4753 = vrot.lane.b32.xlu0 %v9262_v57, %s7387_s17 }
0x1276   :  { %4556 = vrot.lane.b32.xlu2 %v9095_v16, %s7386_s9 }
0x1279   :  { %4550 = vrot.lane.b32.xlu0 %v9268_v17, %s7386_s9 }
0x127e   :  { %4761 = vrot.lane.b32.xlu2 %v9093_v13, %s7387_s17 }
0x1280   :  { %v4239_v49 = vpop.xlane.xlu2 %4238 }
0x1281   :  { %6970 = vrcp.f32 %v4239_v49  ;;  %4759 = vrot.lane.b32.xlu0 %v9274_v19, %s7387_s17 }
0x1286   :  { %4548 = vrot.lane.b32.xlu2 %v9265_v12, %s7386_s9 }
0x1287   :  { %v6971_v9 = vpop.eup %6970 }
0x1288   :  { %v4253_v44 = vmul.f32 %v6971_v9, %v6963_v47  ;;  %v4242_v63 = vpop.xlane.xlu0 %4241 }
0x1289   :  { %6972 = vrcp.f32 %v4242_v63 }
0x128a   :  { %6427 = vmatmul.msk.f32.vlgmr.msrb.gmra.mxu1 %vm296_vm0, %v4253_v44 }
0x128e   :  { %4757 = vrot.lane.b32.xlu2 %v9268_v17, %s7387_s17 }
0x128f   :  { %v6973_v29 = vpop.eup %6972 }
0x1290   :  { %v4016_v26 = vpop.xlane.xlu0 %4015  ;;  %v4245_v13 = vpop.xlane.xlu1 %4244  ;;  %v4254_v23 = vmul.f32 %v6973_v29, %v6965_v32 }
0x1291   :  { %v4026_v15 = vsub.f32 %v4010_v42, %v4016_v26  ;;  %6974 = vrcp.f32 %v4245_v13 }
0x1292   :  { %6428 = vmatmul.msk.f32.gmra.mxu1 %vm296_vm0, %v4254_v23 }
0x1293   :  { %v4030_v59 = vmul.f32 1.442695, %v4026_v15 }
0x1295   :  { %6976 = vpow2.f32 %v4030_v59 }
0x1297   :  { %v6975_v18 = vpop.eup %6974 }
0x1298   :  { %v4019_v25 = vpop.xlane.xlu1 %4018  ;;  %v4255_v47 = vmul.f32 %v6975_v18, %v6967_v54  ;;  %v4025_v42 = vpop.xlane.xlu0 %4024 }
0x1299   :  { %v4248_v52 = vpop.xlane.xlu2 %4247  ;;  %v4027_v3 = vsub.f32 %v4011_v4, %v4019_v25  ;;  %v4029_v54 = vsub.f32 %v9325_v21, %v4025_v42 }
0x129a   :  { %6978 = vrcp.f32 %v4248_v52  ;;  %6429 = vmatmul.msk.f32.gmra.mxu1 %vm296_vm0, %v4255_v47 }
0x129b   :  { %v6977_v60 = vpop.eup %6976  ;;  %v4032_v17 = vmul.f32 1.442695, %v4027_v3  ;;  %v4036_v34 = vmul.f32 1.442695, %v4029_v54 }
0x129c   :  { %v4038_v27 = vsel %vm296_vm0, %v6977_v60, 0.0 }
0x129d   :  { %4039 = vadd.xlane.f32.xlu1 %v4038_v27  ;;  %6980 = vpow2.f32 %v4032_v17 }
0x12a0   :  { %v6979_v32 = vpop.eup %6978 }
0x12a1   :  { %v4022_v20 = vpop.xlane.xlu2 %4021  ;;  %v4256_v36 = vmul.f32 %v6979_v32, %v6969_v39 }
0x12a2   :  { %v4028_v5 = vsub.f32 %v4012_v55, %v4022_v20 }
0x12a3   :  { %6430 = vmatmul.msk.f32.gmra.mxu1 %vm296_vm0, %v4256_v36  ;;  %v6981_v28 = vpop.eup %6980 }
0x12a4   :  { %v4034_v38 = vmul.f32 1.442695, %v4028_v5  ;;  %v4041_v4 = vsel %vm296_vm0, %v6981_v28, 0.0 }
0x12a5   :  { %4042 = vadd.xlane.f32.xlu1 %v4041_v4 }
0x12a6   :  { %6982 = vpow2.f32 %v4034_v38 }
0x12a7   :  { %6984 = vpow2.f32 %v4036_v34 }
0x12a9   :  { %v6647_v37 = vpop.permute.xlu2 %6646 }
0x12aa   :  { %v6648_v61 = vunpack.i.l.bf16 %v6647_v37  ;;  %v6649_v9 = vunpack.i.h.bf16 %v6647_v37 }
0x12ab   :  { %v6652_v41 = vpop.permute.xlu0 %6651 }
0x12ac   :  { %v6983_v49 = vpop.eup %6982  ;;  %v6653_v44 = vunpack.i.l.bf16 %v6652_v41  ;;  %4094 = vmatpush.msra.mxu2 %v6648_v61  ;;  %v6654_v55 = vunpack.i.h.bf16 %v6652_v41 }
0x12ad   :  { %v4044_v39 = vsel %vm296_vm0, %v6983_v49, 0.0  ;;  %v6985_v63 = vpop.eup %6984 }
0x12ae   :  { %4095 = vmatpush.msra.mxu2 %v6649_v9  ;;  %4045 = vadd.xlane.f32.xlu1 %v4044_v39  ;;  %v4047_v26 = vsel %vm296_vm0, %v6985_v63, 0.0 }
0x12b0   :  { %4096 = vmatpush.msra.mxu2 %v6653_v44 }
0x12b1   :  { %v4313_v21 = vpop.permute.xlu2 %4312 }
0x12b2   :  { %4097 = vmatpush.msra.mxu2 %v6654_v55 }
0x12b3   :  { %v4311_v29 = vpop.permute.xlu0 %4310 }
0x12b4   :  { %6431 = vmatpush.xpose.msk.msrb.mxu2 %vm665_vm11, %v4313_v21 }
0x12b6   :  { %4048 = vadd.xlane.f32.xlu1 %v4047_v26 }
0x12b8   :  { %6432 = vmatpush.xpose.msk.msrb.mxu2 %vm665_vm11, %v4311_v29  ;;  %v9424_v29 = vld [vmem:[#allocation13 + $0x18] sm:$0xff] }
0x12b9   :  { %v4307_v17 = vpop.permute.xlu2 %4306  ;;  %4138 = vmatpush.msra.mxu3 %v9424_v29 }
0x12bb   :  { %v4299_v13 = vpop.permute.xlu0 %4298 }
0x12c3   :  { %v4303_v23 = vpop.permute.xlu0 %4302 }
0x12cb   :  { %v4768_v15 = vpop.permute.xlu0 %4767 }
0x12cc   :  { %6467 = vmatpush.xpose.msk.msrb.mxu1 %vm665_vm11, %v4768_v15 }
0x12cf   :  { %4308 = vrot.lane.b32.xlu1 %v9095_v16, %s7385_s5 }
0x12d7   :  { %4765 = vrot.lane.b32.xlu1 %v9099_v58, %s7387_s17 }
0x12df   :  { %4763 = vrot.lane.b32.xlu1 %v9095_v16, %s7387_s17 }
0x12e7   :  { %4546 = vrot.lane.b32.xlu1 %v9262_v57, %s7386_s9 }
0x12ef   :  { %4755 = vrot.lane.b32.xlu1 %v9265_v12, %s7387_s17 }
0x12f7   :  { %4552 = vrot.lane.b32.xlu1 %v9274_v19, %s7386_s9 }
0x1307   :  { %v4286_v59 = vpop.f32.mrf.mxu1 }
0x1308   :  { %6447 = vmatmul.msk.f32.vlgmr.msra.gmra.mxu1 %vm665_vm11, %v4286_v59 }
0x130f   :  { %v4289_v18 = vpop.f32.mrf.mxu1 }
0x1310   :  { %6448 = vmatmul.msk.f32.gmra.mxu1 %vm665_vm11, %v4289_v18  ;;  %v4040_v25 = vpop.xlane.xlu1 %4039 }
0x1311   :  { %6986 = vrcp.f32 %v4040_v25 }
0x1317   :  { %v6987_v58 = vpop.eup %6986  ;;  %v4292_v47 = vpop.f32.mrf.mxu1 }
0x1318   :  { %v4054_v16 = vmul.f32 %v6987_v58, %v6977_v60  ;;  %6449 = vmatmul.msk.f32.gmra.mxu1 %vm665_vm11, %v4292_v47  ;;  %v4043_v57 = vpop.xlane.xlu1 %4042  ;;  %v4301_v60 = vpop.permute.xlu2 %4300 }
0x1319   :  { %6988 = vrcp.f32 %v4043_v57 }
0x131a   :  { %6411 = vmatmul.msk.f32.vlgmr.msra.gmra.mxu2 %vm296_vm0, %v4054_v16 }
0x131f   :  { %v6989_v12 = vpop.eup %6988 }
0x1320   :  { %v4295_v52 = vpop.f32.mrf.mxu1  ;;  %v4055_v3 = vmul.f32 %v6989_v12, %v6981_v28  ;;  %v4561_v5 = vpop.permute.xlu2 %4560 }
0x1321   :  { %6450 = vmatmul.msk.f32.gmra.mxu1 %vm665_vm11, %v4295_v52  ;;  %v4046_v19 = vpop.xlane.xlu1 %4045  ;;  %v4305_v28 = vpop.permute.xlu0 %4304 }
0x1322   :  { %6990 = vrcp.f32 %v4046_v19  ;;  %6412 = vmatmul.msk.f32.gmra.mxu2 %vm296_vm0, %v4055_v3 }
0x1328   :  { %v6991_v27 = vpop.eup %6990  ;;  %v4559_v54 = vpop.permute.xlu2 %4558 }
0x1329   :  { %v4049_v32 = vpop.xlane.xlu1 %4048  ;;  %v4056_v42 = vmul.f32 %v6991_v27, %v6983_v49  ;;  %v4555_v37 = vpop.permute.xlu0 %4554 }
0x132a   :  { %6992 = vrcp.f32 %v4049_v32 }
0x132b   :  { %6413 = vmatmul.msk.f32.gmra.mxu2 %vm296_vm0, %v4056_v42 }
0x1330   :  { %v6993_v20 = vpop.eup %6992  ;;  %v4557_v34 = vpop.permute.xlu2 %4556 }
0x1331   :  { %v4057_v36 = vmul.f32 %v6993_v20, %v6985_v63  ;;  %v4754_v49 = vpop.permute.xlu0 %4753 }
0x1333   :  { %6414 = vmatmul.msk.f32.gmra.mxu2 %vm296_vm0, %v4057_v36 }
0x1338   :  { %v4762_v41 = vpop.permute.xlu2 %4761 }
0x1339   :  { %v4551_v55 = vpop.permute.xlu0 %4550 }
0x1340   :  { %v4549_v44 = vpop.permute.xlu2 %4548 }
0x1341   :  { %v4309_v38 = vpop.permute.xlu1 %4308  ;;  %v4760_v63 = vpop.permute.xlu0 %4759 }
0x1342   :  { %6433 = vmatpush.xpose.msk.msrb.mxu2 %vm665_vm11, %v4309_v38 }
0x1346   :  { %6434 = vmatpush.xpose.msk.msrb.mxu2 %vm665_vm11, %v4307_v17 }
0x1348   :  { %v4758_v21 = vpop.permute.xlu2 %4757 }
0x1349   :  { %6435 = vmatmul.msk.f32.vlgmr.msrb.gmra.mxu2 %vm665_vm11, %v4299_v13  ;;  %v4766_v4 = vpop.permute.xlu1 %4765 }
0x134a   :  { %6451 = vmatpush.xpose.msk.msra.mxu2 %vm665_vm11, %v4561_v5  ;;  %6468 = vmatpush.xpose.msk.msrb.mxu1 %vm665_vm11, %v4766_v4  ;;  %v9450_v4 = vpack.i.bf16 %v9097_v31, %v9101_v14 }
0x134e   :  { %6452 = vmatpush.xpose.msk.msra.mxu2 %vm665_vm11, %v4559_v54 }
0x1351   :  { %6436 = vmatmul.msk.f32.gmra.mxu2 %vm665_vm11, %v4301_v60  ;;  %v4764_v61 = vpop.permute.xlu1 %4763 }
0x1352   :  { %6453 = vmatpush.xpose.msk.msra.mxu2 %vm665_vm11, %v4557_v34  ;;  %6469 = vmatpush.xpose.msk.msrb.mxu1 %vm665_vm11, %v4764_v61  ;;  %v9460_v61 = vpack.i.bf16 %v9105_v8, %v9108_v50  ;;  %v3737_v8 = vadd.f32 %v9317_v62, %v9295_v30 }
0x1356   :  { %6454 = vmatpush.xpose.msk.msra.mxu2 %vm665_vm11, %v4555_v37  ;;  %6470 = vmatpush.xpose.msk.msrb.mxu1 %vm665_vm11, %v4762_v41  ;;  %v3731_v41 = vadd.f32 %v9313_v0, %v9288_v7 }
0x1358   :  { %v3945_v31 = vadd.f32 %v9301_v40, %v3731_v41 }
0x1359   :  { %6437 = vmatmul.msk.f32.gmra.mxu2 %vm665_vm11, %v4303_v23  ;;  %6471 = vmatmul.msk.f32.vlgmr.msrb.gmra.mxu1 %vm665_vm11, %v4754_v49  ;;  %v4547_v9 = vpop.permute.xlu1 %4546 }
0x1361   :  { %6438 = vmatmul.msk.f32.gmra.mxu2 %vm665_vm11, %v4305_v28  ;;  %v4756_v39 = vpop.permute.xlu1 %4755 }
0x1362   :  { %6472 = vmatmul.msk.f32.gmra.mxu1 %vm665_vm11, %v4756_v39 }
0x1369   :  { %6455 = vmatmul.msk.f32.vlgmr.msra.gmra.mxu2 %vm665_vm11, %v4547_v9  ;;  %v4553_v26 = vpop.permute.xlu1 %4552 }
0x136a   :  { %6473 = vmatmul.msk.f32.gmra.mxu1 %vm665_vm11, %v4758_v21 }
0x1371   :  { %6456 = vmatmul.msk.f32.gmra.mxu2 %vm665_vm11, %v4549_v44 }
0x1372   :  { %6474 = vmatmul.msk.f32.gmra.mxu1 %vm665_vm11, %v4760_v63 }
0x1379   :  { %6457 = vmatmul.msk.f32.gmra.mxu2 %vm665_vm11, %v4551_v55  ;;  %v3947_v55 = vadd.f32 %v9305_v11, %v3737_v8 }
0x1381   :  { %6458 = vmatmul.msk.f32.gmra.mxu2 %vm665_vm11, %v4553_v26 }
0x1385   :  { %v9454_v34 = vpop.f32.mrf.mxu1 }
0x138d   :  { %v9456_v37 = vpop.f32.mrf.mxu1 }
0x1395   :  { %v9466_v49 = vpop.f32.mrf.mxu1 }
0x139d   :  { %v4099_v13 = vpop.f32.mrf.mxu2 }
0x139e   :  { %6415 = vmatmul.msk.f32.vlgmr.msra.gmra.mxu3 %vm665_vm11, %v4099_v13  ;;  %v9471_v44 = vpop.f32.mrf.mxu1 }
0x13a5   :  { %v4102_v23 = vpop.f32.mrf.mxu2 }
0x13a6   :  { %6416 = vmatmul.msk.f32.gmra.mxu3 %vm665_vm11, %v4102_v23 }
0x13ae   :  { %v4105_v15 = vpop.f32.mrf.mxu2 }
0x13af   :  { %6417 = vmatmul.msk.f32.gmra.mxu3 %vm665_vm11, %v4105_v15 }
0x13b6   :  { %v4108_v59 = vpop.f32.mrf.mxu2 }
0x13b7   :  { %6418 = vmatmul.msk.f32.gmra.mxu3 %vm665_vm11, %v4108_v59 }
0x13cc   :  { %v4347_v18 = vpop.f32.mrf.mxu2 }
0x13cd   :  { %v4359_v25 = vmul.f32 0.35355338, %v4347_v18 }
0x13cf   :  { %v4363_v58 = vsel %vm296_vm0, %v4359_v25, -inf }
0x13d0   :  { %4364 = vmax.xlane.f32.xlu2 %v4363_v58 }
0x13d4   :  { %v4350_v47 = vpop.f32.mrf.mxu2 }
0x13d5   :  { %v4360_v16 = vmul.f32 0.35355338, %v4350_v47 }
0x13d6   :  { %v4802_v50 = vpop.f32.mrf.mxu1 }
0x13d7   :  { %v4366_v57 = vsel %vm296_vm0, %v4360_v16, -inf }
0x13d8   :  { %4367 = vmax.xlane.f32.xlu1 %v4366_v57 }
0x13dc   :  { %v4353_v12 = vpop.f32.mrf.mxu2 }
0x13dd   :  { %v4361_v52 = vmul.f32 0.35355338, %v4353_v12 }
0x13df   :  { %v4369_v19 = vsel %vm296_vm0, %v4361_v52, -inf  ;;  %v4805_v7 = vpop.f32.mrf.mxu1 }
0x13e0   :  { %4370 = vmax.xlane.f32.xlu0 %v4369_v19  ;;  %v9480_v0 = vmul.f32 0.35355338, %v4805_v7 }
0x13e2   :  { %v4821_v40 = vsel %vm296_vm0, %v9480_v0, -inf }
0x13e4   :  { %v4356_v3 = vpop.f32.mrf.mxu2 }
0x13e5   :  { %v4362_v17 = vmul.f32 0.35355338, %v4356_v3 }
0x13e7   :  { %v4372_v27 = vsel %vm296_vm0, %v4362_v17, -inf }
0x13e8   :  { %4373 = vmax.xlane.f32.xlu2 %v4372_v27 }
0x13ec   :  { %v4595_v32 = vpop.f32.mrf.mxu2 }
0x13ed   :  { %v9436_v42 = vmul.f32 0.35355338, %v4595_v32 }
0x13ef   :  { %v4611_v60 = vsel %vm296_vm0, %v9436_v42, -inf }
0x13f0   :  { %4612 = vmax.xlane.f32.xlu0 %v4611_v60 }
0x13f4   :  { %v4598_v20 = vpop.f32.mrf.mxu2 }
0x13f5   :  { %v9440_v36 = vmul.f32 0.35355338, %v4598_v20  ;;  %v4808_v20 = vpop.f32.mrf.mxu1 }
0x13f7   :  { %v4614_v5 = vsel %vm296_vm0, %v9440_v36, -inf }
0x13f8   :  { %4615 = vmax.xlane.f32.xlu1 %v4614_v5 }
0x13fc   :  { %v4601_v54 = vpop.f32.mrf.mxu2 }
0x13fd   :  { %v9444_v38 = vmul.f32 0.35355338, %v4601_v54 }
0x13ff   :  { %v4617_v28 = vsel %vm296_vm0, %v9444_v38, -inf }
0x1400   :  { %4618 = vmax.xlane.f32.xlu2 %v4617_v28  ;;  %v9508_v28 = vmul.f32 0.35355338, %v4808_v20 }
0x1402   :  { %v4824_v41 = vsel %vm296_vm0, %v9508_v28, -inf }
0x1404   :  { %6661 = vrot.lane.b32.xlu0 %v9450_v4, %s7385_s5  ;;  %v4604_v62 = vpop.f32.mrf.mxu2 }
0x1405   :  { %v9488_v58 = vmul.f32 0.35355338, %v4604_v62 }
0x1418   :  { %6656 = vrot.lane.b32.xlu2 %v9460_v61, %s7385_s5 }
0x1421   :  { %v4140_v14 = vpop.f32.mrf.mxu3 }
0x1422   :  { %v9469_v9 = vadd.f32 %v4140_v14, %v3945_v31  ;;  %v4811_v14 = vpop.f32.mrf.mxu1 }
0x1423   :  { %v9514_v8 = vmul.f32 0.35355338, %v4811_v14 }
0x1425   :  { %v4827_v7 = vsel %vm296_vm0, %v9514_v8, -inf }
0x1429   :  { %v9473_v39 = vpop.f32.mrf.mxu3 }
0x1432   :  { %v4146_v21 = vpop.f32.mrf.mxu3 }
0x1433   :  { %v9478_v63 = vadd.f32 %v4146_v21, %v3947_v55 }
0x1441   :  { %4822 = vmax.xlane.f32.xlu2 %v4821_v40 }
0x1443   :  { %v4365_v26 = vpop.xlane.xlu2 %4364 }
0x1444   :  { %v4375_v13 = vsub.f32 %v4359_v25, %v4365_v26  ;;  %v4620_v25 = vsel %vm296_vm0, %v9488_v58, -inf }
0x1446   :  { %v4379_v23 = vmul.f32 1.442695, %v4375_v13 }
0x1448   :  { %6994 = vpow2.f32 %v4379_v23 }
0x144b   :  { %v4368_v15 = vpop.xlane.xlu1 %4367 }
0x144c   :  { %v4376_v30 = vsub.f32 %v4360_v16, %v4368_v15 }
0x144e   :  { %v9484_v59 = vpop.eup %6994  ;;  %v4381_v18 = vmul.f32 1.442695, %v4376_v30 }
0x144f   :  { %v4387_v11 = vsel %vm296_vm0, %v9484_v59, 0.0 }
0x1450   :  { %4388 = vadd.xlane.f32.xlu1 %v4387_v11  ;;  %6996 = vpow2.f32 %v4381_v18 }
0x1453   :  { %v4371_v47 = vpop.xlane.xlu0 %4370 }
0x1454   :  { %v4377_v57 = vsub.f32 %v4361_v52, %v4371_v47 }
0x1456   :  { %v4383_v12 = vmul.f32 1.442695, %v4377_v57  ;;  %v9494_v19 = vpop.eup %6996 }
0x1457   :  { %v4390_v32 = vsel %vm296_vm0, %v9494_v19, 0.0 }
0x1458   :  { %4621 = vmax.xlane.f32.xlu1 %v4620_v25  ;;  %6998 = vpow2.f32 %v4383_v12 }
0x1459   :  { %6676 = vrot.lane.b32.xlu2 %v9450_v4, %s7387_s17 }
0x145b   :  { %v4374_v16 = vpop.xlane.xlu2 %4373 }
0x145c   :  { %v4378_v3 = vsub.f32 %v4362_v17, %v4374_v16  ;;  %v9506_v17 = vmul.f32 0.35355338, %v4802_v50 }
0x145e   :  { %v4385_v27 = vmul.f32 1.442695, %v4378_v3  ;;  %v9498_v52 = vpop.eup %6998  ;;  %v4818_v31 = vsel %vm296_vm0, %v9506_v17, -inf }
0x145f   :  { %v4393_v54 = vsel %vm296_vm0, %v9498_v52, 0.0 }
0x1460   :  { %7000 = vpow2.f32 %v4385_v27  ;;  %4391 = vadd.xlane.f32.xlu1 %v4390_v32 }
0x1463   :  { %v4613_v21 = vpop.xlane.xlu0 %4612 }
0x1464   :  { %v4623_v30 = vsub.f32 %v9436_v42, %v4613_v21  ;;  %v3734_v42 = vadd.f32 %v9315_v51, %v9292_v24 }
0x1466   :  { %v9500_v60 = vpop.eup %7000  ;;  %v4627_v11 = vmul.f32 1.442695, %v4623_v30 }
0x1467   :  { %v4396_v5 = vsel %vm296_vm0, %v9500_v60, 0.0 }
0x1468   :  { %4397 = vadd.xlane.f32.xlu0 %v4396_v5  ;;  %4394 = vadd.xlane.f32.xlu1 %v4393_v54  ;;  %7002 = vpow2.f32 %v4627_v11 }
0x146b   :  { %v4616_v62 = vpop.xlane.xlu1 %4615 }
0x146c   :  { %v4624_v18 = vsub.f32 %v9440_v36, %v4616_v62 }
0x146e   :  { %v4629_v47 = vmul.f32 1.442695, %v4624_v18  ;;  %v9524_v57 = vpop.eup %7002 }
0x146f   :  { %v4635_v12 = vsel %vm296_vm0, %v9524_v57, 0.0 }
0x1470   :  { %4825 = vmax.xlane.f32.xlu0 %v4824_v41  ;;  %4819 = vmax.xlane.f32.xlu1 %v4818_v31  ;;  %7004 = vpow2.f32 %v4629_v47  ;;  %v4149_v41 = vpop.f32.mrf.mxu3 }
0x1473   :  { %v4619_v55 = vpop.xlane.xlu2 %4618 }
0x1474   :  { %v4625_v25 = vsub.f32 %v9444_v38, %v4619_v55  ;;  %v3946_v38 = vadd.f32 %v9303_v33, %v3734_v42  ;;  %v9548_v33 = vld [vmem:[%s10110_s4] ss:$0 sm:$0xff] }
0x1476   :  { %v6662_v26 = vpop.permute.xlu0 %6661  ;;  %v4631_v16 = vmul.f32 1.442695, %v4625_v25  ;;  %v9532_v27 = vpop.eup %7004  ;;  %v4153_v20 = vadd.f32 %v9473_v39, %v3946_v38 }
0x1477   :  { %v6663_v23 = vunpack.i.l.bf16 %v6662_v26  ;;  %v6664_v15 = vunpack.i.h.bf16 %v6662_v26  ;;  %v4638_v32 = vsel %vm296_vm0, %v9532_v27, 0.0 }
0x1478   :  { %4828 = vmax.xlane.f32.xlu0 %v4827_v7  ;;  %7006 = vpow2.f32 %v4631_v16  ;;  %v4961_v51 = vadd.f32 %v4153_v20, %v8773_v6 }
0x147b   :  { %v6657_v50 = vpop.permute.xlu2 %6656 }
0x147c   :  { %v6658_v40 = vunpack.i.l.bf16 %v6657_v50  ;;  %v6659_v13 = vunpack.i.h.bf16 %v6657_v50 }
0x147e   :  { %4447 = vmatpush.msrb.mxu3 %v6658_v40  ;;  %v9538_v5 = vpop.eup %7006 }
0x147f   :  { %v4641_v39 = vsel %vm296_vm0, %v9538_v5, 0.0 }
0x1480   :  { %4448 = vmatpush.msrb.mxu3 %v6659_v13 }
0x1482   :  { %4449 = vmatpush.msrb.mxu3 %v6663_v23 }
0x1484   :  { %4450 = vmatpush.msrb.mxu3 %v6664_v15 }
0x1489   :  { %6666 = vrot.lane.b32.xlu1 %v9460_v61, %s7387_s17 }
0x148c   :  { %6671 = vrot.lane.b32.xlu0 %v9460_v61, %s7386_s9 }
0x14b3   :  { %4636 = vadd.xlane.f32.xlu1 %v4635_v12 }
0x14b4   :  { %v4823_v3 = vpop.xlane.xlu2 %4822 }
0x14b5   :  { %v4831_v61 = vsub.f32 %v9480_v0, %v4823_v3  ;;  %v3740_v0 = vadd.f32 %v9319_v56, %v9298_v10  ;;  %v9554_v10 = vadd.f32 %v9548_v33, %v4961_v51  ;;  %v4960_v51 = vadd.f32 %v9469_v9, %v8765_v45 }
0x14b7   :  { %v4836_v36 = vmul.f32 1.442695, %v4831_v61  ;;  %v3948_v31 = vadd.f32 %v9307_v43, %v3740_v0  ;;  %v4985_v55 = vsel %vm296_vm0, %v9554_v10, 0.0 }
0x14b9   :  { %7008 = vpow2.f32 %v4836_v36  ;;  %v4155_v56 = vadd.f32 %v4149_v41, %v3948_v31 }
0x14bb   :  { %4639 = vadd.xlane.f32.xlu1 %v4638_v32  ;;  %v4963_v6 = vadd.f32 %v4155_v56, %v8787_v46  ;;  %v9587_v56 = vadd.f32 %v9548_v33, %v4960_v51 }
0x14bc   :  { %v6677_v32 = vpop.permute.xlu2 %6676 }
0x14bd   :  { %v9561_v50 = vadd.f32 %v9548_v33, %v4963_v6  ;;  %v6678_v31 = vunpack.i.l.bf16 %v6677_v32  ;;  %v4962_v6 = vadd.f32 %v9478_v63, %v8779_v2  ;;  %v4982_v45 = vsel %vm296_vm0, %v9587_v56, 0.0 }
0x14bf   :  { %v9542_v24 = vpop.eup %7008  ;;  %v4991_v40 = vsel %vm296_vm0, %v9561_v50, 0.0  ;;  %v9596_v9 = vadd.f32 %v9548_v33, %v4962_v6 }
0x14c0   :  { %v4845_v54 = vsel %vm296_vm0, %v9542_v24, 0.0 }
0x14c1   :  { %4846 = vadd.xlane.f32.xlu0 %v4845_v54 }
0x14c3   :  { %4642 = vadd.xlane.f32.xlu1 %v4641_v39  ;;  %v4389_v14 = vpop.xlane.xlu1 %4388 }
0x14c4   :  { %7010 = vrcp.f32 %v4389_v14  ;;  %v6679_v14 = vunpack.i.h.bf16 %v6677_v32 }
0x14c9   :  { %4986 = vadd.xlane.f32.xlu0 %v4985_v55  ;;  %v4988_v55 = vsel %vm296_vm0, %v9596_v9, 0.0 }
0x14ca   :  { %v7011_v21 = vpop.eup %7010 }
0x14cb   :  { %v4403_v7 = vmul.f32 %v7011_v21, %v9484_v59  ;;  %v4622_v43 = vpop.xlane.xlu1 %4621 }
0x14cc   :  { %v4626_v3 = vsub.f32 %v9488_v58, %v4622_v43 }
0x14cd   :  { %6439 = vmatmul.msk.f32.vlgmr.msrb.gmra.mxu3 %vm296_vm0, %v4403_v7 }
0x14d1   :  { %4992 = vadd.xlane.f32.xlu0 %v4991_v40 }
0x14d3   :  { %v4392_v26 = vpop.xlane.xlu1 %4391 }
0x14d4   :  { %7012 = vrcp.f32 %v4392_v26 }
0x14da   :  { %v7013_v46 = vpop.eup %7012 }
0x14db   :  { %v4398_v13 = vpop.xlane.xlu0 %4397  ;;  %v4395_v23 = vpop.xlane.xlu1 %4394  ;;  %v4404_v15 = vmul.f32 %v7013_v46, %v9494_v19 }
0x14dc   :  { %7014 = vrcp.f32 %v4395_v23 }
0x14dd   :  { %6440 = vmatmul.msk.f32.gmra.mxu3 %vm296_vm0, %v4404_v15  ;;  %7016 = vrcp.f32 %v4398_v13 }
0x14e2   :  { %v7015_v59 = vpop.eup %7014 }
0x14e3   :  { %v4826_v30 = vpop.xlane.xlu0 %4825  ;;  %v4820_v11 = vpop.xlane.xlu1 %4819  ;;  %v4405_v18 = vmul.f32 %v7015_v59, %v9498_v52  ;;  %v4633_v52 = vmul.f32 1.442695, %v4626_v3 }
0x14e4   :  { %v4830_v62 = vsub.f32 %v9506_v17, %v4820_v11  ;;  %v7017_v25 = vpop.eup %7016  ;;  %v4832_v21 = vsub.f32 %v9508_v28, %v4826_v30 }
0x14e5   :  { %6441 = vmatmul.msk.f32.gmra.mxu3 %vm296_vm0, %v4405_v18  ;;  %v4406_v19 = vmul.f32 %v7017_v25, %v9500_v60 }
0x14e6   :  { %v4834_v47 = vmul.f32 1.442695, %v4830_v62  ;;  %v4838_v7 = vmul.f32 1.442695, %v4832_v21 }
0x14e8   :  { %7018 = vpow2.f32 %v4834_v47 }
0x14eb   :  { %v4829_v12 = vpop.xlane.xlu0 %4828 }
0x14ec   :  { %v4833_v16 = vsub.f32 %v9514_v8, %v4829_v12 }
0x14ed   :  { %6442 = vmatmul.msk.f32.gmra.mxu3 %vm296_vm0, %v4406_v19 }
0x14ee   :  { %v4840_v61 = vmul.f32 1.442695, %v4833_v16  ;;  %v7019_v42 = vpop.eup %7018 }
0x14ef   :  { %v4842_v17 = vsel %vm296_vm0, %v7019_v42, 0.0 }
0x14f0   :  { %7020 = vpow2.f32 %v4840_v61  ;;  %4843 = vadd.xlane.f32.xlu2 %v4842_v17 }
0x14f1   :  { %7022 = vpow2.f32 %v4633_v52 }
0x14f2   :  { %7024 = vpow2.f32 %v4838_v7 }
0x14f6   :  { %v9576_v36 = vpop.eup %7020 }
0x14f7   :  { %v4851_v38 = vsel %vm296_vm0, %v9576_v36, 0.0  ;;  %v9580_v60 = vpop.eup %7022 }
0x14f8   :  { %4852 = vadd.xlane.f32.xlu1 %v4851_v38  ;;  %v4644_v41 = vsel %vm296_vm0, %v9580_v60, 0.0  ;;  %v7025_v43 = vpop.eup %7024 }
0x14f9   :  { %v4848_v2 = vsel %vm296_vm0, %v7025_v43, 0.0 }
0x14fb   :  { %v6667_v8 = vpop.permute.xlu1 %6666 }
0x14fc   :  { %v6668_v58 = vunpack.i.l.bf16 %v6667_v8  ;;  %v6669_v20 = vunpack.i.h.bf16 %v6667_v8 }
0x14fe   :  { %v6672_v0 = vpop.permute.xlu0 %6671  ;;  %4898 = vmatpush.msrb.mxu2 %v6668_v58 }
0x14ff   :  { %v6673_v54 = vunpack.i.l.bf16 %v6672_v0  ;;  %v6674_v39 = vunpack.i.h.bf16 %v6672_v0 }
0x1500   :  { %4645 = vadd.xlane.f32.xlu1 %v4644_v41  ;;  %4899 = vmatpush.msrb.mxu2 %v6669_v20 }
0x1501   :  { %4691 = vmatpush.msra.mxu3 %v6673_v54 }
0x1502   :  { %4900 = vmatpush.msrb.mxu2 %v6678_v31 }
0x1503   :  { %4692 = vmatpush.msra.mxu3 %v6674_v39  ;;  %v5182_v39 = vld [vmem:[#allocation14 + $0x10] sm:$0xff] }
0x1504   :  { %4901 = vmatpush.msrb.mxu2 %v6679_v14  ;;  %v5181_v14 = vld [vmem:[#allocation14 + $0x8] sm:$0xff] }
0x1508   :  { %4983 = vadd.xlane.f32.xlu1 %v4982_v45  ;;  %6681 = vrot.lane.b32.xlu2 %v9450_v4, %s7386_s9 }
0x1510   :  { %4989 = vadd.xlane.f32.xlu1 %v4988_v55  ;;  %v5180_v55 = vld [vmem:[#allocation14] sm:$0xff] }
0x1526   :  { %v4637_v63 = vpop.xlane.xlu1 %4636 }
0x152e   :  { %v4640_v4 = vpop.xlane.xlu1 %4639 }
0x1531   :  { %4849 = vadd.xlane.f32.xlu2 %v4848_v2 }
0x1534   :  { %v4847_v23 = vpop.xlane.xlu0 %4846 }
0x1536   :  { %v4643_v46 = vpop.xlane.xlu1 %4642 }
0x153c   :  { %v9624_v54 = vpop.xlane.xlu0 %4986 }
0x1544   :  { %v9626_v41 = vpop.xlane.xlu0 %4992 }
0x1550   :  { %v4452_v40 = vpop.f32.mrf.mxu3 }
0x1551   :  { %6443 = vmatmul.msk.f32.vlgmr.msra.gmra.mxu0 %vm665_vm11, %v4452_v40 }
0x1560   :  { %v4455_v26 = vpop.f32.mrf.mxu3 }
0x1561   :  { %6444 = vmatmul.msk.f32.gmra.mxu0 %vm665_vm11, %v4455_v26 }
0x1563   :  { %v4844_v13 = vpop.xlane.xlu2 %4843 }
0x1564   :  { %7026 = vrcp.f32 %v4844_v13 }
0x1565   :  { %7028 = vrcp.f32 %v4637_v63 }
0x1566   :  { %7030 = vrcp.f32 %v4847_v23  ;;  %v9635_v23 = vld [vmem:[%s10111_s11] ss:$0 sm:$0xff] }
0x1567   :  { %7032 = vrcp.f32 %v4640_v4 }
0x1568   :  { %v4458_v28 = vpop.f32.mrf.mxu3  ;;  %7034 = vrcp.f32 %v4643_v46 }
0x1569   :  { %6445 = vmatmul.msk.f32.gmra.mxu0 %vm665_vm11, %v4458_v28 }
0x156a   :  { %v7027_v15 = vpop.eup %7026 }
0x156b   :  { %v4853_v59 = vpop.xlane.xlu1 %4852  ;;  %v4858_v30 = vmul.f32 %v7027_v15, %v7019_v42  ;;  %v6682_v11 = vpop.permute.xlu2 %6681 }
0x156c   :  { %v7029_v62 = vpop.eup %7028  ;;  %v6683_v18 = vunpack.i.l.bf16 %v6682_v11  ;;  %v6684_v47 = vunpack.i.h.bf16 %v6682_v11 }
0x156d   :  { %6475 = vmatmul.msk.f32.vlgmr.msrb.gmra.mxu2 %vm296_vm0, %v4858_v30  ;;  %v4651_v25 = vmul.f32 %v7029_v62, %v9524_v57  ;;  %v7031_v12 = vpop.eup %7030  ;;  %v9639_v30 = vld [vmem:[%s10112_s24] ss:$0 sm:$0xff] }
0x156e   :  { %4693 = vmatpush.msra.mxu3 %v6683_v18  ;;  %v4859_v3 = vmul.f32 %v7031_v12, %v9542_v24  ;;  %v7033_v61 = vpop.eup %7032 }
0x156f   :  { %v4652_v42 = vmul.f32 %v7033_v61, %v9532_v27  ;;  %v7035_v52 = vpop.eup %7034 }
0x1570   :  { %v4461_v16 = vpop.f32.mrf.mxu3  ;;  %4694 = vmatpush.msra.mxu3 %v6684_v47  ;;  %v4653_v8 = vmul.f32 %v7035_v52, %v9538_v5 }
0x1571   :  { %6446 = vmatmul.msk.f32.gmra.mxu0 %vm665_vm11, %v4461_v16  ;;  %6459 = vmatmul.msk.f32.vlgmr.msra.gmra.mxu3 %vm296_vm0, %v4651_v25 }
0x1572   :  { %4942 = vmatpush.msrb.mxu3 %v9424_v29 }
0x1573   :  { %v4646_v19 = vpop.xlane.xlu1 %4645 }
0x1574   :  { %7036 = vrcp.f32 %v4646_v19 }
0x1575   :  { %6476 = vmatmul.msk.f32.gmra.mxu2 %vm296_vm0, %v4859_v3 }
0x1579   :  { %6460 = vmatmul.msk.f32.gmra.mxu3 %vm296_vm0, %v4652_v42 }
0x157a   :  { %v7037_v58 = vpop.eup %7036 }
0x157b   :  { %v4984_v57 = vpop.xlane.xlu1 %4983  ;;  %v4654_v27 = vmul.f32 %v7037_v58, %v9580_v60  ;;  %v5183_v60 = vld [vmem:[#allocation14 + $0x18] sm:$0xff] }
0x157c   :  { %v5006_v17 = vmul.f32 %v4984_v57, %v7668_v22  ;;  %5224 = vmatpush.msra.mxu0 %v5183_v60 }
0x157e   :  { %v5014_v38 = vsub.f32 %v9587_v56, %v5006_v17  ;;  %5225 = vmatpush.msra.mxu0 %v5182_v39  ;;  %v9680_v39 = vld [vmem:[%s10113_s7] ss:$0 sm:$0xff] }
0x1580   :  { %v5022_v29 = vmul.f32 %v5014_v38, %v5014_v38  ;;  %5226 = vmatpush.msra.mxu0 %v5181_v14 }
0x1581   :  { %6461 = vmatmul.msk.f32.gmra.mxu3 %vm296_vm0, %v4653_v8 }
0x1582   :  { %v5030_v24 = vsel %vm296_vm0, %v5022_v29, 0.0  ;;  %5227 = vmatpush.msra.mxu0 %v5180_v55 }
0x1583   :  { %5031 = vadd.xlane.f32.xlu0 %v5030_v24 }
0x1589   :  { %6462 = vmatmul.msk.f32.gmra.mxu3 %vm296_vm0, %v4654_v27 }
0x15a4   :  { %v4850_v32 = vpop.xlane.xlu2 %4849 }
0x15a5   :  { %7038 = vrcp.f32 %v4850_v32  ;;  %v5007_v32 = vmul.f32 %v9624_v54, %v7668_v22 }
0x15a6   :  { %7040 = vrcp.f32 %v4853_v59 }
0x15ab   :  { %v7039_v20 = vpop.eup %7038 }
0x15ac   :  { %v4860_v0 = vmul.f32 %v7039_v20, %v7025_v43  ;;  %v7041_v51 = vpop.eup %7040 }
0x15ad   :  { %v4861_v5 = vmul.f32 %v7041_v51, %v9576_v36 }
0x15ae   :  { %6477 = vmatmul.msk.f32.gmra.mxu2 %vm296_vm0, %v4860_v0  ;;  %v9665_v0 = vsub.f32 %v9554_v10, %v5007_v32 }
0x15b6   :  { %6478 = vmatmul.msk.f32.gmra.mxu2 %vm296_vm0, %v4861_v5  ;;  %v5009_v5 = vmul.f32 %v9626_v41, %v7668_v22 }
0x15ce   :  { %v4493_v25 = vpop.f32.mrf.mxu0 }
0x15cf   :  { %v4535_v3 = vadd.f32 %v9454_v34, %v4493_v25  ;;  %v5581_v25 = vld [vmem:[%s10114_s18] sm:$0xff] }
0x15de   :  { %v4496_v12 = vpop.f32.mrf.mxu0 }
0x15e6   :  { %v9646_v16 = vpop.f32.mrf.mxu0 }
0x15ee   :  { %v9648_v19 = vpop.f32.mrf.mxu0 }
0x15f0   :  { %v4903_v31 = vpop.f32.mrf.mxu2 }
0x15f1   :  { %6479 = vmatmul.msk.f32.vlgmr.msrb.gmra.mxu3 %vm665_vm11, %v4903_v31  ;;  %v5023_v31 = vmul.f32 %v9665_v0, %v9665_v0 }
0x15f3   :  { %v5033_v60 = vsel %vm296_vm0, %v5023_v31, 0.0 }
0x15f4   :  { %v4696_v6 = vpop.f32.mrf.mxu3 }
0x15f5   :  { %6463 = vmatmul.msk.f32.vlgmr.msrb.gmra.mxu0 %vm665_vm11, %v4696_v6 }
0x15f6   :  { %v5032_v45 = vpop.xlane.xlu0 %5031 }
0x15f7   :  { %v5054_v36 = vmul.f32 %v5032_v45, %v7668_v22 }
0x15f8   :  { %v4906_v7 = vpop.f32.mrf.mxu2 }
0x15f9   :  { %v5062_v21 = vadd.f32 1e-05, %v5054_v36  ;;  %6480 = vmatmul.msk.f32.gmra.mxu3 %vm665_vm11, %v4906_v7 }
0x15fb   :  { %7042 = vrsqrt.f32 %v5062_v21  ;;  %vm5076_vm7 = vweird.f32 %v5062_v21 }
0x15fc   :  { %v4699_v43 = vpop.f32.mrf.mxu3 }
0x15fd   :  { %6464 = vmatmul.msk.f32.gmra.mxu0 %vm665_vm11, %v4699_v43 }
0x1601   :  { %v7043_v2 = vpop.eup %7042 }
0x1602   :  { %v5071_v63 = vmul.f32 %v7043_v2, %v5062_v21  ;;  %vm5077_vm6 = vweird.f32 %v7043_v2 }
0x1603   :  { %vm5078_vm8 = vmor %vm5076_vm7, %vm5077_vm6 }
0x1604   :  { %v5072_v40 = vmul.f32 %v7043_v2, %v5071_v63  ;;  %v4702_v4 = vpop.f32.mrf.mxu3  ;;  %v5587_v63 = vld [vmem:[%s10114_s18 + $0x30] sm:$0xff] }
0x1605   :  { %6465 = vmatmul.msk.f32.gmra.mxu0 %vm665_vm11, %v4702_v4 }
0x1606   :  { %v5073_v26 = vmul.f32 0.5, %v5072_v40  ;;  %v5586_v40 = vld [vmem:[%s10114_s18 + $0x28] sm:$0xff] }
0x1608   :  { %v5074_v46 = vsub.f32 1.5, %v5073_v26 }
0x160a   :  { %v5075_v13 = vmul.f32 %v7043_v2, %v5074_v46  ;;  %v5585_v46 = vld [vmem:[%s10114_s18 + $0x20] sm:$0xff] }
0x160c   :  { %v5079_v28 = vsel %vm5078_vm8, %v7043_v2, %v5075_v13  ;;  %v4705_v59 = vpop.f32.mrf.mxu3  ;;  %v5588_v2 = vld [vmem:[%s10114_s18 + $0x38] sm:$0xff] }
0x160d   :  { %v5150_v15 = vmul.f32 %v5079_v28, %v5014_v38  ;;  %6466 = vmatmul.msk.f32.gmra.mxu0 %vm665_vm11, %v4705_v59  ;;  %v4538_v38 = vadd.f32 %v9456_v37, %v4496_v12  ;;  %5621 = vmatpush.msra.mxu1 %v5588_v2  ;;  %v5584_v28 = vld [vmem:[%s10114_s18 + $0x18] sm:$0xff] }
0x160f   :  { %v5161_v11 = vmul.f32 %v9635_v23, %v5150_v15  ;;  %5622 = vmatpush.msra.mxu1 %v5587_v63 }
0x1611   :  { %v5172_v62 = vadd.f32 %v9639_v30, %v5161_v11  ;;  %5623 = vmatpush.msra.mxu1 %v5586_v40 }
0x1613   :  { %5624 = vmatpush.msra.mxu1 %v5585_v46 }
0x1615   :  { %6483 = vmatmul.msk.f32.vlgmr.msra.gmra.mxu0 %vm296_vm0, %v5172_v62  ;;  %5625 = vmatpush.msra.mxu1 %v5584_v28  ;;  %v5583_v62 = vld [vmem:[%s10114_s18 + $0x10] sm:$0xff] }
0x1617   :  { %5626 = vmatpush.msra.mxu1 %v5583_v62 }
0x1631   :  { %v4909_v18 = vpop.f32.mrf.mxu2 }
0x1632   :  { %6481 = vmatmul.msk.f32.gmra.mxu3 %vm665_vm11, %v4909_v18  ;;  %v5582_v18 = vld [vmem:[%s10114_s18 + $0x8] sm:$0xff] }
0x1633   :  { %5627 = vmatpush.msra.mxu1 %v5582_v18 }
0x1635   :  { %5628 = vmatpush.msra.mxu1 %v5581_v25 }
0x1639   :  { %v4912_v47 = vpop.f32.mrf.mxu2 }
0x163a   :  { %6482 = vmatmul.msk.f32.gmra.mxu3 %vm665_vm11, %v4912_v47 }
0x1672   :  { %v4737_v61 = vpop.f32.mrf.mxu0 }
0x1673   :  { %v4749_v42 = vadd.f32 %v4737_v61, %v4535_v3 }
0x1674   :  { %v4944_v57 = vpop.f32.mrf.mxu3 }
0x1675   :  { %v4956_v17 = vadd.f32 %v4944_v57, %v4749_v42 }
0x1677   :  { %v4964_v52 = vadd.f32 %v4956_v17, %v8923_v35 }
0x1679   :  { %v9654_v8 = vadd.f32 %v9548_v33, %v4964_v52  ;;  %v4541_v52 = vadd.f32 %v9466_v49, %v9646_v16 }
0x167a   :  { %v4740_v29 = vpop.f32.mrf.mxu0 }
0x167b   :  { %v4750_v24 = vadd.f32 %v4740_v29, %v4538_v38  ;;  %v4994_v58 = vsel %vm296_vm0, %v9654_v8, 0.0 }
0x167c   :  { %4995 = vadd.xlane.f32.xlu2 %v4994_v58  ;;  %v4947_v27 = vpop.f32.mrf.mxu3  ;;  %v4990_v58 = vpop.xlane.xlu1 %4989 }
0x167d   :  { %v4957_v34 = vadd.f32 %v4947_v27, %v4750_v24 }
0x167f   :  { %v4965_v20 = vadd.f32 %v4957_v34, %v8929_v1  ;;  %v9676_v1 = vsub.f32 %v9561_v50, %v5009_v5  ;;  %v5008_v5 = vmul.f32 %v4990_v58, %v7668_v22 }
0x1681   :  { %v9662_v35 = vadd.f32 %v9548_v33, %v4965_v20  ;;  %v5025_v14 = vmul.f32 %v9676_v1, %v9676_v1 }
0x1682   :  { %v4743_v37 = vpop.f32.mrf.mxu0 }
0x1683   :  { %v4997_v51 = vsel %vm296_vm0, %v9662_v35, 0.0  ;;  %v5039_v45 = vsel %vm296_vm0, %v5025_v14, 0.0  ;;  %v4751_v24 = vadd.f32 %v4743_v37, %v4541_v52  ;;  %v4544_v14 = vadd.f32 %v9471_v44, %v9648_v19 }
0x1684   :  { %4998 = vadd.xlane.f32.xlu1 %v4997_v51  ;;  %v9714_v37 = vsub.f32 %v9596_v9, %v5008_v5 }
0x1686   :  { %v5024_v19 = vmul.f32 %v9714_v37, %v9714_v37 }
0x168a   :  { %v9673_v54 = vpop.f32.mrf.mxu0 }
0x168c   :  { %5034 = vadd.xlane.f32.xlu1 %v5033_v60 }
0x1692   :  { %v5229_v41 = vpop.f32.mrf.mxu0 }
0x1693   :  { %v9685_v6 = vadd.f32 %v9680_v39, %v5229_v41  ;;  %v4752_v41 = vadd.f32 %v9673_v54, %v4544_v14  ;;  %v5036_v54 = vsel %vm296_vm0, %v5024_v19, 0.0 }
0x1694   :  { %5040 = vadd.xlane.f32.xlu1 %v5039_v45 }
0x1695   :  { %v9689_v55 = vmul.f32 0.70710677, %v9685_v6 }
0x1697   :  { %vm5269_vm11 = vcmp.ge.f32.partialorder %v9689_v55, 0.0  ;;  %v5277_v36 = vsub.f32 0.0, %v9689_v55 }
0x1699   :  { %v5285_v21 = vsel %vm5269_vm11, %v9689_v55, %v5277_v36 }
0x169a   :  { %v5293_v7 = vmul.f32 0.3275911, %v5285_v21  ;;  %v5501_v42 = vsub.f32 0.0, %v5285_v21 }
0x169c   :  { %v5301_v43 = vadd.f32 1.0, %v5293_v7  ;;  %v5509_v38 = vmul.f32 %v5501_v42, %v5285_v21 }
0x169e   :  { %7044 = vrcp.f32 %v5301_v43  ;;  %v5320_v15 = vand.u32 2147483648, %v5301_v43  ;;  %v5318_v11 = vand.u32 2147483647, %v5301_v43  ;;  %vm5314_vm14 = vweird.f32 %v5301_v43 }
0x169f   :  { %v5517_v32 = vmul.f32 1.442695, %v5509_v38 }
0x16a0   :  { %v5321_v12 = vor.u32 1.1754944e-38, %v5320_v15  ;;  %vm5319_vm1 = vcmp.eq.f32.partialorder %v5318_v11, 8.507059e+37 }
0x16a1   :  { %7046 = vpow2.f32 %v5517_v32 }
0x16a4   :  { %v7045_v4 = vpop.eup %7044 }
0x16a5   :  { %v5310_v26 = vmul.f32 %v7045_v4, %v5301_v43  ;;  %vm5315_vm13 = vweird.f32 %v7045_v4 }
0x16a6   :  { %vm5316_vm15 = vmor %vm5314_vm14, %vm5315_vm13 }
0x16a7   :  { %v5311_v13 = vsub.f32 1.0, %v5310_v26  ;;  %v7047_v43 = vpop.eup %7046 }
0x16a9   :  { %v5312_v59 = vmul.f32 %v7045_v4, %v5311_v13 }
0x16ab   :  { %v5313_v47 = vadd.f32 %v7045_v4, %v5312_v59 }
0x16ad   :  { %v5317_v3 = vsel %vm5316_vm15, %v7045_v4, %v5313_v47 }
0x16ae   :  { %v5322_v61 = vsel %vm5319_vm1, %v5321_v12, %v5317_v3 }
0x16af   :  { %v5429_v57 = vmul.f32 1.0614054, %v5322_v61 }
0x16b1   :  { %v5437_v17 = vadd.f32 -1.4531521, %v5429_v57 }
0x16b3   :  { %v5445_v29 = vmul.f32 %v5437_v17, %v5322_v61 }
0x16b5   :  { %v5453_v27 = vadd.f32 1.4214138, %v5445_v29  ;;  %v4950_v34 = vpop.f32.mrf.mxu3 }
0x16b6   :  { %v4958_v20 = vadd.f32 %v4950_v34, %v4751_v24 }
0x16b7   :  { %v5461_v51 = vmul.f32 %v5453_v27, %v5322_v61 }
0x16b8   :  { %v4966_v31 = vadd.f32 %v4958_v20, %v8935_v48 }
0x16b9   :  { %v5469_v60 = vadd.f32 -0.28449672, %v5461_v51 }
0x16ba   :  { %v9711_v49 = vadd.f32 %v9548_v33, %v4966_v31 }
0x16bb   :  { %v5477_v16 = vmul.f32 %v5469_v60, %v5322_v61 }
0x16bc   :  { %v5000_v45 = vsel %vm296_vm0, %v9711_v49, 0.0 }
0x16bd   :  { %v5485_v36 = vadd.f32 0.2548296, %v5477_v16  ;;  %5001 = vadd.xlane.f32.xlu2 %v5000_v45  ;;  %v4953_v48 = vpop.f32.mrf.mxu3 }
0x16be   :  { %v4959_v21 = vadd.f32 %v4953_v48, %v4752_v41 }
0x16bf   :  { %v5493_v7 = vmul.f32 %v5485_v36, %v5322_v61 }
0x16c0   :  { %v4967_v44 = vadd.f32 %v4959_v21, %v8941_v53  ;;  %v5253_v53 = vmul.f32 0.5, %v9685_v6 }
0x16c1   :  { %v5533_v2 = vmul.f32 %v7047_v43, %v5493_v7 }
0x16c2   :  { %v9723_v63 = vadd.f32 %v9548_v33, %v4967_v44 }
0x16c3   :  { %v5541_v40 = vsub.f32 1.0, %v5533_v2 }
0x16c4   :  { %v5003_v4 = vsel %vm296_vm0, %v9723_v63, 0.0 }
0x16c5   :  { %v5549_v26 = vsub.f32 0.0, %v5541_v40  ;;  %5037 = vadd.xlane.f32.xlu2 %v5036_v54  ;;  %5004 = vadd.xlane.f32.xlu0 %v5003_v4 }
0x16c7   :  { %v5557_v46 = vsel %vm5269_vm11, %v5541_v40, %v5549_v26 }
0x16c8   :  { %v5565_v13 = vadd.f32 1.0, %v5557_v46 }
0x16ca   :  { %v5573_v28 = vmul.f32 %v5565_v13, %v5253_v53  ;;  %v9768_v13 = vld [vmem:[%s10115_s22] ss:$0 sm:$0xff] }
0x16cc   :  { %6491 = vmatmul.msk.f32.vlgmr.msra.gmra.mxu1 %vm2903_vm4, %v5573_v28 }
0x16ef   :  { %v4996_v33 = vpop.xlane.xlu2 %4995 }
0x16f0   :  { %v5010_v15 = vmul.f32 %v4996_v33, %v7668_v22 }
0x16f2   :  { %v9734_v59 = vsub.f32 %v9654_v8, %v5010_v15 }
0x16f4   :  { %v5026_v11 = vmul.f32 %v9734_v59, %v9734_v59 }
0x16f6   :  { %v5042_v62 = vsel %vm296_vm0, %v5026_v11, 0.0 }
0x16f7   :  { %v4999_v18 = vpop.xlane.xlu1 %4998  ;;  %5043 = vadd.xlane.f32.xlu0 %v5042_v62 }
0x16f8   :  { %v5011_v55 = vmul.f32 %v4999_v18, %v7668_v22 }
0x16fa   :  { %v9741_v6 = vsub.f32 %v9662_v35, %v5011_v55 }
0x16fc   :  { %v5027_v47 = vmul.f32 %v9741_v6, %v9741_v6 }
0x16fe   :  { %v5045_v25 = vsel %vm296_vm0, %v5027_v47, 0.0 }
0x16ff   :  { %v5035_v12 = vpop.xlane.xlu1 %5034  ;;  %5046 = vadd.xlane.f32.xlu2 %v5045_v25 }
0x1700   :  { %v5055_v3 = vmul.f32 %v5035_v12, %v7668_v22 }
0x1702   :  { %v5063_v61 = vadd.f32 1e-05, %v5055_v3 }
0x1704   :  { %7048 = vrsqrt.f32 %v5063_v61  ;;  %vm5086_vm5 = vweird.f32 %v5063_v61 }
0x1707   :  { %v5041_v32 = vpop.xlane.xlu1 %5040 }
0x1708   :  { %v5057_v20 = vmul.f32 %v5041_v32, %v7668_v22 }
0x170a   :  { %v7049_v42 = vpop.eup %7048  ;;  %v5065_v51 = vadd.f32 1e-05, %v5057_v20 }
0x170b   :  { %v5081_v57 = vmul.f32 %v7049_v42, %v5063_v61  ;;  %vm5087_vm2 = vweird.f32 %v7049_v42 }
0x170c   :  { %vm5088_vm9 = vmor %vm5086_vm5, %vm5087_vm2  ;;  %7050 = vrsqrt.f32 %v5065_v51  ;;  %vm5106_vm7 = vweird.f32 %v5065_v51 }
0x170d   :  { %v5082_v17 = vmul.f32 %v7049_v42, %v5081_v57 }
0x170f   :  { %v5083_v52 = vmul.f32 0.5, %v5082_v17 }
0x1711   :  { %v5084_v38 = vsub.f32 1.5, %v5083_v52 }
0x1712   :  { %v7051_v45 = vpop.eup %7050 }
0x1713   :  { %v5085_v29 = vmul.f32 %v7049_v42, %v5084_v38  ;;  %v5101_v43 = vmul.f32 %v7051_v45, %v5065_v51  ;;  %vm5107_vm12 = vweird.f32 %v7051_v45 }
0x1714   :  { %vm5108_vm8 = vmor %vm5106_vm7, %vm5107_vm12 }
0x1715   :  { %v5089_v24 = vsel %vm5088_vm9, %v7049_v42, %v5085_v29  ;;  %v5102_v2 = vmul.f32 %v7051_v45, %v5101_v43 }
0x1716   :  { %v5151_v58 = vmul.f32 %v5089_v24, %v9665_v0 }
0x1717   :  { %v5103_v54 = vmul.f32 0.5, %v5102_v2 }
0x1718   :  { %v5162_v27 = vmul.f32 %v9635_v23, %v5151_v58 }
0x1719   :  { %v5104_v46 = vsub.f32 1.5, %v5103_v54 }
0x171a   :  { %v5173_v34 = vadd.f32 %v9639_v30, %v5162_v27 }
0x171b   :  { %v5105_v11 = vmul.f32 %v7051_v45, %v5104_v46 }
0x171c   :  { %6484 = vmatmul.msk.f32.gmra.mxu0 %vm296_vm0, %v5173_v34 }
0x171d   :  { %v5109_v12 = vsel %vm5108_vm8, %v7051_v45, %v5105_v11 }
0x171e   :  { %v5153_v3 = vmul.f32 %v5109_v12, %v9676_v1 }
0x1720   :  { %v5164_v42 = vmul.f32 %v9635_v23, %v5153_v3 }
0x1722   :  { %v5175_v57 = vadd.f32 %v9639_v30, %v5164_v42 }
0x1730   :  { %v5002_v5 = vpop.xlane.xlu2 %5001 }
0x1731   :  { %v5012_v31 = vmul.f32 %v5002_v5, %v7668_v22 }
0x1733   :  { %v9754_v60 = vsub.f32 %v9711_v49, %v5012_v31 }
0x1735   :  { %v5028_v0 = vmul.f32 %v9754_v60, %v9754_v60 }
0x1737   :  { %v5048_v14 = vsel %vm296_vm0, %v5028_v0, 0.0 }
0x1738   :  { %v5038_v16 = vpop.xlane.xlu2 %5037  ;;  %5049 = vadd.xlane.f32.xlu1 %v5048_v14  ;;  %v5005_v41 = vpop.xlane.xlu0 %5004 }
0x1739   :  { %v5056_v36 = vmul.f32 %v5038_v16, %v7668_v22  ;;  %v5013_v48 = vmul.f32 %v5005_v41, %v7668_v22 }
0x173b   :  { %v5064_v21 = vadd.f32 1e-05, %v5056_v36  ;;  %v9762_v7 = vsub.f32 %v9723_v63, %v5013_v48 }
0x173d   :  { %7052 = vrsqrt.f32 %v5064_v21  ;;  %v5029_v44 = vmul.f32 %v9762_v7, %v9762_v7  ;;  %vm5096_vm3 = vweird.f32 %v5064_v21 }
0x173f   :  { %v5051_v19 = vsel %vm296_vm0, %v5029_v44, 0.0 }
0x1740   :  { %5052 = vadd.xlane.f32.xlu0 %v5051_v19 }
0x1743   :  { %v7053_v40 = vpop.eup %7052 }
0x1744   :  { %v5091_v4 = vmul.f32 %v7053_v40, %v5064_v21  ;;  %vm5097_vm10 = vweird.f32 %v7053_v40 }
0x1745   :  { %vm5098_vm6 = vmor %vm5096_vm3, %vm5097_vm10 }
0x1746   :  { %v5092_v26 = vmul.f32 %v7053_v40, %v5091_v4 }
0x1748   :  { %v5093_v53 = vmul.f32 0.5, %v5092_v26 }
0x1749   :  { %v5630_v28 = vpop.f32.mrf.mxu1 }
0x174a   :  { %v5094_v33 = vsub.f32 1.5, %v5093_v53  ;;  %v5654_v15 = vadd.f32 %v5630_v28, %v9587_v56 }
0x174c   :  { %v5095_v62 = vmul.f32 %v7053_v40, %v5094_v33  ;;  %v9772_v18 = vadd.f32 %v9768_v13, %v5654_v15 }
0x174e   :  { %v5099_v55 = vsel %vm5098_vm6, %v7053_v40, %v5095_v62  ;;  %v5676_v47 = vsel %vm296_vm0, %v9772_v18, 0.0 }
0x174f   :  { %v5152_v25 = vmul.f32 %v5099_v55, %v9714_v37  ;;  %5677 = vadd.xlane.f32.xlu2 %v5676_v47 }
0x1751   :  { %v5163_v56 = vmul.f32 %v9635_v23, %v5152_v25 }
0x1753   :  { %v5174_v61 = vadd.f32 %v9639_v30, %v5163_v56 }
0x1755   :  { %6485 = vmatmul.msk.f32.gmra.mxu0 %vm296_vm0, %v5174_v61 }
0x175d   :  { %6486 = vmatmul.msk.f32.gmra.mxu0 %vm296_vm0, %v5175_v57 }
0x176a   :  { %v5044_v17 = vpop.xlane.xlu0 %5043 }
0x176b   :  { %v5058_v52 = vmul.f32 %v5044_v17, %v7668_v22 }
0x176d   :  { %v5066_v37 = vadd.f32 1e-05, %v5058_v52 }
0x176f   :  { %7054 = vrsqrt.f32 %v5066_v37  ;;  %vm5116_vm13 = vweird.f32 %v5066_v37 }
0x1772   :  { %v5047_v38 = vpop.xlane.xlu2 %5046 }
0x1773   :  { %v5059_v29 = vmul.f32 %v5047_v38, %v7668_v22 }
0x1775   :  { %v7055_v24 = vpop.eup %7054  ;;  %v5067_v1 = vadd.f32 1e-05, %v5059_v29 }
0x1776   :  { %v5111_v58 = vmul.f32 %v7055_v24, %v5066_v37  ;;  %vm5117_vm11 = vweird.f32 %v7055_v24 }
0x1777   :  { %7056 = vrsqrt.f32 %v5067_v1  ;;  %vm5118_vm14 = vmor %vm5116_vm13, %vm5117_vm11  ;;  %vm5126_vm1 = vweird.f32 %v5067_v1 }
0x1778   :  { %v5112_v27 = vmul.f32 %v7055_v24, %v5111_v58 }
0x177a   :  { %v5113_v34 = vmul.f32 0.5, %v5112_v27 }
0x177c   :  { %v5114_v32 = vsub.f32 1.5, %v5113_v34 }
0x177d   :  { %v7057_v20 = vpop.eup %7056 }
0x177e   :  { %v5115_v51 = vmul.f32 %v7055_v24, %v5114_v32  ;;  %v5121_v5 = vmul.f32 %v7057_v20, %v5067_v1  ;;  %vm5127_vm15 = vweird.f32 %v7057_v20 }
0x177f   :  { %vm5128_vm2 = vmor %vm5126_vm1, %vm5127_vm15 }
0x1780   :  { %v5119_v31 = vsel %vm5118_vm14, %v7055_v24, %v5115_v51  ;;  %v5122_v0 = vmul.f32 %v7057_v20, %v5121_v5 }
0x1781   :  { %v5154_v14 = vmul.f32 %v5119_v31, %v9734_v59 }
0x1782   :  { %v5123_v16 = vmul.f32 0.5, %v5122_v0 }
0x1783   :  { %v5165_v41 = vmul.f32 %v9635_v23, %v5154_v14 }
0x1784   :  { %v5124_v45 = vsub.f32 1.5, %v5123_v16 }
0x1785   :  { %v5176_v36 = vadd.f32 %v9639_v30, %v5165_v41 }
0x1786   :  { %v5125_v48 = vmul.f32 %v7057_v20, %v5124_v45 }
0x1787   :  { %6487 = vmatmul.msk.f32.gmra.mxu0 %vm296_vm0, %v5176_v36 }
0x1788   :  { %v5129_v21 = vsel %vm5128_vm2, %v7057_v20, %v5125_v48 }
0x1789   :  { %v5155_v43 = vmul.f32 %v5129_v21, %v9741_v6 }
0x178b   :  { %v5166_v44 = vmul.f32 %v9635_v23, %v5155_v43 }
0x178d   :  { %v5177_v19 = vadd.f32 %v9639_v30, %v5166_v44 }
0x178f   :  { %6488 = vmatmul.msk.f32.gmra.mxu0 %vm296_vm0, %v5177_v19 }
0x1799   :  { %v5232_v59 = vpop.f32.mrf.mxu0 }
0x179a   :  { %v9795_v2 = vadd.f32 %v9680_v39, %v5232_v59 }
0x179c   :  { %v9798_v40 = vmul.f32 0.70710677, %v9795_v2 }
0x179e   :  { %vm5270_vm5 = vcmp.ge.f32.partialorder %v9798_v40, 0.0  ;;  %v5278_v54 = vsub.f32 0.0, %v9798_v40 }
0x17a0   :  { %v5286_v6 = vsel %vm5270_vm5, %v9798_v40, %v5278_v54 }
0x17a1   :  { %v5294_v4 = vmul.f32 0.3275911, %v5286_v6  ;;  %v5502_v57 = vsub.f32 0.0, %v5286_v6 }
0x17a3   :  { %v5302_v26 = vadd.f32 1.0, %v5294_v4  ;;  %v5510_v24 = vmul.f32 %v5502_v57, %v5286_v6 }
0x17a5   :  { %7058 = vrcp.f32 %v5302_v26  ;;  %v5335_v62 = vand.u32 2147483648, %v5302_v26  ;;  %v5333_v47 = vand.u32 2147483647, %v5302_v26  ;;  %vm5329_vm10 = vweird.f32 %v5302_v26 }
0x17a6   :  { %v5519_v32 = vmul.f32 1.442695, %v5510_v24 }
0x17a7   :  { %v5336_v12 = vor.u32 1.1754944e-38, %v5335_v62  ;;  %vm5334_vm3 = vcmp.eq.f32.partialorder %v5333_v47, 8.507059e+37 }
0x17ab   :  { %v7059_v46 = vpop.eup %7058  ;;  %v5050_v53 = vpop.xlane.xlu1 %5049 }
0x17ac   :  { %v5325_v28 = vmul.f32 %v7059_v46, %v5302_v26  ;;  %v5060_v33 = vmul.f32 %v5050_v53, %v7668_v22  ;;  %vm5330_vm9 = vweird.f32 %v7059_v46 }
0x17ad   :  { %vm5331_vm12 = vmor %vm5329_vm10, %vm5330_vm9 }
0x17ae   :  { %v5326_v15 = vsub.f32 1.0, %v5325_v28  ;;  %v5068_v11 = vadd.f32 1e-05, %v5060_v33 }
0x17b0   :  { %v5327_v55 = vmul.f32 %v7059_v46, %v5326_v15  ;;  %7060 = vrsqrt.f32 %v5068_v11  ;;  %vm5136_vm7 = vweird.f32 %v5068_v11 }
0x17b2   :  { %v5328_v25 = vadd.f32 %v7059_v46, %v5327_v55 }
0x17b3   :  { %v5053_v56 = vpop.xlane.xlu0 %5052 }
0x17b4   :  { %v5332_v3 = vsel %vm5331_vm12, %v7059_v46, %v5328_v25  ;;  %v5061_v61 = vmul.f32 %v5053_v56, %v7668_v22 }
0x17b5   :  { %v5337_v42 = vsel %vm5334_vm3, %v5336_v12, %v5332_v3 }
0x17b6   :  { %v7061_v17 = vpop.eup %7060  ;;  %v5430_v52 = vmul.f32 1.0614054, %v5337_v42  ;;  %v5069_v37 = vadd.f32 1e-05, %v5061_v61 }
0x17b7   :  { %v5131_v38 = vmul.f32 %v7061_v17, %v5068_v11  ;;  %vm5137_vm6 = vweird.f32 %v7061_v17  ;;  %v5254_v11 = vmul.f32 0.5, %v9795_v2 }
0x17b8   :  { %v5438_v29 = vadd.f32 -1.4531521, %v5430_v52  ;;  %7062 = vrsqrt.f32 %v5069_v37  ;;  %vm5138_vm8 = vmor %vm5136_vm7, %vm5137_vm6  ;;  %vm5146_vm13 = vweird.f32 %v5069_v37 }
0x17b9   :  { %v5132_v1 = vmul.f32 %v7061_v17, %v5131_v38  ;;  %7064 = vpow2.f32 %v5519_v32 }
0x17ba   :  { %v5446_v58 = vmul.f32 %v5438_v29, %v5337_v42 }
0x17bb   :  { %v5133_v27 = vmul.f32 0.5, %v5132_v1 }
0x17bc   :  { %v5454_v34 = vadd.f32 1.4214138, %v5446_v58 }
0x17bd   :  { %v5134_v20 = vsub.f32 1.5, %v5133_v27 }
0x17be   :  { %v7063_v51 = vpop.eup %7062  ;;  %v5462_v5 = vmul.f32 %v5454_v34, %v5337_v42 }
0x17bf   :  { %v5135_v31 = vmul.f32 %v7061_v17, %v5134_v20  ;;  %v5141_v0 = vmul.f32 %v7063_v51, %v5069_v37  ;;  %vm5147_vm11 = vweird.f32 %v7063_v51  ;;  %v7065_v54 = vpop.eup %7064 }
0x17c0   :  { %v5470_v14 = vadd.f32 -0.28449672, %v5462_v5  ;;  %vm5148_vm14 = vmor %vm5146_vm13, %vm5147_vm11 }
0x17c1   :  { %v5139_v16 = vsel %vm5138_vm8, %v7061_v17, %v5135_v31  ;;  %v5142_v41 = vmul.f32 %v7063_v51, %v5141_v0 }
0x17c2   :  { %v5478_v45 = vmul.f32 %v5470_v14, %v5337_v42  ;;  %v5156_v36 = vmul.f32 %v5139_v16, %v9754_v60 }
0x17c3   :  { %v5143_v48 = vmul.f32 0.5, %v5142_v41 }
0x17c4   :  { %v5486_v21 = vadd.f32 0.2548296, %v5478_v45  ;;  %v5167_v43 = vmul.f32 %v9635_v23, %v5156_v36 }
0x17c5   :  { %v5144_v44 = vsub.f32 1.5, %v5143_v48 }
0x17c6   :  { %v5494_v19 = vmul.f32 %v5486_v21, %v5337_v42  ;;  %v5178_v59 = vadd.f32 %v9639_v30, %v5167_v43 }
0x17c7   :  { %v5145_v6 = vmul.f32 %v7063_v51, %v5144_v44 }
0x17c8   :  { %v5534_v4 = vmul.f32 %v7065_v54, %v5494_v19  ;;  %6489 = vmatmul.msk.f32.gmra.mxu0 %vm296_vm0, %v5178_v59 }
0x17c9   :  { %v5149_v26 = vsel %vm5148_vm14, %v7063_v51, %v5145_v6 }
0x17ca   :  { %v5542_v46 = vsub.f32 1.0, %v5534_v4  ;;  %v5157_v60 = vmul.f32 %v5149_v26, %v9762_v7 }
0x17cc   :  { %v5550_v53 = vsub.f32 0.0, %v5542_v46  ;;  %v5168_v28 = vmul.f32 %v9635_v23, %v5157_v60 }
0x17ce   :  { %v5558_v33 = vsel %vm5270_vm5, %v5542_v46, %v5550_v53  ;;  %v5179_v15 = vadd.f32 %v9639_v30, %v5168_v28 }
0x17cf   :  { %v5566_v62 = vadd.f32 1.0, %v5558_v33 }
0x17d0   :  { %6490 = vmatmul.msk.f32.gmra.mxu0 %vm296_vm0, %v5179_v15 }
0x17d1   :  { %v5574_v55 = vmul.f32 %v5566_v62, %v5254_v11 }
0x17d2   :  { %v5235_v47 = vpop.f32.mrf.mxu0 }
0x17d3   :  { %v9819_v25 = vadd.f32 %v9680_v39, %v5235_v47  ;;  %6492 = vmatmul.msk.f32.gmra.mxu1 %vm2903_vm4, %v5574_v55 }
0x17d5   :  { %v9823_v7 = vmul.f32 0.70710677, %v9819_v25 }
0x17d7   :  { %vm5271_vm15 = vcmp.ge.f32.partialorder %v9823_v7, 0.0  ;;  %v5279_v23 = vsub.f32 0.0, %v9823_v7 }
0x17d9   :  { %v5287_v30 = vsel %vm5271_vm15, %v9823_v7, %v5279_v23 }
0x17da   :  { %v5295_v2 = vmul.f32 0.3275911, %v5287_v30  ;;  %v5238_v40 = vpop.f32.mrf.mxu0  ;;  %v5503_v5 = vsub.f32 0.0, %v5287_v30 }
0x17db   :  { %v9831_v12 = vadd.f32 %v9680_v39, %v5238_v40 }
0x17dc   :  { %v5303_v56 = vadd.f32 1.0, %v5295_v2  ;;  %v5511_v36 = vmul.f32 %v5503_v5, %v5287_v30 }
0x17dd   :  { %v9834_v3 = vmul.f32 0.70710677, %v9831_v12 }
0x17de   :  { %7066 = vrcp.f32 %v5303_v56  ;;  %v5350_v29 = vand.u32 2147483648, %v5303_v56  ;;  %v5348_v1 = vand.u32 2147483647, %v5303_v56  ;;  %vm5344_vm5 = vweird.f32 %v5303_v56 }
0x17df   :  { %vm5272_vm1 = vcmp.ge.f32.partialorder %v9834_v3, 0.0  ;;  %v5280_v61 = vsub.f32 0.0, %v9834_v3  ;;  %v5521_v59 = vmul.f32 1.442695, %v5511_v36 }
0x17e0   :  { %v5351_v34 = vor.u32 1.1754944e-38, %v5350_v29  ;;  %vm5349_vm10 = vcmp.eq.f32.partialorder %v5348_v1, 8.507059e+37 }
0x17e1   :  { %v5288_v42 = vsel %vm5272_vm1, %v9834_v3, %v5280_v61 }
0x17e2   :  { %v5296_v57 = vmul.f32 0.3275911, %v5288_v42  ;;  %v5504_v6 = vsub.f32 0.0, %v5288_v42 }
0x17e4   :  { %v7067_v17 = vpop.eup %7066  ;;  %v5304_v52 = vadd.f32 1.0, %v5296_v57  ;;  %v5512_v53 = vmul.f32 %v5504_v6, %v5288_v42 }
0x17e5   :  { %v5340_v37 = vmul.f32 %v7067_v17, %v5303_v56  ;;  %vm5345_vm2 = vweird.f32 %v7067_v17 }
0x17e6   :  { %7068 = vrcp.f32 %v5304_v52  ;;  %vm5346_vm9 = vmor %vm5344_vm5, %vm5345_vm2  ;;  %v5365_v14 = vand.u32 2147483648, %v5304_v52  ;;  %v5363_v45 = vand.u32 2147483647, %v5304_v52  ;;  %vm5359_vm3 = vweird.f32 %v5304_v52 }
0x17e7   :  { %v5341_v38 = vsub.f32 1.0, %v5340_v37  ;;  %7070 = vpow2.f32 %v5521_v59  ;;  %v5523_v62 = vmul.f32 1.442695, %v5512_v53 }
0x17e8   :  { %v5366_v43 = vor.u32 1.1754944e-38, %v5365_v14  ;;  %vm5364_vm7 = vcmp.eq.f32.partialorder %v5363_v45, 8.507059e+37 }
0x17e9   :  { %v5342_v24 = vmul.f32 %v7067_v17, %v5341_v38  ;;  %7072 = vpow2.f32 %v5523_v62 }
0x17eb   :  { %v5343_v58 = vadd.f32 %v7067_v17, %v5342_v24  ;;  %v5255_v24 = vmul.f32 0.5, %v9819_v25 }
0x17ec   :  { %v7069_v27 = vpop.eup %7068 }
0x17ed   :  { %v5347_v32 = vsel %vm5346_vm9, %v7067_v17, %v5343_v58  ;;  %v5355_v20 = vmul.f32 %v7069_v27, %v5304_v52  ;;  %vm5360_vm12 = vweird.f32 %v7069_v27  ;;  %v7071_v23 = vpop.eup %7070 }
0x17ee   :  { %v5352_v51 = vsel %vm5349_vm10, %v5351_v34, %v5347_v32  ;;  %vm5361_vm6 = vmor %vm5359_vm3, %vm5360_vm12 }
0x17ef   :  { %v5431_v31 = vmul.f32 1.0614054, %v5352_v51  ;;  %v5356_v0 = vsub.f32 1.0, %v5355_v20  ;;  %v7073_v29 = vpop.eup %7072 }
0x17f1   :  { %v5439_v16 = vadd.f32 -1.4531521, %v5431_v31  ;;  %v5357_v41 = vmul.f32 %v7069_v27, %v5356_v0 }
0x17f3   :  { %v5447_v48 = vmul.f32 %v5439_v16, %v5352_v51  ;;  %v5358_v21 = vadd.f32 %v7069_v27, %v5357_v41  ;;  %v5256_v16 = vmul.f32 0.5, %v9831_v12 }
0x17f5   :  { %v5455_v44 = vadd.f32 1.4214138, %v5447_v48  ;;  %v5362_v19 = vsel %vm5361_vm6, %v7069_v27, %v5358_v21 }
0x17f6   :  { %v5367_v54 = vsel %vm5364_vm7, %v5366_v43, %v5362_v19 }
0x17f7   :  { %v5463_v4 = vmul.f32 %v5455_v44, %v5352_v51  ;;  %v5432_v26 = vmul.f32 1.0614054, %v5367_v54 }
0x17f9   :  { %v5471_v46 = vadd.f32 -0.28449672, %v5463_v4  ;;  %v5440_v60 = vadd.f32 -1.4531521, %v5432_v26 }
0x17fb   :  { %v5479_v28 = vmul.f32 %v5471_v46, %v5352_v51  ;;  %v5448_v33 = vmul.f32 %v5440_v60, %v5367_v54 }
0x17fd   :  { %v5487_v15 = vadd.f32 0.2548296, %v5479_v28  ;;  %v5456_v11 = vadd.f32 1.4214138, %v5448_v33 }
0x17ff   :  { %v5495_v55 = vmul.f32 %v5487_v15, %v5352_v51  ;;  %v5464_v47 = vmul.f32 %v5456_v11, %v5367_v54 }
0x1801   :  { %v5535_v30 = vmul.f32 %v7071_v23, %v5495_v55  ;;  %v5472_v2 = vadd.f32 -0.28449672, %v5464_v47 }
0x1803   :  { %v5543_v40 = vsub.f32 1.0, %v5535_v30  ;;  %v5480_v56 = vmul.f32 %v5472_v2, %v5367_v54 }
0x1804   :  { %v5241_v61 = vpop.f32.mrf.mxu0 }
0x1805   :  { %v5551_v57 = vsub.f32 0.0, %v5543_v40  ;;  %v5488_v17 = vadd.f32 0.2548296, %v5480_v56  ;;  %v9842_v52 = vadd.f32 %v9680_v39, %v5241_v61 }
0x1807   :  { %v5559_v42 = vsel %vm5271_vm15, %v5543_v40, %v5551_v57  ;;  %v5496_v37 = vmul.f32 %v5488_v17, %v5367_v54  ;;  %v9847_v38 = vmul.f32 0.70710677, %v9842_v52 }
0x1808   :  { %v5567_v1 = vadd.f32 1.0, %v5559_v42 }
0x1809   :  { %v5536_v58 = vmul.f32 %v7073_v29, %v5496_v37  ;;  %vm5273_vm8 = vcmp.ge.f32.partialorder %v9847_v38, 0.0  ;;  %v5281_v27 = vsub.f32 0.0, %v9847_v38 }
0x180a   :  { %v5575_v34 = vmul.f32 %v5567_v1, %v5255_v24 }
0x180b   :  { %v5544_v32 = vsub.f32 1.0, %v5536_v58  ;;  %v5289_v7 = vsel %vm5273_vm8, %v9847_v38, %v5281_v27 }
0x180c   :  { %v5297_v20 = vmul.f32 0.3275911, %v5289_v7  ;;  %v5244_v51 = vpop.f32.mrf.mxu0  ;;  %6493 = vmatmul.msk.f32.gmra.mxu1 %vm2903_vm4, %v5575_v34  ;;  %v5505_v28 = vsub.f32 0.0, %v5289_v7 }
0x180d   :  { %v5552_v5 = vsub.f32 0.0, %v5544_v32  ;;  %v9857_v31 = vadd.f32 %v9680_v39, %v5244_v51 }
0x180e   :  { %v5305_v25 = vadd.f32 1.0, %v5297_v20  ;;  %v5513_v23 = vmul.f32 %v5505_v28, %v5289_v7 }
0x180f   :  { %v5560_v0 = vsel %vm5272_vm1, %v5544_v32, %v5552_v5  ;;  %v9862_v14 = vmul.f32 0.70710677, %v9857_v31 }
0x1810   :  { %v5568_v41 = vadd.f32 1.0, %v5560_v0  ;;  %7074 = vrcp.f32 %v5305_v25  ;;  %v5380_v12 = vand.u32 2147483648, %v5305_v25  ;;  %v5378_v54 = vand.u32 2147483647, %v5305_v25 }
0x1811   :  { %vm5274_vm11 = vcmp.ge.f32.partialorder %v9862_v14, 0.0  ;;  %v5282_v45 = vsub.f32 0.0, %v9862_v14  ;;  %vm5374_vm14 = vweird.f32 %v5305_v25  ;;  %v5525_v57 = vmul.f32 1.442695, %v5513_v23 }
0x1812   :  { %v5576_v36 = vmul.f32 %v5568_v41, %v5256_v16  ;;  %v5381_v26 = vor.u32 1.1754944e-38, %v5380_v12  ;;  %vm5379_vm1 = vcmp.eq.f32.partialorder %v5378_v54, 8.507059e+37 }
0x1813   :  { %v5290_v48 = vsel %vm5274_vm11, %v9862_v14, %v5282_v45 }
0x1814   :  { %v5298_v21 = vmul.f32 0.3275911, %v5290_v48  ;;  %6494 = vmatmul.msk.f32.gmra.mxu1 %vm2903_vm4, %v5576_v36  ;;  %v5506_v42 = vsub.f32 0.0, %v5290_v48 }
0x1816   :  { %v7075_v3 = vpop.eup %7074  ;;  %v5306_v43 = vadd.f32 1.0, %v5298_v21  ;;  %v5514_v58 = vmul.f32 %v5506_v42, %v5290_v48 }
0x1817   :  { %v5370_v44 = vmul.f32 %v7075_v3, %v5305_v25  ;;  %vm5375_vm13 = vweird.f32 %v7075_v3 }
0x1818   :  { %7076 = vrcp.f32 %v5306_v43  ;;  %vm5376_vm15 = vmor %vm5374_vm14, %vm5375_vm13  ;;  %v5395_v11 = vand.u32 2147483648, %v5306_v43  ;;  %v5393_v47 = vand.u32 2147483647, %v5306_v43  ;;  %vm5389_vm5 = vweird.f32 %v5306_v43 }
0x1819   :  { %v5371_v19 = vsub.f32 1.0, %v5370_v44  ;;  %7078 = vpow2.f32 %v5525_v57  ;;  %v5527_v20 = vmul.f32 1.442695, %v5514_v58  ;;  %v5257_v44 = vmul.f32 0.5, %v9842_v52 }
0x181a   :  { %v5396_v40 = vor.u32 1.1754944e-38, %v5395_v11  ;;  %vm5394_vm10 = vcmp.eq.f32.partialorder %v5393_v47, 8.507059e+37 }
0x181b   :  { %v5372_v59 = vmul.f32 %v7075_v3, %v5371_v19  ;;  %7080 = vpow2.f32 %v5527_v20 }
0x181d   :  { %v5373_v6 = vadd.f32 %v7075_v3, %v5372_v59 }
0x181e   :  { %v7077_v4 = vpop.eup %7076 }
0x181f   :  { %v5377_v46 = vsel %vm5376_vm15, %v7075_v3, %v5373_v6  ;;  %v5385_v60 = vmul.f32 %v7077_v4, %v5306_v43  ;;  %vm5390_vm2 = vweird.f32 %v7077_v4  ;;  %v7079_v25 = vpop.eup %7078 }
0x1820   :  { %v5382_v53 = vsel %vm5379_vm1, %v5381_v26, %v5377_v46  ;;  %vm5391_vm9 = vmor %vm5389_vm5, %vm5390_vm2  ;;  %v5258_v26 = vmul.f32 0.5, %v9857_v31 }
0x1821   :  { %v5433_v33 = vmul.f32 1.0614054, %v5382_v53  ;;  %v5386_v15 = vsub.f32 1.0, %v5385_v60  ;;  %v7081_v48 = vpop.eup %7080 }
0x1823   :  { %v5441_v62 = vadd.f32 -1.4531521, %v5433_v33  ;;  %v5387_v55 = vmul.f32 %v7077_v4, %v5386_v15 }
0x1825   :  { %v5449_v30 = vmul.f32 %v5441_v62, %v5382_v53  ;;  %v5388_v2 = vadd.f32 %v7077_v4, %v5387_v55 }
0x1827   :  { %v5457_v56 = vadd.f32 1.4214138, %v5449_v30  ;;  %v5392_v61 = vsel %vm5391_vm9, %v7077_v4, %v5388_v2 }
0x1828   :  { %v5397_v17 = vsel %vm5394_vm10, %v5396_v40, %v5392_v61 }
0x1829   :  { %v5465_v37 = vmul.f32 %v5457_v56, %v5382_v53  ;;  %v5434_v29 = vmul.f32 1.0614054, %v5397_v17 }
0x182b   :  { %v5473_v24 = vadd.f32 -0.28449672, %v5465_v37  ;;  %v5442_v1 = vadd.f32 -1.4531521, %v5434_v29 }
0x182d   :  { %v5481_v27 = vmul.f32 %v5473_v24, %v5382_v53  ;;  %v5450_v34 = vmul.f32 %v5442_v1, %v5397_v17 }
0x182f   :  { %v5489_v32 = vadd.f32 0.2548296, %v5481_v27  ;;  %v5458_v7 = vadd.f32 1.4214138, %v5450_v34 }
0x1831   :  { %v5497_v51 = vmul.f32 %v5489_v32, %v5382_v53  ;;  %v5466_v5 = vmul.f32 %v5458_v7, %v5397_v17 }
0x1833   :  { %v5537_v0 = vmul.f32 %v7079_v25, %v5497_v51  ;;  %v5474_v16 = vadd.f32 -0.28449672, %v5466_v5 }
0x1835   :  { %v5545_v41 = vsub.f32 1.0, %v5537_v0  ;;  %v5482_v45 = vmul.f32 %v5474_v16, %v5397_v17 }
0x1837   :  { %v5553_v36 = vsub.f32 0.0, %v5545_v41  ;;  %v5490_v21 = vadd.f32 0.2548296, %v5482_v45 }
0x1839   :  { %v5561_v3 = vsel %vm5273_vm8, %v5545_v41, %v5553_v36  ;;  %v5498_v43 = vmul.f32 %v5490_v21, %v5397_v17 }
0x183a   :  { %v5569_v19 = vadd.f32 1.0, %v5561_v3 }
0x183b   :  { %v5538_v12 = vmul.f32 %v7081_v48, %v5498_v43 }
0x183c   :  { %v5577_v59 = vmul.f32 %v5569_v19, %v5257_v44 }
0x183d   :  { %v5546_v54 = vsub.f32 1.0, %v5538_v12 }
0x183e   :  { %6495 = vmatmul.msk.f32.gmra.mxu1 %vm2903_vm4, %v5577_v59 }
0x183f   :  { %v5554_v6 = vsub.f32 0.0, %v5546_v54 }
0x1841   :  { %v5562_v4 = vsel %vm5274_vm11, %v5546_v54, %v5554_v6 }
0x1842   :  { %v5570_v46 = vadd.f32 1.0, %v5562_v4 }
0x1844   :  { %v5578_v60 = vmul.f32 %v5570_v46, %v5258_v26 }
0x1845   :  { %v5247_v38 = vpop.f32.mrf.mxu0 }
0x1846   :  { %v9879_v53 = vadd.f32 %v9680_v39, %v5247_v38  ;;  %6496 = vmatmul.msk.f32.gmra.mxu1 %vm2903_vm4, %v5578_v60 }
0x1848   :  { %v9883_v52 = vmul.f32 0.70710677, %v9879_v53 }
0x184a   :  { %vm5275_vm12 = vcmp.ge.f32.partialorder %v9883_v52, 0.0  ;;  %v5283_v28 = vsub.f32 0.0, %v9883_v52 }
0x184c   :  { %v5291_v14 = vsel %vm5275_vm12, %v9883_v52, %v5283_v28 }
0x184d   :  { %v5299_v31 = vmul.f32 0.3275911, %v5291_v14  ;;  %v5250_v33 = vpop.f32.mrf.mxu0  ;;  %v5507_v32 = vsub.f32 0.0, %v5291_v14 }
0x184e   :  { %v9891_v15 = vadd.f32 %v9680_v39, %v5250_v33 }
0x184f   :  { %v5307_v11 = vadd.f32 1.0, %v5299_v31  ;;  %v5515_v16 = vmul.f32 %v5507_v32, %v5291_v14 }
0x1850   :  { %v9894_v62 = vmul.f32 0.70710677, %v9891_v15  ;;  %v5633_v55 = vpop.f32.mrf.mxu1 }
0x1851   :  { %7082 = vrcp.f32 %v5307_v11  ;;  %v5655_v23 = vadd.f32 %v5633_v55, %v9554_v10  ;;  %v5410_v42 = vand.u32 2147483648, %v5307_v11  ;;  %v5408_v10 = vand.u32 2147483647, %v5307_v11 }
0x1852   :  { %vm5276_vm3 = vcmp.ge.f32.partialorder %v9894_v62, 0.0  ;;  %v5284_v47 = vsub.f32 0.0, %v9894_v62  ;;  %vm5404_vm7 = vweird.f32 %v5307_v11  ;;  %v5529_v43 = vmul.f32 1.442695, %v5515_v16 }
0x1853   :  { %v9903_v2 = vadd.f32 %v9768_v13, %v5655_v23  ;;  %v5411_v1 = vor.u32 1.1754944e-38, %v5410_v42  ;;  %vm5409_vm11 = vcmp.eq.f32.partialorder %v5408_v10, 8.507059e+37 }
0x1854   :  { %v5292_v30 = vsel %vm5276_vm3, %v9894_v62, %v5284_v47 }
0x1855   :  { %v5300_v39 = vmul.f32 0.3275911, %v5292_v30  ;;  %v5679_v40 = vsel %vm296_vm0, %v9903_v2, 0.0  ;;  %v5508_v44 = vsub.f32 0.0, %v5292_v30 }
0x1856   :  { %5680 = vadd.xlane.f32.xlu1 %v5679_v40 }
0x1857   :  { %v7083_v56 = vpop.eup %7082  ;;  %v5308_v61 = vadd.f32 1.0, %v5300_v39  ;;  %v5516_v6 = vmul.f32 %v5508_v44, %v5292_v30 }
0x1858   :  { %v5400_v57 = vmul.f32 %v7083_v56, %v5307_v11  ;;  %vm5405_vm6 = vweird.f32 %v7083_v56 }
0x1859   :  { %7084 = vrcp.f32 %v5308_v61  ;;  %vm5406_vm8 = vmor %vm5404_vm7, %vm5405_vm6  ;;  %v5425_v51 = vand.u32 2147483648, %v5308_v61  ;;  %v5423_v0 = vand.u32 2147483647, %v5308_v61  ;;  %vm5419_vm14 = vweird.f32 %v5308_v61 }
0x185a   :  { %v5401_v17 = vsub.f32 1.0, %v5400_v57  ;;  %7086 = vpow2.f32 %v5529_v43  ;;  %v5531_v38 = vmul.f32 1.442695, %v5516_v6 }
0x185b   :  { %v5426_v36 = vor.u32 1.1754944e-38, %v5425_v51  ;;  %vm5424_vm1 = vcmp.eq.f32.partialorder %v5423_v0, 8.507059e+37 }
0x185c   :  { %v5402_v37 = vmul.f32 %v7083_v56, %v5401_v17  ;;  %7088 = vpow2.f32 %v5531_v38 }
0x185e   :  { %v5403_v29 = vadd.f32 %v7083_v56, %v5402_v37 }
0x185f   :  { %v7085_v24 = vpop.eup %7084 }
0x1860   :  { %v5407_v58 = vsel %vm5406_vm8, %v7083_v56, %v5403_v29  ;;  %v5415_v27 = vmul.f32 %v7085_v24, %v5308_v61  ;;  %vm5420_vm13 = vweird.f32 %v7085_v24  ;;  %v7087_v31 = vpop.eup %7086  ;;  %v5259_v61 = vmul.f32 0.5, %v9879_v53 }
0x1861   :  { %v5412_v34 = vsel %vm5409_vm11, %v5411_v1, %v5407_v58  ;;  %vm5421_vm15 = vmor %vm5419_vm14, %vm5420_vm13 }
0x1862   :  { %v5435_v7 = vmul.f32 1.0614054, %v5412_v34  ;;  %v5416_v20 = vsub.f32 1.0, %v5415_v27  ;;  %v7089_v30 = vpop.eup %7088 }
0x1864   :  { %v5443_v5 = vadd.f32 -1.4531521, %v5435_v7  ;;  %v5417_v25 = vmul.f32 %v7085_v24, %v5416_v20 }
0x1866   :  { %v5451_v41 = vmul.f32 %v5443_v5, %v5412_v34  ;;  %v5418_v45 = vadd.f32 %v7085_v24, %v5417_v25 }
0x1868   :  { %v5459_v21 = vadd.f32 1.4214138, %v5451_v41  ;;  %v5422_v3 = vsel %vm5421_vm15, %v7085_v24, %v5418_v45  ;;  %v5260_v24 = vmul.f32 0.5, %v9891_v15 }
0x1869   :  { %v5427_v48 = vsel %vm5424_vm1, %v5426_v36, %v5422_v3  ;;  %v5678_v3 = vpop.xlane.xlu2 %5677 }
0x186a   :  { %v5467_v19 = vmul.f32 %v5459_v21, %v5412_v34  ;;  %v5436_v12 = vmul.f32 1.0614054, %v5427_v48 }
0x186c   :  { %v5475_v59 = vadd.f32 -0.28449672, %v5467_v19  ;;  %v5444_v54 = vadd.f32 -1.4531521, %v5436_v12 }
0x186e   :  { %v5483_v4 = vmul.f32 %v5475_v59, %v5412_v34  ;;  %v5452_v26 = vmul.f32 %v5444_v54, %v5427_v48 }
0x1870   :  { %v5491_v46 = vadd.f32 0.2548296, %v5483_v4  ;;  %v5460_v60 = vadd.f32 1.4214138, %v5452_v26 }
0x1872   :  { %v5499_v28 = vmul.f32 %v5491_v46, %v5412_v34  ;;  %v5468_v14 = vmul.f32 %v5460_v60, %v5427_v48 }
0x1874   :  { %v5539_v33 = vmul.f32 %v7087_v31, %v5499_v28  ;;  %v5476_v11 = vadd.f32 -0.28449672, %v5468_v14 }
0x1876   :  { %v5547_v55 = vsub.f32 1.0, %v5539_v33  ;;  %v5484_v47 = vmul.f32 %v5476_v11, %v5427_v48 }
0x1878   :  { %v5555_v23 = vsub.f32 0.0, %v5547_v55  ;;  %v5492_v39 = vadd.f32 0.2548296, %v5484_v47 }
0x187a   :  { %v5563_v40 = vsel %vm5275_vm12, %v5547_v55, %v5555_v23  ;;  %v5500_v56 = vmul.f32 %v5492_v39, %v5427_v48 }
0x187b   :  { %v5571_v57 = vadd.f32 1.0, %v5563_v40 }
0x187c   :  { %v5540_v17 = vmul.f32 %v7089_v30, %v5500_v56 }
0x187d   :  { %v5579_v42 = vmul.f32 %v5571_v57, %v5259_v61 }
0x187e   :  { %v5548_v37 = vsub.f32 1.0, %v5540_v17 }
0x187f   :  { %6497 = vmatmul.msk.f32.gmra.mxu1 %vm2903_vm4, %v5579_v42 }
0x1880   :  { %v5556_v10 = vsub.f32 0.0, %v5548_v37 }
0x1882   :  { %v5564_v29 = vsel %vm5276_vm3, %v5548_v37, %v5556_v10 }
0x1883   :  { %v5572_v1 = vadd.f32 1.0, %v5564_v29 }
0x1885   :  { %v5580_v58 = vmul.f32 %v5572_v1, %v5260_v24 }
0x1887   :  { %6498 = vmatmul.msk.f32.gmra.mxu1 %vm2903_vm4, %v5580_v58 }
0x1889   :  { %v5636_v52 = vpop.f32.mrf.mxu1 }
0x188a   :  { %v5656_v27 = vadd.f32 %v5636_v52, %v9596_v9  ;;  %v9969_v52 = vld [vmem:[%s10116_s3] ss:$0 sm:$0xff] }
0x188c   :  { %v5668_v53 = vadd.f32 %v9768_v13, %v5656_v27 }
0x188e   :  { %v5682_v34 = vsel %vm296_vm0, %v5668_v53, 0.0 }
0x188f   :  { %5683 = vadd.xlane.f32.xlu1 %v5682_v34  ;;  %v9972_v34 = vld [vmem:[%s10117_s20] ss:$0 sm:$0xff] }
0x1891   :  { %v5639_v32 = vpop.f32.mrf.mxu1 }
0x1892   :  { %v5657_v9 = vadd.f32 %v5639_v32, %v9561_v50  ;;  %v5700_v50 = vmul.f32 %v5678_v3, %v7668_v22 }
0x1894   :  { %v5669_v41 = vadd.f32 %v9768_v13, %v5657_v9  ;;  %v9934_v19 = vsub.f32 %v9772_v18, %v5700_v50 }
0x1896   :  { %v5685_v36 = vsel %vm296_vm0, %v5669_v41, 0.0  ;;  %v5716_v26 = vmul.f32 %v9934_v19, %v9934_v19 }
0x1898   :  { %v5724_v60 = vsel %vm296_vm0, %v5716_v26, 0.0 }
0x18bb   :  { %v5642_v7 = vpop.f32.mrf.mxu1 }
0x18bc   :  { %v5658_v20 = vadd.f32 %v5642_v7, %v9654_v8 }
0x18be   :  { %v5670_v62 = vadd.f32 %v9768_v13, %v5658_v20 }
0x18c0   :  { %v5688_v15 = vsel %vm296_vm0, %v5670_v62, 0.0 }
0x18c1   :  { %5689 = vadd.xlane.f32.xlu0 %v5688_v15 }
0x18c3   :  { %v5645_v51 = vpop.f32.mrf.mxu1 }
0x18c4   :  { %v5659_v5 = vadd.f32 %v5645_v51, %v9662_v35 }
0x18c6   :  { %v5671_v25 = vadd.f32 %v9768_v13, %v5659_v5 }
0x18c8   :  { %v5691_v0 = vsel %vm296_vm0, %v5671_v25, 0.0 }
0x18c9   :  { %5692 = vadd.xlane.f32.xlu2 %v5691_v0  ;;  %v5681_v16 = vpop.xlane.xlu1 %5680 }
0x18ca   :  { %v5701_v8 = vmul.f32 %v5681_v16, %v7668_v22 }
0x18cc   :  { %v5709_v45 = vsub.f32 %v9903_v2, %v5701_v8 }
0x18ce   :  { %v5717_v21 = vmul.f32 %v5709_v45, %v5709_v45 }
0x18d0   :  { %v5727_v35 = vsel %vm296_vm0, %v5717_v21, 0.0 }
0x18d1   :  { %5686 = vadd.xlane.f32.xlu2 %v5685_v36 }
0x18d9   :  { %5728 = vadd.xlane.f32.xlu2 %v5727_v35 }
0x18fc   :  { %v5648_v43 = vpop.f32.mrf.mxu1 }
0x18fd   :  { %v5660_v48 = vadd.f32 %v5648_v43, %v9711_v49 }
0x18ff   :  { %v5672_v44 = vadd.f32 %v9768_v13, %v5660_v48 }
0x1901   :  { %v5694_v2 = vsel %vm296_vm0, %v5672_v44, 0.0 }
0x1902   :  { %v5684_v12 = vpop.xlane.xlu1 %5683  ;;  %5695 = vadd.xlane.f32.xlu0 %v5694_v2 }
0x1903   :  { %v5702_v59 = vmul.f32 %v5684_v12, %v7668_v22 }
0x1904   :  { %v5651_v54 = vpop.f32.mrf.mxu1 }
0x1905   :  { %v9938_v6 = vsub.f32 %v5668_v53, %v5702_v59  ;;  %v5661_v4 = vadd.f32 %v5651_v54, %v9723_v63 }
0x1907   :  { %v5673_v49 = vadd.f32 %v9768_v13, %v5661_v4  ;;  %v5718_v18 = vmul.f32 %v9938_v6, %v9938_v6 }
0x1909   :  { %v5730_v46 = vsel %vm296_vm0, %v5718_v18, 0.0  ;;  %v5697_v38 = vsel %vm296_vm0, %v5673_v49, 0.0 }
0x190a   :  { %5731 = vadd.xlane.f32.xlu2 %v5730_v46  ;;  %5725 = vadd.xlane.f32.xlu0 %v5724_v60 }
0x190b   :  { %5698 = vadd.xlane.f32.xlu1 %v5697_v38 }
0x1934   :  { %v5690_v28 = vpop.xlane.xlu0 %5689 }
0x1935   :  { %v5704_v63 = vmul.f32 %v5690_v28, %v7668_v22 }
0x1937   :  { %v9950_v14 = vsub.f32 %v5670_v62, %v5704_v63 }
0x1939   :  { %v5720_v13 = vmul.f32 %v9950_v14, %v9950_v14 }
0x193b   :  { %v5736_v31 = vsel %vm296_vm0, %v5720_v13, 0.0 }
0x193c   :  { %v5693_v33 = vpop.xlane.xlu2 %5692  ;;  %5737 = vadd.xlane.f32.xlu1 %v5736_v31 }
0x193d   :  { %v5705_v11 = vmul.f32 %v5693_v33, %v7668_v22 }
0x193f   :  { %v9956_v55 = vsub.f32 %v5671_v25, %v5705_v11 }
0x1941   :  { %v5721_v47 = vmul.f32 %v9956_v55, %v9956_v55 }
0x1943   :  { %v5739_v23 = vsel %vm296_vm0, %v5721_v47, 0.0 }
0x1944   :  { %v5687_v39 = vpop.xlane.xlu2 %5686  ;;  %5740 = vadd.xlane.f32.xlu0 %v5739_v23 }
0x1945   :  { %v5703_v40 = vmul.f32 %v5687_v39, %v7668_v22 }
0x1947   :  { %v9962_v56 = vsub.f32 %v5669_v41, %v5703_v40 }
0x1949   :  { %v5719_v30 = vmul.f32 %v9962_v56, %v9962_v56 }
0x194b   :  { %v5733_v61 = vsel %vm296_vm0, %v5719_v30, 0.0 }
0x194c   :  { %v5729_v57 = vpop.xlane.xlu2 %5728  ;;  %5734 = vadd.xlane.f32.xlu0 %v5733_v61 }
0x194d   :  { %v5749_v17 = vmul.f32 %v5729_v57, %v7668_v22 }
0x194f   :  { %v5757_v42 = vadd.f32 1e-05, %v5749_v17 }
0x1951   :  { %7090 = vrsqrt.f32 %v5757_v42  ;;  %vm5780_vm2 = vweird.f32 %v5757_v42 }
0x1957   :  { %v7091_v37 = vpop.eup %7090 }
0x1958   :  { %v5775_v10 = vmul.f32 %v7091_v37, %v5757_v42  ;;  %vm5781_vm4 = vweird.f32 %v7091_v37 }
0x1959   :  { %vm5782_vm5 = vmor %vm5780_vm2, %vm5781_vm4 }
0x195a   :  { %v5776_v29 = vmul.f32 %v7091_v37, %v5775_v10 }
0x195c   :  { %v5777_v24 = vmul.f32 0.5, %v5776_v29 }
0x195e   :  { %v5778_v1 = vsub.f32 1.5, %v5777_v24 }
0x1960   :  { %v5779_v58 = vmul.f32 %v7091_v37, %v5778_v1 }
0x1962   :  { %v5783_v27 = vsel %vm5782_vm5, %v7091_v37, %v5779_v58 }
0x1963   :  { %v5845_v53 = vmul.f32 %v5783_v27, %v5709_v45 }
0x1965   :  { %v5856_v32 = vmul.f32 %v9969_v52, %v5845_v53 }
0x1967   :  { %v9976_v7 = vadd.f32 %v9972_v34, %v5856_v32 }
0x1969   :  { %v5877_v20 = vsel %vm296_vm0, %v9976_v7, 0.0 }
0x196a   :  { %5878 = vadd.xlane.f32.xlu0 %v5877_v20 }
0x1975   :  { %v5696_v62 = vpop.xlane.xlu0 %5695 }
0x1976   :  { %v5706_v15 = vmul.f32 %v5696_v62, %v7668_v22 }
0x1978   :  { %v9981_v51 = vsub.f32 %v5672_v44, %v5706_v15 }
0x197a   :  { %v5722_v5 = vmul.f32 %v9981_v51, %v9981_v51 }
0x197c   :  { %v5742_v25 = vsel %vm296_vm0, %v5722_v5, 0.0 }
0x197d   :  { %v5732_v9 = vpop.xlane.xlu2 %5731  ;;  %5743 = vadd.xlane.f32.xlu1 %v5742_v25  ;;  %v5726_v0 = vpop.xlane.xlu0 %5725 }
0x197e   :  { %v5750_v16 = vmul.f32 %v5732_v9, %v7668_v22  ;;  %v5699_v41 = vpop.xlane.xlu1 %5698  ;;  %v5748_v8 = vmul.f32 %v5726_v0, %v7668_v22 }
0x197f   :  { %v5707_v45 = vmul.f32 %v5699_v41, %v7668_v22 }
0x1980   :  { %v5758_v36 = vadd.f32 1e-05, %v5750_v16  ;;  %v5756_v21 = vadd.f32 1e-05, %v5748_v8 }
0x1981   :  { %v9989_v35 = vsub.f32 %v5673_v49, %v5707_v45 }
0x1982   :  { %7092 = vrsqrt.f32 %v5758_v36  ;;  %vm5790_vm12 = vweird.f32 %v5758_v36  ;;  %vm5770_vm6 = vweird.f32 %v5756_v21 }
0x1983   :  { %7094 = vrsqrt.f32 %v5756_v21  ;;  %v5723_v3 = vmul.f32 %v9989_v35, %v9989_v35 }
0x1985   :  { %v5745_v43 = vsel %vm296_vm0, %v5723_v3, 0.0 }
0x1986   :  { %5746 = vadd.xlane.f32.xlu2 %v5745_v43 }
0x1988   :  { %v7093_v50 = vpop.eup %7092 }
0x1989   :  { %v7095_v48 = vpop.eup %7094  ;;  %v5785_v44 = vmul.f32 %v7093_v50, %v5758_v36  ;;  %vm5791_vm9 = vweird.f32 %v7093_v50 }
0x198a   :  { %v5765_v2 = vmul.f32 %v7095_v48, %v5756_v21  ;;  %vm5771_vm10 = vweird.f32 %v7095_v48  ;;  %vm5792_vm3 = vmor %vm5790_vm12, %vm5791_vm9 }
0x198b   :  { %v5786_v12 = vmul.f32 %v7093_v50, %v5785_v44  ;;  %vm5772_vm7 = vmor %vm5770_vm6, %vm5771_vm10 }
0x198c   :  { %v5766_v59 = vmul.f32 %v7095_v48, %v5765_v2 }
0x198d   :  { %v5787_v54 = vmul.f32 0.5, %v5786_v12 }
0x198e   :  { %v5767_v4 = vmul.f32 0.5, %v5766_v59 }
0x198f   :  { %v5788_v26 = vsub.f32 1.5, %v5787_v54 }
0x1990   :  { %v5768_v49 = vsub.f32 1.5, %v5767_v4 }
0x1991   :  { %v5789_v18 = vmul.f32 %v7093_v50, %v5788_v26 }
0x1992   :  { %v5769_v46 = vmul.f32 %v7095_v48, %v5768_v49 }
0x1993   :  { %v5793_v60 = vsel %vm5792_vm3, %v7093_v50, %v5789_v18 }
0x1994   :  { %v5846_v38 = vmul.f32 %v5793_v60, %v9938_v6  ;;  %v5773_v28 = vsel %vm5772_vm7, %v7095_v48, %v5769_v46 }
0x1995   :  { %v5844_v63 = vmul.f32 %v5773_v28, %v9934_v19 }
0x1996   :  { %v5857_v13 = vmul.f32 %v9969_v52, %v5846_v38 }
0x1997   :  { %v5855_v31 = vmul.f32 %v9969_v52, %v5844_v63 }
0x1998   :  { %v9999_v33 = vadd.f32 %v9972_v34, %v5857_v13 }
0x1999   :  { %v10002_v11 = vadd.f32 %v9972_v34, %v5855_v31 }
0x199a   :  { %v5880_v47 = vsel %vm296_vm0, %v9999_v33, 0.0 }
0x199b   :  { %5881 = vadd.xlane.f32.xlu0 %v5880_v47  ;;  %v5874_v6 = vsel %vm296_vm0, %v10002_v11, 0.0 }
0x199c   :  { %5875 = vadd.xlane.f32.xlu1 %v5874_v6 }
0x19af   :  { %v5738_v23 = vpop.xlane.xlu1 %5737 }
0x19b0   :  { %v5752_v19 = vmul.f32 %v5738_v23, %v7668_v22 }
0x19b2   :  { %v5760_v39 = vadd.f32 1e-05, %v5752_v19 }
0x19b4   :  { %7096 = vrsqrt.f32 %v5760_v39  ;;  %vm5810_vm11 = vweird.f32 %v5760_v39 }
0x19b7   :  { %v5741_v40 = vpop.xlane.xlu0 %5740 }
0x19b8   :  { %v5753_v30 = vmul.f32 %v5741_v40, %v7668_v22 }
0x19ba   :  { %v7097_v61 = vpop.eup %7096  ;;  %v5761_v57 = vadd.f32 1e-05, %v5753_v30 }
0x19bb   :  { %v5805_v17 = vmul.f32 %v7097_v61, %v5760_v39  ;;  %vm5811_vm8 = vweird.f32 %v7097_v61 }
0x19bc   :  { %7098 = vrsqrt.f32 %v5761_v57  ;;  %vm5812_vm13 = vmor %vm5810_vm11, %vm5811_vm8  ;;  %vm5820_vm15 = vweird.f32 %v5761_v57  ;;  %vm5978_vm8 = vcmask 1041408   ;;  %vm5927_vm11 = vcmask 130112  }
0x19bd   :  { %v5806_v42 = vmul.f32 %v7097_v61, %v5805_v17 }
0x19bf   :  { %v5807_v37 = vmul.f32 0.5, %v5806_v42  ;;  %v5735_v10 = vpop.xlane.xlu0 %5734 }
0x19c0   :  { %v5751_v29 = vmul.f32 %v5735_v10, %v7668_v22  ;;  %v5909_v10 = vld [vmem:[%s10118_s12 + $0x18] sm:$0xff] }
0x19c1   :  { %v5808_v24 = vsub.f32 1.5, %v5807_v37  ;;  %5960 = vmatpush.msra.mxu2 %v5909_v10  ;;  %v6075_v10 = vld [vmem:[%s7567_s30 + $0x10] sm:$0xff] }
0x19c2   :  { %v7099_v1 = vpop.eup %7098  ;;  %v5759_v58 = vadd.f32 1e-05, %v5751_v29  ;;  %v5908_v29 = vld [vmem:[%s10118_s12 + $0x10] sm:$0xff] }
0x19c3   :  { %v5809_v27 = vmul.f32 %v7097_v61, %v5808_v24  ;;  %v5815_v53 = vmul.f32 %v7099_v1, %v5761_v57  ;;  %vm5821_vm14 = vweird.f32 %v7099_v1  ;;  %5961 = vmatpush.msra.mxu2 %v5908_v29  ;;  %v5907_v24 = vld [vmem:[%s10118_s12 + $0x8] sm:$0xff] }
0x19c4   :  { %7100 = vrsqrt.f32 %v5759_v58  ;;  %vm5822_vm1 = vmor %vm5820_vm15, %vm5821_vm14  ;;  %vm5800_vm2 = vweird.f32 %v5759_v58  ;;  %vm5935_vm14 = vcmask 261312   ;;  %vm5944_vm15 = vcmask 1041409   ;;  %v6074_v29 = vld [vmem:[%s7567_s30 + $0x8] sm:$0xff] }
0x19c5   :  { %v5816_v32 = vmul.f32 %v7099_v1, %v5815_v53  ;;  %v5813_v20 = vsel %vm5812_vm13, %v7097_v61, %v5809_v27  ;;  %5962 = vmatpush.msra.mxu2 %v5907_v24  ;;  %vm5931_vm13 = vcmask 195712   ;;  %v6073_v24 = vld [vmem:[%s7567_s30] sm:$0xff] }
0x19c6   :  { %v5848_v62 = vmul.f32 %v5813_v20, %v9950_v14 }
0x19c7   :  { %v5817_v15 = vmul.f32 0.5, %v5816_v32  ;;  %v5922_v32 = vlaneseq }
0x19c8   :  { %v5859_v5 = vmul.f32 %v9969_v52, %v5848_v62 }
0x19c9   :  { %v5818_v25 = vsub.f32 1.5, %v5817_v15 }
0x19ca   :  { %v7101_v9 = vpop.eup %7100  ;;  %v10014_v0 = vadd.f32 %v9972_v34, %v5859_v5 }
0x19cb   :  { %v5819_v16 = vmul.f32 %v7099_v1, %v5818_v25  ;;  %v5795_v41 = vmul.f32 %v7101_v9, %v5759_v58  ;;  %vm5801_vm4 = vweird.f32 %v7101_v9  ;;  %v5969_v58 = vld [vmem:[%s10119_s26] sm:$0x3] }
0x19cc   :  { %v5886_v8 = vsel %vm296_vm0, %v10014_v0, 0.0  ;;  %vm5802_vm5 = vmor %vm5800_vm2, %vm5801_vm4 }
0x19cd   :  { %v5796_v45 = vmul.f32 %v7101_v9, %v5795_v41  ;;  %5887 = vadd.xlane.f32.xlu2 %v5886_v8  ;;  %v5823_v36 = vsel %vm5822_vm1, %v7099_v1, %v5819_v16  ;;  %v5906_v1 = vld [vmem:[%s10118_s12] sm:$0xff]  ;;  %vm5974_vm1 = vcmask 15360  }
0x19ce   :  { %v5849_v14 = vmul.f32 %v5823_v36, %v9956_v55  ;;  %5963 = vmatpush.msra.mxu2 %v5906_v1 }
0x19cf   :  { %v5797_v21 = vmul.f32 0.5, %v5796_v45 }
0x19d0   :  { %v5860_v3 = vmul.f32 %v9969_v52, %v5849_v14  ;;  %6500 = vmatpush.msk.msrb.mxu2 %vm5978_vm8, %v5969_v58 }
0x19d1   :  { %v5798_v43 = vsub.f32 1.5, %v5797_v21 }
0x19d2   :  { %v10021_v50 = vadd.f32 %v9972_v34, %v5860_v3 }
0x19d3   :  { %v5799_v48 = vmul.f32 %v7101_v9, %v5798_v43 }
0x19d4   :  { %v5889_v44 = vsel %vm296_vm0, %v10021_v50, 0.0 }
0x19d5   :  { %v5803_v2 = vsel %vm5802_vm5, %v7101_v9, %v5799_v48  ;;  %5890 = vadd.xlane.f32.xlu1 %v5889_v44 }
0x19d6   :  { %v5847_v12 = vmul.f32 %v5803_v2, %v9962_v56 }
0x19d8   :  { %v5858_v55 = vmul.f32 %v9969_v52, %v5847_v12 }
0x19da   :  { %v5869_v59 = vadd.f32 %v9972_v34, %v5858_v55 }
0x19dc   :  { %6037 = vmatpush.msra.mxu3 %v5869_v59  ;;  %v5883_v54 = vsel %vm296_vm0, %v5869_v59, 0.0 }
0x19dd   :  { %5884 = vadd.xlane.f32.xlu1 %v5883_v54 }
0x19de   :  { %6038 = vmatpush.msra.mxu3 %v9999_v33 }
0x19e0   :  { %6039 = vmatpush.msra.mxu3 %v9976_v7 }
0x19e2   :  { %6040 = vmatpush.msra.mxu3 %v10002_v11 }
0x19f0   :  { %v5744_v4 = vpop.xlane.xlu1 %5743 }
0x19f1   :  { %v5754_v26 = vmul.f32 %v5744_v4, %v7668_v22 }
0x19f3   :  { %v5762_v49 = vadd.f32 1e-05, %v5754_v26 }
0x19f5   :  { %7102 = vrsqrt.f32 %v5762_v49  ;;  %vm5830_vm10 = vweird.f32 %v5762_v49 }
0x19f9   :  { %v5747_v56 = vpop.xlane.xlu2 %5746 }
0x19fa   :  { %v5755_v18 = vmul.f32 %v5747_v56, %v7668_v22 }
0x19fb   :  { %v7103_v46 = vpop.eup %7102 }
0x19fc   :  { %v5825_v60 = vmul.f32 %v7103_v46, %v5762_v49  ;;  %v5763_v38 = vadd.f32 1e-05, %v5755_v18  ;;  %vm5831_vm9 = vweird.f32 %v7103_v46 }
0x19fd   :  { %vm5832_vm12 = vmor %vm5830_vm10, %vm5831_vm9  ;;  %vm6071_vm10 = vcmask 1040384  }
0x19fe   :  { %v5826_v28 = vmul.f32 %v7103_v46, %v5825_v60  ;;  %7104 = vrsqrt.f32 %v5763_v38  ;;  %vm5840_vm6 = vweird.f32 %v5763_v38 }
0x1a00   :  { %v5827_v63 = vmul.f32 0.5, %v5826_v28 }
0x1a02   :  { %v5828_v13 = vsub.f32 1.5, %v5827_v63 }
0x1a04   :  { %v7105_v31 = vpop.eup %7104  ;;  %v5829_v7 = vmul.f32 %v7103_v46, %v5828_v13 }
0x1a05   :  { %v5835_v33 = vmul.f32 %v7105_v31, %v5763_v38  ;;  %vm5841_vm3 = vweird.f32 %v7105_v31 }
0x1a06   :  { %v5833_v11 = vsel %vm5832_vm12, %v7103_v46, %v5829_v7  ;;  %vm5842_vm7 = vmor %vm5840_vm6, %vm5841_vm3  ;;  %vm6104_vm12 = vcmask 74752  }
0x1a07   :  { %v5836_v47 = vmul.f32 %v7105_v31, %v5835_v33  ;;  %v5850_v6 = vmul.f32 %v5833_v11, %v9981_v51 }
0x1a09   :  { %v5837_v23 = vmul.f32 0.5, %v5836_v47  ;;  %v5861_v19 = vmul.f32 %v9969_v52, %v5850_v6  ;;  %v6076_v47 = vld [vmem:[%s7567_s30 + $0x18] sm:$0xff]  ;;  %s7314_s30 = sshra.s32 %s6114_s2, 4  ;;  %s7315_s30 = int_to_ptr.hbm [resolvable:$true] %s7314_s30 }
0x1a0a   :  { %6096 = vmatpush.msrb.mxu3 %v6076_v47  ;;  %s7316_s10 = scalar_lea.hbm %s7315_s30, 2  ;;  %p7319_p13 = scmp.lt.s32.totalorder %s7315_s30, %s7577_s8 }
0x1a0b   :  { %v5838_v39 = vsub.f32 1.5, %v5837_v23  ;;  %v10037_v40 = vadd.f32 %v9972_v34, %v5861_v19  ;;  %p7317_p12 = scmp.ne.s32.totalorder %s7315_s30, %s7316_s10  ;;  %p7320_p0 = scmp.lt.s32.totalorder %s7318_s0, %s7316_s10 }
0x1a0c   :  { %6097 = vmatpush.msrb.mxu3 %v6075_v10 }
0x1a0d   :  { %v5839_v30 = vmul.f32 %v7105_v31, %v5838_v39  ;;  %v5892_v61 = vsel %vm296_vm0, %v10037_v40, 0.0  ;;  %p7321_p1 = por %p7320_p0, %p7319_p13 }
0x1a0e   :  { %5893 = vadd.xlane.f32.xlu2 %v5892_v61  ;;  %6098 = vmatpush.msrb.mxu3 %v6074_v29 }
0x1a0f   :  { %v5843_v51 = vsel %vm5842_vm7, %v7105_v31, %v5839_v30  ;;  %v5876_v27 = vpop.xlane.xlu1 %5875  ;;  %v6702_v31 = vld [vmem:[%s7562_s6] ss:$0 sm:$0xff]  ;;  %s7388_s6 = smov [#allocation16]   ;;  %p7322_p2 = pnand %p7321_p1, %p7317_p12 }
0x1a10   :  { %v5851_v57 = vmul.f32 %v5843_v51, %v9989_v35  ;;  %v5879_v35 = vpop.xlane.xlu0 %5878  ;;  %v5898_v62 = vmul.f32 %v5876_v27, %v7668_v22  ;;  %6099 = vmatpush.msrb.mxu3 %v6073_v24  ;;  %s6111_s23 = sshll.u32 %s7388_s6, 4  ;;  %s6112_s23 = int_to_ptr.vmem [resolvable:$true] %s6111_s23 }
0x1a11   :  { %v5899_v9 = vmul.f32 %v5879_v35, %v7668_v22 }
0x1a12   :  { %v5862_v17 = vmul.f32 %v9969_v52, %v5851_v57 }
0x1a14   :  { %v5873_v42 = vadd.f32 %v9972_v34, %v5862_v17  ;;  %v5923_v34 = vand.u32 127, %v5922_v32 }
0x1a16   :  { %v5895_v37 = vsel %vm296_vm0, %v5873_v42, 0.0  ;;  %v5925_v25 = vadd.s32 4294967288, %v5923_v34  ;;  %v5929_v41 = vadd.s32 4294967280, %v5923_v34  ;;  %v5924_v36 = vperm.slane %v5898_v62, %v5923_v34 }
0x1a17   :  { %5896 = vadd.xlane.f32.xlu0 %v5895_v37  ;;  %v5933_v21 = vadd.s32 4294967272, %v5923_v34 }
0x1a18   :  { %v5882_v20 = vpop.xlane.xlu0 %5881  ;;  %v5926_v43 = vperm.slane %v5899_v9, %v5925_v25 }
0x1a19   :  { %v5900_v8 = vmul.f32 %v5882_v20, %v7668_v22 }
0x1a1a   :  { %v5928_v55 = vsel %vm5927_vm11, %v5926_v43, %v5924_v36 }
0x1a1b   :  { %v5930_v44 = vperm.slane %v5900_v8, %v5929_v41 }
0x1a1d   :  { %v5932_v56 = vsel %vm5931_vm13, %v5930_v44, %v5928_v55 }
0x1a40   :  { %v5888_v52 = vpop.xlane.xlu2 %5887 }
0x1a41   :  { %v5902_v14 = vmul.f32 %v5888_v52, %v7668_v22 }
0x1a43   :  { %v5937_v59 = vperm.slane %v5902_v14, %v5923_v34 }
0x1a48   :  { %v5891_v53 = vpop.xlane.xlu1 %5890 }
0x1a49   :  { %v5903_v16 = vmul.f32 %v5891_v53, %v7668_v22  ;;  %v6703_v53 = vld [vmem:[%s7572_s19] ss:$0 sm:$0xff] }
0x1a4b   :  { %v5938_v48 = vperm.slane %v5903_v16, %v5925_v25 }
0x1a4d   :  { %v5939_v26 = vsel %vm5927_vm11, %v5938_v48, %v5937_v59 }
0x1a50   :  { %v5885_v5 = vpop.xlane.xlu1 %5884 }
0x1a51   :  { %v5901_v3 = vmul.f32 %v5885_v5, %v7668_v22 }
0x1a53   :  { %v5934_v54 = vperm.slane %v5901_v3, %v5933_v21 }
0x1a55   :  { %v5936_v46 = vsel %vm5935_vm14, %v5934_v54, %v5932_v56 }
0x1a81   :  { %v5894_v15 = vpop.xlane.xlu2 %5893 }
0x1a82   :  { %v5904_v45 = vmul.f32 %v5894_v15, %v7668_v22 }
0x1a84   :  { %v5940_v2 = vperm.slane %v5904_v45, %v5929_v41 }
0x1a86   :  { %v5941_v18 = vsel %vm5931_vm13, %v5940_v2, %v5939_v26 }
0x1a8a   :  { %v5897_v12 = vpop.xlane.xlu0 %5896 }
0x1a8b   :  { %v5905_v4 = vmul.f32 %v5897_v12, %v7668_v22  ;;  %v6701_v22 = vld [vmem:[%s10120_s1] ss:$0 sm:$0xff] }
0x1a8d   :  { %v5942_v49 = vperm.slane %v5905_v4, %v5933_v21 }
0x1a8f   :  { %v5943_v60 = vsel %vm5935_vm14, %v5942_v49, %v5941_v18 }
0x1a90   :  { %v5945_v38 = vsel %vm5944_vm15, %v5943_v60, %v5936_v46 }
0x1a91   :  { %6499 = vmatmul.msk.f32.vlgmr.msra.gmra.mxu2 %vm296_vm0, %v5945_v38 }
0x1a92   :  { %6060 = vmatpush.msra.mxu2 %v5873_v42 }
0x1a94   :  { %6061 = vmatpush.msra.mxu2 %v10037_v40 }
0x1a96   :  { %6062 = vmatpush.msra.mxu2 %v10021_v50 }
0x1a98   :  { %6063 = vmatpush.msra.mxu2 %v10014_v0 }
0x1b14   :  { %v5965_v28 = vpop.f32.mrf.mxu2 }
0x1b15   :  { %v5966_v63 = vadd.f32 %v6701_v22, %v5965_v28 }
0x1b17   :  { %v5968_v13 = vmax.f32 %v5966_v63, 0.0 }
0x1b19   :  { %6501 = vmatmul.msk.f32.vlgmr.msrb.gmra.mxu2 %vm5974_vm1, %v5968_v13 }
0x1b9c   :  { %v5999_v7 = vpop.f32.mrf.mxu2 }
0x1b9d   :  { %v6000_v33 = vadd.f32 %v6702_v31, %v5999_v7 }
0x1b9f   :  { %v6502_v11 = vmul.f32 -1.442695, %v6000_v33 }
0x1ba1   :  { %7106 = vpow2.f32 %v6502_v11 }
0x1ba7   :  { %v7107_v6 = vpop.eup %7106 }
0x1ba8   :  { %v6005_v23 = vadd.f32 1.0, %v7107_v6 }
0x1baa   :  { %7108 = vrcp.f32 %v6005_v23  ;;  %v6017_v0 = vand.u32 2147483648, %v6005_v23  ;;  %v6015_v30 = vand.u32 2147483647, %v6005_v23  ;;  %vm6011_vm2 = vweird.f32 %v6005_v23 }
0x1bac   :  { %v6018_v51 = vor.u32 1.1754944e-38, %v6017_v0  ;;  %vm6016_vm9 = vcmp.eq.f32.partialorder %v6015_v30, 8.507059e+37 }
0x1bb0   :  { %v7109_v19 = vpop.eup %7108 }
0x1bb1   :  { %v6007_v50 = vmul.f32 %v7109_v19, %v6005_v23  ;;  %vm6012_vm4 = vweird.f32 %v7109_v19 }
0x1bb2   :  { %vm6013_vm5 = vmor %vm6011_vm2, %vm6012_vm4 }
0x1bb3   :  { %v6008_v39 = vsub.f32 1.0, %v6007_v50 }
0x1bb5   :  { %v6009_v40 = vmul.f32 %v7109_v19, %v6008_v39 }
0x1bb7   :  { %v6010_v61 = vadd.f32 %v7109_v19, %v6009_v40 }
0x1bb9   :  { %v6014_v57 = vsel %vm6013_vm5, %v7109_v19, %v6010_v61 }
0x1bba   :  { %v6019_v17 = vsel %vm6016_vm9, %v6018_v51, %v6014_v57 }
0x1bbb   :  { %v6021_v42 = vmul.f32 0.03125, %v6019_v17 }
0x1bbd   :  { %6503 = vmatmul.msk.f32.vlgmr.msra.gmra.mxu3 %vm296_vm0, %v6021_v42  ;;  %v6045_v37 = vrot.slane %v6021_v42, 1 }
0x1bbf   :  { %6504 = vmatmul.msk.f32.vlgmr.msra.gmra.mxu2 %vm296_vm0, %v6045_v37 }
0x1c40   :  { %v6042_v27 = vpop.f32.mrf.mxu3 }
0x1c42   :  { %v6065_v1 = vpop.f32.mrf.mxu2 }
0x1c43   :  { %v6069_v58 = vrot.slane %v6065_v1, 7 }
0x1c45   :  { %v6072_v35 = vsel %vm6071_vm10, %v6042_v27, %v6069_v58 }
0x1c46   :  { %6505 = vmatmul.msk.f32.vlgmr.msrb.gmra.mxu3 %vm296_vm0, %v6072_v35 }
0x1cc9   :  { %v6101_v52 = vpop.f32.mrf.mxu3 }
0x1cca   :  { %v6102_v32 = vadd.f32 %v6703_v53, %v6101_v52 }
0x1ccc   :  { %6105 = vst.msk [vmem:[#allocation16] sm:$0x3] %vm6104_vm12, %v6102_v32 }
0x1ccd   :  { %7325 = shalt.err (!%p7322_p2)
}
0x1cce   :  { %6116 = dma.vmem_to_hbm [thread:$0]  %s6112_s23, 32, %s6114_s2, [#allocation4]  }
0x1ccf   :  { %7336 = dma.done.wait [#allocation4], 32  }
0x1cd0   :  { %7337 = vsyncadd [#allocation4], 4294967264 }
0x1cd1   :  { %6121 = vsyncpa [#allocation3], 1 }
0x1cd2   :  { %6122 = vsyncpa [#allocation6], 1 }
0x1cd3   :  { %6123 = vsyncpa [#allocation9], 1 }
0x1cd4   :  { %6124 = vsyncpa [#allocation12], 1 }
0x1cd5   :  { %6125 = vsyncpa [#allocation15], 1 }
0x1cd6   :  { %6126 = vsyncpa [#allocation4], 1 }

</bundles_post_ra>
